<compile_context>
chip_gen: v7x
topology: tpu7x:2x2x1
jax: 0.10.0
libtpu: 0.0.40
codegen_flags: <defaults>
</compile_context>

<pallas_src>
import jax
import jax.numpy as jnp
from jax.experimental import pallas as pl
from jax.experimental.pallas import tpu as pltpu

NUM_CLASSES = 7
NUM_CONDITIONS = 3
FEAT = 2048
H1 = 1024
H2 = 512
OUT_PAD = 128          # per-condition output lanes (>= NUM_CLASSES, lane-dense)
LEAKY_SLOPE = 0.01     # PyTorch nn.LeakyReLU default negative_slope


def _leaky_relu(x):
    return jnp.where(x >= 0, x, LEAKY_SLOPE * x)


def net_head_kernel(x_ref, w1_ref, b1_ref, w2_ref, b2_ref, w3_ref, b3_ref,
                    out_ref):
    """Fused head for one batch tile; weights stay resident across the grid.

    x_ref  : (TB, 2048)         f32  (cast to bf16 in-kernel)
    w1_ref : (2048, 1024)       bf16    b1_ref : (1, 1024)       f32
    w2_ref : (1024, C*512)      bf16    b2_ref : (1, C*512)      f32
    w3_ref : (C, 512, 128)      bf16 (7 real cols per condition)
    b3_ref : (C, 1, 128)        f32
    out_ref: (C, TB, 128)       f32 (lane-dense slab, condition-major)
    """
    # Shared trunk: Linear(2048->1024) + LeakyReLU (Dropout = identity, eval).
    x = x_ref[...].astype(jnp.bfloat16)
    h1 = jnp.dot(x, w1_ref[...],
                 preferred_element_type=jnp.float32) + b1_ref[...]
    h1 = _leaky_relu(h1)

    # All conditions' Linear(1024->512) fused along lanes: one MXU matmul.
    h2 = jnp.dot(h1.astype(jnp.bfloat16), w2_ref[...],
                 preferred_element_type=jnp.float32) + b2_ref[...]
    h2 = _leaky_relu(h2)
    h2b = h2.astype(jnp.bfloat16)

    # Per-condition Linear(512->num_classes) as three small matmuls on static,
    # lane-tile-aligned slices of h2; each store is one unmasked lane-dense
    # (TB, 128) write.
    for c in range(NUM_CONDITIONS):
        hc = h2b[:, c * H2:(c + 1) * H2]
        out_ref[c] = (jnp.dot(hc, w3_ref[c],
                              preferred_element_type=jnp.float32)
                      + b3_ref[c])


def init_params(key):
    """Model parameters: bf16 weights, f32 biases (logical per-condition form)."""
    ks = jax.random.split(key, 6)
    scale = 0.02
    w1 = (scale * jax.random.normal(ks[0], (FEAT, H1), jnp.float32)
          ).astype(jnp.bfloat16)
    b1 = scale * jax.random.normal(ks[1], (1, H1), jnp.float32)
    w2 = (scale * jax.random.normal(ks[2], (NUM_CONDITIONS, H1, H2), jnp.float32)
          ).astype(jnp.bfloat16)
    b2 = scale * jax.random.normal(ks[3], (NUM_CONDITIONS, 1, H2), jnp.float32)
    w3 = (scale * jax.random.normal(ks[4], (NUM_CONDITIONS, H2, NUM_CLASSES),
                                    jnp.float32)).astype(jnp.bfloat16)
    b3 = scale * jax.random.normal(ks[5], (NUM_CONDITIONS, 1, NUM_CLASSES),
                                   jnp.float32)
    return w1, b1, w2, b2, w3, b3


def pack_params(params):
    """One-time packing of per-condition weights into the fused, lane-dense
    layout consumed by the kernel (done once, outside the per-call path)."""
    w1, b1, w2, b2, w3, b3 = params
    C = w2.shape[0]

    w1p = w1                                            # (2048, 1024) bf16
    b1p = b1.reshape(1, H1)                             # (1, 1024)    f32

    # (C, 1024, 512) -> (1024, C*512): column block c == w2[c].
    w2p = jnp.transpose(w2, (1, 0, 2)).reshape(H1, C * H2)
    b2p = b2.reshape(1, C * H2)

    # Per-condition (512, 128) heads; the 7 real columns sit at the start of
    # each 128-lane block, remaining lanes are zero (sliced off in wrapper).
    w3p = jnp.zeros((C, H2, OUT_PAD), jnp.bfloat16).at[:, :, :NUM_CLASSES].set(w3)
    b3p = jnp.zeros((C, 1, OUT_PAD), jnp.float32).at[:, :, :NUM_CLASSES].set(b3)
    return w1p, b1p, w2p, b2p, w3p, b3p


def net_head_pallas(x, packed, *, max_batch_tile=256):
    """x: (B, 2048) f32 pooled features. Returns (num_conditions, B, num_classes)."""
    w1p, b1p, w2p, b2p, w3p, b3p = packed
    C = w3p.shape[0]
    B = x.shape[0]

    # bf16 sublane pack -> pad the batch to a multiple of 16; tile at <=256
    # rows so large batches pipeline while weights stay VMEM-resident.
    Bp = max(16, ((B + 15) // 16) * 16)
    if Bp <= max_batch_tile:
        TB = Bp
    else:
        TB = max_batch_tile
        Bp = ((B + TB - 1) // TB) * TB
    # TODO(synk): the zero-pad of the ragged last tile could be replaced by a
    #             BlockSpec-level partial tile to avoid the (tiny) pad op.
    x_p = jnp.pad(x, ((0, Bp - B), (0, 0))) if Bp != B else x

    weight_bytes = (w1p.size * 2 + w2p.size * 2 + w3p.size * 2
                    + b1p.size * 4 + b2p.size * 4 + b3p.size * 4)
    cost = pl.CostEstimate(
        flops=2 * Bp * (FEAT * H1 + H1 * C * H2 + C * H2 * OUT_PAD),
        transcendentals=0,
        bytes_accessed=weight_bytes + Bp * FEAT * 4 + C * Bp * OUT_PAD * 4)

    out = pl.pallas_call(
        net_head_kernel,
        out_shape=jax.ShapeDtypeStruct((C, Bp, OUT_PAD), jnp.float32),
        grid_spec=pltpu.PrefetchScalarGridSpec(
            num_scalar_prefetch=0,
            grid=(Bp // TB,),
            in_specs=[
                pl.BlockSpec((TB, FEAT), lambda i: (i, 0)),          # x tile
                pl.BlockSpec((FEAT, H1), lambda i: (0, 0)),          # w1 resident
                pl.BlockSpec((1, H1), lambda i: (0, 0)),             # b1
                pl.BlockSpec((H1, C * H2), lambda i: (0, 0)),        # w2 resident
                pl.BlockSpec((1, C * H2), lambda i: (0, 0)),         # b2
                pl.BlockSpec((C, H2, OUT_PAD), lambda i: (0, 0, 0)), # w3 resident
                pl.BlockSpec((C, 1, OUT_PAD), lambda i: (0, 0, 0)),  # b3
            ],
            out_specs=pl.BlockSpec((C, TB, OUT_PAD), lambda i: (0, i, 0)),
        ),
        compiler_params=pltpu.CompilerParams(
            dimension_semantics=("parallel",),   # batch tiles -> v7x megacore
            vmem_limit_bytes=32 * 1024 * 1024),
        cost_estimate=cost,
    )(x_p, w1p, b1p, w2p, b2p, w3p, b3p)

    # Lane-dense condition-major slab -> (C, B, NUM_CLASSES): slice only.
    return out[:, :B, :NUM_CLASSES]


def net_head_ref(x, params):
    """Pure-JAX reference mirroring the kernel numerics (bf16 operands,
    f32 MXU accumulation), eval-mode dropout."""
    w1, b1, w2, b2, w3, b3 = params
    xb = x.astype(jnp.bfloat16)
    h1 = _leaky_relu(jnp.dot(xb, w1, preferred_element_type=jnp.float32) + b1)
    h2 = _leaky_relu(jnp.einsum('bh,chk->cbk', h1.astype(jnp.bfloat16), w2,
                                preferred_element_type=jnp.float32) + b2)
    return jnp.einsum('cbk,ckn->cbn', h2.astype(jnp.bfloat16), w3,
                      preferred_element_type=jnp.float32) + b3


if __name__ == "__main__":
    key = jax.random.PRNGKey(0)
    k_x, k_p = jax.random.split(key)
    batch = 2
    # Deterministic synthetic resnet152 pooled features (stand-in for the
    # frozen backbone applied to a (2, 3, 224, 224) NCHW image batch).
    x = jax.random.normal(k_x, (batch, FEAT), jnp.float32)
    params = init_params(k_p)
    packed = pack_params(params)

    out = net_head_pallas(x, packed)
    out = jax.block_until_ready(out)

    ref = net_head_ref(x, params)
    assert out.shape == (NUM_CONDITIONS, batch, NUM_CLASSES)
    assert jnp.allclose(out, ref, rtol=2e-3, atol=2e-3)
    print("KERNEL_OK")
</pallas_src>

<mosaic_0001>
module attributes {stable_mosaic.version = 11 : i64} {
  func.func @net_head_kernel(%arg0: i32, %arg1: memref<16x2048xf32, #tpu.memory_space<vmem>>, %arg2: memref<2048x1024xbf16, #tpu.memory_space<vmem>>, %arg3: memref<1x1024xf32, #tpu.memory_space<vmem>>, %arg4: memref<1024x1536xbf16, #tpu.memory_space<vmem>>, %arg5: memref<1x1536xf32, #tpu.memory_space<vmem>>, %arg6: memref<3x512x128xbf16, #tpu.memory_space<vmem>>, %arg7: memref<3x1x128xf32, #tpu.memory_space<vmem>>, %arg8: memref<3x16x128xf32, #tpu.memory_space<vmem>>) attributes {dimension_semantics = [#tpu.dimension_semantics<parallel>], iteration_bounds = array<i64: 1>, scalar_prefetch = 0 : i64, scratch_operands = 0 : i64, tpu.core_type = #tpu.core_type<tc>, window_params = [{transform_indices = @transform_0, window_bounds = array<i64: 16, 2048>}, {pipeline_mode = #tpu.pipeline_mode<synchronous>, transform_indices = @transform_1, window_bounds = array<i64: 2048, 1024>}, {pipeline_mode = #tpu.pipeline_mode<synchronous>, transform_indices = @transform_2, window_bounds = array<i64: 1, 1024>}, {pipeline_mode = #tpu.pipeline_mode<synchronous>, transform_indices = @transform_3, window_bounds = array<i64: 1024, 1536>}, {pipeline_mode = #tpu.pipeline_mode<synchronous>, transform_indices = @transform_4, window_bounds = array<i64: 1, 1536>}, {pipeline_mode = #tpu.pipeline_mode<synchronous>, transform_indices = @transform_5, window_bounds = array<i64: 3, 512, 128>}, {pipeline_mode = #tpu.pipeline_mode<synchronous>, transform_indices = @transform_6, window_bounds = array<i64: 3, 1, 128>}, {transform_indices = @transform_7, window_bounds = array<i64: 3, 16, 128>}]} {
    %c0 = arith.constant 0 : index
    %c0_0 = arith.constant 0 : index
    %0 = vector.load %arg1[%c0, %c0_0] : memref<16x2048xf32, #tpu.memory_space<vmem>>, vector<16x2048xf32>
    %1 = arith.truncf %0 : vector<16x2048xf32> to vector<16x2048xbf16>
    %c0_1 = arith.constant 0 : index
    %c0_2 = arith.constant 0 : index
    %2 = vector.load %arg2[%c0_1, %c0_2] : memref<2048x1024xbf16, #tpu.memory_space<vmem>>, vector<2048x1024xbf16>
    %cst = arith.constant dense<0.000000e+00> : vector<16x1024xf32>
    %3 = tpu.matmul %1, %2, %cst {dimension_numbers = #tpu.dot_dimension_numbers<[1], [0], [0], [1], [0, 0, 1, 1], [], []>} : vector<16x2048xbf16>, vector<2048x1024xbf16>, vector<16x1024xf32> -> vector<16x1024xf32>
    %c0_3 = arith.constant 0 : index
    %c0_4 = arith.constant 0 : index
    %4 = vector.load %arg3[%c0_3, %c0_4] : memref<1x1024xf32, #tpu.memory_space<vmem>>, vector<1x1024xf32>
    %5 = vector.broadcast %4 : vector<1x1024xf32> to vector<16x1024xf32>
    %6 = arith.addf %3, %5 : vector<16x1024xf32>
    %cst_5 = arith.constant 0.000000e+00 : f32
    %7 = vector.broadcast %cst_5 : f32 to vector<16x1024xf32>
    %8 = arith.cmpf oge, %6, %7 : vector<16x1024xf32>
    %cst_6 = arith.constant 0.00999999977 : f32
    %9 = vector.broadcast %cst_6 : f32 to vector<16x1024xf32>
    %10 = arith.mulf %9, %6 : vector<16x1024xf32>
    %11 = arith.select %8, %6, %10 : vector<16x1024xi1>, vector<16x1024xf32>
    %12 = arith.truncf %11 : vector<16x1024xf32> to vector<16x1024xbf16>
    %c0_7 = arith.constant 0 : index
    %c0_8 = arith.constant 0 : index
    %13 = vector.load %arg4[%c0_7, %c0_8] : memref<1024x1536xbf16, #tpu.memory_space<vmem>>, vector<1024x1536xbf16>
    %cst_9 = arith.constant dense<0.000000e+00> : vector<16x1536xf32>
    %14 = tpu.matmul %12, %13, %cst_9 {dimension_numbers = #tpu.dot_dimension_numbers<[1], [0], [0], [1], [0, 0, 1, 1], [], []>} : vector<16x1024xbf16>, vector<1024x1536xbf16>, vector<16x1536xf32> -> vector<16x1536xf32>
    %c0_10 = arith.constant 0 : index
    %c0_11 = arith.constant 0 : index
    %15 = vector.load %arg5[%c0_10, %c0_11] : memref<1x1536xf32, #tpu.memory_space<vmem>>, vector<1x1536xf32>
    %16 = vector.broadcast %15 : vector<1x1536xf32> to vector<16x1536xf32>
    %17 = arith.addf %14, %16 : vector<16x1536xf32>
    %cst_12 = arith.constant 0.000000e+00 : f32
    %18 = vector.broadcast %cst_12 : f32 to vector<16x1536xf32>
    %19 = arith.cmpf oge, %17, %18 : vector<16x1536xf32>
    %cst_13 = arith.constant 0.00999999977 : f32
    %20 = vector.broadcast %cst_13 : f32 to vector<16x1536xf32>
    %21 = arith.mulf %20, %17 : vector<16x1536xf32>
    %22 = arith.select %19, %17, %21 : vector<16x1536xi1>, vector<16x1536xf32>
    %23 = arith.truncf %22 : vector<16x1536xf32> to vector<16x1536xbf16>
    %24 = vector.extract_strided_slice %23 {offsets = [0, 0], sizes = [16, 512], strides = [1, 1]} : vector<16x1536xbf16> to vector<16x512xbf16>
    %c0_14 = arith.constant 0 : index
    %c0_15 = arith.constant 0 : index
    %c0_16 = arith.constant 0 : index
    %25 = vector.load %arg6[%c0_14, %c0_15, %c0_16] : memref<3x512x128xbf16, #tpu.memory_space<vmem>>, vector<1x512x128xbf16>
    %26 = vector.shape_cast %25 : vector<1x512x128xbf16> to vector<512x128xbf16>
    %cst_17 = arith.constant dense<0.000000e+00> : vector<16x128xf32>
    %27 = tpu.matmul %24, %26, %cst_17 {dimension_numbers = #tpu.dot_dimension_numbers<[1], [0], [0], [1], [0, 0, 1, 1], [], []>} : vector<16x512xbf16>, vector<512x128xbf16>, vector<16x128xf32> -> vector<16x128xf32>
    %c0_18 = arith.constant 0 : index
    %c0_19 = arith.constant 0 : index
    %c0_20 = arith.constant 0 : index
    %28 = vector.load %arg7[%c0_18, %c0_19, %c0_20] : memref<3x1x128xf32, #tpu.memory_space<vmem>>, vector<1x1x128xf32>
    %29 = vector.shape_cast %28 : vector<1x1x128xf32> to vector<1x128xf32>
    %30 = vector.broadcast %29 : vector<1x128xf32> to vector<16x128xf32>
    %31 = arith.addf %27, %30 : vector<16x128xf32>
    %c0_21 = arith.constant 0 : index
    %c0_22 = arith.constant 0 : index
    %c0_23 = arith.constant 0 : index
    %32 = vector.load %arg8[%c0_21, %c0_22, %c0_23] : memref<3x16x128xf32, #tpu.memory_space<vmem>>, vector<1x16x128xf32>
    %33 = vector.shape_cast %32 : vector<1x16x128xf32> to vector<16x128xf32>
    %34 = vector.shape_cast %31 : vector<16x128xf32> to vector<1x16x128xf32>
    tpu.vector_store %arg8[%c0_21, %c0_22, %c0_23], %34 {strides = array<i32>} : memref<3x16x128xf32, #tpu.memory_space<vmem>>, vector<1x16x128xf32>,
    %35 = vector.extract_strided_slice %23 {offsets = [0, 512], sizes = [16, 512], strides = [1, 1]} : vector<16x1536xbf16> to vector<16x512xbf16>
    %c1 = arith.constant 1 : index
    %c0_24 = arith.constant 0 : index
    %c0_25 = arith.constant 0 : index
    %36 = vector.load %arg6[%c1, %c0_24, %c0_25] : memref<3x512x128xbf16, #tpu.memory_space<vmem>>, vector<1x512x128xbf16>
    %37 = vector.shape_cast %36 : vector<1x512x128xbf16> to vector<512x128xbf16>
    %cst_26 = arith.constant dense<0.000000e+00> : vector<16x128xf32>
    %38 = tpu.matmul %35, %37, %cst_26 {dimension_numbers = #tpu.dot_dimension_numbers<[1], [0], [0], [1], [0, 0, 1, 1], [], []>} : vector<16x512xbf16>, vector<512x128xbf16>, vector<16x128xf32> -> vector<16x128xf32>
    %c1_27 = arith.constant 1 : index
    %c0_28 = arith.constant 0 : index
    %c0_29 = arith.constant 0 : index
    %39 = vector.load %arg7[%c1_27, %c0_28, %c0_29] : memref<3x1x128xf32, #tpu.memory_space<vmem>>, vector<1x1x128xf32>
    %40 = vector.shape_cast %39 : vector<1x1x128xf32> to vector<1x128xf32>
    %41 = vector.broadcast %40 : vector<1x128xf32> to vector<16x128xf32>
    %42 = arith.addf %38, %41 : vector<16x128xf32>
    %c1_30 = arith.constant 1 : index
    %c0_31 = arith.constant 0 : index
    %c0_32 = arith.constant 0 : index
    %43 = vector.load %arg8[%c1_30, %c0_31, %c0_32] : memref<3x16x128xf32, #tpu.memory_space<vmem>>, vector<1x16x128xf32>
    %44 = vector.shape_cast %43 : vector<1x16x128xf32> to vector<16x128xf32>
    %45 = vector.shape_cast %42 : vector<16x128xf32> to vector<1x16x128xf32>
    tpu.vector_store %arg8[%c1_30, %c0_31, %c0_32], %45 {strides = array<i32>} : memref<3x16x128xf32, #tpu.memory_space<vmem>>, vector<1x16x128xf32>,
    %46 = vector.extract_strided_slice %23 {offsets = [0, 1024], sizes = [16, 512], strides = [1, 1]} : vector<16x1536xbf16> to vector<16x512xbf16>
    %c2 = arith.constant 2 : index
    %c0_33 = arith.constant 0 : index
    %c0_34 = arith.constant 0 : index
    %47 = vector.load %arg6[%c2, %c0_33, %c0_34] : memref<3x512x128xbf16, #tpu.memory_space<vmem>>, vector<1x512x128xbf16>
    %48 = vector.shape_cast %47 : vector<1x512x128xbf16> to vector<512x128xbf16>
    %cst_35 = arith.constant dense<0.000000e+00> : vector<16x128xf32>
    %49 = tpu.matmul %46, %48, %cst_35 {dimension_numbers = #tpu.dot_dimension_numbers<[1], [0], [0], [1], [0, 0, 1, 1], [], []>} : vector<16x512xbf16>, vector<512x128xbf16>, vector<16x128xf32> -> vector<16x128xf32>
    %c2_36 = arith.constant 2 : index
    %c0_37 = arith.constant 0 : index
    %c0_38 = arith.constant 0 : index
    %50 = vector.load %arg7[%c2_36, %c0_37, %c0_38] : memref<3x1x128xf32, #tpu.memory_space<vmem>>, vector<1x1x128xf32>
    %51 = vector.shape_cast %50 : vector<1x1x128xf32> to vector<1x128xf32>
    %52 = vector.broadcast %51 : vector<1x128xf32> to vector<16x128xf32>
    %53 = arith.addf %49, %52 : vector<16x128xf32>
    %c2_39 = arith.constant 2 : index
    %c0_40 = arith.constant 0 : index
    %c0_41 = arith.constant 0 : index
    %54 = vector.load %arg8[%c2_39, %c0_40, %c0_41] : memref<3x16x128xf32, #tpu.memory_space<vmem>>, vector<1x16x128xf32>
    %55 = vector.shape_cast %54 : vector<1x16x128xf32> to vector<16x128xf32>
    %56 = vector.shape_cast %53 : vector<16x128xf32> to vector<1x16x128xf32>
    tpu.vector_store %arg8[%c2_39, %c0_40, %c0_41], %56 {strides = array<i32>} : memref<3x16x128xf32, #tpu.memory_space<vmem>>, vector<1x16x128xf32>,
    return
  }
  func.func @transform_0(%arg0: i32) -> (i32, i32) {
    %c0_i32 = arith.constant 0 : i32
    %c0_i32_0 = arith.constant 0 : i32
    return %arg0, %c0_i32 : i32, i32
  }
  func.func @transform_1(%arg0: i32) -> (i32, i32) {
    %c0_i32 = arith.constant 0 : i32
    %c0_i32_0 = arith.constant 0 : i32
    %c0_i32_1 = arith.constant 0 : i32
    return %c0_i32, %c0_i32_0 : i32, i32
  }
  func.func @transform_2(%arg0: i32) -> (i32, i32) {
    %c0_i32 = arith.constant 0 : i32
    %c0_i32_0 = arith.constant 0 : i32
    %c0_i32_1 = arith.constant 0 : i32
    return %c0_i32, %c0_i32_0 : i32, i32
  }
  func.func @transform_3(%arg0: i32) -> (i32, i32) {
    %c0_i32 = arith.constant 0 : i32
    %c0_i32_0 = arith.constant 0 : i32
    %c0_i32_1 = arith.constant 0 : i32
    return %c0_i32, %c0_i32_0 : i32, i32
  }
  func.func @transform_4(%arg0: i32) -> (i32, i32) {
    %c0_i32 = arith.constant 0 : i32
    %c0_i32_0 = arith.constant 0 : i32
    %c0_i32_1 = arith.constant 0 : i32
    return %c0_i32, %c0_i32_0 : i32, i32
  }
  func.func @transform_5(%arg0: i32) -> (i32, i32, i32) {
    %c0_i32 = arith.constant 0 : i32
    %c0_i32_0 = arith.constant 0 : i32
    %c0_i32_1 = arith.constant 0 : i32
    %c0_i32_2 = arith.constant 0 : i32
    return %c0_i32, %c0_i32_0, %c0_i32_1 : i32, i32, i32
  }
  func.func @transform_6(%arg0: i32) -> (i32, i32, i32) {
    %c0_i32 = arith.constant 0 : i32
    %c0_i32_0 = arith.constant 0 : i32
    %c0_i32_1 = arith.constant 0 : i32
    %c0_i32_2 = arith.constant 0 : i32
    return %c0_i32, %c0_i32_0, %c0_i32_1 : i32, i32, i32
  }
  func.func @transform_7(%arg0: i32) -> (i32, i32, i32) {
    %c0_i32 = arith.constant 0 : i32
    %c0_i32_0 = arith.constant 0 : i32
    %c0_i32_1 = arith.constant 0 : i32
    return %c0_i32, %arg0, %c0_i32_0 : i32, i32, i32
  }
}

</mosaic_0001>

<bundles_post_ra>
// kernel: tpu_custom_call.1
= control target key start
LH: loop header
LB: loop body
LE: loop exit
PB: predicated region body
PF: predicated region fallthrough
CT: control target
= control target key end

     0   :  { %12 = vsyncpa [#allocation3], 0  ;;  %s18828_s0 = inlined_call_operand.hbm [shape: f32[16,2048], index: 0, kind: input, shape index: {}]   ;;  %s18829_s1 = inlined_call_operand.hbm [shape: bf16[2048,1024], index: 1, kind: input, shape index: {}]   ;;  %s18830_s2 = inlined_call_operand.hbm [shape: f32[1,1024], index: 2, kind: input, shape index: {}]   ;;  %s18831_s3 = inlined_call_operand.hbm [shape: bf16[1024,1536], index: 3, kind: input, shape index: {}]   ;;  %s18832_s4 = inlined_call_operand.hbm [shape: f32[1,1536], index: 4, kind: input, shape index: {}]   ;;  %s18833_s5 = inlined_call_operand.hbm [shape: bf16[3,512,128], index: 5, kind: input, shape index: {}]   ;;  %s18834_s6 = inlined_call_operand.hbm [shape: f32[3,1,128], index: 6, kind: input, shape index: {}]   ;;  %s18835_s7 = inlined_call_operand.hbm [shape: f32[3,16,128], index: 7, kind: output, shape index: {}]  }
   0x1   :  { %13 = vsyncpa [#allocation6], 0 }
   0x2   :  { %14 = vsyncpa [#allocation9], 0 }
   0x3   :  { %15 = vsyncpa [#allocation12], 0 }
   0x4   :  { %16 = vsyncpa [#allocation4], 0  ;;  %s18342_s24 = smov [#allocation5]   ;;  %s18156_s28 = scalar_lea.hbm %s18829_s1, 131072 }
   0x5   :  { %s34_s25 = sshll.u32 %s18342_s24, 4  ;;  %p18157_p0 = scmp.ne.s32.totalorder %s18829_s1, %s18156_s28  ;;  %s35_s25 = int_to_ptr.vmem [resolvable:$true] %s34_s25 }
   0x6   :  { %p18160_p1 = scmp.lt.u32.totalorder %s18156_s28, %s18829_s1 }
   0x8   :  { %p18162_p2 = pnand %p18160_p1, %p18157_p0 }
   0xa   :  { %18165 = shalt.err (!%p18162_p2)
}
   0xb   :  { %s18166_s10 = scalar_lea.vmem %s35_s25, 131072  ;;  %p18171_p4 = scmp.lt.s32.totalorder %s35_s25, %s35_s25 }
   0xc   :  { %p18167_p3 = scmp.ne.s32.totalorder %s35_s25, %s18166_s10  ;;  %p18172_p5 = scmp.lt.s32.totalorder %s18166_s10, %s18166_s10 }
   0xe   :  { %p18173_p6 = por %p18172_p5, %p18171_p4 }
  0x10   :  { %p18174_p7 = pnand %p18173_p6, %p18167_p3 }
  0x12   :  { %18177 = shalt.err (!%p18174_p7)
}
  0x13   :  { %s18343_s11 = smov 512   ;;  %s18344_s12 = smov 32  }
  0x14   :  { %40 = dma.hbm_to_vmem [thread:$0]  %s18829_s1, 131072, %s35_s25, [#allocation6], %s18343_s11, %s18343_s11, %s18344_s12  }
  0x15   :  { %s18345_s15 = smov [#allocation8]   ;;  %s18178_s19 = scalar_lea.hbm %s18831_s3, 98304 }
  0x16   :  { %s56_s16 = sshll.u32 %s18345_s15, 4  ;;  %p18179_p8 = scmp.ne.s32.totalorder %s18831_s3, %s18178_s19  ;;  %s57_s16 = int_to_ptr.vmem [resolvable:$true] %s56_s16 }
  0x17   :  { %p18182_p9 = scmp.lt.u32.totalorder %s18178_s19, %s18831_s3 }
  0x19   :  { %p18184_p10 = pnand %p18182_p9, %p18179_p8 }
  0x1b   :  { %18187 = shalt.err (!%p18184_p10)
}
  0x1c   :  { %s18188_s24 = scalar_lea.vmem %s57_s16, 98304  ;;  %p18193_p12 = scmp.lt.s32.totalorder %s57_s16, %s57_s16 }
  0x1d   :  { %p18189_p11 = scmp.ne.s32.totalorder %s57_s16, %s18188_s24  ;;  %p18194_p13 = scmp.lt.s32.totalorder %s18188_s24, %s18188_s24 }
  0x1f   :  { %p18195_p0 = por %p18194_p13, %p18193_p12 }
  0x21   :  { %p18196_p1 = pnand %p18195_p0, %p18189_p11 }
  0x23   :  { %18199 = shalt.err (!%p18196_p1)
}
  0x24   :  { %s18346_s1 = smov 768   ;;  %s18347_s25 = smov 48  }
  0x25   :  { %62 = dma.hbm_to_vmem [thread:$0]  %s18831_s3, 98304, %s57_s16, [#allocation9], %s18346_s1, %s18346_s1, %s18347_s25  }
  0x26   :  { %s18348_s28 = smov [#allocation11]   ;;  %s18200_s9 = scalar_lea.hbm %s18833_s5, 12288 }
  0x27   :  { %s78_s29 = sshll.u32 %s18348_s28, 4  ;;  %p18201_p2 = scmp.ne.s32.totalorder %s18833_s5, %s18200_s9  ;;  %s79_s29 = int_to_ptr.vmem [resolvable:$true] %s78_s29 }
  0x28   :  { %p18204_p3 = scmp.lt.u32.totalorder %s18200_s9, %s18833_s5 }
  0x2a   :  { %p18206_p4 = pnand %p18204_p3, %p18201_p2 }
  0x2c   :  { %18209 = shalt.err (!%p18206_p4)
}
  0x2d   :  { %s18210_s14 = scalar_lea.vmem %s79_s29, 12288  ;;  %p18215_p6 = scmp.lt.s32.totalorder %s79_s29, %s79_s29 }
  0x2e   :  { %p18211_p5 = scmp.ne.s32.totalorder %s79_s29, %s18210_s14  ;;  %p18216_p7 = scmp.lt.s32.totalorder %s18210_s14, %s18210_s14 }
  0x30   :  { %p18217_p8 = por %p18216_p7, %p18215_p6 }
  0x32   :  { %p18218_p9 = pnand %p18217_p8, %p18211_p5 }
  0x34   :  { %18221 = shalt.err (!%p18218_p9)
}
  0x35   :  { %s18349_s3 = smov 64   ;;  %s18350_s15 = smov 4  }
  0x36   :  { %84 = dma.hbm_to_vmem [thread:$0]  %s18833_s5, 12288, %s79_s29, [#allocation12], %s18349_s3, %s18349_s3, %s18350_s15  }
  0x37   :  { %s18351_s18 = smov [#allocation2]   ;;  %s18222_s22 = scalar_lea.hbm %s18828_s0, 4096 }
  0x38   :  { %s22_s19 = sshll.u32 %s18351_s18, 4  ;;  %p18223_p10 = scmp.ne.s32.totalorder %s18828_s0, %s18222_s22  ;;  %s23_s19 = int_to_ptr.vmem [resolvable:$true] %s22_s19 }
  0x39   :  { %p18226_p11 = scmp.lt.u32.totalorder %s18222_s22, %s18828_s0 }
  0x3b   :  { %p18228_p12 = pnand %p18226_p11, %p18223_p10 }
  0x3d   :  { %18231 = shalt.err (!%p18228_p12)
}
  0x3e   :  { %s18232_s26 = scalar_lea.vmem %s23_s19, 4096  ;;  %p18237_p0 = scmp.lt.s32.totalorder %s23_s19, %s23_s19 }
  0x3f   :  { %p18233_p13 = scmp.ne.s32.totalorder %s23_s19, %s18232_s26  ;;  %p18238_p1 = scmp.lt.s32.totalorder %s18232_s26, %s18232_s26 }
  0x41   :  { %p18239_p2 = por %p18238_p1, %p18237_p0 }
  0x43   :  { %p18240_p3 = pnand %p18239_p2, %p18233_p13 }
  0x45   :  { %18243 = shalt.err (!%p18240_p3)
}
  0x46   :  { %s18352_s5 = smov 2048   ;;  %s18353_s27 = smov 128  }
  0x47   :  { %28 = dma.hbm_to_vmem [thread:$0]  %s18828_s0, 4096, %s23_s19, [#allocation3], %s18352_s5, %s18352_s5, %s18353_s27  }
  0x48   :  { %s18354_s30 = smov [#allocation7]   ;;  %s18355_s9 = smov [#allocation10]  }
  0x49   :  { %s47_s8 = sshll.u32 %s18354_s30, 4  ;;  %s69_s10 = sshll.u32 %s18355_s9, 4  ;;  %s48_s8 = int_to_ptr.vmem [resolvable:$true] %s47_s8  ;;  %s70_s10 = int_to_ptr.vmem [resolvable:$true] %s69_s10 }
  0x4a   :  { %s18244_s13 = scalar_lea.hbm %s18830_s2, 128 }
  0x4b   :  { %p18245_p4 = scmp.ne.s32.totalorder %s18830_s2, %s18244_s13  ;;  %p18248_p5 = scmp.lt.u32.totalorder %s18244_s13, %s18830_s2 }
  0x4d   :  { %p18250_p6 = pnand %p18248_p5, %p18245_p4 }
  0x4f   :  { %18253 = shalt.err (!%p18250_p6)
}
  0x50   :  { %s18254_s0 = scalar_lea.vmem %s48_s8, 128  ;;  %p18259_p8 = scmp.lt.s32.totalorder %s48_s8, %s48_s8 }
  0x51   :  { %p18255_p7 = scmp.ne.s32.totalorder %s48_s8, %s18254_s0  ;;  %p18260_p9 = scmp.lt.s32.totalorder %s18254_s0, %s18254_s0 }
  0x53   :  { %p18261_p10 = por %p18260_p9, %p18259_p8 }
  0x55   :  { %p18262_p11 = pnand %p18261_p10, %p18255_p7 }
  0x57   :  { %18265 = shalt.err (!%p18262_p11)
}
  0x58   :  { %50 = dma.hbm_to_vmem [thread:$0]  %s18830_s2, 128, %s48_s8, [#allocation6]  }
  0x59   :  { %s18266_s21 = scalar_lea.hbm %s18832_s4, 192 }
  0x5a   :  { %p18267_p12 = scmp.ne.s32.totalorder %s18832_s4, %s18266_s21  ;;  %p18270_p13 = scmp.lt.u32.totalorder %s18266_s21, %s18832_s4 }
  0x5c   :  { %p18272_p0 = pnand %p18270_p13, %p18267_p12 }
  0x5e   :  { %18275 = shalt.err (!%p18272_p0)
}
  0x5f   :  { %s18276_s25 = scalar_lea.vmem %s70_s10, 192  ;;  %p18281_p2 = scmp.lt.s32.totalorder %s70_s10, %s70_s10 }
  0x60   :  { %p18277_p1 = scmp.ne.s32.totalorder %s70_s10, %s18276_s25  ;;  %p18282_p3 = scmp.lt.s32.totalorder %s18276_s25, %s18276_s25 }
  0x62   :  { %p18283_p4 = por %p18282_p3, %p18281_p2 }
  0x64   :  { %p18284_p5 = pnand %p18283_p4, %p18277_p1 }
  0x66   :  { %18287 = shalt.err (!%p18284_p5)
}
  0x67   :  { %72 = dma.hbm_to_vmem [thread:$0]  %s18832_s4, 192, %s70_s10, [#allocation9]  }
  0x68   :  { %s18356_s5 = smov [#allocation13]   ;;  %s18288_s8 = scalar_lea.hbm %s18834_s6, 48 }
  0x69   :  { %s90_s28 = sshll.u32 %s18356_s5, 4  ;;  %p18289_p6 = scmp.ne.s32.totalorder %s18834_s6, %s18288_s8  ;;  %s91_s28 = int_to_ptr.vmem [resolvable:$true] %s90_s28 }
  0x6a   :  { %p18292_p7 = scmp.lt.u32.totalorder %s18288_s8, %s18834_s6 }
  0x6c   :  { %p18294_p8 = pnand %p18292_p7, %p18289_p6 }
  0x6e   :  { %18297 = shalt.err (!%p18294_p8)
}
  0x6f   :  { %s18298_s14 = scalar_lea.vmem %s91_s28, 48  ;;  %s18302_s4 = scalar_lea.vmem %s91_s28, 64 }
  0x70   :  { %p18299_p9 = scmp.ne.s32.totalorder %s91_s28, %s18298_s14  ;;  %p18303_p10 = scmp.lt.s32.totalorder %s91_s28, %s91_s28 }
  0x71   :  { %p18304_p11 = scmp.lt.s32.totalorder %s18302_s4, %s18298_s14 }
  0x73   :  { %p18305_p12 = por %p18304_p11, %p18303_p10 }
  0x75   :  { %p18306_p13 = pnand %p18305_p12, %p18299_p9 }
  0x77   :  { %18309 = shalt.err (!%p18306_p13)
}
  0x78   :  { %s18357_s10 = smov 16   ;;  %s18358_s3 = smov 1  }
  0x79   :  { %96 = dma.hbm_to_vmem [thread:$0]  %s18834_s6, 48, %s91_s28, [#allocation12], %s18357_s10, %s18357_s10, %s18358_s3  }
  0x7a   :  { %18332 = dma.done.wait [#allocation3], 4096  }
  0x7b   :  { %18333 = vsyncadd [#allocation3], 4294963200 }
  0x7c   :  { %18334 = dma.done.wait [#allocation6], 131200  }
  0x7d   :  { %18335 = vsyncadd [#allocation6], 4294836096 }
  0x7e   :  { %18336 = dma.done.wait [#allocation9], 98496  }
  0x7f   :  { %18337 = vsyncadd [#allocation9], 4294868800 }
  0x80   :  { %18338 = dma.done.wait [#allocation12], 12336  }
  0x81   :  { %18339 = vsyncadd [#allocation12], 4294954960  ;;  %v167_v0 = vld [vmem:[#allocation5] sm:$0xff]  ;;  %v168_v2 = vld [vmem:[#allocation5 + $0x8] sm:$0xff]  ;;  %s18359_s6 = smov [#allocation14]  }
  0x82   :  { %v171_v1 = vld [vmem:[#allocation5 + $0x20] sm:$0xff]  ;;  %v172_v4 = vld [vmem:[#allocation5 + $0x28] sm:$0xff]  ;;  %s14625_s0 = sshll.u32 %s18359_s6, 4  ;;  %s14626_s0 = int_to_ptr.vmem [resolvable:$true] %s14625_s0 }
  0x83   :  { %v14641_v3 = vcombine.high %v167_v0, %v171_v1  ;;  %v14640_v5 = vcombine.low %v167_v0, %v171_v1  ;;  %v175_v6 = vld [vmem:[#allocation5 + $0x40] sm:$0xff]  ;;  %v14643_v8 = vcombine.high %v168_v2, %v172_v4  ;;  %v14642_v9 = vcombine.low %v168_v2, %v172_v4  ;;  %v176_v11 = vld [vmem:[#allocation5 + $0x48] sm:$0xff]  ;;  %s18310_s17 = scalar_lea.vmem %s14626_s0, 768  ;;  %p18315_p1 = scmp.lt.s32.totalorder %s14626_s0, %s14626_s0 }
  0x84   :  { %v179_v7 = vld [vmem:[#allocation5 + $0x60] sm:$0xff]  ;;  %v180_v12 = vld [vmem:[#allocation5 + $0x68] sm:$0xff]  ;;  %p18311_p0 = scmp.ne.s32.totalorder %s14626_s0, %s18310_s17  ;;  %p18316_p2 = scmp.lt.s32.totalorder %s18310_s17, %s18310_s17 }
  0x85   :  { %v14649_v10 = vcombine.high %v175_v6, %v179_v7  ;;  %v183_v13 = vld [vmem:[#allocation5 + $0x80] sm:$0xff]  ;;  %6353 = vmatprep.subr.bf16.mxu0 %v14641_v3  ;;  %v14651_v14 = vcombine.high %v176_v11, %v180_v12  ;;  %v184_v16 = vld [vmem:[#allocation5 + $0x88] sm:$0xff]  ;;  %6697 = vmatprep.subr.bf16.mxu1 %v14643_v8  ;;  %v14648_v18 = vcombine.low %v175_v6, %v179_v7 }
  0x86   :  { %v187_v15 = vld [vmem:[#allocation5 + $0xa0] sm:$0xff]  ;;  %v188_v17 = vld [vmem:[#allocation5 + $0xa8] sm:$0xff]  ;;  %6354 = vmatpush1.bf16.msra.mxu0 %v14640_v5  ;;  %6698 = vmatpush1.bf16.msra.mxu1 %v14642_v9  ;;  %v14650_v19 = vcombine.low %v176_v11, %v180_v12  ;;  %p18317_p3 = por %p18316_p2, %p18315_p1 }
  0x87   :  { %6355 = vmatprep.subr.bf16.mxu0 %v14649_v10  ;;  %v14657_v20 = vcombine.high %v183_v13, %v187_v15  ;;  %6699 = vmatprep.subr.bf16.mxu1 %v14651_v14  ;;  %v14659_v21 = vcombine.high %v184_v16, %v188_v17  ;;  %v191_v22 = vld [vmem:[#allocation5 + $0xc0] sm:$0xff]  ;;  %v192_v24 = vld [vmem:[#allocation5 + $0xc8] sm:$0xff]  ;;  %v14656_v26 = vcombine.low %v183_v13, %v187_v15 }
  0x88   :  { %v195_v23 = vld [vmem:[#allocation5 + $0xe0] sm:$0xff]  ;;  %v196_v25 = vld [vmem:[#allocation5 + $0xe8] sm:$0xff]  ;;  %v14658_v27 = vcombine.low %v184_v16, %v188_v17  ;;  %p18318_p4 = pnand %p18317_p3, %p18311_p0 }
  0x89   :  { %v14665_v28 = vcombine.high %v191_v22, %v195_v23  ;;  %v14667_v29 = vcombine.high %v192_v24, %v196_v25  ;;  %v199_v30 = vld [vmem:[#allocation5 + $0x100] sm:$0xff]  ;;  %v200_v32 = vld [vmem:[#allocation5 + $0x108] sm:$0xff]  ;;  %v14664_v34 = vcombine.low %v191_v22, %v195_v23  ;;  %v14666_v35 = vcombine.low %v192_v24, %v196_v25 }
  0x8a   :  { %6356 = vmatpush1.bf16.msra.mxu0 %v14648_v18  ;;  %6700 = vmatpush1.bf16.msra.mxu1 %v14650_v19  ;;  %v203_v31 = vld [vmem:[#allocation5 + $0x120] sm:$0xff]  ;;  %v204_v33 = vld [vmem:[#allocation5 + $0x128] sm:$0xff] }
  0x8b   :  { %6357 = vmatprep.subr.bf16.mxu0 %v14657_v20  ;;  %6701 = vmatprep.subr.bf16.mxu1 %v14659_v21  ;;  %v14673_v36 = vcombine.high %v199_v30, %v203_v31  ;;  %v14675_v37 = vcombine.high %v200_v32, %v204_v33  ;;  %v207_v38 = vld [vmem:[#allocation5 + $0x140] sm:$0xff]  ;;  %v208_v40 = vld [vmem:[#allocation5 + $0x148] sm:$0xff]  ;;  %v14672_v42 = vcombine.low %v199_v30, %v203_v31 }
  0x8c   :  { %v211_v39 = vld [vmem:[#allocation5 + $0x160] sm:$0xff]  ;;  %v212_v41 = vld [vmem:[#allocation5 + $0x168] sm:$0xff]  ;;  %v14674_v43 = vcombine.low %v200_v32, %v204_v33 }
  0x8d   :  { %v14681_v44 = vcombine.high %v207_v38, %v211_v39  ;;  %v14683_v45 = vcombine.high %v208_v40, %v212_v41  ;;  %v215_v46 = vld [vmem:[#allocation5 + $0x180] sm:$0xff]  ;;  %v216_v48 = vld [vmem:[#allocation5 + $0x188] sm:$0xff]  ;;  %v14680_v50 = vcombine.low %v207_v38, %v211_v39  ;;  %v14682_v51 = vcombine.low %v208_v40, %v212_v41 }
  0x8e   :  { %6358 = vmatpush1.bf16.msra.mxu0 %v14656_v26  ;;  %6702 = vmatpush1.bf16.msra.mxu1 %v14658_v27  ;;  %v219_v47 = vld [vmem:[#allocation5 + $0x1a0] sm:$0xff]  ;;  %v220_v49 = vld [vmem:[#allocation5 + $0x1a8] sm:$0xff] }
  0x8f   :  { %6359 = vmatprep.subr.bf16.mxu0 %v14665_v28  ;;  %6703 = vmatprep.subr.bf16.mxu1 %v14667_v29  ;;  %v14689_v52 = vcombine.high %v215_v46, %v219_v47  ;;  %v120_v53 = vld [vmem:[#allocation2 + $0x8] sm:$0xff]  ;;  %v14691_v55 = vcombine.high %v216_v48, %v220_v49  ;;  %v223_v56 = vld [vmem:[#allocation5 + $0x1c0] sm:$0xff]  ;;  %v14688_v61 = vcombine.low %v215_v46, %v219_v47 }
  0x90   :  { %v136_v54 = vld [vmem:[#allocation2 + $0x88] sm:$0xff]  ;;  %v227_v57 = vld [vmem:[#allocation5 + $0x1e0] sm:$0xff]  ;;  %v14690_v62 = vcombine.low %v216_v48, %v220_v49 }
  0x91   :  { %v18486_v58 = vpack.c.bf16 %v136_v54, %v120_v53  ;;  %v224_v59 = vld [vmem:[#allocation5 + $0x1c8] sm:$0xff]  ;;  %v14697_v63 = vcombine.high %v223_v56, %v227_v57  ;;  %v231_v1 = vld [vmem:[#allocation5 + $0x200] sm:$0xff]  ;;  %v14696_v5 = vcombine.low %v223_v56, %v227_v57 }
  0x92   :  { %6360 = vmatpush1.bf16.msra.mxu0 %v14664_v34  ;;  %6704 = vmatpush1.bf16.msra.mxu1 %v14666_v35  ;;  %v228_v60 = vld [vmem:[#allocation5 + $0x1e8] sm:$0xff]  ;;  %v235_v2 = vld [vmem:[#allocation5 + $0x220] sm:$0xff] }
  0x93   :  { %6361 = vmatprep.subr.bf16.mxu0 %v14673_v36  ;;  %6705 = vmatprep.subr.bf16.mxu1 %v14675_v37  ;;  %v14699_v0 = vcombine.high %v224_v59, %v228_v60  ;;  %v232_v3 = vld [vmem:[#allocation5 + $0x208] sm:$0xff]  ;;  %v14698_v6 = vcombine.low %v224_v59, %v228_v60  ;;  %v14705_v7 = vcombine.high %v231_v1, %v235_v2  ;;  %v239_v9 = vld [vmem:[#allocation5 + $0x240] sm:$0xff] }
  0x94   :  { %6385 = vmatprep.mubr.bf16.mxu0 %v18486_v58  ;;  %6729 = vmatprep.mubr.bf16.mxu1 %v18486_v58  ;;  %v236_v4 = vld [vmem:[#allocation5 + $0x228] sm:$0xff]  ;;  %v243_v10 = vld [vmem:[#allocation5 + $0x260] sm:$0xff]  ;;  %v14704_v13 = vcombine.low %v231_v1, %v235_v2 }
  0x95   :  { %v14707_v8 = vcombine.high %v232_v3, %v236_v4  ;;  %v240_v11 = vld [vmem:[#allocation5 + $0x248] sm:$0xff]  ;;  %v14706_v14 = vcombine.low %v232_v3, %v236_v4  ;;  %v14713_v15 = vcombine.high %v239_v9, %v243_v10  ;;  %v247_v17 = vld [vmem:[#allocation5 + $0x280] sm:$0xff]  ;;  %v14712_v21 = vcombine.low %v239_v9, %v243_v10 }
  0x96   :  { %6362 = vmatpush1.bf16.msra.mxu0 %v14672_v42  ;;  %6706 = vmatpush1.bf16.msra.mxu1 %v14674_v43  ;;  %v244_v12 = vld [vmem:[#allocation5 + $0x268] sm:$0xff]  ;;  %v251_v18 = vld [vmem:[#allocation5 + $0x2a0] sm:$0xff] }
  0x97   :  { %6363 = vmatprep.subr.bf16.mxu0 %v14681_v44  ;;  %6707 = vmatprep.subr.bf16.mxu1 %v14683_v45  ;;  %v14715_v16 = vcombine.high %v240_v11, %v244_v12  ;;  %v248_v19 = vld [vmem:[#allocation5 + $0x288] sm:$0xff]  ;;  %v14714_v22 = vcombine.low %v240_v11, %v244_v12  ;;  %v14721_v23 = vcombine.high %v247_v17, %v251_v18  ;;  %v255_v25 = vld [vmem:[#allocation5 + $0x2c0] sm:$0xff] }
  0x98   :  { %v252_v20 = vld [vmem:[#allocation5 + $0x2a8] sm:$0xff]  ;;  %v259_v26 = vld [vmem:[#allocation5 + $0x2e0] sm:$0xff]  ;;  %v14720_v29 = vcombine.low %v247_v17, %v251_v18  ;;  %v122_v17 = vld [vmem:[#allocation2 + $0x18] sm:$0xff] }
  0x99   :  { %v14723_v24 = vcombine.high %v248_v19, %v252_v20  ;;  %v256_v27 = vld [vmem:[#allocation5 + $0x2c8] sm:$0xff]  ;;  %v14722_v30 = vcombine.low %v248_v19, %v252_v20  ;;  %v14729_v31 = vcombine.high %v255_v25, %v259_v26  ;;  %v263_v33 = vld [vmem:[#allocation5 + $0x300] sm:$0xff]  ;;  %v14728_v37 = vcombine.low %v255_v25, %v259_v26  ;;  %v138_v18 = vld [vmem:[#allocation2 + $0x98] sm:$0xff] }
  0x9a   :  { %6364 = vmatpush1.bf16.msra.mxu0 %v14680_v50  ;;  %6708 = vmatpush1.bf16.msra.mxu1 %v14682_v51  ;;  %v260_v28 = vld [vmem:[#allocation5 + $0x2e8] sm:$0xff]  ;;  %v267_v34 = vld [vmem:[#allocation5 + $0x320] sm:$0xff]  ;;  %v18492_v25 = vpack.c.bf16 %v138_v18, %v122_v17 }
  0x9b   :  { %6365 = vmatprep.subr.bf16.mxu0 %v14689_v52  ;;  %6709 = vmatprep.subr.bf16.mxu1 %v14691_v55  ;;  %v14731_v32 = vcombine.high %v256_v27, %v260_v28  ;;  %v264_v35 = vld [vmem:[#allocation5 + $0x308] sm:$0xff]  ;;  %v14730_v38 = vcombine.low %v256_v27, %v260_v28  ;;  %v14737_v39 = vcombine.high %v263_v33, %v267_v34  ;;  %v271_v41 = vld [vmem:[#allocation5 + $0x340] sm:$0xff] }
  0x9c   :  { %v268_v36 = vld [vmem:[#allocation5 + $0x328] sm:$0xff]  ;;  %v275_v42 = vld [vmem:[#allocation5 + $0x360] sm:$0xff]  ;;  %v14736_v45 = vcombine.low %v263_v33, %v267_v34 }
  0x9d   :  { %v14739_v40 = vcombine.high %v264_v35, %v268_v36  ;;  %v272_v43 = vld [vmem:[#allocation5 + $0x348] sm:$0xff]  ;;  %v14738_v46 = vcombine.low %v264_v35, %v268_v36  ;;  %v14745_v47 = vcombine.high %v271_v41, %v275_v42  ;;  %v279_v49 = vld [vmem:[#allocation5 + $0x380] sm:$0xff]  ;;  %v14744_v53 = vcombine.low %v271_v41, %v275_v42 }
  0x9e   :  { %6366 = vmatpush1.bf16.msra.mxu0 %v14688_v61  ;;  %6710 = vmatpush1.bf16.msra.mxu1 %v14690_v62  ;;  %v276_v44 = vld [vmem:[#allocation5 + $0x368] sm:$0xff]  ;;  %v283_v50 = vld [vmem:[#allocation5 + $0x3a0] sm:$0xff] }
  0x9f   :  { %6367 = vmatprep.subr.bf16.mxu0 %v14697_v63  ;;  %6711 = vmatprep.subr.bf16.mxu1 %v14699_v0  ;;  %v14747_v48 = vcombine.high %v272_v43, %v276_v44  ;;  %v280_v51 = vld [vmem:[#allocation5 + $0x388] sm:$0xff]  ;;  %v14746_v54 = vcombine.low %v272_v43, %v276_v44  ;;  %v14753_v55 = vcombine.high %v279_v49, %v283_v50  ;;  %v287_v57 = vld [vmem:[#allocation5 + $0x3c0] sm:$0xff] }
  0xa0   :  { %v284_v52 = vld [vmem:[#allocation5 + $0x3a8] sm:$0xff]  ;;  %v291_v59 = vld [vmem:[#allocation5 + $0x3e0] sm:$0xff]  ;;  %v14752_v62 = vcombine.low %v279_v49, %v283_v50 }
  0xa1   :  { %v14755_v56 = vcombine.high %v280_v51, %v284_v52  ;;  %v288_v60 = vld [vmem:[#allocation5 + $0x3c8] sm:$0xff]  ;;  %v14754_v63 = vcombine.low %v280_v51, %v284_v52  ;;  %v14761_v0 = vcombine.high %v287_v57, %v291_v59  ;;  %v295_v2 = vld [vmem:[#allocation5 + $0x400] sm:$0xff] }
  0xa2   :  { %6368 = vmatpush1.bf16.msra.mxu0 %v14696_v5  ;;  %6712 = vmatpush1.bf16.msra.mxu1 %v14698_v6  ;;  %v292_v61 = vld [vmem:[#allocation5 + $0x3e8] sm:$0xff]  ;;  %v299_v3 = vld [vmem:[#allocation5 + $0x420] sm:$0xff]  ;;  %v14760_v6 = vcombine.low %v287_v57, %v291_v59 }
  0xa3   :  { %6369 = vmatprep.subr.bf16.mxu0 %v14705_v7  ;;  %6713 = vmatprep.subr.bf16.mxu1 %v14707_v8  ;;  %v14763_v1 = vcombine.high %v288_v60, %v292_v61  ;;  %v296_v4 = vld [vmem:[#allocation5 + $0x408] sm:$0xff]  ;;  %v119_v7 = vld [vmem:[#allocation2] sm:$0xff]  ;;  %v14762_v9 = vcombine.low %v288_v60, %v292_v61  ;;  %v14769_v10 = vcombine.high %v295_v2, %v299_v3 }
  0xa4   :  { %v300_v5 = vld [vmem:[#allocation5 + $0x428] sm:$0xff]  ;;  %v135_v8 = vld [vmem:[#allocation2 + $0x80] sm:$0xff]  ;;  %v14768_v19 = vcombine.low %v295_v2, %v299_v3 }
  0xa5   :  { %v14771_v11 = vcombine.high %v296_v4, %v300_v5  ;;  %v303_v12 = vld [vmem:[#allocation5 + $0x440] sm:$0xff]  ;;  %v14770_v20 = vcombine.low %v296_v4, %v300_v5  ;;  %v312_v26 = vld [vmem:[#allocation5 + $0x488] sm:$0xff] }
  0xa6   :  { %6370 = vmatpush1.bf16.msra.mxu0 %v14704_v13  ;;  %6714 = vmatpush1.bf16.msra.mxu1 %v14706_v14  ;;  %v307_v13 = vld [vmem:[#allocation5 + $0x460] sm:$0xff]  ;;  %v304_v14 = vld [vmem:[#allocation5 + $0x448] sm:$0xff] }
  0xa7   :  { %6371 = vmatprep.subr.bf16.mxu0 %v14713_v15  ;;  %6715 = vmatprep.subr.bf16.mxu1 %v14715_v16  ;;  %v18490_v15 = vpack.c.bf16 %v135_v8, %v119_v7  ;;  %v308_v16 = vld [vmem:[#allocation5 + $0x468] sm:$0xff]  ;;  %v14776_v28 = vcombine.low %v303_v12, %v307_v13  ;;  %v359_v8 = vld [vmem:[#allocation5 + $0x600] sm:$0xff] }
  0xa8   :  { %v316_v27 = vld [vmem:[#allocation5 + $0x4a8] sm:$0xff]  ;;  %v367_v17 = vld [vmem:[#allocation5 + $0x640] sm:$0xff] }
  0xa9   :  { %v14787_v33 = vcombine.high %v312_v26, %v316_v27  ;;  %v320_v34 = vld [vmem:[#allocation5 + $0x4c8] sm:$0xff]  ;;  %v371_v18 = vld [vmem:[#allocation5 + $0x660] sm:$0xff] }
  0xaa   :  { %6372 = vmatpush1.bf16.msra.mxu0 %v14712_v21  ;;  %6716 = vmatpush1.bf16.msra.mxu1 %v14714_v22  ;;  %v14777_v21 = vcombine.high %v303_v12, %v307_v13  ;;  %v14779_v22 = vcombine.high %v304_v14, %v308_v16  ;;  %v324_v35 = vld [vmem:[#allocation5 + $0x4e8] sm:$0xff] }
  0xab   :  { %6373 = vmatprep.subr.bf16.mxu0 %v14721_v23  ;;  %6717 = vmatprep.subr.bf16.mxu1 %v14723_v24  ;;  %v311_v23 = vld [vmem:[#allocation5 + $0x480] sm:$0xff]  ;;  %v328_v41 = vld [vmem:[#allocation5 + $0x508] sm:$0xff]  ;;  %v14795_v42 = vcombine.high %v320_v34, %v324_v35 }
  0xac   :  { %v315_v24 = vld [vmem:[#allocation5 + $0x4a0] sm:$0xff]  ;;  %v332_v43 = vld [vmem:[#allocation5 + $0x528] sm:$0xff] }
  0xad   :  { %v14784_v36 = vcombine.low %v311_v23, %v315_v24  ;;  %v336_v49 = vld [vmem:[#allocation5 + $0x548] sm:$0xff]  ;;  %v14803_v50 = vcombine.high %v328_v41, %v332_v43 }
  0xae   :  { %6374 = vmatpush1.bf16.msra.mxu0 %v14720_v29  ;;  %6718 = vmatpush1.bf16.msra.mxu1 %v14722_v30  ;;  %v14778_v29 = vcombine.low %v304_v14, %v308_v16  ;;  %v14785_v30 = vcombine.high %v311_v23, %v315_v24  ;;  %v340_v51 = vld [vmem:[#allocation5 + $0x568] sm:$0xff]  ;;  %v14841_v24 = vcombine.high %v367_v17, %v371_v18 }
  0xaf   :  { %6375 = vmatprep.subr.bf16.mxu0 %v14729_v31  ;;  %6719 = vmatprep.subr.bf16.mxu1 %v14731_v32  ;;  %v319_v31 = vld [vmem:[#allocation5 + $0x4c0] sm:$0xff]  ;;  %v344_v57 = vld [vmem:[#allocation5 + $0x588] sm:$0xff]  ;;  %v14811_v59 = vcombine.high %v336_v49, %v340_v51 }
  0xb0   :  { %v323_v32 = vld [vmem:[#allocation5 + $0x4e0] sm:$0xff]  ;;  %v348_v60 = vld [vmem:[#allocation5 + $0x5a8] sm:$0xff] }
  0xb1   :  { %v14792_v44 = vcombine.low %v319_v31, %v323_v32  ;;  %v352_v2 = vld [vmem:[#allocation5 + $0x5c8] sm:$0xff]  ;;  %v14819_v3 = vcombine.high %v344_v57, %v348_v60 }
  0xb2   :  { %6376 = vmatpush1.bf16.msra.mxu0 %v14728_v37  ;;  %6720 = vmatpush1.bf16.msra.mxu1 %v14730_v38  ;;  %v14786_v37 = vcombine.low %v312_v26, %v316_v27  ;;  %v14793_v38 = vcombine.high %v319_v31, %v323_v32  ;;  %v356_v4 = vld [vmem:[#allocation5 + $0x5e8] sm:$0xff]  ;;  %v375_v26 = vld [vmem:[#allocation5 + $0x680] sm:$0xff]  ;;  %v14840_v31 = vcombine.low %v367_v17, %v371_v18  ;;  %v121_v17 = vld [vmem:[#allocation2 + $0x10] sm:$0xff] }
  0xb3   :  { %6377 = vmatprep.subr.bf16.mxu0 %v14737_v39  ;;  %6721 = vmatprep.subr.bf16.mxu1 %v14739_v40  ;;  %v327_v39 = vld [vmem:[#allocation5 + $0x500] sm:$0xff]  ;;  %v364_v12 = vld [vmem:[#allocation5 + $0x628] sm:$0xff]  ;;  %v14826_v14 = vcombine.low %v352_v2, %v356_v4  ;;  %v137_v18 = vld [vmem:[#allocation2 + $0x90] sm:$0xff] }
  0xb4   :  { %v331_v40 = vld [vmem:[#allocation5 + $0x520] sm:$0xff] }
  0xb5   :  { %v14800_v52 = vcombine.low %v327_v39, %v331_v40  ;;  %v379_v27 = vld [vmem:[#allocation5 + $0x6a0] sm:$0xff] }
  0xb6   :  { %6378 = vmatpush1.bf16.msra.mxu0 %v14736_v45  ;;  %6722 = vmatpush1.bf16.msra.mxu1 %v14738_v46  ;;  %v14794_v45 = vcombine.low %v320_v34, %v324_v35  ;;  %v14801_v46 = vcombine.high %v327_v39, %v331_v40  ;;  %v383_v34 = vld [vmem:[#allocation5 + $0x6c0] sm:$0xff]  ;;  %v14848_v39 = vcombine.low %v375_v26, %v379_v27 }
  0xb7   :  { %6379 = vmatprep.subr.bf16.mxu0 %v14745_v47  ;;  %6723 = vmatprep.subr.bf16.mxu1 %v14747_v48  ;;  %v335_v47 = vld [vmem:[#allocation5 + $0x540] sm:$0xff] }
  0xb8   :  { %v339_v48 = vld [vmem:[#allocation5 + $0x560] sm:$0xff] }
  0xb9   :  { %v14808_v61 = vcombine.low %v335_v47, %v339_v48  ;;  %v387_v35 = vld [vmem:[#allocation5 + $0x6e0] sm:$0xff] }
  0xba   :  { %6380 = vmatpush1.bf16.msra.mxu0 %v14744_v53  ;;  %6724 = vmatpush1.bf16.msra.mxu1 %v14746_v54  ;;  %v14802_v53 = vcombine.low %v328_v41, %v332_v43  ;;  %v14809_v54 = vcombine.high %v335_v47, %v339_v48  ;;  %v14857_v41 = vcombine.high %v383_v34, %v387_v35  ;;  %v395_v43 = vld [vmem:[#allocation5 + $0x720] sm:$0xff] }
  0xbb   :  { %6381 = vmatprep.subr.bf16.mxu0 %v14753_v55  ;;  %6725 = vmatprep.subr.bf16.mxu1 %v14755_v56  ;;  %v343_v55 = vld [vmem:[#allocation5 + $0x580] sm:$0xff]  ;;  %v14856_v47 = vcombine.low %v383_v34, %v387_v35 }
  0xbc   :  { %v347_v56 = vld [vmem:[#allocation5 + $0x5a0] sm:$0xff] }
  0xbd   :  { %v14816_v5 = vcombine.low %v343_v55, %v347_v56  ;;  %v439_v35 = vld [vmem:[#allocation5 + $0x880] sm:$0xff] }
  0xbe   :  { %6382 = vmatpush1.bf16.msra.mxu0 %v14752_v62  ;;  %6726 = vmatpush1.bf16.msra.mxu1 %v14754_v63  ;;  %v14810_v62 = vcombine.low %v336_v49, %v340_v51  ;;  %v14817_v63 = vcombine.high %v343_v55, %v347_v56  ;;  %v403_v51 = vld [vmem:[#allocation5 + $0x760] sm:$0xff] }
  0xbf   :  { %6383 = vmatprep.subr.bf16.mxu0 %v14761_v0  ;;  %6727 = vmatprep.subr.bf16.mxu1 %v14763_v1  ;;  %v351_v0 = vld [vmem:[#allocation5 + $0x5c0] sm:$0xff] }
  0xc0   :  { %v355_v1 = vld [vmem:[#allocation5 + $0x5e0] sm:$0xff] }
  0xc1   :  { %v14825_v7 = vcombine.high %v351_v0, %v355_v1  ;;  %v14824_v13 = vcombine.low %v351_v0, %v355_v1 }
  0xc2   :  { %6384 = vmatpush1.bf16.msra.mxu0 %v14760_v6  ;;  %6728 = vmatpush1.bf16.msra.mxu1 %v14762_v9  ;;  %v14818_v6 = vcombine.low %v344_v57, %v348_v60  ;;  %v363_v9 = vld [vmem:[#allocation5 + $0x620] sm:$0xff] }
  0xc3   :  { %6396 = vmatprep.subr.bf16.mxu0 %v14769_v10  ;;  %6740 = vmatprep.subr.bf16.mxu1 %v14771_v11  ;;  %v360_v10 = vld [vmem:[#allocation5 + $0x608] sm:$0xff]  ;;  %v14827_v11 = vcombine.high %v352_v2, %v356_v4  ;;  %v14833_v16 = vcombine.high %v359_v8, %v363_v9  ;;  %v411_v60 = vld [vmem:[#allocation5 + $0x7a0] sm:$0xff] }
  0xc4   :  { %v14834_v23 = vcombine.low %v360_v10, %v364_v12  ;;  %v419_v4 = vld [vmem:[#allocation5 + $0x7e0] sm:$0xff] }
  0xc5   :  { %6386 = vmatmul.mubr.bf16.vlgmr.msra.gmra.mrb[0].mxu0 %v18490_v15  ;;  %6730 = vmatmul.mubr.bf16.vlgmr.msra.gmra.mrb[0].mxu1 %v18490_v15 }
  0xc6   :  { %6397 = vmatpush1.bf16.msra.mxu0 %v14768_v19  ;;  %6741 = vmatpush1.bf16.msra.mxu1 %v14770_v20  ;;  %v368_v19 = vld [vmem:[#allocation5 + $0x648] sm:$0xff]  ;;  %v14835_v20 = vcombine.high %v360_v10, %v364_v12  ;;  %v427_v12 = vld [vmem:[#allocation5 + $0x820] sm:$0xff] }
  0xc7   :  { %6398 = vmatprep.subr.bf16.mxu0 %v14777_v21  ;;  %6742 = vmatprep.subr.bf16.mxu1 %v14779_v22  ;;  %v372_v21 = vld [vmem:[#allocation5 + $0x668] sm:$0xff]  ;;  %v14832_v22 = vcombine.low %v359_v8, %v363_v9  ;;  %v423_v9 = vld [vmem:[#allocation5 + $0x800] sm:$0xff] }
  0xc8   :  { %6428 = vmatprep.mubr.bf16.mxu0 %v18492_v25  ;;  %6772 = vmatprep.mubr.bf16.mxu1 %v18492_v25  ;;  %v14842_v32 = vcombine.low %v368_v19, %v372_v21 }
  0xca   :  { %6399 = vmatpush1.bf16.msra.mxu0 %v14776_v28  ;;  %6743 = vmatpush1.bf16.msra.mxu1 %v14778_v29  ;;  %v376_v28 = vld [vmem:[#allocation5 + $0x688] sm:$0xff]  ;;  %v14843_v29 = vcombine.high %v368_v19, %v372_v21  ;;  %v435_v21 = vld [vmem:[#allocation5 + $0x860] sm:$0xff] }
  0xcb   :  { %6400 = vmatprep.subr.bf16.mxu0 %v14785_v30  ;;  %6744 = vmatprep.subr.bf16.mxu1 %v14787_v33  ;;  %v380_v30 = vld [vmem:[#allocation5 + $0x6a8] sm:$0xff]  ;;  %v14849_v33 = vcombine.high %v375_v26, %v379_v27 }
  0xcc   :  { %v14850_v40 = vcombine.low %v376_v28, %v380_v30  ;;  %v436_v26 = vld [vmem:[#allocation5 + $0x868] sm:$0xff] }
  0xcd   :  { %v124_v27 = vld [vmem:[#allocation2 + $0x28] sm:$0xff] }
  0xce   :  { %6401 = vmatpush1.bf16.msra.mxu0 %v14784_v36  ;;  %6745 = vmatpush1.bf16.msra.mxu1 %v14786_v37  ;;  %v384_v36 = vld [vmem:[#allocation5 + $0x6c8] sm:$0xff]  ;;  %v14851_v37 = vcombine.high %v376_v28, %v380_v30  ;;  %v18498_v30 = vpack.c.bf16 %v137_v18, %v121_v17 }
  0xcf   :  { %6402 = vmatprep.subr.bf16.mxu0 %v14793_v38  ;;  %6746 = vmatprep.subr.bf16.mxu1 %v14795_v42  ;;  %v388_v38 = vld [vmem:[#allocation5 + $0x6e8] sm:$0xff]  ;;  %v391_v42 = vld [vmem:[#allocation5 + $0x700] sm:$0xff] }
  0xd0   :  { %v14858_v48 = vcombine.low %v384_v36, %v388_v38  ;;  %v14865_v49 = vcombine.high %v391_v42, %v395_v43  ;;  %v14864_v55 = vcombine.low %v391_v42, %v395_v43  ;;  %v447_v43 = vld [vmem:[#allocation5 + $0x8c0] sm:$0xff]  ;;  %v484_v17 = vld [vmem:[#allocation5 + $0x9e8] sm:$0xff] }
  0xd2   :  { %6403 = vmatpush1.bf16.msra.mxu0 %v14792_v44  ;;  %6747 = vmatpush1.bf16.msra.mxu1 %v14794_v45  ;;  %v392_v44 = vld [vmem:[#allocation5 + $0x708] sm:$0xff]  ;;  %v14859_v45 = vcombine.high %v384_v36, %v388_v38  ;;  %v443_v36 = vld [vmem:[#allocation5 + $0x8a0] sm:$0xff] }
  0xd3   :  { %6404 = vmatprep.subr.bf16.mxu0 %v14801_v46  ;;  %6748 = vmatprep.subr.bf16.mxu1 %v14803_v50  ;;  %v396_v46 = vld [vmem:[#allocation5 + $0x728] sm:$0xff]  ;;  %v399_v50 = vld [vmem:[#allocation5 + $0x740] sm:$0xff]  ;;  %v14913_v42 = vcombine.high %v439_v35, %v443_v36 }
  0xd4   :  { %v14866_v56 = vcombine.low %v392_v44, %v396_v46  ;;  %v14873_v57 = vcombine.high %v399_v50, %v403_v51  ;;  %v14872_v0 = vcombine.low %v399_v50, %v403_v51  ;;  %v440_v38 = vld [vmem:[#allocation5 + $0x888] sm:$0xff]  ;;  %v455_v51 = vld [vmem:[#allocation5 + $0x900] sm:$0xff] }
  0xd6   :  { %6405 = vmatpush1.bf16.msra.mxu0 %v14800_v52  ;;  %6749 = vmatpush1.bf16.msra.mxu1 %v14802_v53  ;;  %v400_v52 = vld [vmem:[#allocation5 + $0x748] sm:$0xff]  ;;  %v14867_v53 = vcombine.high %v392_v44, %v396_v46  ;;  %v451_v44 = vld [vmem:[#allocation5 + $0x8e0] sm:$0xff] }
  0xd7   :  { %6406 = vmatprep.subr.bf16.mxu0 %v14809_v54  ;;  %6750 = vmatprep.subr.bf16.mxu1 %v14811_v59  ;;  %v404_v54 = vld [vmem:[#allocation5 + $0x768] sm:$0xff]  ;;  %v407_v59 = vld [vmem:[#allocation5 + $0x780] sm:$0xff]  ;;  %v14921_v50 = vcombine.high %v447_v43, %v451_v44 }
  0xd8   :  { %v14874_v1 = vcombine.low %v400_v52, %v404_v54  ;;  %v14881_v2 = vcombine.high %v407_v59, %v411_v60  ;;  %v14880_v8 = vcombine.low %v407_v59, %v411_v60  ;;  %v463_v60 = vld [vmem:[#allocation5 + $0x940] sm:$0xff] }
  0xda   :  { %6407 = vmatpush1.bf16.msra.mxu0 %v14808_v61  ;;  %6751 = vmatpush1.bf16.msra.mxu1 %v14810_v62  ;;  %v408_v61 = vld [vmem:[#allocation5 + $0x788] sm:$0xff]  ;;  %v14875_v62 = vcombine.high %v400_v52, %v404_v54  ;;  %v459_v52 = vld [vmem:[#allocation5 + $0x920] sm:$0xff] }
  0xdb   :  { %6408 = vmatprep.subr.bf16.mxu0 %v14817_v63  ;;  %6752 = vmatprep.subr.bf16.mxu1 %v14819_v3  ;;  %v412_v63 = vld [vmem:[#allocation5 + $0x7a8] sm:$0xff]  ;;  %v415_v3 = vld [vmem:[#allocation5 + $0x7c0] sm:$0xff]  ;;  %v14929_v59 = vcombine.high %v455_v51, %v459_v52 }
  0xdc   :  { %v14882_v10 = vcombine.low %v408_v61, %v412_v63  ;;  %v14888_v19 = vcombine.low %v415_v3, %v419_v4 }
  0xde   :  { %6409 = vmatpush1.bf16.msra.mxu0 %v14816_v5  ;;  %6753 = vmatpush1.bf16.msra.mxu1 %v14818_v6  ;;  %v416_v5 = vld [vmem:[#allocation5 + $0x7c8] sm:$0xff]  ;;  %v14883_v6 = vcombine.high %v408_v61, %v412_v63  ;;  %v467_v61 = vld [vmem:[#allocation5 + $0x960] sm:$0xff] }
  0xdf   :  { %6410 = vmatprep.subr.bf16.mxu0 %v14825_v7  ;;  %6754 = vmatprep.subr.bf16.mxu1 %v14827_v11  ;;  %v420_v7 = vld [vmem:[#allocation5 + $0x7e8] sm:$0xff]  ;;  %v14889_v11 = vcombine.high %v415_v3, %v419_v4  ;;  %v14937_v3 = vcombine.high %v463_v60, %v467_v61  ;;  %v471_v4 = vld [vmem:[#allocation5 + $0x980] sm:$0xff] }
  0xe2   :  { %6411 = vmatpush1.bf16.msra.mxu0 %v14824_v13  ;;  %6755 = vmatpush1.bf16.msra.mxu1 %v14826_v14  ;;  %v424_v13 = vld [vmem:[#allocation5 + $0x808] sm:$0xff] }
  0xe3   :  { %6412 = vmatprep.subr.bf16.mxu0 %v14833_v16  ;;  %6756 = vmatprep.subr.bf16.mxu1 %v14835_v20  ;;  %v428_v14 = vld [vmem:[#allocation5 + $0x828] sm:$0xff]  ;;  %v14891_v16 = vcombine.high %v416_v5, %v420_v7  ;;  %v431_v20 = vld [vmem:[#allocation5 + $0x840] sm:$0xff] }
  0xe4   :  { %v14899_v28 = vcombine.high %v424_v13, %v428_v14 }
  0xe6   :  { %6413 = vmatpush1.bf16.msra.mxu0 %v14832_v22  ;;  %6757 = vmatpush1.bf16.msra.mxu1 %v14834_v23  ;;  %v14890_v22 = vcombine.low %v416_v5, %v420_v7  ;;  %v14897_v23 = vcombine.high %v423_v9, %v427_v12  ;;  %v475_v5 = vld [vmem:[#allocation5 + $0x9a0] sm:$0xff] }
  0xe7   :  { %6414 = vmatprep.subr.bf16.mxu0 %v14841_v24  ;;  %6758 = vmatprep.subr.bf16.mxu1 %v14843_v29  ;;  %v432_v24 = vld [vmem:[#allocation5 + $0x848] sm:$0xff]  ;;  %v14944_v18 = vcombine.low %v471_v4, %v475_v5 }
  0xe8   :  { %v140_v29 = vld [vmem:[#allocation2 + $0xa8] sm:$0xff]  ;;  %v14907_v34 = vcombine.high %v432_v24, %v436_v26 }
  0xea   :  { %6415 = vmatpush1.bf16.msra.mxu0 %v14840_v31  ;;  %6759 = vmatpush1.bf16.msra.mxu1 %v14842_v32  ;;  %v14896_v31 = vcombine.low %v423_v9, %v427_v12  ;;  %v14898_v32 = vcombine.low %v424_v13, %v428_v14  ;;  %v14936_v9 = vcombine.low %v463_v60, %v467_v61  ;;  %v479_v12 = vld [vmem:[#allocation5 + $0x9c0] sm:$0xff]  ;;  %v480_v14 = vld [vmem:[#allocation5 + $0x9c8] sm:$0xff] }
  0xeb   :  { %6416 = vmatprep.subr.bf16.mxu0 %v14849_v33  ;;  %6760 = vmatprep.subr.bf16.mxu1 %v14851_v37  ;;  %v14905_v33 = vcombine.high %v431_v20, %v435_v21  ;;  %v18500_v37 = vpack.c.bf16 %v140_v29, %v124_v27  ;;  %v483_v13 = vld [vmem:[#allocation5 + $0x9e0] sm:$0xff]  ;;  %v524_v61 = vld [vmem:[#allocation5 + $0xb28] sm:$0xff] }
  0xec   :  { %v14952_v27 = vcombine.low %v479_v12, %v483_v13 }
  0xee   :  { %6417 = vmatpush1.bf16.msra.mxu0 %v14848_v39  ;;  %6761 = vmatpush1.bf16.msra.mxu1 %v14850_v40  ;;  %v444_v39 = vld [vmem:[#allocation5 + $0x8a8] sm:$0xff]  ;;  %v14904_v40 = vcombine.low %v431_v20, %v435_v21  ;;  %v14953_v20 = vcombine.high %v479_v12, %v483_v13  ;;  %v487_v21 = vld [vmem:[#allocation5 + $0xa00] sm:$0xff] }
  0xef   :  { %6418 = vmatprep.subr.bf16.mxu0 %v14857_v41  ;;  %6762 = vmatprep.subr.bf16.mxu1 %v14859_v45  ;;  %v14906_v41 = vcombine.low %v432_v24, %v436_v26  ;;  %v448_v45 = vld [vmem:[#allocation5 + $0x8c8] sm:$0xff]  ;;  %v14915_v46 = vcombine.high %v440_v38, %v444_v39  ;;  %v14955_v24 = vcombine.high %v480_v14, %v484_v17 }
  0xf0   :  { %v492_v26 = vld [vmem:[#allocation5 + $0xa28] sm:$0xff] }
  0xf1   :  { %v540_v13 = vld [vmem:[#allocation5 + $0xba8] sm:$0xff] }
  0xf2   :  { %6419 = vmatpush1.bf16.msra.mxu0 %v14856_v47  ;;  %6763 = vmatpush1.bf16.msra.mxu1 %v14858_v48  ;;  %v452_v47 = vld [vmem:[#allocation5 + $0x8e8] sm:$0xff]  ;;  %v14912_v48 = vcombine.low %v439_v35, %v443_v36 }
  0xf3   :  { %6420 = vmatprep.subr.bf16.mxu0 %v14865_v49  ;;  %6764 = vmatprep.subr.bf16.mxu1 %v14867_v53  ;;  %v14914_v49 = vcombine.low %v440_v38, %v444_v39  ;;  %v456_v53 = vld [vmem:[#allocation5 + $0x908] sm:$0xff]  ;;  %v14923_v54 = vcombine.high %v448_v45, %v452_v47 }
  0xf4   :  { %v500_v35 = vld [vmem:[#allocation5 + $0xa68] sm:$0xff] }
  0xf6   :  { %6421 = vmatpush1.bf16.msra.mxu0 %v14864_v55  ;;  %6765 = vmatpush1.bf16.msra.mxu1 %v14866_v56  ;;  %v460_v55 = vld [vmem:[#allocation5 + $0x928] sm:$0xff]  ;;  %v14920_v56 = vcombine.low %v447_v43, %v451_v44 }
  0xf7   :  { %6422 = vmatprep.subr.bf16.mxu0 %v14873_v57  ;;  %6766 = vmatprep.subr.bf16.mxu1 %v14875_v62  ;;  %v14922_v57 = vcombine.low %v448_v45, %v452_v47  ;;  %v464_v62 = vld [vmem:[#allocation5 + $0x948] sm:$0xff]  ;;  %v14931_v63 = vcombine.high %v456_v53, %v460_v55 }
  0xf8   :  { %v508_v44 = vld [vmem:[#allocation5 + $0xaa8] sm:$0xff] }
  0xfa   :  { %6423 = vmatpush1.bf16.msra.mxu0 %v14872_v0  ;;  %6767 = vmatpush1.bf16.msra.mxu1 %v14874_v1  ;;  %v468_v0 = vld [vmem:[#allocation5 + $0x968] sm:$0xff]  ;;  %v14928_v1 = vcombine.low %v455_v51, %v459_v52 }
  0xfb   :  { %6424 = vmatprep.subr.bf16.mxu0 %v14881_v2  ;;  %6768 = vmatprep.subr.bf16.mxu1 %v14883_v6  ;;  %v14930_v2 = vcombine.low %v456_v53, %v460_v55  ;;  %v472_v6 = vld [vmem:[#allocation5 + $0x988] sm:$0xff]  ;;  %v14939_v7 = vcombine.high %v464_v62, %v468_v0 }
  0xfc   :  { %v516_v52 = vld [vmem:[#allocation5 + $0xae8] sm:$0xff] }
  0xfe   :  { %6425 = vmatpush1.bf16.msra.mxu0 %v14880_v8  ;;  %6769 = vmatpush1.bf16.msra.mxu1 %v14882_v10  ;;  %v476_v8 = vld [vmem:[#allocation5 + $0x9a8] sm:$0xff]  ;;  %v14938_v10 = vcombine.low %v464_v62, %v468_v0 }
  0xff   :  { %6426 = vmatprep.subr.bf16.mxu0 %v14889_v11  ;;  %6770 = vmatprep.subr.bf16.mxu1 %v14891_v16  ;;  %v14945_v11 = vcombine.high %v471_v4, %v475_v5  ;;  %v14947_v16 = vcombine.high %v472_v6, %v476_v8  ;;  %v532_v5 = vld [vmem:[#allocation5 + $0xb68] sm:$0xff] }
 0x102   :  { %6427 = vmatpush1.bf16.msra.mxu0 %v14888_v19  ;;  %6771 = vmatpush1.bf16.msra.mxu1 %v14890_v22  ;;  %v14946_v19 = vcombine.low %v472_v6, %v476_v8  ;;  %v491_v22 = vld [vmem:[#allocation5 + $0xa20] sm:$0xff] }
 0x103   :  { %6439 = vmatprep.subr.bf16.mxu0 %v14897_v23  ;;  %6783 = vmatprep.subr.bf16.mxu1 %v14899_v28  ;;  %v488_v23 = vld [vmem:[#allocation5 + $0xa08] sm:$0xff]  ;;  %v14954_v28 = vcombine.low %v480_v14, %v484_v17  ;;  %v14961_v29 = vcombine.high %v487_v21, %v491_v22  ;;  %v14960_v36 = vcombine.low %v487_v21, %v491_v22 }
 0x104   :  { %v14962_v38 = vcombine.low %v488_v23, %v492_v26  ;;  %v548_v22 = vld [vmem:[#allocation5 + $0xbe8] sm:$0xff] }
 0x105   :  { %6429 = vmatmul.mubr.bf16.vlgmr.msra.gmra.mrb[0].mxu0 %v18498_v30  ;;  %6773 = vmatmul.mubr.bf16.vlgmr.msra.gmra.mrb[0].mxu1 %v18498_v30 }
 0x106   :  { %6440 = vmatpush1.bf16.msra.mxu0 %v14896_v31  ;;  %6784 = vmatpush1.bf16.msra.mxu1 %v14898_v32  ;;  %v495_v31 = vld [vmem:[#allocation5 + $0xa40] sm:$0xff] }
 0x107   :  { %6441 = vmatprep.subr.bf16.mxu0 %v14905_v33  ;;  %6785 = vmatprep.subr.bf16.mxu1 %v14907_v34  ;;  %v499_v32 = vld [vmem:[#allocation5 + $0xa60] sm:$0xff]  ;;  %v496_v33 = vld [vmem:[#allocation5 + $0xa48] sm:$0xff]  ;;  %v14963_v34 = vcombine.high %v488_v23, %v492_v26 }
 0x108   :  { %6471 = vmatprep.mubr.bf16.mxu0 %v18500_v37  ;;  %6815 = vmatprep.mubr.bf16.mxu1 %v18500_v37  ;;  %v14969_v39 = vcombine.high %v495_v31, %v499_v32  ;;  %v14971_v43 = vcombine.high %v496_v33, %v500_v35  ;;  %v14968_v45 = vcombine.low %v495_v31, %v499_v32  ;;  %v556_v31 = vld [vmem:[#allocation5 + $0xc28] sm:$0xff] }
 0x10a   :  { %6442 = vmatpush1.bf16.msra.mxu0 %v14904_v40  ;;  %6786 = vmatpush1.bf16.msra.mxu1 %v14906_v41  ;;  %v503_v40 = vld [vmem:[#allocation5 + $0xa80] sm:$0xff] }
 0x10b   :  { %6443 = vmatprep.subr.bf16.mxu0 %v14913_v42  ;;  %6787 = vmatprep.subr.bf16.mxu1 %v14915_v46  ;;  %v507_v41 = vld [vmem:[#allocation5 + $0xaa0] sm:$0xff]  ;;  %v504_v42 = vld [vmem:[#allocation5 + $0xa88] sm:$0xff]  ;;  %v14970_v46 = vcombine.low %v496_v33, %v500_v35 }
 0x10c   :  { %v14977_v47 = vcombine.high %v503_v40, %v507_v41  ;;  %v14979_v51 = vcombine.high %v504_v42, %v508_v44  ;;  %v14976_v53 = vcombine.low %v503_v40, %v507_v41  ;;  %v123_v33 = vld [vmem:[#allocation2 + $0x20] sm:$0xff]  ;;  %v560_v41 = vld [vmem:[#allocation5 + $0xc48] sm:$0xff] }
 0x10e   :  { %6444 = vmatpush1.bf16.msra.mxu0 %v14912_v48  ;;  %6788 = vmatpush1.bf16.msra.mxu1 %v14914_v49  ;;  %v511_v48 = vld [vmem:[#allocation5 + $0xac0] sm:$0xff] }
 0x10f   :  { %6445 = vmatprep.subr.bf16.mxu0 %v14921_v50  ;;  %6789 = vmatprep.subr.bf16.mxu1 %v14923_v54  ;;  %v515_v49 = vld [vmem:[#allocation5 + $0xae0] sm:$0xff]  ;;  %v512_v50 = vld [vmem:[#allocation5 + $0xac8] sm:$0xff]  ;;  %v14978_v54 = vcombine.low %v504_v42, %v508_v44 }
 0x110   :  { %v14985_v55 = vcombine.high %v511_v48, %v515_v49  ;;  %v14987_v60 = vcombine.high %v512_v50, %v516_v52  ;;  %v14984_v62 = vcombine.low %v511_v48, %v515_v49  ;;  %v564_v42 = vld [vmem:[#allocation5 + $0xc68] sm:$0xff] }
 0x112   :  { %6446 = vmatpush1.bf16.msra.mxu0 %v14920_v56  ;;  %6790 = vmatpush1.bf16.msra.mxu1 %v14922_v57  ;;  %v519_v56 = vld [vmem:[#allocation5 + $0xb00] sm:$0xff] }
 0x113   :  { %6447 = vmatprep.subr.bf16.mxu0 %v14929_v59  ;;  %6791 = vmatprep.subr.bf16.mxu1 %v14931_v63  ;;  %v523_v57 = vld [vmem:[#allocation5 + $0xb20] sm:$0xff]  ;;  %v520_v59 = vld [vmem:[#allocation5 + $0xb08] sm:$0xff]  ;;  %v14986_v63 = vcombine.low %v512_v50, %v516_v52  ;;  %v15035_v50 = vcombine.high %v560_v41, %v564_v42 }
 0x114   :  { %v14993_v0 = vcombine.high %v519_v56, %v523_v57  ;;  %v14995_v4 = vcombine.high %v520_v59, %v524_v61  ;;  %v14992_v6 = vcombine.low %v519_v56, %v523_v57  ;;  %v571_v52 = vld [vmem:[#allocation5 + $0xca0] sm:$0xff]  ;;  %v15034_v57 = vcombine.low %v560_v41, %v564_v42  ;;  %v616_v42 = vld [vmem:[#allocation5 + $0xe08] sm:$0xff] }
 0x115   :  { %v619_v41 = vld [vmem:[#allocation5 + $0xe20] sm:$0xff] }
 0x116   :  { %6448 = vmatpush1.bf16.msra.mxu0 %v14928_v1  ;;  %6792 = vmatpush1.bf16.msra.mxu1 %v14930_v2  ;;  %v527_v1 = vld [vmem:[#allocation5 + $0xb40] sm:$0xff] }
 0x117   :  { %6449 = vmatprep.subr.bf16.mxu0 %v14937_v3  ;;  %6793 = vmatprep.subr.bf16.mxu1 %v14939_v7  ;;  %v531_v2 = vld [vmem:[#allocation5 + $0xb60] sm:$0xff]  ;;  %v528_v3 = vld [vmem:[#allocation5 + $0xb48] sm:$0xff]  ;;  %v14994_v7 = vcombine.low %v520_v59, %v524_v61 }
 0x118   :  { %v15001_v8 = vcombine.high %v527_v1, %v531_v2  ;;  %v15003_v12 = vcombine.high %v528_v3, %v532_v5  ;;  %v15000_v14 = vcombine.low %v527_v1, %v531_v2  ;;  %v579_v61 = vld [vmem:[#allocation5 + $0xce0] sm:$0xff] }
 0x11a   :  { %6450 = vmatpush1.bf16.msra.mxu0 %v14936_v9  ;;  %6794 = vmatpush1.bf16.msra.mxu1 %v14938_v10  ;;  %v535_v9 = vld [vmem:[#allocation5 + $0xb80] sm:$0xff] }
 0x11b   :  { %6451 = vmatprep.subr.bf16.mxu0 %v14945_v11  ;;  %6795 = vmatprep.subr.bf16.mxu1 %v14947_v16  ;;  %v539_v10 = vld [vmem:[#allocation5 + $0xba0] sm:$0xff]  ;;  %v536_v11 = vld [vmem:[#allocation5 + $0xb88] sm:$0xff]  ;;  %v15002_v16 = vcombine.low %v528_v3, %v532_v5 }
 0x11c   :  { %v15009_v17 = vcombine.high %v535_v9, %v539_v10  ;;  %v15011_v21 = vcombine.high %v536_v11, %v540_v13  ;;  %v15008_v23 = vcombine.low %v535_v9, %v539_v10  ;;  %v15010_v26 = vcombine.low %v536_v11, %v540_v13  ;;  %v587_v5 = vld [vmem:[#allocation5 + $0xd20] sm:$0xff] }
 0x11d   :  { %v595_v13 = vld [vmem:[#allocation5 + $0xd60] sm:$0xff] }
 0x11e   :  { %6452 = vmatpush1.bf16.msra.mxu0 %v14944_v18  ;;  %6796 = vmatpush1.bf16.msra.mxu1 %v14946_v19  ;;  %v543_v18 = vld [vmem:[#allocation5 + $0xbc0] sm:$0xff] }
 0x11f   :  { %6453 = vmatprep.subr.bf16.mxu0 %v14953_v20  ;;  %6797 = vmatprep.subr.bf16.mxu1 %v14955_v24  ;;  %v547_v19 = vld [vmem:[#allocation5 + $0xbe0] sm:$0xff]  ;;  %v544_v20 = vld [vmem:[#allocation5 + $0xbc8] sm:$0xff] }
 0x120   :  { %v551_v24 = vld [vmem:[#allocation5 + $0xc00] sm:$0xff]  ;;  %v15019_v32 = vcombine.high %v544_v20, %v548_v22  ;;  %v15016_v35 = vcombine.low %v543_v18, %v547_v19 }
 0x122   :  { %6454 = vmatpush1.bf16.msra.mxu0 %v14952_v27  ;;  %6798 = vmatpush1.bf16.msra.mxu1 %v14954_v28  ;;  %v15017_v27 = vcombine.high %v543_v18, %v547_v19  ;;  %v555_v28 = vld [vmem:[#allocation5 + $0xc20] sm:$0xff] }
 0x123   :  { %6455 = vmatprep.subr.bf16.mxu0 %v14961_v29  ;;  %6799 = vmatprep.subr.bf16.mxu1 %v14963_v34  ;;  %v552_v29 = vld [vmem:[#allocation5 + $0xc08] sm:$0xff]  ;;  %v139_v34 = vld [vmem:[#allocation2 + $0xa0] sm:$0xff]  ;;  %v15025_v40 = vcombine.high %v551_v24, %v555_v28 }
 0x124   :  { %v15027_v44 = vcombine.high %v552_v29, %v556_v31  ;;  %v15026_v48 = vcombine.low %v552_v29, %v556_v31  ;;  %v607_v31 = vld [vmem:[#allocation5 + $0xdc0] sm:$0xff] }
 0x126   :  { %6456 = vmatpush1.bf16.msra.mxu0 %v14960_v36  ;;  %6800 = vmatpush1.bf16.msra.mxu1 %v14962_v38  ;;  %v559_v36 = vld [vmem:[#allocation5 + $0xc40] sm:$0xff] }
 0x127   :  { %6457 = vmatprep.subr.bf16.mxu0 %v14969_v39  ;;  %6801 = vmatprep.subr.bf16.mxu1 %v14971_v43  ;;  %v563_v38 = vld [vmem:[#allocation5 + $0xc60] sm:$0xff]  ;;  %v15018_v39 = vcombine.low %v544_v20, %v548_v22  ;;  %v126_v43 = vld [vmem:[#allocation2 + $0x38] sm:$0xff] }
 0x128   :  { %v15033_v49 = vcombine.high %v559_v36, %v563_v38  ;;  %v15032_v56 = vcombine.low %v559_v36, %v563_v38  ;;  %v603_v22 = vld [vmem:[#allocation5 + $0xda0] sm:$0xff] }
 0x12a   :  { %6458 = vmatpush1.bf16.msra.mxu0 %v14968_v45  ;;  %6802 = vmatpush1.bf16.msra.mxu1 %v14970_v46  ;;  %v142_v45 = vld [vmem:[#allocation2 + $0xb8] sm:$0xff]  ;;  %v18506_v46 = vpack.c.bf16 %v139_v34, %v123_v33  ;;  %v608_v33 = vld [vmem:[#allocation5 + $0xdc8] sm:$0xff] }
 0x12b   :  { %6459 = vmatprep.subr.bf16.mxu0 %v14977_v47  ;;  %6803 = vmatprep.subr.bf16.mxu1 %v14979_v51  ;;  %v15024_v47 = vcombine.low %v551_v24, %v555_v28  ;;  %v567_v51 = vld [vmem:[#allocation5 + $0xc80] sm:$0xff] }
 0x12c   :  { %v15041_v59 = vcombine.high %v567_v51, %v571_v52  ;;  %v15040_v1 = vcombine.low %v567_v51, %v571_v52  ;;  %v624_v51 = vld [vmem:[#allocation5 + $0xe48] sm:$0xff] }
 0x12e   :  { %6460 = vmatpush1.bf16.msra.mxu0 %v14976_v53  ;;  %6804 = vmatpush1.bf16.msra.mxu1 %v14978_v54  ;;  %v18508_v53 = vpack.c.bf16 %v142_v45, %v126_v43  ;;  %v568_v54 = vld [vmem:[#allocation5 + $0xc88] sm:$0xff] }
 0x12f   :  { %6461 = vmatprep.subr.bf16.mxu0 %v14985_v55  ;;  %6805 = vmatprep.subr.bf16.mxu1 %v14987_v60  ;;  %v572_v55 = vld [vmem:[#allocation5 + $0xca8] sm:$0xff]  ;;  %v575_v60 = vld [vmem:[#allocation5 + $0xcc0] sm:$0xff] }
 0x130   :  { %v15042_v2 = vcombine.low %v568_v54, %v572_v55  ;;  %v15049_v3 = vcombine.high %v575_v60, %v579_v61  ;;  %v15048_v9 = vcombine.low %v575_v60, %v579_v61  ;;  %v635_v60 = vld [vmem:[#allocation5 + $0xea0] sm:$0xff]  ;;  %v632_v61 = vld [vmem:[#allocation5 + $0xe88] sm:$0xff] }
 0x132   :  { %6462 = vmatpush1.bf16.msra.mxu0 %v14984_v62  ;;  %6806 = vmatpush1.bf16.msra.mxu1 %v14986_v63  ;;  %v576_v62 = vld [vmem:[#allocation5 + $0xcc8] sm:$0xff]  ;;  %v15043_v63 = vcombine.high %v568_v54, %v572_v55 }
 0x133   :  { %6463 = vmatprep.subr.bf16.mxu0 %v14993_v0  ;;  %6807 = vmatprep.subr.bf16.mxu1 %v14995_v4  ;;  %v580_v0 = vld [vmem:[#allocation5 + $0xce8] sm:$0xff]  ;;  %v583_v4 = vld [vmem:[#allocation5 + $0xd00] sm:$0xff] }
 0x134   :  { %v15050_v10 = vcombine.low %v576_v62, %v580_v0  ;;  %v15057_v11 = vcombine.high %v583_v4, %v587_v5  ;;  %v15056_v18 = vcombine.low %v583_v4, %v587_v5  ;;  %v628_v54 = vld [vmem:[#allocation5 + $0xe68] sm:$0xff]  ;;  %v643_v4 = vld [vmem:[#allocation5 + $0xee0] sm:$0xff] }
 0x135   :  { %v640_v5 = vld [vmem:[#allocation5 + $0xec8] sm:$0xff] }
 0x136   :  { %6464 = vmatpush1.bf16.msra.mxu0 %v14992_v6  ;;  %6808 = vmatpush1.bf16.msra.mxu1 %v14994_v7  ;;  %v584_v6 = vld [vmem:[#allocation5 + $0xd08] sm:$0xff]  ;;  %v15051_v7 = vcombine.high %v576_v62, %v580_v0  ;;  %v15099_v62 = vcombine.high %v624_v51, %v628_v54 }
 0x137   :  { %6465 = vmatprep.subr.bf16.mxu0 %v15001_v8  ;;  %6809 = vmatprep.subr.bf16.mxu1 %v15003_v12  ;;  %v588_v8 = vld [vmem:[#allocation5 + $0xd28] sm:$0xff]  ;;  %v591_v12 = vld [vmem:[#allocation5 + $0xd40] sm:$0xff] }
 0x138   :  { %v15058_v19 = vcombine.low %v584_v6, %v588_v8  ;;  %v15065_v20 = vcombine.high %v591_v12, %v595_v13 }
 0x13a   :  { %6466 = vmatpush1.bf16.msra.mxu0 %v15000_v14  ;;  %6810 = vmatpush1.bf16.msra.mxu1 %v15002_v16  ;;  %v592_v14 = vld [vmem:[#allocation5 + $0xd48] sm:$0xff]  ;;  %v15059_v16 = vcombine.high %v584_v6, %v588_v8 }
 0x13b   :  { %6467 = vmatprep.subr.bf16.mxu0 %v15009_v17  ;;  %6811 = vmatprep.subr.bf16.mxu1 %v15011_v21  ;;  %v596_v17 = vld [vmem:[#allocation5 + $0xd68] sm:$0xff]  ;;  %v599_v21 = vld [vmem:[#allocation5 + $0xd80] sm:$0xff] }
 0x13c   :  { %v15067_v24 = vcombine.high %v592_v14, %v596_v17  ;;  %v15066_v28 = vcombine.low %v592_v14, %v596_v17  ;;  %v15073_v29 = vcombine.high %v599_v21, %v603_v22  ;;  %v15072_v36 = vcombine.low %v599_v21, %v603_v22  ;;  %v659_v21 = vld [vmem:[#allocation5 + $0xf60] sm:$0xff]  ;;  %v656_v22 = vld [vmem:[#allocation5 + $0xf48] sm:$0xff] }
 0x13e   :  { %6468 = vmatpush1.bf16.msra.mxu0 %v15008_v23  ;;  %6812 = vmatpush1.bf16.msra.mxu1 %v15010_v26  ;;  %v600_v23 = vld [vmem:[#allocation5 + $0xd88] sm:$0xff] }
 0x13f   :  { %6469 = vmatprep.subr.bf16.mxu0 %v15017_v27  ;;  %6813 = vmatprep.subr.bf16.mxu1 %v15019_v32  ;;  %v604_v26 = vld [vmem:[#allocation5 + $0xda8] sm:$0xff]  ;;  %v15064_v27 = vcombine.low %v591_v12, %v595_v13  ;;  %v611_v32 = vld [vmem:[#allocation5 + $0xde0] sm:$0xff] }
 0x140   :  { %v15075_v34 = vcombine.high %v600_v23, %v604_v26  ;;  %v15074_v38 = vcombine.low %v600_v23, %v604_v26  ;;  %v15080_v45 = vcombine.low %v607_v31, %v611_v32  ;;  %v651_v12 = vld [vmem:[#allocation5 + $0xf20] sm:$0xff]  ;;  %v648_v13 = vld [vmem:[#allocation5 + $0xf08] sm:$0xff] }
 0x142   :  { %6470 = vmatpush1.bf16.msra.mxu0 %v15016_v35  ;;  %6814 = vmatpush1.bf16.msra.mxu1 %v15018_v39  ;;  %v612_v35 = vld [vmem:[#allocation5 + $0xde8] sm:$0xff]  ;;  %v15081_v39 = vcombine.high %v607_v31, %v611_v32  ;;  %v667_v31 = vld [vmem:[#allocation5 + $0xfa0] sm:$0xff] }
 0x143   :  { %6482 = vmatprep.subr.bf16.mxu0 %v15025_v40  ;;  %6826 = vmatprep.subr.bf16.mxu1 %v15027_v44  ;;  %v615_v40 = vld [vmem:[#allocation5 + $0xe00] sm:$0xff]  ;;  %v15083_v43 = vcombine.high %v608_v33, %v612_v35  ;;  %v620_v44 = vld [vmem:[#allocation5 + $0xe28] sm:$0xff] }
 0x144   :  { %v15091_v52 = vcombine.high %v616_v42, %v620_v44  ;;  %v15088_v55 = vcombine.low %v615_v40, %v619_v41  ;;  %v664_v32 = vld [vmem:[#allocation5 + $0xf88] sm:$0xff] }
 0x145   :  { %6472 = vmatmul.mubr.bf16.vlgmr.msra.gmra.mrb[0].mxu0 %v18506_v46  ;;  %6816 = vmatmul.mubr.bf16.vlgmr.msra.gmra.mrb[0].mxu1 %v18506_v46 }
 0x146   :  { %6483 = vmatpush1.bf16.msra.mxu0 %v15024_v47  ;;  %6827 = vmatpush1.bf16.msra.mxu1 %v15026_v48  ;;  %v15082_v47 = vcombine.low %v608_v33, %v612_v35  ;;  %v15089_v48 = vcombine.high %v615_v40, %v619_v41  ;;  %v675_v40 = vld [vmem:[#allocation5 + $0xfe0] sm:$0xff]  ;;  %v672_v41 = vld [vmem:[#allocation5 + $0xfc8] sm:$0xff] }
 0x147   :  { %6484 = vmatprep.subr.bf16.mxu0 %v15033_v49  ;;  %6828 = vmatprep.subr.bf16.mxu1 %v15035_v50  ;;  %v623_v49 = vld [vmem:[#allocation5 + $0xe40] sm:$0xff] }
 0x148   :  { %6514 = vmatprep.mubr.bf16.mxu0 %v18508_v53  ;;  %6858 = vmatprep.mubr.bf16.mxu1 %v18508_v53  ;;  %v627_v50 = vld [vmem:[#allocation5 + $0xe60] sm:$0xff] }
 0x149   :  { %v15096_v0 = vcombine.low %v623_v49, %v627_v50 }
 0x14a   :  { %6485 = vmatpush1.bf16.msra.mxu0 %v15032_v56  ;;  %6829 = vmatpush1.bf16.msra.mxu1 %v15034_v57  ;;  %v15090_v56 = vcombine.low %v616_v42, %v620_v44  ;;  %v15097_v57 = vcombine.high %v623_v49, %v627_v50  ;;  %v683_v49 = vld [vmem:[#allocation5 + $0x1020] sm:$0xff]  ;;  %v680_v50 = vld [vmem:[#allocation5 + $0x1008] sm:$0xff] }
 0x14b   :  { %6486 = vmatprep.subr.bf16.mxu0 %v15041_v59  ;;  %6830 = vmatprep.subr.bf16.mxu1 %v15043_v63  ;;  %v631_v59 = vld [vmem:[#allocation5 + $0xe80] sm:$0xff]  ;;  %v636_v63 = vld [vmem:[#allocation5 + $0xea8] sm:$0xff] }
 0x14c   :  { %v15107_v6 = vcombine.high %v632_v61, %v636_v63  ;;  %v15104_v8 = vcombine.low %v631_v59, %v635_v60 }
 0x14e   :  { %6487 = vmatpush1.bf16.msra.mxu0 %v15040_v1  ;;  %6831 = vmatpush1.bf16.msra.mxu1 %v15042_v2  ;;  %v15098_v1 = vcombine.low %v624_v51, %v628_v54  ;;  %v15105_v2 = vcombine.high %v631_v59, %v635_v60  ;;  %v684_v51 = vld [vmem:[#allocation5 + $0x1028] sm:$0xff]  ;;  %v125_v54 = vld [vmem:[#allocation2 + $0x30] sm:$0xff]  ;;  %v691_v59 = vld [vmem:[#allocation5 + $0x1060] sm:$0xff] }
 0x14f   :  { %6488 = vmatprep.subr.bf16.mxu0 %v15049_v3  ;;  %6832 = vmatprep.subr.bf16.mxu1 %v15051_v7  ;;  %v639_v3 = vld [vmem:[#allocation5 + $0xec0] sm:$0xff]  ;;  %v644_v7 = vld [vmem:[#allocation5 + $0xee8] sm:$0xff] }
 0x150   :  { %v15115_v14 = vcombine.high %v640_v5, %v644_v7  ;;  %v15112_v17 = vcombine.low %v639_v3, %v643_v4 }
 0x152   :  { %6489 = vmatpush1.bf16.msra.mxu0 %v15048_v9  ;;  %6833 = vmatpush1.bf16.msra.mxu1 %v15050_v10  ;;  %v15106_v9 = vcombine.low %v632_v61, %v636_v63  ;;  %v15113_v10 = vcombine.high %v639_v3, %v643_v4  ;;  %v692_v63 = vld [vmem:[#allocation5 + $0x1068] sm:$0xff] }
 0x153   :  { %6490 = vmatprep.subr.bf16.mxu0 %v15057_v11  ;;  %6834 = vmatprep.subr.bf16.mxu1 %v15059_v16  ;;  %v647_v11 = vld [vmem:[#allocation5 + $0xf00] sm:$0xff]  ;;  %v652_v16 = vld [vmem:[#allocation5 + $0xf28] sm:$0xff] }
 0x154   :  { %v15123_v23 = vcombine.high %v648_v13, %v652_v16  ;;  %v15120_v26 = vcombine.low %v647_v11, %v651_v12 }
 0x156   :  { %6491 = vmatpush1.bf16.msra.mxu0 %v15056_v18  ;;  %6835 = vmatpush1.bf16.msra.mxu1 %v15058_v19  ;;  %v15114_v18 = vcombine.low %v640_v5, %v644_v7  ;;  %v15121_v19 = vcombine.high %v647_v11, %v651_v12  ;;  %v15154_v5 = vcombine.low %v680_v50, %v684_v51  ;;  %v696_v11 = vld [vmem:[#allocation5 + $0x1088] sm:$0xff] }
 0x157   :  { %6492 = vmatprep.subr.bf16.mxu0 %v15065_v20  ;;  %6836 = vmatprep.subr.bf16.mxu1 %v15067_v24  ;;  %v655_v20 = vld [vmem:[#allocation5 + $0xf40] sm:$0xff]  ;;  %v660_v24 = vld [vmem:[#allocation5 + $0xf68] sm:$0xff] }
 0x158   :  { %v15131_v33 = vcombine.high %v656_v22, %v660_v24  ;;  %v15128_v35 = vcombine.low %v655_v20, %v659_v21  ;;  %v700_v12 = vld [vmem:[#allocation5 + $0x10a8] sm:$0xff] }
 0x15a   :  { %6493 = vmatpush1.bf16.msra.mxu0 %v15064_v27  ;;  %6837 = vmatpush1.bf16.msra.mxu1 %v15066_v28  ;;  %v15122_v27 = vcombine.low %v648_v13, %v652_v16  ;;  %v15129_v28 = vcombine.high %v655_v20, %v659_v21  ;;  %v15171_v20 = vcombine.high %v696_v11, %v700_v12  ;;  %v708_v21 = vld [vmem:[#allocation5 + $0x10e8] sm:$0xff] }
 0x15b   :  { %6494 = vmatprep.subr.bf16.mxu0 %v15073_v29  ;;  %6838 = vmatprep.subr.bf16.mxu1 %v15075_v34  ;;  %v663_v29 = vld [vmem:[#allocation5 + $0xf80] sm:$0xff]  ;;  %v668_v34 = vld [vmem:[#allocation5 + $0xfa8] sm:$0xff] }
 0x15c   :  { %v15139_v42 = vcombine.high %v664_v32, %v668_v34  ;;  %v15136_v44 = vcombine.low %v663_v29, %v667_v31 }
 0x15e   :  { %6495 = vmatpush1.bf16.msra.mxu0 %v15072_v36  ;;  %6839 = vmatpush1.bf16.msra.mxu1 %v15074_v38  ;;  %v15130_v36 = vcombine.low %v656_v22, %v660_v24  ;;  %v15137_v38 = vcombine.high %v663_v29, %v667_v31  ;;  %v716_v31 = vld [vmem:[#allocation5 + $0x1128] sm:$0xff] }
 0x15f   :  { %6496 = vmatprep.subr.bf16.mxu0 %v15081_v39  ;;  %6840 = vmatprep.subr.bf16.mxu1 %v15083_v43  ;;  %v671_v39 = vld [vmem:[#allocation5 + $0xfc0] sm:$0xff]  ;;  %v676_v43 = vld [vmem:[#allocation5 + $0xfe8] sm:$0xff] }
 0x160   :  { %v15146_v60 = vcombine.low %v672_v41, %v676_v43 }
 0x162   :  { %6497 = vmatpush1.bf16.msra.mxu0 %v15080_v45  ;;  %6841 = vmatpush1.bf16.msra.mxu1 %v15082_v47  ;;  %v679_v45 = vld [vmem:[#allocation5 + $0x1000] sm:$0xff]  ;;  %v15138_v47 = vcombine.low %v664_v32, %v668_v34 }
 0x163   :  { %6498 = vmatprep.subr.bf16.mxu0 %v15089_v48  ;;  %6842 = vmatprep.subr.bf16.mxu1 %v15091_v52  ;;  %v15145_v48 = vcombine.high %v671_v39, %v675_v40  ;;  %v15147_v52 = vcombine.high %v672_v41, %v676_v43  ;;  %v15153_v61 = vcombine.high %v679_v45, %v683_v49 }
 0x164   :  { %v15152_v4 = vcombine.low %v679_v45, %v683_v49  ;;  %v731_v45 = vld [vmem:[#allocation5 + $0x11a0] sm:$0xff]  ;;  %v732_v49 = vld [vmem:[#allocation5 + $0x11a8] sm:$0xff] }
 0x166   :  { %6499 = vmatpush1.bf16.msra.mxu0 %v15088_v55  ;;  %6843 = vmatpush1.bf16.msra.mxu1 %v15090_v56  ;;  %v141_v55 = vld [vmem:[#allocation2 + $0xb0] sm:$0xff]  ;;  %v15144_v56 = vcombine.low %v671_v39, %v675_v40  ;;  %v724_v40 = vld [vmem:[#allocation5 + $0x1168] sm:$0xff] }
 0x167   :  { %6500 = vmatprep.subr.bf16.mxu0 %v15097_v57  ;;  %6844 = vmatprep.subr.bf16.mxu1 %v15099_v62  ;;  %v687_v57 = vld [vmem:[#allocation5 + $0x1040] sm:$0xff]  ;;  %v688_v62 = vld [vmem:[#allocation5 + $0x1048] sm:$0xff]  ;;  %v18514_v3 = vpack.c.bf16 %v141_v55, %v125_v54 }
 0x168   :  { %v15163_v7 = vcombine.high %v688_v62, %v692_v63  ;;  %v15160_v13 = vcombine.low %v687_v57, %v691_v59  ;;  %v735_v54 = vld [vmem:[#allocation5 + $0x11c0] sm:$0xff] }
 0x169   :  { %v739_v55 = vld [vmem:[#allocation5 + $0x11e0] sm:$0xff] }
 0x16a   :  { %6501 = vmatpush1.bf16.msra.mxu0 %v15096_v0  ;;  %6845 = vmatpush1.bf16.msra.mxu1 %v15098_v1  ;;  %v128_v0 = vld [vmem:[#allocation2 + $0x48] sm:$0xff]  ;;  %v15155_v1 = vcombine.high %v680_v50, %v684_v51 }
 0x16b   :  { %6502 = vmatprep.subr.bf16.mxu0 %v15105_v2  ;;  %6846 = vmatprep.subr.bf16.mxu1 %v15107_v6  ;;  %v144_v2 = vld [vmem:[#allocation2 + $0xc8] sm:$0xff]  ;;  %v15161_v6 = vcombine.high %v687_v57, %v691_v59 }
 0x16c   :  { %v740_v59 = vld [vmem:[#allocation5 + $0x11e8] sm:$0xff] }
 0x16e   :  { %6503 = vmatpush1.bf16.msra.mxu0 %v15104_v8  ;;  %6847 = vmatpush1.bf16.msra.mxu1 %v15106_v9  ;;  %v695_v8 = vld [vmem:[#allocation5 + $0x1080] sm:$0xff] }
 0x16f   :  { %6504 = vmatprep.subr.bf16.mxu0 %v15113_v10  ;;  %6848 = vmatprep.subr.bf16.mxu1 %v15115_v14  ;;  %v699_v9 = vld [vmem:[#allocation5 + $0x10a0] sm:$0xff]  ;;  %v18516_v10 = vpack.c.bf16 %v144_v2, %v128_v0  ;;  %v15162_v14 = vcombine.low %v688_v62, %v692_v63  ;;  %v15209_v62 = vcombine.high %v735_v54, %v739_v55 }
 0x170   :  { %v15169_v16 = vcombine.high %v695_v8, %v699_v9  ;;  %v15168_v22 = vcombine.low %v695_v8, %v699_v9  ;;  %v743_v63 = vld [vmem:[#allocation5 + $0x1200] sm:$0xff] }
 0x171   :  { %v747_v0 = vld [vmem:[#allocation5 + $0x1220] sm:$0xff] }
 0x172   :  { %6505 = vmatpush1.bf16.msra.mxu0 %v15112_v17  ;;  %6849 = vmatpush1.bf16.msra.mxu1 %v15114_v18  ;;  %v703_v17 = vld [vmem:[#allocation5 + $0x10c0] sm:$0xff] }
 0x173   :  { %6506 = vmatprep.subr.bf16.mxu0 %v15121_v19  ;;  %6850 = vmatprep.subr.bf16.mxu1 %v15123_v23  ;;  %v707_v18 = vld [vmem:[#allocation5 + $0x10e0] sm:$0xff]  ;;  %v704_v19 = vld [vmem:[#allocation5 + $0x10c8] sm:$0xff]  ;;  %v15170_v23 = vcombine.low %v696_v11, %v700_v12 }
 0x174   :  { %v15177_v24 = vcombine.high %v703_v17, %v707_v18  ;;  %v15179_v29 = vcombine.high %v704_v19, %v708_v21  ;;  %v15176_v32 = vcombine.low %v703_v17, %v707_v18  ;;  %v751_v8 = vld [vmem:[#allocation5 + $0x1240] sm:$0xff]  ;;  %v752_v11 = vld [vmem:[#allocation5 + $0x1248] sm:$0xff] }
 0x175   :  { %v755_v9 = vld [vmem:[#allocation5 + $0x1260] sm:$0xff] }
 0x176   :  { %6507 = vmatpush1.bf16.msra.mxu0 %v15120_v26  ;;  %6851 = vmatpush1.bf16.msra.mxu1 %v15122_v27  ;;  %v711_v26 = vld [vmem:[#allocation5 + $0x1100] sm:$0xff]  ;;  %v15225_v17 = vcombine.high %v751_v8, %v755_v9 }
 0x177   :  { %6508 = vmatprep.subr.bf16.mxu0 %v15129_v28  ;;  %6852 = vmatprep.subr.bf16.mxu1 %v15131_v33  ;;  %v715_v27 = vld [vmem:[#allocation5 + $0x1120] sm:$0xff]  ;;  %v712_v28 = vld [vmem:[#allocation5 + $0x1108] sm:$0xff]  ;;  %v15178_v33 = vcombine.low %v704_v19, %v708_v21 }
 0x178   :  { %v15185_v34 = vcombine.high %v711_v26, %v715_v27  ;;  %v15187_v39 = vcombine.high %v712_v28, %v716_v31  ;;  %v15184_v41 = vcombine.low %v711_v26, %v715_v27  ;;  %v759_v18 = vld [vmem:[#allocation5 + $0x1280] sm:$0xff] }
 0x179   :  { %v763_v19 = vld [vmem:[#allocation5 + $0x12a0] sm:$0xff] }
 0x17a   :  { %6509 = vmatpush1.bf16.msra.mxu0 %v15128_v35  ;;  %6853 = vmatpush1.bf16.msra.mxu1 %v15130_v36  ;;  %v719_v35 = vld [vmem:[#allocation5 + $0x1140] sm:$0xff]  ;;  %v15233_v26 = vcombine.high %v759_v18, %v763_v19 }
 0x17b   :  { %6510 = vmatprep.subr.bf16.mxu0 %v15137_v38  ;;  %6854 = vmatprep.subr.bf16.mxu1 %v15139_v42  ;;  %v723_v36 = vld [vmem:[#allocation5 + $0x1160] sm:$0xff]  ;;  %v720_v38 = vld [vmem:[#allocation5 + $0x1148] sm:$0xff]  ;;  %v15186_v42 = vcombine.low %v712_v28, %v716_v31 }
 0x17c   :  { %v15193_v43 = vcombine.high %v719_v35, %v723_v36  ;;  %v15192_v50 = vcombine.low %v719_v35, %v723_v36  ;;  %v15194_v51 = vcombine.low %v720_v38, %v724_v40  ;;  %v767_v27 = vld [vmem:[#allocation5 + $0x12c0] sm:$0xff] }
 0x17d   :  { %v771_v28 = vld [vmem:[#allocation5 + $0x12e0] sm:$0xff] }
 0x17e   :  { %6511 = vmatpush1.bf16.msra.mxu0 %v15136_v44  ;;  %6855 = vmatpush1.bf16.msra.mxu1 %v15138_v47  ;;  %v727_v44 = vld [vmem:[#allocation5 + $0x1180] sm:$0xff]  ;;  %v728_v47 = vld [vmem:[#allocation5 + $0x1188] sm:$0xff]  ;;  %v15241_v35 = vcombine.high %v767_v27, %v771_v28 }
 0x17f   :  { %6512 = vmatprep.subr.bf16.mxu0 %v15145_v48  ;;  %6856 = vmatprep.subr.bf16.mxu1 %v15147_v52  ;;  %v15195_v48 = vcombine.high %v720_v38, %v724_v40  ;;  %v15201_v52 = vcombine.high %v727_v44, %v731_v45  ;;  %v15203_v57 = vcombine.high %v728_v47, %v732_v49  ;;  %v775_v36 = vld [vmem:[#allocation5 + $0x1300] sm:$0xff] }
 0x180   :  { %v779_v38 = vld [vmem:[#allocation5 + $0x1320] sm:$0xff] }
 0x182   :  { %6513 = vmatpush1.bf16.msra.mxu0 %v15144_v56  ;;  %6857 = vmatpush1.bf16.msra.mxu1 %v15146_v60  ;;  %v736_v56 = vld [vmem:[#allocation5 + $0x11c8] sm:$0xff]  ;;  %v15200_v60 = vcombine.low %v727_v44, %v731_v45  ;;  %v15249_v44 = vcombine.high %v775_v36, %v779_v38  ;;  %v783_v45 = vld [vmem:[#allocation5 + $0x1340] sm:$0xff] }
 0x183   :  { %6525 = vmatprep.subr.bf16.mxu0 %v15153_v61  ;;  %6869 = vmatprep.subr.bf16.mxu1 %v15155_v1  ;;  %v15202_v61 = vcombine.low %v728_v47, %v732_v49  ;;  %v744_v1 = vld [vmem:[#allocation5 + $0x1208] sm:$0xff]  ;;  %v15211_v2 = vcombine.high %v736_v56, %v740_v59  ;;  %v787_v47 = vld [vmem:[#allocation5 + $0x1360] sm:$0xff] }
 0x185   :  { %6515 = vmatmul.mubr.bf16.vlgmr.msra.gmra.mrb[0].mxu0 %v18514_v3  ;;  %6859 = vmatmul.mubr.bf16.vlgmr.msra.gmra.mrb[0].mxu1 %v18514_v3 }
 0x186   :  { %6526 = vmatpush1.bf16.msra.mxu0 %v15152_v4  ;;  %6870 = vmatpush1.bf16.msra.mxu1 %v15154_v5  ;;  %v748_v4 = vld [vmem:[#allocation5 + $0x1228] sm:$0xff]  ;;  %v15208_v5 = vcombine.low %v735_v54, %v739_v55  ;;  %v15257_v54 = vcombine.high %v783_v45, %v787_v47  ;;  %v791_v55 = vld [vmem:[#allocation5 + $0x1380] sm:$0xff] }
 0x187   :  { %6527 = vmatprep.subr.bf16.mxu0 %v15161_v6  ;;  %6871 = vmatprep.subr.bf16.mxu1 %v15163_v7  ;;  %v15210_v6 = vcombine.low %v736_v56, %v740_v59  ;;  %v15217_v7 = vcombine.high %v743_v63, %v747_v0  ;;  %v15219_v12 = vcombine.high %v744_v1, %v748_v4  ;;  %v795_v56 = vld [vmem:[#allocation5 + $0x13a0] sm:$0xff] }
 0x188   :  { %6557 = vmatprep.mubr.bf16.mxu0 %v18516_v10  ;;  %6901 = vmatprep.mubr.bf16.mxu1 %v18516_v10 }
 0x18a   :  { %6528 = vmatpush1.bf16.msra.mxu0 %v15160_v13  ;;  %6872 = vmatpush1.bf16.msra.mxu1 %v15162_v14  ;;  %v756_v13 = vld [vmem:[#allocation5 + $0x1268] sm:$0xff]  ;;  %v15216_v14 = vcombine.low %v743_v63, %v747_v0  ;;  %v15265_v63 = vcombine.high %v791_v55, %v795_v56  ;;  %v799_v0 = vld [vmem:[#allocation5 + $0x13c0] sm:$0xff] }
 0x18b   :  { %6529 = vmatprep.subr.bf16.mxu0 %v15169_v16  ;;  %6873 = vmatprep.subr.bf16.mxu1 %v15171_v20  ;;  %v15218_v16 = vcombine.low %v744_v1, %v748_v4  ;;  %v760_v20 = vld [vmem:[#allocation5 + $0x1288] sm:$0xff]  ;;  %v15227_v21 = vcombine.high %v752_v11, %v756_v13  ;;  %v803_v1 = vld [vmem:[#allocation5 + $0x13e0] sm:$0xff] }
 0x18e   :  { %6530 = vmatpush1.bf16.msra.mxu0 %v15168_v22  ;;  %6874 = vmatpush1.bf16.msra.mxu1 %v15170_v23  ;;  %v764_v22 = vld [vmem:[#allocation5 + $0x12a8] sm:$0xff]  ;;  %v15224_v23 = vcombine.low %v751_v8, %v755_v9  ;;  %v15273_v9 = vcombine.high %v799_v0, %v803_v1 }
 0x18f   :  { %6531 = vmatprep.subr.bf16.mxu0 %v15177_v24  ;;  %6875 = vmatprep.subr.bf16.mxu1 %v15179_v29  ;;  %v15226_v24 = vcombine.low %v752_v11, %v756_v13  ;;  %v768_v29 = vld [vmem:[#allocation5 + $0x12c8] sm:$0xff]  ;;  %v15235_v31 = vcombine.high %v760_v20, %v764_v22  ;;  %v811_v11 = vld [vmem:[#allocation5 + $0x1420] sm:$0xff] }
 0x190   :  { %v812_v13 = vld [vmem:[#allocation5 + $0x1428] sm:$0xff] }
 0x192   :  { %6532 = vmatpush1.bf16.msra.mxu0 %v15176_v32  ;;  %6876 = vmatpush1.bf16.msra.mxu1 %v15178_v33  ;;  %v772_v32 = vld [vmem:[#allocation5 + $0x12e8] sm:$0xff]  ;;  %v15232_v33 = vcombine.low %v759_v18, %v763_v19  ;;  %v15272_v18 = vcombine.low %v799_v0, %v803_v1  ;;  %v815_v19 = vld [vmem:[#allocation5 + $0x1440] sm:$0xff] }
 0x193   :  { %6533 = vmatprep.subr.bf16.mxu0 %v15185_v34  ;;  %6877 = vmatprep.subr.bf16.mxu1 %v15187_v39  ;;  %v15234_v34 = vcombine.low %v760_v20, %v764_v22  ;;  %v776_v39 = vld [vmem:[#allocation5 + $0x1308] sm:$0xff]  ;;  %v15243_v40 = vcombine.high %v768_v29, %v772_v32  ;;  %v819_v20 = vld [vmem:[#allocation5 + $0x1460] sm:$0xff] }
 0x194   :  { %v851_v0 = vld [vmem:[#allocation5 + $0x1560] sm:$0xff]  ;;  %v848_v1 = vld [vmem:[#allocation5 + $0x1548] sm:$0xff] }
 0x196   :  { %6534 = vmatpush1.bf16.msra.mxu0 %v15184_v41  ;;  %6878 = vmatpush1.bf16.msra.mxu1 %v15186_v42  ;;  %v780_v41 = vld [vmem:[#allocation5 + $0x1328] sm:$0xff]  ;;  %v15240_v42 = vcombine.low %v767_v27, %v771_v28  ;;  %v146_v28 = vld [vmem:[#allocation2 + $0xd8] sm:$0xff] }
 0x197   :  { %6535 = vmatprep.subr.bf16.mxu0 %v15193_v43  ;;  %6879 = vmatprep.subr.bf16.mxu1 %v15195_v48  ;;  %v15242_v43 = vcombine.low %v768_v29, %v772_v32  ;;  %v784_v48 = vld [vmem:[#allocation5 + $0x1348] sm:$0xff]  ;;  %v15251_v49 = vcombine.high %v776_v39, %v780_v41 }
 0x19a   :  { %6536 = vmatpush1.bf16.msra.mxu0 %v15192_v50  ;;  %6880 = vmatpush1.bf16.msra.mxu1 %v15194_v51  ;;  %v788_v50 = vld [vmem:[#allocation5 + $0x1368] sm:$0xff]  ;;  %v15248_v51 = vcombine.low %v775_v36, %v779_v38  ;;  %v827_v36 = vld [vmem:[#allocation5 + $0x14a0] sm:$0xff] }
 0x19b   :  { %6537 = vmatprep.subr.bf16.mxu0 %v15201_v52  ;;  %6881 = vmatprep.subr.bf16.mxu1 %v15203_v57  ;;  %v15250_v52 = vcombine.low %v776_v39, %v780_v41  ;;  %v792_v57 = vld [vmem:[#allocation5 + $0x1388] sm:$0xff]  ;;  %v15259_v59 = vcombine.high %v784_v48, %v788_v50  ;;  %v15288_v41 = vcombine.low %v815_v19, %v819_v20 }
 0x19c   :  { %v824_v39 = vld [vmem:[#allocation5 + $0x1488] sm:$0xff] }
 0x19e   :  { %6538 = vmatpush1.bf16.msra.mxu0 %v15200_v60  ;;  %6882 = vmatpush1.bf16.msra.mxu1 %v15202_v61  ;;  %v796_v60 = vld [vmem:[#allocation5 + $0x13a8] sm:$0xff]  ;;  %v15256_v61 = vcombine.low %v783_v45, %v787_v47  ;;  %v835_v45 = vld [vmem:[#allocation5 + $0x14e0] sm:$0xff] }
 0x19f   :  { %6539 = vmatprep.subr.bf16.mxu0 %v15209_v62  ;;  %6883 = vmatprep.subr.bf16.mxu1 %v15211_v2  ;;  %v15258_v62 = vcombine.low %v784_v48, %v788_v50  ;;  %v800_v2 = vld [vmem:[#allocation5 + $0x13c8] sm:$0xff]  ;;  %v15267_v4 = vcombine.high %v792_v57, %v796_v60  ;;  %v15266_v8 = vcombine.low %v792_v57, %v796_v60 }
 0x1a0   :  { %v832_v47 = vld [vmem:[#allocation5 + $0x14c8] sm:$0xff] }
 0x1a2   :  { %6540 = vmatpush1.bf16.msra.mxu0 %v15208_v5  ;;  %6884 = vmatpush1.bf16.msra.mxu1 %v15210_v6  ;;  %v804_v5 = vld [vmem:[#allocation5 + $0x13e8] sm:$0xff]  ;;  %v15264_v6 = vcombine.low %v791_v55, %v795_v56  ;;  %v843_v55 = vld [vmem:[#allocation5 + $0x1520] sm:$0xff] }
 0x1a3   :  { %6541 = vmatprep.subr.bf16.mxu0 %v15217_v7  ;;  %6885 = vmatprep.subr.bf16.mxu1 %v15219_v12  ;;  %v807_v7 = vld [vmem:[#allocation5 + $0x1400] sm:$0xff]  ;;  %v808_v12 = vld [vmem:[#allocation5 + $0x1408] sm:$0xff] }
 0x1a4   :  { %v15281_v22 = vcombine.high %v807_v7, %v811_v11  ;;  %v15283_v27 = vcombine.high %v808_v12, %v812_v13  ;;  %v15282_v32 = vcombine.low %v808_v12, %v812_v13  ;;  %v840_v56 = vld [vmem:[#allocation5 + $0x1508] sm:$0xff] }
 0x1a5   :  { %v860_v13 = vld [vmem:[#allocation5 + $0x15a8] sm:$0xff] }
 0x1a6   :  { %6542 = vmatpush1.bf16.msra.mxu0 %v15216_v14  ;;  %6886 = vmatpush1.bf16.msra.mxu1 %v15218_v16  ;;  %v15275_v14 = vcombine.high %v800_v2, %v804_v5  ;;  %v127_v16 = vld [vmem:[#allocation2 + $0x40] sm:$0xff] }
 0x1a7   :  { %6543 = vmatprep.subr.bf16.mxu0 %v15225_v17  ;;  %6887 = vmatprep.subr.bf16.mxu1 %v15227_v21  ;;  %v143_v17 = vld [vmem:[#allocation2 + $0xc0] sm:$0xff]  ;;  %v15274_v21 = vcombine.low %v800_v2, %v804_v5 }
 0x1a8   :  { %v18522_v29 = vpack.c.bf16 %v143_v17, %v127_v16 }
 0x1aa   :  { %6544 = vmatpush1.bf16.msra.mxu0 %v15224_v23  ;;  %6888 = vmatpush1.bf16.msra.mxu1 %v15226_v24  ;;  %v816_v23 = vld [vmem:[#allocation5 + $0x1448] sm:$0xff] }
 0x1ab   :  { %6545 = vmatprep.subr.bf16.mxu0 %v15233_v26  ;;  %6889 = vmatprep.subr.bf16.mxu1 %v15235_v31  ;;  %v820_v24 = vld [vmem:[#allocation5 + $0x1468] sm:$0xff]  ;;  %v130_v26 = vld [vmem:[#allocation2 + $0x58] sm:$0xff]  ;;  %v15280_v31 = vcombine.low %v807_v7, %v811_v11 }
 0x1ac   :  { %v18524_v38 = vpack.c.bf16 %v146_v28, %v130_v26  ;;  %v856_v11 = vld [vmem:[#allocation5 + $0x1588] sm:$0xff]  ;;  %v875_v28 = vld [vmem:[#allocation5 + $0x1620] sm:$0xff] }
 0x1ae   :  { %6546 = vmatpush1.bf16.msra.mxu0 %v15232_v33  ;;  %6890 = vmatpush1.bf16.msra.mxu1 %v15234_v34  ;;  %v15289_v33 = vcombine.high %v815_v19, %v819_v20  ;;  %v15291_v34 = vcombine.high %v816_v23, %v820_v24  ;;  %v867_v19 = vld [vmem:[#allocation5 + $0x15e0] sm:$0xff]  ;;  %v864_v20 = vld [vmem:[#allocation5 + $0x15c8] sm:$0xff] }
 0x1af   :  { %6547 = vmatprep.subr.bf16.mxu0 %v15241_v35  ;;  %6891 = vmatprep.subr.bf16.mxu1 %v15243_v40  ;;  %v823_v35 = vld [vmem:[#allocation5 + $0x1480] sm:$0xff]  ;;  %v828_v40 = vld [vmem:[#allocation5 + $0x14a8] sm:$0xff] }
 0x1b0   :  { %v15299_v48 = vcombine.high %v824_v39, %v828_v40  ;;  %v15296_v50 = vcombine.low %v823_v35, %v827_v36 }
 0x1b2   :  { %6548 = vmatpush1.bf16.msra.mxu0 %v15240_v42  ;;  %6892 = vmatpush1.bf16.msra.mxu1 %v15242_v43  ;;  %v15290_v42 = vcombine.low %v816_v23, %v820_v24  ;;  %v15297_v43 = vcombine.high %v823_v35, %v827_v36  ;;  %v15330_v24 = vcombine.low %v856_v11, %v860_v13 }
 0x1b3   :  { %6549 = vmatprep.subr.bf16.mxu0 %v15249_v44  ;;  %6893 = vmatprep.subr.bf16.mxu1 %v15251_v49  ;;  %v831_v44 = vld [vmem:[#allocation5 + $0x14c0] sm:$0xff]  ;;  %v836_v49 = vld [vmem:[#allocation5 + $0x14e8] sm:$0xff] }
 0x1b4   :  { %v15307_v57 = vcombine.high %v832_v47, %v836_v49  ;;  %v15304_v60 = vcombine.low %v831_v44, %v835_v45 }
 0x1b6   :  { %6550 = vmatpush1.bf16.msra.mxu0 %v15248_v51  ;;  %6894 = vmatpush1.bf16.msra.mxu1 %v15250_v52  ;;  %v15298_v51 = vcombine.low %v824_v39, %v828_v40  ;;  %v15305_v52 = vcombine.high %v831_v44, %v835_v45  ;;  %v879_v39 = vld [vmem:[#allocation5 + $0x1640] sm:$0xff] }
 0x1b7   :  { %6551 = vmatprep.subr.bf16.mxu0 %v15257_v54  ;;  %6895 = vmatprep.subr.bf16.mxu1 %v15259_v59  ;;  %v839_v54 = vld [vmem:[#allocation5 + $0x1500] sm:$0xff]  ;;  %v844_v59 = vld [vmem:[#allocation5 + $0x1528] sm:$0xff] }
 0x1b8   :  { %v15315_v2 = vcombine.high %v840_v56, %v844_v59  ;;  %v15312_v5 = vcombine.low %v839_v54, %v843_v55  ;;  %v883_v40 = vld [vmem:[#allocation5 + $0x1660] sm:$0xff] }
 0x1ba   :  { %6552 = vmatpush1.bf16.msra.mxu0 %v15256_v61  ;;  %6896 = vmatpush1.bf16.msra.mxu1 %v15258_v62  ;;  %v15306_v61 = vcombine.low %v832_v47, %v836_v49  ;;  %v15313_v62 = vcombine.high %v839_v54, %v843_v55  ;;  %v15353_v47 = vcombine.high %v879_v39, %v883_v40  ;;  %v891_v49 = vld [vmem:[#allocation5 + $0x16a0] sm:$0xff] }
 0x1bb   :  { %6553 = vmatprep.subr.bf16.mxu0 %v15265_v63  ;;  %6897 = vmatprep.subr.bf16.mxu1 %v15267_v4  ;;  %v847_v63 = vld [vmem:[#allocation5 + $0x1540] sm:$0xff]  ;;  %v852_v4 = vld [vmem:[#allocation5 + $0x1568] sm:$0xff]  ;;  %v15352_v54 = vcombine.low %v879_v39, %v883_v40 }
 0x1bc   :  { %v15321_v7 = vcombine.high %v847_v63, %v851_v0  ;;  %v15323_v12 = vcombine.high %v848_v1, %v852_v4  ;;  %v15322_v16 = vcombine.low %v848_v1, %v852_v4  ;;  %v907_v4 = vld [vmem:[#allocation5 + $0x1720] sm:$0xff] }
 0x1bd   :  { %v935_v40 = vld [vmem:[#allocation5 + $0x1800] sm:$0xff] }
 0x1be   :  { %6554 = vmatpush1.bf16.msra.mxu0 %v15264_v6  ;;  %6898 = vmatpush1.bf16.msra.mxu1 %v15266_v8  ;;  %v15314_v6 = vcombine.low %v840_v56, %v844_v59  ;;  %v855_v8 = vld [vmem:[#allocation5 + $0x1580] sm:$0xff] }
 0x1bf   :  { %6555 = vmatprep.subr.bf16.mxu0 %v15273_v9  ;;  %6899 = vmatprep.subr.bf16.mxu1 %v15275_v14  ;;  %v859_v9 = vld [vmem:[#allocation5 + $0x15a0] sm:$0xff]  ;;  %v15320_v14 = vcombine.low %v847_v63, %v851_v0 }
 0x1c0   :  { %v15329_v17 = vcombine.high %v855_v8, %v859_v9  ;;  %v15328_v23 = vcombine.low %v855_v8, %v859_v9  ;;  %v899_v59 = vld [vmem:[#allocation5 + $0x16e0] sm:$0xff] }
 0x1c2   :  { %6556 = vmatpush1.bf16.msra.mxu0 %v15272_v18  ;;  %6900 = vmatpush1.bf16.msra.mxu1 %v15274_v21  ;;  %v863_v18 = vld [vmem:[#allocation5 + $0x15c0] sm:$0xff]  ;;  %v15331_v21 = vcombine.high %v856_v11, %v860_v13 }
 0x1c3   :  { %6568 = vmatprep.subr.bf16.mxu0 %v15281_v22  ;;  %6912 = vmatprep.subr.bf16.mxu1 %v15283_v27  ;;  %v868_v22 = vld [vmem:[#allocation5 + $0x15e8] sm:$0xff]  ;;  %v15337_v26 = vcombine.high %v863_v18, %v867_v19  ;;  %v871_v27 = vld [vmem:[#allocation5 + $0x1600] sm:$0xff] }
 0x1c4   :  { %v15338_v35 = vcombine.low %v864_v20, %v868_v22  ;;  %v15345_v36 = vcombine.high %v871_v27, %v875_v28  ;;  %v15344_v44 = vcombine.low %v871_v27, %v875_v28  ;;  %v915_v13 = vld [vmem:[#allocation5 + $0x1760] sm:$0xff] }
 0x1c5   :  { %6558 = vmatmul.mubr.bf16.vlgmr.msra.gmra.mrb[0].mxu0 %v18522_v29  ;;  %6902 = vmatmul.mubr.bf16.vlgmr.msra.gmra.mrb[0].mxu1 %v18522_v29 }
 0x1c6   :  { %6569 = vmatpush1.bf16.msra.mxu0 %v15280_v31  ;;  %6913 = vmatpush1.bf16.msra.mxu1 %v15282_v32  ;;  %v872_v31 = vld [vmem:[#allocation5 + $0x1608] sm:$0xff]  ;;  %v15339_v32 = vcombine.high %v864_v20, %v868_v22  ;;  %v923_v22 = vld [vmem:[#allocation5 + $0x17a0] sm:$0xff] }
 0x1c7   :  { %6570 = vmatprep.subr.bf16.mxu0 %v15289_v33  ;;  %6914 = vmatprep.subr.bf16.mxu1 %v15291_v34  ;;  %v876_v33 = vld [vmem:[#allocation5 + $0x1628] sm:$0xff]  ;;  %v15336_v34 = vcombine.low %v863_v18, %v867_v19 }
 0x1c8   :  { %6600 = vmatprep.mubr.bf16.mxu0 %v18524_v38  ;;  %6944 = vmatprep.mubr.bf16.mxu1 %v18524_v38  ;;  %v15346_v45 = vcombine.low %v872_v31, %v876_v33 }
 0x1ca   :  { %6571 = vmatpush1.bf16.msra.mxu0 %v15288_v41  ;;  %6915 = vmatpush1.bf16.msra.mxu1 %v15290_v42  ;;  %v880_v41 = vld [vmem:[#allocation5 + $0x1648] sm:$0xff]  ;;  %v15347_v42 = vcombine.high %v872_v31, %v876_v33  ;;  %v931_v33 = vld [vmem:[#allocation5 + $0x17e0] sm:$0xff] }
 0x1cb   :  { %6572 = vmatprep.subr.bf16.mxu0 %v15297_v43  ;;  %6916 = vmatprep.subr.bf16.mxu1 %v15299_v48  ;;  %v884_v43 = vld [vmem:[#allocation5 + $0x1668] sm:$0xff]  ;;  %v887_v48 = vld [vmem:[#allocation5 + $0x1680] sm:$0xff] }
 0x1cc   :  { %v15354_v55 = vcombine.low %v880_v41, %v884_v43  ;;  %v15361_v56 = vcombine.high %v887_v48, %v891_v49  ;;  %v15360_v63 = vcombine.low %v887_v48, %v891_v49  ;;  %v129_v48 = vld [vmem:[#allocation2 + $0x50] sm:$0xff] }
 0x1cd   :  { %v145_v49 = vld [vmem:[#allocation2 + $0xd0] sm:$0xff] }
 0x1ce   :  { %6573 = vmatpush1.bf16.msra.mxu0 %v15296_v50  ;;  %6917 = vmatpush1.bf16.msra.mxu1 %v15298_v51  ;;  %v888_v50 = vld [vmem:[#allocation5 + $0x1688] sm:$0xff]  ;;  %v15355_v51 = vcombine.high %v880_v41, %v884_v43  ;;  %v939_v43 = vld [vmem:[#allocation5 + $0x1820] sm:$0xff] }
 0x1cf   :  { %6574 = vmatprep.subr.bf16.mxu0 %v15305_v52  ;;  %6918 = vmatprep.subr.bf16.mxu1 %v15307_v57  ;;  %v892_v52 = vld [vmem:[#allocation5 + $0x16a8] sm:$0xff]  ;;  %v895_v57 = vld [vmem:[#allocation5 + $0x16c0] sm:$0xff] }
 0x1d0   :  { %v15362_v0 = vcombine.low %v888_v50, %v892_v52  ;;  %v15369_v1 = vcombine.high %v895_v57, %v899_v59  ;;  %v15368_v8 = vcombine.low %v895_v57, %v899_v59  ;;  %v948_v57 = vld [vmem:[#allocation5 + $0x1868] sm:$0xff] }
 0x1d1   :  { %v132_v59 = vld [vmem:[#allocation2 + $0x68] sm:$0xff] }
 0x1d2   :  { %6575 = vmatpush1.bf16.msra.mxu0 %v15304_v60  ;;  %6919 = vmatpush1.bf16.msra.mxu1 %v15306_v61  ;;  %v896_v60 = vld [vmem:[#allocation5 + $0x16c8] sm:$0xff]  ;;  %v15363_v61 = vcombine.high %v888_v50, %v892_v52  ;;  %v947_v52 = vld [vmem:[#allocation5 + $0x1860] sm:$0xff] }
 0x1d3   :  { %6576 = vmatprep.subr.bf16.mxu0 %v15313_v62  ;;  %6920 = vmatprep.subr.bf16.mxu1 %v15315_v2  ;;  %v900_v62 = vld [vmem:[#allocation5 + $0x16e8] sm:$0xff]  ;;  %v903_v2 = vld [vmem:[#allocation5 + $0x1700] sm:$0xff] }
 0x1d4   :  { %v15370_v9 = vcombine.low %v896_v60, %v900_v62  ;;  %v15377_v11 = vcombine.high %v903_v2, %v907_v4  ;;  %v15376_v18 = vcombine.low %v903_v2, %v907_v4  ;;  %v951_v2 = vld [vmem:[#allocation5 + $0x1880] sm:$0xff] }
 0x1d6   :  { %6577 = vmatpush1.bf16.msra.mxu0 %v15312_v5  ;;  %6921 = vmatpush1.bf16.msra.mxu1 %v15314_v6  ;;  %v904_v5 = vld [vmem:[#allocation5 + $0x1708] sm:$0xff]  ;;  %v15371_v6 = vcombine.high %v896_v60, %v900_v62  ;;  %v18530_v62 = vpack.c.bf16 %v145_v49, %v129_v48 }
 0x1d7   :  { %6578 = vmatprep.subr.bf16.mxu0 %v15321_v7  ;;  %6922 = vmatprep.subr.bf16.mxu1 %v15323_v12  ;;  %v908_v7 = vld [vmem:[#allocation5 + $0x1728] sm:$0xff]  ;;  %v911_v12 = vld [vmem:[#allocation5 + $0x1740] sm:$0xff] }
 0x1d8   :  { %v15378_v19 = vcombine.low %v904_v5, %v908_v7  ;;  %v15385_v20 = vcombine.high %v911_v12, %v915_v13  ;;  %v15384_v27 = vcombine.low %v911_v12, %v915_v13  ;;  %v959_v13 = vld [vmem:[#allocation5 + $0x18c0] sm:$0xff]  ;;  %v988_v48 = vld [vmem:[#allocation5 + $0x19a8] sm:$0xff] }
 0x1da   :  { %6579 = vmatpush1.bf16.msra.mxu0 %v15320_v14  ;;  %6923 = vmatpush1.bf16.msra.mxu1 %v15322_v16  ;;  %v912_v14 = vld [vmem:[#allocation5 + $0x1748] sm:$0xff]  ;;  %v15379_v16 = vcombine.high %v904_v5, %v908_v7  ;;  %v955_v5 = vld [vmem:[#allocation5 + $0x18a0] sm:$0xff] }
 0x1db   :  { %6580 = vmatprep.subr.bf16.mxu0 %v15329_v17  ;;  %6924 = vmatprep.subr.bf16.mxu1 %v15331_v21  ;;  %v916_v17 = vld [vmem:[#allocation5 + $0x1768] sm:$0xff]  ;;  %v919_v21 = vld [vmem:[#allocation5 + $0x1780] sm:$0xff]  ;;  %v15425_v12 = vcombine.high %v951_v2, %v955_v5 }
 0x1dc   :  { %v15386_v28 = vcombine.low %v912_v14, %v916_v17  ;;  %v15393_v31 = vcombine.high %v919_v21, %v923_v22  ;;  %v15392_v39 = vcombine.low %v919_v21, %v923_v22  ;;  %v956_v7 = vld [vmem:[#allocation5 + $0x18a8] sm:$0xff]  ;;  %v967_v22 = vld [vmem:[#allocation5 + $0x1900] sm:$0xff] }
 0x1de   :  { %6581 = vmatpush1.bf16.msra.mxu0 %v15328_v23  ;;  %6925 = vmatpush1.bf16.msra.mxu1 %v15330_v24  ;;  %v920_v23 = vld [vmem:[#allocation5 + $0x1788] sm:$0xff]  ;;  %v15387_v24 = vcombine.high %v912_v14, %v916_v17  ;;  %v963_v14 = vld [vmem:[#allocation5 + $0x18e0] sm:$0xff] }
 0x1df   :  { %6582 = vmatprep.subr.bf16.mxu0 %v15337_v26  ;;  %6926 = vmatprep.subr.bf16.mxu1 %v15339_v32  ;;  %v924_v26 = vld [vmem:[#allocation5 + $0x17a8] sm:$0xff]  ;;  %v927_v32 = vld [vmem:[#allocation5 + $0x17c0] sm:$0xff]  ;;  %v15433_v21 = vcombine.high %v959_v13, %v963_v14 }
 0x1e0   :  { %v15394_v41 = vcombine.low %v920_v23, %v924_v26  ;;  %v15400_v50 = vcombine.low %v927_v32, %v931_v33 }
 0x1e2   :  { %6583 = vmatpush1.bf16.msra.mxu0 %v15336_v34  ;;  %6927 = vmatpush1.bf16.msra.mxu1 %v15338_v35  ;;  %v928_v34 = vld [vmem:[#allocation5 + $0x17c8] sm:$0xff]  ;;  %v15395_v35 = vcombine.high %v920_v23, %v924_v26  ;;  %v971_v23 = vld [vmem:[#allocation5 + $0x1920] sm:$0xff] }
 0x1e3   :  { %6584 = vmatprep.subr.bf16.mxu0 %v15345_v36  ;;  %6928 = vmatprep.subr.bf16.mxu1 %v15347_v42  ;;  %v932_v36 = vld [vmem:[#allocation5 + $0x17e8] sm:$0xff]  ;;  %v15401_v42 = vcombine.high %v927_v32, %v931_v33  ;;  %v15441_v32 = vcombine.high %v967_v22, %v971_v23  ;;  %v975_v33 = vld [vmem:[#allocation5 + $0x1940] sm:$0xff] }
 0x1e6   :  { %6585 = vmatpush1.bf16.msra.mxu0 %v15344_v44  ;;  %6929 = vmatpush1.bf16.msra.mxu1 %v15346_v45  ;;  %v936_v44 = vld [vmem:[#allocation5 + $0x1808] sm:$0xff] }
 0x1e7   :  { %6586 = vmatprep.subr.bf16.mxu0 %v15353_v47  ;;  %6930 = vmatprep.subr.bf16.mxu1 %v15355_v51  ;;  %v940_v45 = vld [vmem:[#allocation5 + $0x1828] sm:$0xff]  ;;  %v15403_v47 = vcombine.high %v928_v34, %v932_v36  ;;  %v943_v51 = vld [vmem:[#allocation5 + $0x1840] sm:$0xff] }
 0x1e8   :  { %v15411_v60 = vcombine.high %v936_v44, %v940_v45 }
 0x1ea   :  { %6587 = vmatpush1.bf16.msra.mxu0 %v15352_v54  ;;  %6931 = vmatpush1.bf16.msra.mxu1 %v15354_v55  ;;  %v15402_v54 = vcombine.low %v928_v34, %v932_v36  ;;  %v15409_v55 = vcombine.high %v935_v40, %v939_v43  ;;  %v979_v34 = vld [vmem:[#allocation5 + $0x1960] sm:$0xff] }
 0x1eb   :  { %6588 = vmatprep.subr.bf16.mxu0 %v15361_v56  ;;  %6932 = vmatprep.subr.bf16.mxu1 %v15363_v61  ;;  %v944_v56 = vld [vmem:[#allocation5 + $0x1848] sm:$0xff]  ;;  %v15448_v49 = vcombine.low %v975_v33, %v979_v34 }
 0x1ec   :  { %v148_v61 = vld [vmem:[#allocation2 + $0xe8] sm:$0xff]  ;;  %v15419_v4 = vcombine.high %v944_v56, %v948_v57 }
 0x1ee   :  { %6589 = vmatpush1.bf16.msra.mxu0 %v15360_v63  ;;  %6933 = vmatpush1.bf16.msra.mxu1 %v15362_v0  ;;  %v15408_v63 = vcombine.low %v935_v40, %v939_v43  ;;  %v15410_v0 = vcombine.low %v936_v44, %v940_v45  ;;  %v15440_v40 = vcombine.low %v967_v22, %v971_v23  ;;  %v983_v43 = vld [vmem:[#allocation5 + $0x1980] sm:$0xff]  ;;  %v984_v45 = vld [vmem:[#allocation5 + $0x1988] sm:$0xff] }
 0x1ef   :  { %6590 = vmatprep.subr.bf16.mxu0 %v15369_v1  ;;  %6934 = vmatprep.subr.bf16.mxu1 %v15371_v6  ;;  %v15417_v1 = vcombine.high %v943_v51, %v947_v52  ;;  %v952_v6 = vld [vmem:[#allocation5 + $0x1888] sm:$0xff]  ;;  %v987_v44 = vld [vmem:[#allocation5 + $0x19a0] sm:$0xff] }
 0x1f0   :  { %v15427_v17 = vcombine.high %v952_v6, %v956_v7  ;;  %v1020_v23 = vld [vmem:[#allocation5 + $0x1aa8] sm:$0xff] }
 0x1f2   :  { %6591 = vmatpush1.bf16.msra.mxu0 %v15368_v8  ;;  %6935 = vmatpush1.bf16.msra.mxu1 %v15370_v9  ;;  %v18532_v8 = vpack.c.bf16 %v148_v61, %v132_v59  ;;  %v15416_v9 = vcombine.low %v943_v51, %v947_v52  ;;  %v15457_v51 = vcombine.high %v983_v43, %v987_v44  ;;  %v991_v52 = vld [vmem:[#allocation5 + $0x19c0] sm:$0xff] }
 0x1f3   :  { %6592 = vmatprep.subr.bf16.mxu0 %v15377_v11  ;;  %6936 = vmatprep.subr.bf16.mxu1 %v15379_v16  ;;  %v15418_v11 = vcombine.low %v944_v56, %v948_v57  ;;  %v960_v16 = vld [vmem:[#allocation5 + $0x18c8] sm:$0xff]  ;;  %v15459_v56 = vcombine.high %v984_v45, %v988_v48  ;;  %v15456_v59 = vcombine.low %v983_v43, %v987_v44 }
 0x1f4   :  { %v996_v57 = vld [vmem:[#allocation5 + $0x19e8] sm:$0xff] }
 0x1f5   :  { %v1036_v44 = vld [vmem:[#allocation5 + $0x1b28] sm:$0xff] }
 0x1f6   :  { %6593 = vmatpush1.bf16.msra.mxu0 %v15376_v18  ;;  %6937 = vmatpush1.bf16.msra.mxu1 %v15378_v19  ;;  %v964_v18 = vld [vmem:[#allocation5 + $0x18e8] sm:$0xff]  ;;  %v15424_v19 = vcombine.low %v951_v2, %v955_v5 }
 0x1f7   :  { %6594 = vmatprep.subr.bf16.mxu0 %v15385_v20  ;;  %6938 = vmatprep.subr.bf16.mxu1 %v15387_v24  ;;  %v15426_v20 = vcombine.low %v952_v6, %v956_v7  ;;  %v968_v24 = vld [vmem:[#allocation5 + $0x1908] sm:$0xff]  ;;  %v15435_v26 = vcombine.high %v960_v16, %v964_v18 }
 0x1fa   :  { %6595 = vmatpush1.bf16.msra.mxu0 %v15384_v27  ;;  %6939 = vmatpush1.bf16.msra.mxu1 %v15386_v28  ;;  %v972_v27 = vld [vmem:[#allocation5 + $0x1928] sm:$0xff]  ;;  %v15432_v28 = vcombine.low %v959_v13, %v963_v14 }
 0x1fb   :  { %6596 = vmatprep.subr.bf16.mxu0 %v15393_v31  ;;  %6940 = vmatprep.subr.bf16.mxu1 %v15395_v35  ;;  %v15434_v31 = vcombine.low %v960_v16, %v964_v18  ;;  %v976_v35 = vld [vmem:[#allocation5 + $0x1948] sm:$0xff]  ;;  %v15443_v36 = vcombine.high %v968_v24, %v972_v27 }
 0x1fc   :  { %v1012_v14 = vld [vmem:[#allocation5 + $0x1a68] sm:$0xff] }
 0x1fe   :  { %6597 = vmatpush1.bf16.msra.mxu0 %v15392_v39  ;;  %6941 = vmatpush1.bf16.msra.mxu1 %v15394_v41  ;;  %v980_v39 = vld [vmem:[#allocation5 + $0x1968] sm:$0xff]  ;;  %v15442_v41 = vcombine.low %v968_v24, %v972_v27 }
 0x1ff   :  { %6598 = vmatprep.subr.bf16.mxu0 %v15401_v42  ;;  %6942 = vmatprep.subr.bf16.mxu1 %v15403_v47  ;;  %v15449_v42 = vcombine.high %v975_v33, %v979_v34  ;;  %v15451_v47 = vcombine.high %v976_v35, %v980_v39  ;;  %v1028_v34 = vld [vmem:[#allocation5 + $0x1ae8] sm:$0xff] }
 0x202   :  { %6599 = vmatpush1.bf16.msra.mxu0 %v15400_v50  ;;  %6943 = vmatpush1.bf16.msra.mxu1 %v15402_v54  ;;  %v15450_v50 = vcombine.low %v976_v35, %v980_v39  ;;  %v995_v54 = vld [vmem:[#allocation5 + $0x19e0] sm:$0xff] }
 0x203   :  { %6611 = vmatprep.subr.bf16.mxu0 %v15409_v55  ;;  %6955 = vmatprep.subr.bf16.mxu1 %v15411_v60  ;;  %v992_v55 = vld [vmem:[#allocation5 + $0x19c8] sm:$0xff]  ;;  %v15458_v60 = vcombine.low %v984_v45, %v988_v48  ;;  %v15465_v61 = vcombine.high %v991_v52, %v995_v54  ;;  %v15464_v5 = vcombine.low %v991_v52, %v995_v54 }
 0x204   :  { %v15467_v2 = vcombine.high %v992_v55, %v996_v57  ;;  %v15466_v6 = vcombine.low %v992_v55, %v996_v57  ;;  %v1044_v54 = vld [vmem:[#allocation5 + $0x1b68] sm:$0xff] }
 0x205   :  { %6601 = vmatmul.mubr.bf16.vlgmr.msra.gmra.mrb[0].mxu0 %v18530_v62  ;;  %6945 = vmatmul.mubr.bf16.vlgmr.msra.gmra.mrb[0].mxu1 %v18530_v62 }
 0x206   :  { %6612 = vmatpush1.bf16.msra.mxu0 %v15408_v63  ;;  %6956 = vmatpush1.bf16.msra.mxu1 %v15410_v0  ;;  %v999_v63 = vld [vmem:[#allocation5 + $0x1a00] sm:$0xff] }
 0x207   :  { %6613 = vmatprep.subr.bf16.mxu0 %v15417_v1  ;;  %6957 = vmatprep.subr.bf16.mxu1 %v15419_v4  ;;  %v1003_v0 = vld [vmem:[#allocation5 + $0x1a20] sm:$0xff]  ;;  %v1000_v1 = vld [vmem:[#allocation5 + $0x1a08] sm:$0xff] }
 0x208   :  { %6643 = vmatprep.mubr.bf16.mxu0 %v18532_v8  ;;  %6987 = vmatprep.mubr.bf16.mxu1 %v18532_v8  ;;  %v1004_v4 = vld [vmem:[#allocation5 + $0x1a28] sm:$0xff]  ;;  %v15473_v7 = vcombine.high %v999_v63, %v1003_v0  ;;  %v15472_v16 = vcombine.low %v999_v63, %v1003_v0 }
 0x209   :  { %v15475_v13 = vcombine.high %v1000_v1, %v1004_v4  ;;  %v1052_v0 = vld [vmem:[#allocation5 + $0x1ba8] sm:$0xff] }
 0x20a   :  { %6614 = vmatpush1.bf16.msra.mxu0 %v15416_v9  ;;  %6958 = vmatpush1.bf16.msra.mxu1 %v15418_v11  ;;  %v1007_v9 = vld [vmem:[#allocation5 + $0x1a40] sm:$0xff] }
 0x20b   :  { %6615 = vmatprep.subr.bf16.mxu0 %v15425_v12  ;;  %6959 = vmatprep.subr.bf16.mxu1 %v15427_v17  ;;  %v1011_v11 = vld [vmem:[#allocation5 + $0x1a60] sm:$0xff]  ;;  %v1008_v12 = vld [vmem:[#allocation5 + $0x1a48] sm:$0xff]  ;;  %v15474_v17 = vcombine.low %v1000_v1, %v1004_v4 }
 0x20c   :  { %v15481_v18 = vcombine.high %v1007_v9, %v1011_v11  ;;  %v15483_v22 = vcombine.high %v1008_v12, %v1012_v14  ;;  %v15480_v24 = vcombine.low %v1007_v9, %v1011_v11  ;;  %v1060_v11 = vld [vmem:[#allocation5 + $0x1be8] sm:$0xff] }
 0x20e   :  { %6616 = vmatpush1.bf16.msra.mxu0 %v15424_v19  ;;  %6960 = vmatpush1.bf16.msra.mxu1 %v15426_v20  ;;  %v1015_v19 = vld [vmem:[#allocation5 + $0x1a80] sm:$0xff] }
 0x20f   :  { %6617 = vmatprep.subr.bf16.mxu0 %v15433_v21  ;;  %6961 = vmatprep.subr.bf16.mxu1 %v15435_v26  ;;  %v1019_v20 = vld [vmem:[#allocation5 + $0x1aa0] sm:$0xff]  ;;  %v1016_v21 = vld [vmem:[#allocation5 + $0x1a88] sm:$0xff]  ;;  %v15482_v26 = vcombine.low %v1008_v12, %v1012_v14 }
 0x210   :  { %v15489_v27 = vcombine.high %v1015_v19, %v1019_v20  ;;  %v15491_v33 = vcombine.high %v1016_v21, %v1020_v23  ;;  %v15488_v35 = vcombine.low %v1015_v19, %v1019_v20  ;;  %v1068_v19 = vld [vmem:[#allocation5 + $0x1c28] sm:$0xff] }
 0x212   :  { %6618 = vmatpush1.bf16.msra.mxu0 %v15432_v28  ;;  %6962 = vmatpush1.bf16.msra.mxu1 %v15434_v31  ;;  %v1023_v28 = vld [vmem:[#allocation5 + $0x1ac0] sm:$0xff] }
 0x213   :  { %6619 = vmatprep.subr.bf16.mxu0 %v15441_v32  ;;  %6963 = vmatprep.subr.bf16.mxu1 %v15443_v36  ;;  %v1027_v31 = vld [vmem:[#allocation5 + $0x1ae0] sm:$0xff]  ;;  %v1024_v32 = vld [vmem:[#allocation5 + $0x1ac8] sm:$0xff]  ;;  %v15490_v36 = vcombine.low %v1016_v21, %v1020_v23 }
 0x214   :  { %v15497_v39 = vcombine.high %v1023_v28, %v1027_v31  ;;  %v15499_v43 = vcombine.high %v1024_v32, %v1028_v34  ;;  %v15496_v45 = vcombine.low %v1023_v28, %v1027_v31  ;;  %v131_v21 = vld [vmem:[#allocation2 + $0x60] sm:$0xff]  ;;  %v1072_v31 = vld [vmem:[#allocation5 + $0x1c48] sm:$0xff] }
 0x216   :  { %6620 = vmatpush1.bf16.msra.mxu0 %v15440_v40  ;;  %6964 = vmatpush1.bf16.msra.mxu1 %v15442_v41  ;;  %v1031_v40 = vld [vmem:[#allocation5 + $0x1b00] sm:$0xff] }
 0x217   :  { %6621 = vmatprep.subr.bf16.mxu0 %v15449_v42  ;;  %6965 = vmatprep.subr.bf16.mxu1 %v15451_v47  ;;  %v1035_v41 = vld [vmem:[#allocation5 + $0x1b20] sm:$0xff]  ;;  %v1032_v42 = vld [vmem:[#allocation5 + $0x1b08] sm:$0xff]  ;;  %v15498_v47 = vcombine.low %v1024_v32, %v1028_v34 }
 0x218   :  { %v15505_v48 = vcombine.high %v1031_v40, %v1035_v41  ;;  %v15507_v52 = vcombine.high %v1032_v42, %v1036_v44  ;;  %v15504_v55 = vcombine.low %v1031_v40, %v1035_v41  ;;  %v1076_v32 = vld [vmem:[#allocation5 + $0x1c68] sm:$0xff] }
 0x21a   :  { %6622 = vmatpush1.bf16.msra.mxu0 %v15448_v49  ;;  %6966 = vmatpush1.bf16.msra.mxu1 %v15450_v50  ;;  %v1039_v49 = vld [vmem:[#allocation5 + $0x1b40] sm:$0xff] }
 0x21b   :  { %6623 = vmatprep.subr.bf16.mxu0 %v15457_v51  ;;  %6967 = vmatprep.subr.bf16.mxu1 %v15459_v56  ;;  %v1043_v50 = vld [vmem:[#allocation5 + $0x1b60] sm:$0xff]  ;;  %v1040_v51 = vld [vmem:[#allocation5 + $0x1b48] sm:$0xff]  ;;  %v15506_v56 = vcombine.low %v1032_v42, %v1036_v44 }
 0x21c   :  { %v15513_v57 = vcombine.high %v1039_v49, %v1043_v50  ;;  %v15515_v63 = vcombine.high %v1040_v51, %v1044_v54  ;;  %v15512_v1 = vcombine.low %v1039_v49, %v1043_v50  ;;  %v1079_v42 = vld [vmem:[#allocation5 + $0x1c80] sm:$0xff]  ;;  %v1080_v44 = vld [vmem:[#allocation5 + $0x1c88] sm:$0xff]  ;;  %v15546_v50 = vcombine.low %v1072_v31, %v1076_v32 }
 0x21e   :  { %6624 = vmatpush1.bf16.msra.mxu0 %v15456_v59  ;;  %6968 = vmatpush1.bf16.msra.mxu1 %v15458_v60  ;;  %v1047_v59 = vld [vmem:[#allocation5 + $0x1b80] sm:$0xff] }
 0x21f   :  { %6625 = vmatprep.subr.bf16.mxu0 %v15465_v61  ;;  %6969 = vmatprep.subr.bf16.mxu1 %v15467_v2  ;;  %v1051_v60 = vld [vmem:[#allocation5 + $0x1ba0] sm:$0xff]  ;;  %v1048_v61 = vld [vmem:[#allocation5 + $0x1b88] sm:$0xff]  ;;  %v15514_v2 = vcombine.low %v1040_v51, %v1044_v54 }
 0x220   :  { %v15521_v4 = vcombine.high %v1047_v59, %v1051_v60  ;;  %v15523_v9 = vcombine.high %v1048_v61, %v1052_v0  ;;  %v15520_v12 = vcombine.low %v1047_v59, %v1051_v60  ;;  %v15522_v14 = vcombine.low %v1048_v61, %v1052_v0  ;;  %v1091_v54 = vld [vmem:[#allocation5 + $0x1ce0] sm:$0xff] }
 0x221   :  { %v1099_v0 = vld [vmem:[#allocation5 + $0x1d20] sm:$0xff] }
 0x222   :  { %6626 = vmatpush1.bf16.msra.mxu0 %v15464_v5  ;;  %6970 = vmatpush1.bf16.msra.mxu1 %v15466_v6  ;;  %v1055_v5 = vld [vmem:[#allocation5 + $0x1bc0] sm:$0xff] }
 0x223   :  { %6627 = vmatprep.subr.bf16.mxu0 %v15473_v7  ;;  %6971 = vmatprep.subr.bf16.mxu1 %v15475_v13  ;;  %v1059_v6 = vld [vmem:[#allocation5 + $0x1be0] sm:$0xff]  ;;  %v1056_v7 = vld [vmem:[#allocation5 + $0x1bc8] sm:$0xff] }
 0x224   :  { %v1063_v13 = vld [vmem:[#allocation5 + $0x1c00] sm:$0xff]  ;;  %v15531_v20 = vcombine.high %v1056_v7, %v1060_v11  ;;  %v15528_v23 = vcombine.low %v1055_v5, %v1059_v6 }
 0x226   :  { %6628 = vmatpush1.bf16.msra.mxu0 %v15472_v16  ;;  %6972 = vmatpush1.bf16.msra.mxu1 %v15474_v17  ;;  %v15529_v16 = vcombine.high %v1055_v5, %v1059_v6  ;;  %v1067_v17 = vld [vmem:[#allocation5 + $0x1c20] sm:$0xff] }
 0x227   :  { %6629 = vmatprep.subr.bf16.mxu0 %v15481_v18  ;;  %6973 = vmatprep.subr.bf16.mxu1 %v15483_v22  ;;  %v1064_v18 = vld [vmem:[#allocation5 + $0x1c08] sm:$0xff]  ;;  %v147_v22 = vld [vmem:[#allocation2 + $0xe0] sm:$0xff]  ;;  %v15537_v28 = vcombine.high %v1063_v13, %v1067_v17 }
 0x228   :  { %v15539_v34 = vcombine.high %v1064_v18, %v1068_v19  ;;  %v15538_v40 = vcombine.low %v1064_v18, %v1068_v19  ;;  %v1111_v19 = vld [vmem:[#allocation5 + $0x1d80] sm:$0xff] }
 0x22a   :  { %6630 = vmatpush1.bf16.msra.mxu0 %v15480_v24  ;;  %6974 = vmatpush1.bf16.msra.mxu1 %v15482_v26  ;;  %v1071_v24 = vld [vmem:[#allocation5 + $0x1c40] sm:$0xff] }
 0x22b   :  { %6631 = vmatprep.subr.bf16.mxu0 %v15489_v27  ;;  %6975 = vmatprep.subr.bf16.mxu1 %v15491_v33  ;;  %v1075_v26 = vld [vmem:[#allocation5 + $0x1c60] sm:$0xff]  ;;  %v15530_v27 = vcombine.low %v1056_v7, %v1060_v11  ;;  %v134_v33 = vld [vmem:[#allocation2 + $0x78] sm:$0xff] }
 0x22c   :  { %v15545_v41 = vcombine.high %v1071_v24, %v1075_v26  ;;  %v15544_v49 = vcombine.low %v1071_v24, %v1075_v26  ;;  %v1107_v11 = vld [vmem:[#allocation5 + $0x1d60] sm:$0xff] }
 0x22e   :  { %6632 = vmatpush1.bf16.msra.mxu0 %v15488_v35  ;;  %6976 = vmatpush1.bf16.msra.mxu1 %v15490_v36  ;;  %v150_v35 = vld [vmem:[#allocation2 + $0xf8] sm:$0xff]  ;;  %v18538_v36 = vpack.c.bf16 %v147_v22, %v131_v21  ;;  %v1112_v21 = vld [vmem:[#allocation5 + $0x1d88] sm:$0xff] }
 0x22f   :  { %6633 = vmatprep.subr.bf16.mxu0 %v15497_v39  ;;  %6977 = vmatprep.subr.bf16.mxu1 %v15499_v43  ;;  %v15536_v39 = vcombine.low %v1063_v13, %v1067_v17  ;;  %v1083_v43 = vld [vmem:[#allocation5 + $0x1ca0] sm:$0xff] }
 0x230   :  { %v15553_v51 = vcombine.high %v1079_v42, %v1083_v43  ;;  %v15552_v59 = vcombine.low %v1079_v42, %v1083_v43  ;;  %v1131_v42 = vld [vmem:[#allocation5 + $0x1e20] sm:$0xff]  ;;  %v1128_v43 = vld [vmem:[#allocation5 + $0x1e08] sm:$0xff] }
 0x232   :  { %6634 = vmatpush1.bf16.msra.mxu0 %v15496_v45  ;;  %6978 = vmatpush1.bf16.msra.mxu1 %v15498_v47  ;;  %v15547_v45 = vcombine.high %v1072_v31, %v1076_v32  ;;  %v1084_v47 = vld [vmem:[#allocation5 + $0x1ca8] sm:$0xff]  ;;  %v1123_v31 = vld [vmem:[#allocation5 + $0x1de0] sm:$0xff] }
 0x233   :  { %6635 = vmatprep.subr.bf16.mxu0 %v15505_v48  ;;  %6979 = vmatprep.subr.bf16.mxu1 %v15507_v52  ;;  %v18540_v48 = vpack.c.bf16 %v150_v35, %v134_v33  ;;  %v1087_v52 = vld [vmem:[#allocation5 + $0x1cc0] sm:$0xff]  ;;  %v15554_v60 = vcombine.low %v1080_v44, %v1084_v47  ;;  %v1120_v32 = vld [vmem:[#allocation5 + $0x1dc8] sm:$0xff] }
 0x234   :  { %v15561_v61 = vcombine.high %v1087_v52, %v1091_v54  ;;  %v15560_v5 = vcombine.low %v1087_v52, %v1091_v54  ;;  %v1139_v52 = vld [vmem:[#allocation5 + $0x1e60] sm:$0xff]  ;;  %v1136_v54 = vld [vmem:[#allocation5 + $0x1e48] sm:$0xff] }
 0x236   :  { %6636 = vmatpush1.bf16.msra.mxu0 %v15504_v55  ;;  %6980 = vmatpush1.bf16.msra.mxu1 %v15506_v56  ;;  %v1088_v55 = vld [vmem:[#allocation5 + $0x1cc8] sm:$0xff]  ;;  %v15555_v56 = vcombine.high %v1080_v44, %v1084_v47 }
 0x237   :  { %6637 = vmatprep.subr.bf16.mxu0 %v15513_v57  ;;  %6981 = vmatprep.subr.bf16.mxu1 %v15515_v63  ;;  %v1092_v57 = vld [vmem:[#allocation5 + $0x1ce8] sm:$0xff]  ;;  %v1095_v63 = vld [vmem:[#allocation5 + $0x1d00] sm:$0xff] }
 0x238   :  { %v15562_v6 = vcombine.low %v1088_v55, %v1092_v57  ;;  %v15569_v7 = vcombine.high %v1095_v63, %v1099_v0 }
 0x23a   :  { %6638 = vmatpush1.bf16.msra.mxu0 %v15512_v1  ;;  %6982 = vmatpush1.bf16.msra.mxu1 %v15514_v2  ;;  %v1096_v1 = vld [vmem:[#allocation5 + $0x1d08] sm:$0xff]  ;;  %v15563_v2 = vcombine.high %v1088_v55, %v1092_v57 }
 0x23b   :  { %6639 = vmatprep.subr.bf16.mxu0 %v15521_v4  ;;  %6983 = vmatprep.subr.bf16.mxu1 %v15523_v9  ;;  %v1100_v4 = vld [vmem:[#allocation5 + $0x1d28] sm:$0xff]  ;;  %v1103_v9 = vld [vmem:[#allocation5 + $0x1d40] sm:$0xff] }
 0x23c   :  { %v15571_v13 = vcombine.high %v1096_v1, %v1100_v4  ;;  %v15570_v17 = vcombine.low %v1096_v1, %v1100_v4  ;;  %v15577_v18 = vcombine.high %v1103_v9, %v1107_v11  ;;  %v15576_v24 = vcombine.low %v1103_v9, %v1107_v11  ;;  %v1155_v9 = vld [vmem:[#allocation5 + $0x1ee0] sm:$0xff]  ;;  %v1152_v11 = vld [vmem:[#allocation5 + $0x1ec8] sm:$0xff] }
 0x23e   :  { %6640 = vmatpush1.bf16.msra.mxu0 %v15520_v12  ;;  %6984 = vmatpush1.bf16.msra.mxu1 %v15522_v14  ;;  %v1104_v12 = vld [vmem:[#allocation5 + $0x1d48] sm:$0xff] }
 0x23f   :  { %6641 = vmatprep.subr.bf16.mxu0 %v15529_v16  ;;  %6985 = vmatprep.subr.bf16.mxu1 %v15531_v20  ;;  %v1108_v14 = vld [vmem:[#allocation5 + $0x1d68] sm:$0xff]  ;;  %v15568_v16 = vcombine.low %v1095_v63, %v1099_v0  ;;  %v1115_v20 = vld [vmem:[#allocation5 + $0x1da0] sm:$0xff] }
 0x240   :  { %v15579_v22 = vcombine.high %v1104_v12, %v1108_v14  ;;  %v15578_v26 = vcombine.low %v1104_v12, %v1108_v14  ;;  %v15584_v35 = vcombine.low %v1111_v19, %v1115_v20  ;;  %v1147_v63 = vld [vmem:[#allocation5 + $0x1ea0] sm:$0xff]  ;;  %v1144_v0 = vld [vmem:[#allocation5 + $0x1e88] sm:$0xff] }
 0x242   :  { %6642 = vmatpush1.bf16.msra.mxu0 %v15528_v23  ;;  %6986 = vmatpush1.bf16.msra.mxu1 %v15530_v27  ;;  %v1116_v23 = vld [vmem:[#allocation5 + $0x1da8] sm:$0xff]  ;;  %v15585_v27 = vcombine.high %v1111_v19, %v1115_v20  ;;  %v1163_v19 = vld [vmem:[#allocation5 + $0x1f20] sm:$0xff] }
 0x243   :  { %6654 = vmatprep.subr.bf16.mxu0 %v15537_v28  ;;  %6998 = vmatprep.subr.bf16.mxu1 %v15539_v34  ;;  %v1119_v28 = vld [vmem:[#allocation5 + $0x1dc0] sm:$0xff]  ;;  %v15587_v33 = vcombine.high %v1112_v21, %v1116_v23  ;;  %v1124_v34 = vld [vmem:[#allocation5 + $0x1de8] sm:$0xff] }
 0x244   :  { %v15595_v44 = vcombine.high %v1120_v32, %v1124_v34  ;;  %v15592_v47 = vcombine.low %v1119_v28, %v1123_v31  ;;  %v1160_v20 = vld [vmem:[#allocation5 + $0x1f08] sm:$0xff] }
 0x245   :  { %6644 = vmatmul.mubr.bf16.vlgmr.msra.gmra.mrb[0].mxu0 %v18538_v36  ;;  %6988 = vmatmul.mubr.bf16.vlgmr.msra.gmra.mrb[0].mxu1 %v18538_v36 }
 0x246   :  { %6655 = vmatpush1.bf16.msra.mxu0 %v15536_v39  ;;  %6999 = vmatpush1.bf16.msra.mxu1 %v15538_v40  ;;  %v15586_v39 = vcombine.low %v1112_v21, %v1116_v23  ;;  %v15593_v40 = vcombine.high %v1119_v28, %v1123_v31  ;;  %v1171_v28 = vld [vmem:[#allocation5 + $0x1f60] sm:$0xff]  ;;  %v1168_v31 = vld [vmem:[#allocation5 + $0x1f48] sm:$0xff] }
 0x247   :  { %6656 = vmatprep.subr.bf16.mxu0 %v15545_v41  ;;  %7000 = vmatprep.subr.bf16.mxu1 %v15547_v45  ;;  %v1127_v41 = vld [vmem:[#allocation5 + $0x1e00] sm:$0xff]  ;;  %v1132_v45 = vld [vmem:[#allocation5 + $0x1e28] sm:$0xff] }
 0x248   :  { %6686 = vmatprep.mubr.bf16.mxu0 %v18540_v48  ;;  %7030 = vmatprep.mubr.bf16.mxu1 %v18540_v48  ;;  %v15603_v55 = vcombine.high %v1128_v43, %v1132_v45  ;;  %v15600_v57 = vcombine.low %v1127_v41, %v1131_v42 }
 0x24a   :  { %6657 = vmatpush1.bf16.msra.mxu0 %v15544_v49  ;;  %7001 = vmatpush1.bf16.msra.mxu1 %v15546_v50  ;;  %v15594_v49 = vcombine.low %v1120_v32, %v1124_v34  ;;  %v15601_v50 = vcombine.high %v1127_v41, %v1131_v42  ;;  %v1179_v41 = vld [vmem:[#allocation5 + $0x1fa0] sm:$0xff]  ;;  %v1176_v42 = vld [vmem:[#allocation5 + $0x1f88] sm:$0xff] }
 0x24b   :  { %6658 = vmatprep.subr.bf16.mxu0 %v15553_v51  ;;  %7002 = vmatprep.subr.bf16.mxu1 %v15555_v56  ;;  %v1135_v51 = vld [vmem:[#allocation5 + $0x1e40] sm:$0xff]  ;;  %v1140_v56 = vld [vmem:[#allocation5 + $0x1e68] sm:$0xff] }
 0x24c   :  { %v15611_v1 = vcombine.high %v1136_v54, %v1140_v56  ;;  %v15608_v4 = vcombine.low %v1135_v51, %v1139_v52 }
 0x24e   :  { %6659 = vmatpush1.bf16.msra.mxu0 %v15552_v59  ;;  %7003 = vmatpush1.bf16.msra.mxu1 %v15554_v60  ;;  %v15602_v59 = vcombine.low %v1128_v43, %v1132_v45  ;;  %v15609_v60 = vcombine.high %v1135_v51, %v1139_v52  ;;  %v1187_v51 = vld [vmem:[#allocation5 + $0x1fe0] sm:$0xff]  ;;  %v1184_v52 = vld [vmem:[#allocation5 + $0x1fc8] sm:$0xff] }
 0x24f   :  { %6660 = vmatprep.subr.bf16.mxu0 %v15561_v61  ;;  %7004 = vmatprep.subr.bf16.mxu1 %v15563_v2  ;;  %v1143_v61 = vld [vmem:[#allocation5 + $0x1e80] sm:$0xff]  ;;  %v1148_v2 = vld [vmem:[#allocation5 + $0x1ea8] sm:$0xff] }
 0x250   :  { %v15619_v12 = vcombine.high %v1144_v0, %v1148_v2  ;;  %v15616_v14 = vcombine.low %v1143_v61, %v1147_v63 }
 0x252   :  { %6661 = vmatpush1.bf16.msra.mxu0 %v15560_v5  ;;  %7005 = vmatpush1.bf16.msra.mxu1 %v15562_v6  ;;  %v15610_v5 = vcombine.low %v1136_v54, %v1140_v56  ;;  %v15617_v6 = vcombine.high %v1143_v61, %v1147_v63  ;;  %v173_v61 = vld [vmem:[#allocation5 + $0x30] sm:$0xff]  ;;  %v170_v63 = vld [vmem:[#allocation5 + $0x18] sm:$0xff] }
 0x253   :  { %6662 = vmatprep.subr.bf16.mxu0 %v15569_v7  ;;  %7006 = vmatprep.subr.bf16.mxu1 %v15571_v13  ;;  %v1151_v7 = vld [vmem:[#allocation5 + $0x1ec0] sm:$0xff]  ;;  %v1156_v13 = vld [vmem:[#allocation5 + $0x1ee8] sm:$0xff] }
 0x254   :  { %v15627_v21 = vcombine.high %v1152_v11, %v1156_v13  ;;  %v15624_v23 = vcombine.low %v1151_v7, %v1155_v9 }
 0x256   :  { %6663 = vmatpush1.bf16.msra.mxu0 %v15568_v16  ;;  %7007 = vmatpush1.bf16.msra.mxu1 %v15570_v17  ;;  %v15618_v16 = vcombine.low %v1144_v0, %v1148_v2  ;;  %v15625_v17 = vcombine.high %v1151_v7, %v1155_v9  ;;  %v149_v2 = vld [vmem:[#allocation2 + $0xf0] sm:$0xff] }
 0x257   :  { %6664 = vmatprep.subr.bf16.mxu0 %v15577_v18  ;;  %7008 = vmatprep.subr.bf16.mxu1 %v15579_v22  ;;  %v1159_v18 = vld [vmem:[#allocation5 + $0x1f00] sm:$0xff]  ;;  %v1164_v22 = vld [vmem:[#allocation5 + $0x1f28] sm:$0xff]  ;;  %v177_v9 = vld [vmem:[#allocation5 + $0x50] sm:$0xff] }
 0x258   :  { %v15635_v32 = vcombine.high %v1160_v20, %v1164_v22  ;;  %v15632_v34 = vcombine.low %v1159_v18, %v1163_v19 }
 0x25a   :  { %6665 = vmatpush1.bf16.msra.mxu0 %v15576_v24  ;;  %7009 = vmatpush1.bf16.msra.mxu1 %v15578_v26  ;;  %v15626_v24 = vcombine.low %v1152_v11, %v1156_v13  ;;  %v15633_v26 = vcombine.high %v1159_v18, %v1163_v19  ;;  %v181_v11 = vld [vmem:[#allocation5 + $0x70] sm:$0xff] }
 0x25b   :  { %6666 = vmatprep.subr.bf16.mxu0 %v15585_v27  ;;  %7010 = vmatprep.subr.bf16.mxu1 %v15587_v33  ;;  %v1167_v27 = vld [vmem:[#allocation5 + $0x1f40] sm:$0xff]  ;;  %v1172_v33 = vld [vmem:[#allocation5 + $0x1f68] sm:$0xff]  ;;  %v14653_v19 = vcombine.high %v177_v9, %v181_v11 }
 0x25c   :  { %v15643_v43 = vcombine.high %v1168_v31, %v1172_v33  ;;  %v15640_v45 = vcombine.low %v1167_v27, %v1171_v28 }
 0x25e   :  { %6667 = vmatpush1.bf16.msra.mxu0 %v15584_v35  ;;  %7011 = vmatpush1.bf16.msra.mxu1 %v15586_v39  ;;  %v15634_v35 = vcombine.low %v1160_v20, %v1164_v22  ;;  %v15641_v39 = vcombine.high %v1167_v27, %v1171_v28  ;;  %v185_v20 = vld [vmem:[#allocation5 + $0x90] sm:$0xff]  ;;  %v186_v22 = vld [vmem:[#allocation5 + $0x98] sm:$0xff] }
 0x25f   :  { %6668 = vmatprep.subr.bf16.mxu0 %v15593_v40  ;;  %7012 = vmatprep.subr.bf16.mxu1 %v15595_v44  ;;  %v1175_v40 = vld [vmem:[#allocation5 + $0x1f80] sm:$0xff]  ;;  %v1180_v44 = vld [vmem:[#allocation5 + $0x1fa8] sm:$0xff] }
 0x260   :  { %v15651_v54 = vcombine.high %v1176_v42, %v1180_v44  ;;  %v15648_v56 = vcombine.low %v1175_v40, %v1179_v41 }
 0x262   :  { %6669 = vmatpush1.bf16.msra.mxu0 %v15592_v47  ;;  %7013 = vmatpush1.bf16.msra.mxu1 %v15594_v49  ;;  %v15642_v47 = vcombine.low %v1168_v31, %v1172_v33  ;;  %v15649_v49 = vcombine.high %v1175_v40, %v1179_v41  ;;  %v193_v31 = vld [vmem:[#allocation5 + $0xd0] sm:$0xff]  ;;  %v194_v33 = vld [vmem:[#allocation5 + $0xd8] sm:$0xff] }
 0x263   :  { %6670 = vmatprep.subr.bf16.mxu0 %v15601_v50  ;;  %7014 = vmatprep.subr.bf16.mxu1 %v15603_v55  ;;  %v1183_v50 = vld [vmem:[#allocation5 + $0x1fc0] sm:$0xff]  ;;  %v1188_v55 = vld [vmem:[#allocation5 + $0x1fe8] sm:$0xff] }
 0x264   :  { %v15659_v0 = vcombine.high %v1184_v52, %v1188_v55 }
 0x266   :  { %6671 = vmatpush1.bf16.msra.mxu0 %v15600_v57  ;;  %7015 = vmatpush1.bf16.msra.mxu1 %v15602_v59  ;;  %v15650_v57 = vcombine.low %v1176_v42, %v1180_v44  ;;  %v15657_v59 = vcombine.high %v1183_v50, %v1187_v51  ;;  %v201_v42 = vld [vmem:[#allocation5 + $0x110] sm:$0xff]  ;;  %v202_v44 = vld [vmem:[#allocation5 + $0x118] sm:$0xff] }
 0x267   :  { %6672 = vmatprep.subr.bf16.mxu0 %v15609_v60  ;;  %7016 = vmatprep.subr.bf16.mxu1 %v15611_v1  ;;  %v169_v60 = vld [vmem:[#allocation5 + $0x10] sm:$0xff] }
 0x268   :  { %v133_v1 = vld [vmem:[#allocation2 + $0x70] sm:$0xff]  ;;  %v14645_v7 = vcombine.high %v169_v60, %v173_v61 }
 0x26a   :  { %6673 = vmatpush1.bf16.msra.mxu0 %v15608_v4  ;;  %7017 = vmatpush1.bf16.msra.mxu1 %v15610_v5  ;;  %v174_v4 = vld [vmem:[#allocation5 + $0x38] sm:$0xff]  ;;  %v15656_v5 = vcombine.low %v1183_v50, %v1187_v51 }
 0x26b   :  { %6674 = vmatprep.subr.bf16.mxu0 %v15617_v6  ;;  %7018 = vmatprep.subr.bf16.mxu1 %v15619_v12  ;;  %v15658_v6 = vcombine.low %v1184_v52, %v1188_v55  ;;  %v178_v12 = vld [vmem:[#allocation5 + $0x58] sm:$0xff]  ;;  %v14647_v13 = vcombine.high %v170_v63, %v174_v4  ;;  %v14646_v18 = vcombine.low %v170_v63, %v174_v4  ;;  %v209_v52 = vld [vmem:[#allocation5 + $0x150] sm:$0xff] }
 0x26c   :  { %v221_v63 = vld [vmem:[#allocation5 + $0x1b0] sm:$0xff] }
 0x26e   :  { %6675 = vmatpush1.bf16.msra.mxu0 %v15616_v14  ;;  %7019 = vmatpush1.bf16.msra.mxu1 %v15618_v16  ;;  %v182_v14 = vld [vmem:[#allocation5 + $0x78] sm:$0xff]  ;;  %v18546_v16 = vpack.c.bf16 %v149_v2, %v133_v1 }
 0x26f   :  { %6676 = vmatprep.subr.bf16.mxu0 %v15625_v17  ;;  %7020 = vmatprep.subr.bf16.mxu1 %v15627_v21  ;;  %v14644_v17 = vcombine.low %v169_v60, %v173_v61  ;;  %v189_v21 = vld [vmem:[#allocation5 + $0xb0] sm:$0xff]  ;;  %v14654_v27 = vcombine.low %v178_v12, %v182_v14  ;;  %v222_v2 = vld [vmem:[#allocation5 + $0x1b8] sm:$0xff] }
 0x270   :  { %v14661_v28 = vcombine.high %v185_v20, %v189_v21  ;;  %v217_v61 = vld [vmem:[#allocation5 + $0x190] sm:$0xff] }
 0x272   :  { %6677 = vmatpush1.bf16.msra.mxu0 %v15624_v23  ;;  %7021 = vmatpush1.bf16.msra.mxu1 %v15626_v24  ;;  %v14655_v23 = vcombine.high %v178_v12, %v182_v14  ;;  %v190_v24 = vld [vmem:[#allocation5 + $0xb8] sm:$0xff]  ;;  %v14692_v14 = vcombine.low %v217_v61, %v221_v63 }
 0x273   :  { %6678 = vmatprep.subr.bf16.mxu0 %v15633_v26  ;;  %7022 = vmatprep.subr.bf16.mxu1 %v15635_v32  ;;  %v14652_v26 = vcombine.low %v177_v9, %v181_v11  ;;  %v197_v32 = vld [vmem:[#allocation5 + $0xf0] sm:$0xff]  ;;  %v14662_v40 = vcombine.low %v186_v22, %v190_v24  ;;  %v226_v11 = vld [vmem:[#allocation5 + $0x1d8] sm:$0xff] }
 0x274   :  { %v14669_v41 = vcombine.high %v193_v31, %v197_v32  ;;  %v229_v9 = vld [vmem:[#allocation5 + $0x1f0] sm:$0xff] }
 0x276   :  { %6679 = vmatpush1.bf16.msra.mxu0 %v15632_v34  ;;  %7023 = vmatpush1.bf16.msra.mxu1 %v15634_v35  ;;  %v14663_v34 = vcombine.high %v186_v22, %v190_v24  ;;  %v198_v35 = vld [vmem:[#allocation5 + $0xf8] sm:$0xff] }
 0x277   :  { %6680 = vmatprep.subr.bf16.mxu0 %v15641_v39  ;;  %7024 = vmatprep.subr.bf16.mxu1 %v15643_v43  ;;  %v14660_v39 = vcombine.low %v185_v20, %v189_v21  ;;  %v205_v43 = vld [vmem:[#allocation5 + $0x130] sm:$0xff]  ;;  %v14670_v50 = vcombine.low %v194_v33, %v198_v35  ;;  %v234_v21 = vld [vmem:[#allocation5 + $0x218] sm:$0xff] }
 0x278   :  { %v14677_v51 = vcombine.high %v201_v42, %v205_v43  ;;  %v237_v20 = vld [vmem:[#allocation5 + $0x230] sm:$0xff] }
 0x27a   :  { %6681 = vmatpush1.bf16.msra.mxu0 %v15640_v45  ;;  %7025 = vmatpush1.bf16.msra.mxu1 %v15642_v47  ;;  %v14671_v45 = vcombine.high %v194_v33, %v198_v35  ;;  %v206_v47 = vld [vmem:[#allocation5 + $0x138] sm:$0xff] }
 0x27b   :  { %6682 = vmatprep.subr.bf16.mxu0 %v15649_v49  ;;  %7026 = vmatprep.subr.bf16.mxu1 %v15651_v54  ;;  %v14668_v49 = vcombine.low %v193_v31, %v197_v32  ;;  %v210_v54 = vld [vmem:[#allocation5 + $0x158] sm:$0xff]  ;;  %v14679_v55 = vcombine.high %v202_v44, %v206_v47  ;;  %v245_v31 = vld [vmem:[#allocation5 + $0x270] sm:$0xff] }
 0x27c   :  { %v242_v32 = vld [vmem:[#allocation5 + $0x258] sm:$0xff] }
 0x27e   :  { %6683 = vmatpush1.bf16.msra.mxu0 %v15648_v56  ;;  %7027 = vmatpush1.bf16.msra.mxu1 %v15650_v57  ;;  %v214_v56 = vld [vmem:[#allocation5 + $0x178] sm:$0xff]  ;;  %v14676_v57 = vcombine.low %v201_v42, %v205_v43  ;;  %v253_v42 = vld [vmem:[#allocation5 + $0x2b0] sm:$0xff] }
 0x27f   :  { %6684 = vmatprep.subr.bf16.mxu0 %v15657_v59  ;;  %7028 = vmatprep.subr.bf16.mxu1 %v15659_v0  ;;  %v14678_v59 = vcombine.low %v202_v44, %v206_v47  ;;  %v218_v0 = vld [vmem:[#allocation5 + $0x198] sm:$0xff]  ;;  %v14687_v1 = vcombine.high %v210_v54, %v214_v56 }
 0x280   :  { %v14695_v12 = vcombine.high %v218_v0, %v222_v2  ;;  %v250_v43 = vld [vmem:[#allocation5 + $0x298] sm:$0xff] }
 0x282   :  { %6685 = vmatpush1.bf16.msra.mxu0 %v15656_v5  ;;  %7029 = vmatpush1.bf16.msra.mxu1 %v15658_v6  ;;  %v14686_v5 = vcombine.low %v210_v54, %v214_v56  ;;  %v14693_v6 = vcombine.high %v217_v61, %v221_v63  ;;  %v269_v61 = vld [vmem:[#allocation5 + $0x330] sm:$0xff]  ;;  %v266_v63 = vld [vmem:[#allocation5 + $0x318] sm:$0xff] }
 0x283   :  { %7041 = vmatprep.subr.bf16.mxu0 %v14645_v7  ;;  %7385 = vmatprep.subr.bf16.mxu1 %v14647_v13  ;;  %v225_v7 = vld [vmem:[#allocation5 + $0x1d0] sm:$0xff]  ;;  %v230_v13 = vld [vmem:[#allocation5 + $0x1f8] sm:$0xff] }
 0x284   :  { %v14703_v22 = vcombine.high %v226_v11, %v230_v13  ;;  %v14700_v24 = vcombine.low %v225_v7, %v229_v9 }
 0x285   :  { %6687 = vmatmul.mubr.bf16.vlgmr.msra.gmra.mrb[0].mxu0 %v18546_v16  ;;  %7031 = vmatmul.mubr.bf16.vlgmr.msra.gmra.mrb[0].mxu1 %v18546_v16 }
 0x286   :  { %7042 = vmatpush1.bf16.msra.mxu0 %v14644_v17  ;;  %7386 = vmatpush1.bf16.msra.mxu1 %v14646_v18  ;;  %v14694_v17 = vcombine.low %v218_v0, %v222_v2  ;;  %v14701_v18 = vcombine.high %v225_v7, %v229_v9  ;;  %v277_v7 = vld [vmem:[#allocation5 + $0x370] sm:$0xff]  ;;  %v274_v9 = vld [vmem:[#allocation5 + $0x358] sm:$0xff] }
 0x287   :  { %7043 = vmatprep.subr.bf16.mxu0 %v14653_v19  ;;  %7387 = vmatprep.subr.bf16.mxu1 %v14655_v23  ;;  %v233_v19 = vld [vmem:[#allocation5 + $0x210] sm:$0xff]  ;;  %v238_v23 = vld [vmem:[#allocation5 + $0x238] sm:$0xff] }
 0x288   :  { %7073 = vmatprep.mubr.bf16.mxu0 %v18486_v58  ;;  %7417 = vmatprep.mubr.bf16.mxu1 %v18486_v58  ;;  %v213_v58 = vld [vmem:[#allocation5 + $0x170] sm:$0xff]  ;;  %v14711_v33 = vcombine.high %v234_v21, %v238_v23  ;;  %v14708_v35 = vcombine.low %v233_v19, %v237_v20 }
 0x289   :  { %v14685_v60 = vcombine.high %v209_v52, %v213_v58  ;;  %v14684_v4 = vcombine.low %v209_v52, %v213_v58  ;;  %v261_v52 = vld [vmem:[#allocation5 + $0x2f0] sm:$0xff]  ;;  %v258_v58 = vld [vmem:[#allocation5 + $0x2d8] sm:$0xff] }
 0x28a   :  { %7044 = vmatpush1.bf16.msra.mxu0 %v14652_v26  ;;  %7388 = vmatpush1.bf16.msra.mxu1 %v14654_v27  ;;  %v14702_v26 = vcombine.low %v226_v11, %v230_v13  ;;  %v14709_v27 = vcombine.high %v233_v19, %v237_v20  ;;  %v281_v19 = vld [vmem:[#allocation5 + $0x390] sm:$0xff] }
 0x28b   :  { %7045 = vmatprep.subr.bf16.mxu0 %v14661_v28  ;;  %7389 = vmatprep.subr.bf16.mxu1 %v14663_v34  ;;  %v241_v28 = vld [vmem:[#allocation5 + $0x250] sm:$0xff]  ;;  %v246_v34 = vld [vmem:[#allocation5 + $0x278] sm:$0xff] }
 0x28c   :  { %v14719_v44 = vcombine.high %v242_v32, %v246_v34  ;;  %v14716_v47 = vcombine.low %v241_v28, %v245_v31  ;;  %v285_v20 = vld [vmem:[#allocation5 + $0x3b0] sm:$0xff] }
 0x28e   :  { %7046 = vmatpush1.bf16.msra.mxu0 %v14660_v39  ;;  %7390 = vmatpush1.bf16.msra.mxu1 %v14662_v40  ;;  %v14710_v39 = vcombine.low %v234_v21, %v238_v23  ;;  %v14717_v40 = vcombine.high %v241_v28, %v245_v31  ;;  %v282_v21 = vld [vmem:[#allocation5 + $0x398] sm:$0xff]  ;;  %v289_v28 = vld [vmem:[#allocation5 + $0x3d0] sm:$0xff] }
 0x28f   :  { %7047 = vmatprep.subr.bf16.mxu0 %v14669_v41  ;;  %7391 = vmatprep.subr.bf16.mxu1 %v14671_v45  ;;  %v249_v41 = vld [vmem:[#allocation5 + $0x290] sm:$0xff]  ;;  %v254_v45 = vld [vmem:[#allocation5 + $0x2b8] sm:$0xff] }
 0x290   :  { %v14727_v54 = vcombine.high %v250_v43, %v254_v45  ;;  %v14724_v56 = vcombine.low %v249_v41, %v253_v42  ;;  %v293_v31 = vld [vmem:[#allocation5 + $0x3f0] sm:$0xff] }
 0x292   :  { %7048 = vmatpush1.bf16.msra.mxu0 %v14668_v49  ;;  %7392 = vmatpush1.bf16.msra.mxu1 %v14670_v50  ;;  %v14718_v49 = vcombine.low %v242_v32, %v246_v34  ;;  %v14725_v50 = vcombine.high %v249_v41, %v253_v42  ;;  %v290_v32 = vld [vmem:[#allocation5 + $0x3d8] sm:$0xff]  ;;  %v14756_v34 = vcombine.low %v281_v19, %v285_v20  ;;  %v297_v41 = vld [vmem:[#allocation5 + $0x410] sm:$0xff] }
 0x293   :  { %7049 = vmatprep.subr.bf16.mxu0 %v14677_v51  ;;  %7393 = vmatprep.subr.bf16.mxu1 %v14679_v55  ;;  %v257_v51 = vld [vmem:[#allocation5 + $0x2d0] sm:$0xff]  ;;  %v262_v55 = vld [vmem:[#allocation5 + $0x2f8] sm:$0xff] }
 0x294   :  { %v14735_v0 = vcombine.high %v258_v58, %v262_v55  ;;  %v14732_v2 = vcombine.low %v257_v51, %v261_v52  ;;  %v301_v42 = vld [vmem:[#allocation5 + $0x430] sm:$0xff] }
 0x296   :  { %7050 = vmatpush1.bf16.msra.mxu0 %v14676_v57  ;;  %7394 = vmatpush1.bf16.msra.mxu1 %v14678_v59  ;;  %v14726_v57 = vcombine.low %v250_v43, %v254_v45  ;;  %v14733_v59 = vcombine.high %v257_v51, %v261_v52  ;;  %v298_v43 = vld [vmem:[#allocation5 + $0x418] sm:$0xff]  ;;  %v14764_v45 = vcombine.low %v289_v28, %v293_v31  ;;  %v305_v51 = vld [vmem:[#allocation5 + $0x450] sm:$0xff] }
 0x297   :  { %7051 = vmatprep.subr.bf16.mxu0 %v14685_v60  ;;  %7395 = vmatprep.subr.bf16.mxu1 %v14687_v1  ;;  %v265_v60 = vld [vmem:[#allocation5 + $0x310] sm:$0xff]  ;;  %v270_v1 = vld [vmem:[#allocation5 + $0x338] sm:$0xff] }
 0x298   :  { %v14743_v11 = vcombine.high %v266_v63, %v270_v1  ;;  %v14740_v13 = vcombine.low %v265_v60, %v269_v61  ;;  %v309_v52 = vld [vmem:[#allocation5 + $0x470] sm:$0xff] }
 0x29a   :  { %7052 = vmatpush1.bf16.msra.mxu0 %v14684_v4  ;;  %7396 = vmatpush1.bf16.msra.mxu1 %v14686_v5  ;;  %v14734_v4 = vcombine.low %v258_v58, %v262_v55  ;;  %v14741_v5 = vcombine.high %v265_v60, %v269_v61  ;;  %v306_v58 = vld [vmem:[#allocation5 + $0x458] sm:$0xff]  ;;  %v14772_v55 = vcombine.low %v297_v41, %v301_v42  ;;  %v313_v60 = vld [vmem:[#allocation5 + $0x490] sm:$0xff] }
 0x29b   :  { %7053 = vmatprep.subr.bf16.mxu0 %v14693_v6  ;;  %7397 = vmatprep.subr.bf16.mxu1 %v14695_v12  ;;  %v273_v6 = vld [vmem:[#allocation5 + $0x350] sm:$0xff]  ;;  %v278_v12 = vld [vmem:[#allocation5 + $0x378] sm:$0xff] }
 0x29c   :  { %v14748_v23 = vcombine.low %v273_v6, %v277_v7  ;;  %v317_v61 = vld [vmem:[#allocation5 + $0x4b0] sm:$0xff] }
 0x29e   :  { %7054 = vmatpush1.bf16.msra.mxu0 %v14692_v14  ;;  %7398 = vmatpush1.bf16.msra.mxu1 %v14694_v17  ;;  %v14742_v14 = vcombine.low %v266_v63, %v270_v1  ;;  %v14749_v17 = vcombine.high %v273_v6, %v277_v7  ;;  %v314_v63 = vld [vmem:[#allocation5 + $0x498] sm:$0xff]  ;;  %v14780_v1 = vcombine.low %v305_v51, %v309_v52  ;;  %v321_v6 = vld [vmem:[#allocation5 + $0x4d0] sm:$0xff] }
 0x29f   :  { %7055 = vmatprep.subr.bf16.mxu0 %v14701_v18  ;;  %7399 = vmatprep.subr.bf16.mxu1 %v14703_v22  ;;  %v14751_v18 = vcombine.high %v274_v9, %v278_v12  ;;  %v286_v22 = vld [vmem:[#allocation5 + $0x3b8] sm:$0xff]  ;;  %v325_v7 = vld [vmem:[#allocation5 + $0x4f0] sm:$0xff] }
 0x2a2   :  { %7056 = vmatpush1.bf16.msra.mxu0 %v14700_v24  ;;  %7400 = vmatpush1.bf16.msra.mxu1 %v14702_v26  ;;  %v14750_v24 = vcombine.low %v274_v9, %v278_v12  ;;  %v14757_v26 = vcombine.high %v281_v19, %v285_v20  ;;  %v322_v9 = vld [vmem:[#allocation5 + $0x4d8] sm:$0xff]  ;;  %v14788_v12 = vcombine.low %v313_v60, %v317_v61 }
 0x2a3   :  { %7057 = vmatprep.subr.bf16.mxu0 %v14709_v27  ;;  %7401 = vmatprep.subr.bf16.mxu1 %v14711_v33  ;;  %v14759_v27 = vcombine.high %v282_v21, %v286_v22  ;;  %v294_v33 = vld [vmem:[#allocation5 + $0x3f8] sm:$0xff] }
 0x2a4   :  { %v330_v19 = vld [vmem:[#allocation5 + $0x518] sm:$0xff] }
 0x2a5   :  { %v334_v20 = vld [vmem:[#allocation5 + $0x538] sm:$0xff] }
 0x2a6   :  { %7058 = vmatpush1.bf16.msra.mxu0 %v14708_v35  ;;  %7402 = vmatpush1.bf16.msra.mxu1 %v14710_v39  ;;  %v14758_v35 = vcombine.low %v282_v21, %v286_v22  ;;  %v14765_v39 = vcombine.high %v289_v28, %v293_v31  ;;  %v14796_v21 = vcombine.low %v321_v6, %v325_v7  ;;  %v342_v28 = vld [vmem:[#allocation5 + $0x578] sm:$0xff] }
 0x2a7   :  { %7059 = vmatprep.subr.bf16.mxu0 %v14717_v40  ;;  %7403 = vmatprep.subr.bf16.mxu1 %v14719_v44  ;;  %v14767_v40 = vcombine.high %v290_v32, %v294_v33  ;;  %v302_v44 = vld [vmem:[#allocation5 + $0x438] sm:$0xff] }
 0x2aa   :  { %7060 = vmatpush1.bf16.msra.mxu0 %v14716_v47  ;;  %7404 = vmatpush1.bf16.msra.mxu1 %v14718_v49  ;;  %v14766_v47 = vcombine.low %v290_v32, %v294_v33  ;;  %v14773_v49 = vcombine.high %v297_v41, %v301_v42  ;;  %v14806_v32 = vcombine.low %v330_v19, %v334_v20  ;;  %v350_v41 = vld [vmem:[#allocation5 + $0x5b8] sm:$0xff] }
 0x2ab   :  { %7061 = vmatprep.subr.bf16.mxu0 %v14725_v50  ;;  %7405 = vmatprep.subr.bf16.mxu1 %v14727_v54  ;;  %v14775_v50 = vcombine.high %v298_v43, %v302_v44  ;;  %v310_v54 = vld [vmem:[#allocation5 + $0x478] sm:$0xff] }
 0x2ae   :  { %7062 = vmatpush1.bf16.msra.mxu0 %v14724_v56  ;;  %7406 = vmatpush1.bf16.msra.mxu1 %v14726_v57  ;;  %v14774_v56 = vcombine.low %v298_v43, %v302_v44  ;;  %v14781_v57 = vcombine.high %v305_v51, %v309_v52  ;;  %v358_v51 = vld [vmem:[#allocation5 + $0x5f8] sm:$0xff] }
 0x2af   :  { %7063 = vmatprep.subr.bf16.mxu0 %v14733_v59  ;;  %7407 = vmatprep.subr.bf16.mxu1 %v14735_v0  ;;  %v14783_v59 = vcombine.high %v306_v58, %v310_v54  ;;  %v318_v0 = vld [vmem:[#allocation5 + $0x4b8] sm:$0xff] }
 0x2b2   :  { %7064 = vmatpush1.bf16.msra.mxu0 %v14732_v2  ;;  %7408 = vmatpush1.bf16.msra.mxu1 %v14734_v4  ;;  %v14782_v2 = vcombine.low %v306_v58, %v310_v54  ;;  %v14789_v4 = vcombine.high %v313_v60, %v317_v61  ;;  %v366_v60 = vld [vmem:[#allocation5 + $0x638] sm:$0xff] }
 0x2b3   :  { %7065 = vmatprep.subr.bf16.mxu0 %v14741_v5  ;;  %7409 = vmatprep.subr.bf16.mxu1 %v14743_v11  ;;  %v14791_v5 = vcombine.high %v314_v63, %v318_v0  ;;  %v326_v11 = vld [vmem:[#allocation5 + $0x4f8] sm:$0xff] }
 0x2b4   :  { %v14798_v22 = vcombine.low %v322_v9, %v326_v11 }
 0x2b6   :  { %7066 = vmatpush1.bf16.msra.mxu0 %v14740_v13  ;;  %7410 = vmatpush1.bf16.msra.mxu1 %v14742_v14  ;;  %v14797_v13 = vcombine.high %v321_v6, %v325_v7  ;;  %v14799_v14 = vcombine.high %v322_v9, %v326_v11  ;;  %v374_v6 = vld [vmem:[#allocation5 + $0x678] sm:$0xff] }
 0x2b7   :  { %7067 = vmatprep.subr.bf16.mxu0 %v14749_v17  ;;  %7411 = vmatprep.subr.bf16.mxu1 %v14751_v18  ;;  %v329_v17 = vld [vmem:[#allocation5 + $0x510] sm:$0xff] }
 0x2b8   :  { %v333_v18 = vld [vmem:[#allocation5 + $0x530] sm:$0xff] }
 0x2b9   :  { %v14804_v31 = vcombine.low %v329_v17, %v333_v18 }
 0x2ba   :  { %7068 = vmatpush1.bf16.msra.mxu0 %v14748_v23  ;;  %7412 = vmatpush1.bf16.msra.mxu1 %v14750_v24  ;;  %v14805_v23 = vcombine.high %v329_v17, %v333_v18  ;;  %v337_v24 = vld [vmem:[#allocation5 + $0x550] sm:$0xff]  ;;  %v382_v17 = vld [vmem:[#allocation5 + $0x6b8] sm:$0xff] }
 0x2bb   :  { %7069 = vmatprep.subr.bf16.mxu0 %v14757_v26  ;;  %7413 = vmatprep.subr.bf16.mxu1 %v14759_v27  ;;  %v341_v26 = vld [vmem:[#allocation5 + $0x570] sm:$0xff]  ;;  %v338_v27 = vld [vmem:[#allocation5 + $0x558] sm:$0xff] }
 0x2bc   :  { %v14813_v33 = vcombine.high %v337_v24, %v341_v26  ;;  %v14812_v42 = vcombine.low %v337_v24, %v341_v26  ;;  %v14814_v43 = vcombine.low %v338_v27, %v342_v28  ;;  %v390_v24 = vld [vmem:[#allocation5 + $0x6f8] sm:$0xff] }
 0x2be   :  { %7070 = vmatpush1.bf16.msra.mxu0 %v14756_v34  ;;  %7414 = vmatpush1.bf16.msra.mxu1 %v14758_v35  ;;  %v14815_v34 = vcombine.high %v338_v27, %v342_v28  ;;  %v345_v35 = vld [vmem:[#allocation5 + $0x590] sm:$0xff] }
 0x2bf   :  { %7071 = vmatprep.subr.bf16.mxu0 %v14765_v39  ;;  %7415 = vmatprep.subr.bf16.mxu1 %v14767_v40  ;;  %v349_v39 = vld [vmem:[#allocation5 + $0x5b0] sm:$0xff]  ;;  %v346_v40 = vld [vmem:[#allocation5 + $0x598] sm:$0xff] }
 0x2c0   :  { %v14821_v44 = vcombine.high %v345_v35, %v349_v39  ;;  %v14820_v52 = vcombine.low %v345_v35, %v349_v39  ;;  %v14822_v58 = vcombine.low %v346_v40, %v350_v41  ;;  %v398_v35 = vld [vmem:[#allocation5 + $0x738] sm:$0xff] }
 0x2c2   :  { %7072 = vmatpush1.bf16.msra.mxu0 %v14764_v45  ;;  %7416 = vmatpush1.bf16.msra.mxu1 %v14766_v47  ;;  %v14823_v45 = vcombine.high %v346_v40, %v350_v41  ;;  %v353_v47 = vld [vmem:[#allocation5 + $0x5d0] sm:$0xff] }
 0x2c3   :  { %7084 = vmatprep.subr.bf16.mxu0 %v14773_v49  ;;  %7428 = vmatprep.subr.bf16.mxu1 %v14775_v50  ;;  %v357_v49 = vld [vmem:[#allocation5 + $0x5f0] sm:$0xff]  ;;  %v354_v50 = vld [vmem:[#allocation5 + $0x5d8] sm:$0xff] }
 0x2c4   :  { %v14829_v54 = vcombine.high %v353_v47, %v357_v49  ;;  %v14828_v61 = vcombine.low %v353_v47, %v357_v49  ;;  %v406_v47 = vld [vmem:[#allocation5 + $0x778] sm:$0xff] }
 0x2c5   :  { %7074 = vmatmul.mubr.bf16.vlgmr.msra.gmra.mrb[4].mxu0 %v18490_v15  ;;  %7418 = vmatmul.mubr.bf16.vlgmr.msra.gmra.mrb[4].mxu1 %v18490_v15  ;;  %v14790_v15 = vcombine.low %v314_v63, %v318_v0  ;;  %v14830_v63 = vcombine.low %v354_v50, %v358_v51 }
 0x2c6   :  { %7085 = vmatpush1.bf16.msra.mxu0 %v14772_v55  ;;  %7429 = vmatpush1.bf16.msra.mxu1 %v14774_v56  ;;  %v14831_v55 = vcombine.high %v354_v50, %v358_v51  ;;  %v361_v56 = vld [vmem:[#allocation5 + $0x610] sm:$0xff] }
 0x2c7   :  { %7086 = vmatprep.subr.bf16.mxu0 %v14781_v57  ;;  %7430 = vmatprep.subr.bf16.mxu1 %v14783_v59  ;;  %v365_v57 = vld [vmem:[#allocation5 + $0x630] sm:$0xff]  ;;  %v362_v59 = vld [vmem:[#allocation5 + $0x618] sm:$0xff] }
 0x2c8   :  { %7116 = vmatprep.mubr.bf16.mxu0 %v18492_v25  ;;  %7460 = vmatprep.mubr.bf16.mxu1 %v18492_v25  ;;  %v14807_v25 = vcombine.high %v330_v19, %v334_v20  ;;  %v14837_v0 = vcombine.high %v361_v56, %v365_v57  ;;  %v14836_v7 = vcombine.low %v361_v56, %v365_v57  ;;  %v414_v56 = vld [vmem:[#allocation5 + $0x7b8] sm:$0xff] }
 0x2c9   :  { %v14838_v9 = vcombine.low %v362_v59, %v366_v60 }
 0x2ca   :  { %7087 = vmatpush1.bf16.msra.mxu0 %v14780_v1  ;;  %7431 = vmatpush1.bf16.msra.mxu1 %v14782_v2  ;;  %v14839_v1 = vcombine.high %v362_v59, %v366_v60  ;;  %v369_v2 = vld [vmem:[#allocation5 + $0x650] sm:$0xff] }
 0x2cb   :  { %7088 = vmatprep.subr.bf16.mxu0 %v14789_v4  ;;  %7432 = vmatprep.subr.bf16.mxu1 %v14791_v5  ;;  %v373_v4 = vld [vmem:[#allocation5 + $0x670] sm:$0xff]  ;;  %v370_v5 = vld [vmem:[#allocation5 + $0x658] sm:$0xff] }
 0x2cc   :  { %v14845_v11 = vcombine.high %v369_v2, %v373_v4  ;;  %v14844_v18 = vcombine.low %v369_v2, %v373_v4  ;;  %v14846_v19 = vcombine.low %v370_v5, %v374_v6  ;;  %v422_v2 = vld [vmem:[#allocation5 + $0x7f8] sm:$0xff] }
 0x2ce   :  { %7089 = vmatpush1.bf16.msra.mxu0 %v14788_v12  ;;  %7433 = vmatpush1.bf16.msra.mxu1 %v14790_v15  ;;  %v14847_v12 = vcombine.high %v370_v5, %v374_v6  ;;  %v377_v15 = vld [vmem:[#allocation5 + $0x690] sm:$0xff] }
 0x2cf   :  { %7090 = vmatprep.subr.bf16.mxu0 %v14797_v13  ;;  %7434 = vmatprep.subr.bf16.mxu1 %v14799_v14  ;;  %v381_v13 = vld [vmem:[#allocation5 + $0x6b0] sm:$0xff]  ;;  %v378_v14 = vld [vmem:[#allocation5 + $0x698] sm:$0xff] }
 0x2d0   :  { %v14853_v20 = vcombine.high %v377_v15, %v381_v13  ;;  %v14852_v26 = vcombine.low %v377_v15, %v381_v13  ;;  %v14854_v27 = vcombine.low %v378_v14, %v382_v17  ;;  %v430_v15 = vld [vmem:[#allocation5 + $0x838] sm:$0xff] }
 0x2d2   :  { %7091 = vmatpush1.bf16.msra.mxu0 %v14796_v21  ;;  %7435 = vmatpush1.bf16.msra.mxu1 %v14798_v22  ;;  %v14855_v21 = vcombine.high %v378_v14, %v382_v17  ;;  %v385_v22 = vld [vmem:[#allocation5 + $0x6d0] sm:$0xff] }
 0x2d3   :  { %7092 = vmatprep.subr.bf16.mxu0 %v14805_v23  ;;  %7436 = vmatprep.subr.bf16.mxu1 %v14807_v25  ;;  %v389_v23 = vld [vmem:[#allocation5 + $0x6f0] sm:$0xff]  ;;  %v386_v25 = vld [vmem:[#allocation5 + $0x6d8] sm:$0xff] }
 0x2d4   :  { %v14861_v28 = vcombine.high %v385_v22, %v389_v23  ;;  %v14860_v39 = vcombine.low %v385_v22, %v389_v23  ;;  %v14862_v40 = vcombine.low %v386_v25, %v390_v24  ;;  %v438_v22 = vld [vmem:[#allocation5 + $0x878] sm:$0xff] }
 0x2d6   :  { %7093 = vmatpush1.bf16.msra.mxu0 %v14804_v31  ;;  %7437 = vmatpush1.bf16.msra.mxu1 %v14806_v32  ;;  %v14863_v31 = vcombine.high %v386_v25, %v390_v24  ;;  %v393_v32 = vld [vmem:[#allocation5 + $0x710] sm:$0xff] }
 0x2d7   :  { %7094 = vmatprep.subr.bf16.mxu0 %v14813_v33  ;;  %7438 = vmatprep.subr.bf16.mxu1 %v14815_v34  ;;  %v397_v33 = vld [vmem:[#allocation5 + $0x730] sm:$0xff]  ;;  %v394_v34 = vld [vmem:[#allocation5 + $0x718] sm:$0xff] }
 0x2d8   :  { %v14869_v41 = vcombine.high %v393_v32, %v397_v33  ;;  %v14868_v49 = vcombine.low %v393_v32, %v397_v33  ;;  %v14870_v50 = vcombine.low %v394_v34, %v398_v35  ;;  %v446_v32 = vld [vmem:[#allocation5 + $0x8b8] sm:$0xff] }
 0x2da   :  { %7095 = vmatpush1.bf16.msra.mxu0 %v14812_v42  ;;  %7439 = vmatpush1.bf16.msra.mxu1 %v14814_v43  ;;  %v14871_v42 = vcombine.high %v394_v34, %v398_v35  ;;  %v401_v43 = vld [vmem:[#allocation5 + $0x750] sm:$0xff] }
 0x2db   :  { %7096 = vmatprep.subr.bf16.mxu0 %v14821_v44  ;;  %7440 = vmatprep.subr.bf16.mxu1 %v14823_v45  ;;  %v405_v44 = vld [vmem:[#allocation5 + $0x770] sm:$0xff]  ;;  %v402_v45 = vld [vmem:[#allocation5 + $0x758] sm:$0xff] }
 0x2dc   :  { %v14877_v51 = vcombine.high %v401_v43, %v405_v44  ;;  %v14876_v57 = vcombine.low %v401_v43, %v405_v44  ;;  %v14878_v59 = vcombine.low %v402_v45, %v406_v47  ;;  %v454_v43 = vld [vmem:[#allocation5 + $0x8f8] sm:$0xff] }
 0x2de   :  { %7097 = vmatpush1.bf16.msra.mxu0 %v14820_v52  ;;  %7441 = vmatpush1.bf16.msra.mxu1 %v14822_v58  ;;  %v14879_v52 = vcombine.high %v402_v45, %v406_v47  ;;  %v409_v58 = vld [vmem:[#allocation5 + $0x790] sm:$0xff] }
 0x2df   :  { %7098 = vmatprep.subr.bf16.mxu0 %v14829_v54  ;;  %7442 = vmatprep.subr.bf16.mxu1 %v14831_v55  ;;  %v413_v54 = vld [vmem:[#allocation5 + $0x7b0] sm:$0xff]  ;;  %v410_v55 = vld [vmem:[#allocation5 + $0x798] sm:$0xff] }
 0x2e0   :  { %v14885_v60 = vcombine.high %v409_v58, %v413_v54  ;;  %v14884_v4 = vcombine.low %v409_v58, %v413_v54  ;;  %v14886_v5 = vcombine.low %v410_v55, %v414_v56 }
 0x2e2   :  { %7099 = vmatpush1.bf16.msra.mxu0 %v14828_v61  ;;  %7443 = vmatpush1.bf16.msra.mxu1 %v14830_v63  ;;  %v14887_v61 = vcombine.high %v410_v55, %v414_v56  ;;  %v417_v63 = vld [vmem:[#allocation5 + $0x7d0] sm:$0xff] }
 0x2e3   :  { %7100 = vmatprep.subr.bf16.mxu0 %v14837_v0  ;;  %7444 = vmatprep.subr.bf16.mxu1 %v14839_v1  ;;  %v421_v0 = vld [vmem:[#allocation5 + $0x7f0] sm:$0xff]  ;;  %v418_v1 = vld [vmem:[#allocation5 + $0x7d8] sm:$0xff] }
 0x2e4   :  { %v14893_v6 = vcombine.high %v417_v63, %v421_v0  ;;  %v14892_v13 = vcombine.low %v417_v63, %v421_v0  ;;  %v14894_v14 = vcombine.low %v418_v1, %v422_v2  ;;  %v465_v56 = vld [vmem:[#allocation5 + $0x950] sm:$0xff] }
 0x2e6   :  { %7101 = vmatpush1.bf16.msra.mxu0 %v14836_v7  ;;  %7445 = vmatpush1.bf16.msra.mxu1 %v14838_v9  ;;  %v14895_v7 = vcombine.high %v418_v1, %v422_v2  ;;  %v425_v9 = vld [vmem:[#allocation5 + $0x810] sm:$0xff] }
 0x2e7   :  { %7102 = vmatprep.subr.bf16.mxu0 %v14845_v11  ;;  %7446 = vmatprep.subr.bf16.mxu1 %v14847_v12  ;;  %v429_v11 = vld [vmem:[#allocation5 + $0x830] sm:$0xff]  ;;  %v426_v12 = vld [vmem:[#allocation5 + $0x818] sm:$0xff] }
 0x2e8   :  { %v14901_v17 = vcombine.high %v425_v9, %v429_v11  ;;  %v14900_v23 = vcombine.low %v425_v9, %v429_v11  ;;  %v14902_v25 = vcombine.low %v426_v12, %v430_v15  ;;  %v473_v2 = vld [vmem:[#allocation5 + $0x990] sm:$0xff] }
 0x2ea   :  { %7103 = vmatpush1.bf16.msra.mxu0 %v14844_v18  ;;  %7447 = vmatpush1.bf16.msra.mxu1 %v14846_v19  ;;  %v14903_v18 = vcombine.high %v426_v12, %v430_v15  ;;  %v433_v19 = vld [vmem:[#allocation5 + $0x850] sm:$0xff] }
 0x2eb   :  { %7104 = vmatprep.subr.bf16.mxu0 %v14853_v20  ;;  %7448 = vmatprep.subr.bf16.mxu1 %v14855_v21  ;;  %v437_v20 = vld [vmem:[#allocation5 + $0x870] sm:$0xff]  ;;  %v434_v21 = vld [vmem:[#allocation5 + $0x858] sm:$0xff] }
 0x2ec   :  { %v14909_v24 = vcombine.high %v433_v19, %v437_v20  ;;  %v14908_v33 = vcombine.low %v433_v19, %v437_v20  ;;  %v14910_v34 = vcombine.low %v434_v21, %v438_v22  ;;  %v481_v15 = vld [vmem:[#allocation5 + $0x9d0] sm:$0xff] }
 0x2ee   :  { %7105 = vmatpush1.bf16.msra.mxu0 %v14852_v26  ;;  %7449 = vmatpush1.bf16.msra.mxu1 %v14854_v27  ;;  %v14911_v26 = vcombine.high %v434_v21, %v438_v22  ;;  %v441_v27 = vld [vmem:[#allocation5 + $0x890] sm:$0xff] }
 0x2ef   :  { %7106 = vmatprep.subr.bf16.mxu0 %v14861_v28  ;;  %7450 = vmatprep.subr.bf16.mxu1 %v14863_v31  ;;  %v445_v28 = vld [vmem:[#allocation5 + $0x8b0] sm:$0xff]  ;;  %v442_v31 = vld [vmem:[#allocation5 + $0x898] sm:$0xff] }
 0x2f0   :  { %v14917_v35 = vcombine.high %v441_v27, %v445_v28  ;;  %v14916_v44 = vcombine.low %v441_v27, %v445_v28  ;;  %v489_v22 = vld [vmem:[#allocation5 + $0xa10] sm:$0xff] }
 0x2f2   :  { %7107 = vmatpush1.bf16.msra.mxu0 %v14860_v39  ;;  %7451 = vmatpush1.bf16.msra.mxu1 %v14862_v40  ;;  %v14919_v39 = vcombine.high %v442_v31, %v446_v32  ;;  %v449_v40 = vld [vmem:[#allocation5 + $0x8d0] sm:$0xff] }
 0x2f3   :  { %7108 = vmatprep.subr.bf16.mxu0 %v14869_v41  ;;  %7452 = vmatprep.subr.bf16.mxu1 %v14871_v42  ;;  %v453_v41 = vld [vmem:[#allocation5 + $0x8f0] sm:$0xff]  ;;  %v450_v42 = vld [vmem:[#allocation5 + $0x8d8] sm:$0xff] }
 0x2f4   :  { %v14925_v45 = vcombine.high %v449_v40, %v453_v41  ;;  %v14927_v47 = vcombine.high %v450_v42, %v454_v43  ;;  %v14924_v58 = vcombine.low %v449_v40, %v453_v41  ;;  %v14926_v54 = vcombine.low %v450_v42, %v454_v43  ;;  %v505_v43 = vld [vmem:[#allocation5 + $0xa90] sm:$0xff] }
 0x2f6   :  { %7109 = vmatpush1.bf16.msra.mxu0 %v14868_v49  ;;  %7453 = vmatpush1.bf16.msra.mxu1 %v14870_v50  ;;  %v457_v49 = vld [vmem:[#allocation5 + $0x910] sm:$0xff] }
 0x2f7   :  { %7110 = vmatprep.subr.bf16.mxu0 %v14877_v51  ;;  %7454 = vmatprep.subr.bf16.mxu1 %v14879_v52  ;;  %v461_v50 = vld [vmem:[#allocation5 + $0x930] sm:$0xff]  ;;  %v458_v51 = vld [vmem:[#allocation5 + $0x918] sm:$0xff] }
 0x2f8   :  { %v462_v52 = vld [vmem:[#allocation5 + $0x938] sm:$0xff]  ;;  %v14933_v55 = vcombine.high %v457_v49, %v461_v50 }
 0x2f9   :  { %v14934_v63 = vcombine.low %v458_v51, %v462_v52 }
 0x2fa   :  { %7111 = vmatpush1.bf16.msra.mxu0 %v14876_v57  ;;  %7455 = vmatpush1.bf16.msra.mxu1 %v14878_v59  ;;  %v469_v57 = vld [vmem:[#allocation5 + $0x970] sm:$0xff]  ;;  %v466_v59 = vld [vmem:[#allocation5 + $0x958] sm:$0xff] }
 0x2fb   :  { %7112 = vmatprep.subr.bf16.mxu0 %v14885_v60  ;;  %7456 = vmatprep.subr.bf16.mxu1 %v14887_v61  ;;  %v470_v60 = vld [vmem:[#allocation5 + $0x978] sm:$0xff]  ;;  %v14932_v61 = vcombine.low %v457_v49, %v461_v50  ;;  %v14941_v0 = vcombine.high %v465_v56, %v469_v57 }
 0x2fc   :  { %v14943_v1 = vcombine.high %v466_v59, %v470_v60  ;;  %v14942_v9 = vcombine.low %v466_v59, %v470_v60  ;;  %v521_v60 = vld [vmem:[#allocation5 + $0xb10] sm:$0xff] }
 0x2fe   :  { %7113 = vmatpush1.bf16.msra.mxu0 %v14884_v4  ;;  %7457 = vmatpush1.bf16.msra.mxu1 %v14886_v5  ;;  %v477_v4 = vld [vmem:[#allocation5 + $0x9b0] sm:$0xff]  ;;  %v474_v5 = vld [vmem:[#allocation5 + $0x998] sm:$0xff] }
 0x2ff   :  { %7114 = vmatprep.subr.bf16.mxu0 %v14893_v6  ;;  %7458 = vmatprep.subr.bf16.mxu1 %v14895_v7  ;;  %v478_v6 = vld [vmem:[#allocation5 + $0x9b8] sm:$0xff]  ;;  %v14940_v7 = vcombine.low %v465_v56, %v469_v57  ;;  %v14949_v11 = vcombine.high %v473_v2, %v477_v4 }
 0x300   :  { %v14951_v12 = vcombine.high %v474_v5, %v478_v6  ;;  %v14950_v19 = vcombine.low %v474_v5, %v478_v6  ;;  %v529_v6 = vld [vmem:[#allocation5 + $0xb50] sm:$0xff] }
 0x302   :  { %7115 = vmatpush1.bf16.msra.mxu0 %v14892_v13  ;;  %7459 = vmatpush1.bf16.msra.mxu1 %v14894_v14  ;;  %v485_v13 = vld [vmem:[#allocation5 + $0x9f0] sm:$0xff]  ;;  %v482_v14 = vld [vmem:[#allocation5 + $0x9d8] sm:$0xff] }
 0x303   :  { %7127 = vmatprep.subr.bf16.mxu0 %v14901_v17  ;;  %7471 = vmatprep.subr.bf16.mxu1 %v14903_v18  ;;  %v486_v17 = vld [vmem:[#allocation5 + $0x9f8] sm:$0xff]  ;;  %v14948_v18 = vcombine.low %v473_v2, %v477_v4  ;;  %v14957_v20 = vcombine.high %v481_v15, %v485_v13 }
 0x304   :  { %v14959_v21 = vcombine.high %v482_v14, %v486_v17  ;;  %v14958_v27 = vcombine.low %v482_v14, %v486_v17  ;;  %v537_v17 = vld [vmem:[#allocation5 + $0xb90] sm:$0xff] }
 0x305   :  { %7117 = vmatmul.mubr.bf16.vlgmr.msra.gmra.mrb[4].mxu0 %v18498_v30  ;;  %7461 = vmatmul.mubr.bf16.vlgmr.msra.gmra.mrb[4].mxu1 %v18498_v30  ;;  %v14918_v30 = vcombine.low %v442_v31, %v446_v32  ;;  %v497_v32 = vld [vmem:[#allocation5 + $0xa50] sm:$0xff] }
 0x306   :  { %7128 = vmatpush1.bf16.msra.mxu0 %v14900_v23  ;;  %7472 = vmatpush1.bf16.msra.mxu1 %v14902_v25  ;;  %v493_v23 = vld [vmem:[#allocation5 + $0xa30] sm:$0xff]  ;;  %v490_v25 = vld [vmem:[#allocation5 + $0xa18] sm:$0xff] }
 0x307   :  { %7129 = vmatprep.subr.bf16.mxu0 %v14909_v24  ;;  %7473 = vmatprep.subr.bf16.mxu1 %v14911_v26  ;;  %v494_v24 = vld [vmem:[#allocation5 + $0xa38] sm:$0xff]  ;;  %v14956_v26 = vcombine.low %v481_v15, %v485_v13  ;;  %v14965_v28 = vcombine.high %v489_v22, %v493_v23 }
 0x308   :  { %7159 = vmatprep.mubr.bf16.mxu0 %v18500_v37  ;;  %7503 = vmatprep.mubr.bf16.mxu1 %v18500_v37  ;;  %v14935_v37 = vcombine.high %v458_v51, %v462_v52  ;;  %v14967_v31 = vcombine.high %v490_v25, %v494_v24  ;;  %v14966_v40 = vcombine.low %v490_v25, %v494_v24  ;;  %v513_v52 = vld [vmem:[#allocation5 + $0xad0] sm:$0xff] }
 0x309   :  { %v545_v24 = vld [vmem:[#allocation5 + $0xbd0] sm:$0xff] }
 0x30a   :  { %7130 = vmatpush1.bf16.msra.mxu0 %v14908_v33  ;;  %7474 = vmatpush1.bf16.msra.mxu1 %v14910_v34  ;;  %v501_v33 = vld [vmem:[#allocation5 + $0xa70] sm:$0xff]  ;;  %v498_v34 = vld [vmem:[#allocation5 + $0xa58] sm:$0xff] }
 0x30b   :  { %7131 = vmatprep.subr.bf16.mxu0 %v14917_v35  ;;  %7475 = vmatprep.subr.bf16.mxu1 %v14919_v39  ;;  %v502_v35 = vld [vmem:[#allocation5 + $0xa78] sm:$0xff]  ;;  %v14964_v39 = vcombine.low %v489_v22, %v493_v23  ;;  %v14973_v41 = vcombine.high %v497_v32, %v501_v33 }
 0x30c   :  { %v14975_v42 = vcombine.high %v498_v34, %v502_v35  ;;  %v14974_v49 = vcombine.low %v498_v34, %v502_v35  ;;  %v553_v35 = vld [vmem:[#allocation5 + $0xc10] sm:$0xff] }
 0x30e   :  { %7132 = vmatpush1.bf16.msra.mxu0 %v14916_v44  ;;  %7476 = vmatpush1.bf16.msra.mxu1 %v14918_v30  ;;  %v509_v44 = vld [vmem:[#allocation5 + $0xab0] sm:$0xff]  ;;  %v506_v30 = vld [vmem:[#allocation5 + $0xa98] sm:$0xff] }
 0x30f   :  { %7133 = vmatprep.subr.bf16.mxu0 %v14925_v45  ;;  %7477 = vmatprep.subr.bf16.mxu1 %v14927_v47  ;;  %v510_v45 = vld [vmem:[#allocation5 + $0xab8] sm:$0xff]  ;;  %v14972_v47 = vcombine.low %v497_v32, %v501_v33  ;;  %v14981_v50 = vcombine.high %v505_v43, %v509_v44 }
 0x310   :  { %v14983_v51 = vcombine.high %v506_v30, %v510_v45  ;;  %v14982_v56 = vcombine.low %v506_v30, %v510_v45  ;;  %v561_v45 = vld [vmem:[#allocation5 + $0xc50] sm:$0xff] }
 0x312   :  { %7134 = vmatpush1.bf16.msra.mxu0 %v14924_v58  ;;  %7478 = vmatpush1.bf16.msra.mxu1 %v14926_v54  ;;  %v517_v58 = vld [vmem:[#allocation5 + $0xaf0] sm:$0xff]  ;;  %v514_v54 = vld [vmem:[#allocation5 + $0xad8] sm:$0xff] }
 0x313   :  { %7135 = vmatprep.subr.bf16.mxu0 %v14933_v55  ;;  %7479 = vmatprep.subr.bf16.mxu1 %v14935_v37  ;;  %v518_v55 = vld [vmem:[#allocation5 + $0xaf8] sm:$0xff]  ;;  %v14980_v37 = vcombine.low %v505_v43, %v509_v44  ;;  %v14989_v57 = vcombine.high %v513_v52, %v517_v58 }
 0x314   :  { %v14991_v59 = vcombine.high %v514_v54, %v518_v55  ;;  %v14990_v2 = vcombine.low %v514_v54, %v518_v55  ;;  %v569_v55 = vld [vmem:[#allocation5 + $0xc90] sm:$0xff] }
 0x316   :  { %7136 = vmatpush1.bf16.msra.mxu0 %v14932_v61  ;;  %7480 = vmatpush1.bf16.msra.mxu1 %v14934_v63  ;;  %v525_v61 = vld [vmem:[#allocation5 + $0xb30] sm:$0xff]  ;;  %v522_v63 = vld [vmem:[#allocation5 + $0xb18] sm:$0xff] }
 0x317   :  { %7137 = vmatprep.subr.bf16.mxu0 %v14941_v0  ;;  %7481 = vmatprep.subr.bf16.mxu1 %v14943_v1  ;;  %v526_v0 = vld [vmem:[#allocation5 + $0xb38] sm:$0xff]  ;;  %v14988_v1 = vcombine.low %v513_v52, %v517_v58  ;;  %v14997_v4 = vcombine.high %v521_v60, %v525_v61 }
 0x318   :  { %v14999_v5 = vcombine.high %v522_v63, %v526_v0  ;;  %v14998_v15 = vcombine.low %v522_v63, %v526_v0  ;;  %v577_v0 = vld [vmem:[#allocation5 + $0xcd0] sm:$0xff] }
 0x31a   :  { %7138 = vmatpush1.bf16.msra.mxu0 %v14940_v7  ;;  %7482 = vmatpush1.bf16.msra.mxu1 %v14942_v9  ;;  %v533_v7 = vld [vmem:[#allocation5 + $0xb70] sm:$0xff]  ;;  %v530_v9 = vld [vmem:[#allocation5 + $0xb58] sm:$0xff] }
 0x31b   :  { %7139 = vmatprep.subr.bf16.mxu0 %v14949_v11  ;;  %7483 = vmatprep.subr.bf16.mxu1 %v14951_v12  ;;  %v534_v11 = vld [vmem:[#allocation5 + $0xb78] sm:$0xff]  ;;  %v14996_v12 = vcombine.low %v521_v60, %v525_v61  ;;  %v15005_v13 = vcombine.high %v529_v6, %v533_v7 }
 0x31c   :  { %v15007_v14 = vcombine.high %v530_v9, %v534_v11  ;;  %v15006_v22 = vcombine.low %v530_v9, %v534_v11  ;;  %v585_v11 = vld [vmem:[#allocation5 + $0xd10] sm:$0xff] }
 0x31e   :  { %7140 = vmatpush1.bf16.msra.mxu0 %v14948_v18  ;;  %7484 = vmatpush1.bf16.msra.mxu1 %v14950_v19  ;;  %v541_v18 = vld [vmem:[#allocation5 + $0xbb0] sm:$0xff]  ;;  %v538_v19 = vld [vmem:[#allocation5 + $0xb98] sm:$0xff] }
 0x31f   :  { %7141 = vmatprep.subr.bf16.mxu0 %v14957_v20  ;;  %7485 = vmatprep.subr.bf16.mxu1 %v14959_v21  ;;  %v542_v20 = vld [vmem:[#allocation5 + $0xbb8] sm:$0xff]  ;;  %v15004_v21 = vcombine.low %v529_v6, %v533_v7  ;;  %v15013_v23 = vcombine.high %v537_v17, %v541_v18 }
 0x320   :  { %v15015_v25 = vcombine.high %v538_v19, %v542_v20  ;;  %v15014_v32 = vcombine.low %v538_v19, %v542_v20  ;;  %v593_v20 = vld [vmem:[#allocation5 + $0xd50] sm:$0xff] }
 0x322   :  { %7142 = vmatpush1.bf16.msra.mxu0 %v14956_v26  ;;  %7486 = vmatpush1.bf16.msra.mxu1 %v14958_v27  ;;  %v549_v26 = vld [vmem:[#allocation5 + $0xbf0] sm:$0xff]  ;;  %v546_v27 = vld [vmem:[#allocation5 + $0xbd8] sm:$0xff] }
 0x323   :  { %7143 = vmatprep.subr.bf16.mxu0 %v14965_v28  ;;  %7487 = vmatprep.subr.bf16.mxu1 %v14967_v31  ;;  %v550_v28 = vld [vmem:[#allocation5 + $0xbf8] sm:$0xff]  ;;  %v15012_v31 = vcombine.low %v537_v17, %v541_v18  ;;  %v15021_v33 = vcombine.high %v545_v24, %v549_v26 }
 0x324   :  { %v15023_v34 = vcombine.high %v546_v27, %v550_v28  ;;  %v15022_v43 = vcombine.low %v546_v27, %v550_v28 }
 0x326   :  { %7144 = vmatpush1.bf16.msra.mxu0 %v14964_v39  ;;  %7488 = vmatpush1.bf16.msra.mxu1 %v14966_v40  ;;  %v557_v39 = vld [vmem:[#allocation5 + $0xc30] sm:$0xff]  ;;  %v554_v40 = vld [vmem:[#allocation5 + $0xc18] sm:$0xff] }
 0x327   :  { %7145 = vmatprep.subr.bf16.mxu0 %v14973_v41  ;;  %7489 = vmatprep.subr.bf16.mxu1 %v14975_v42  ;;  %v558_v41 = vld [vmem:[#allocation5 + $0xc38] sm:$0xff]  ;;  %v15020_v42 = vcombine.low %v545_v24, %v549_v26  ;;  %v15029_v44 = vcombine.high %v553_v35, %v557_v39  ;;  %v1191_v26 = vld [vmem:[#allocation7] sm:$0xff] }
 0x328   :  { %v15031_v30 = vcombine.high %v554_v40, %v558_v41  ;;  %v15030_v52 = vcombine.low %v554_v40, %v558_v41  ;;  %v602_v41 = vld [vmem:[#allocation5 + $0xd98] sm:$0xff] }
 0x32a   :  { %7146 = vmatpush1.bf16.msra.mxu0 %v14972_v47  ;;  %7490 = vmatpush1.bf16.msra.mxu1 %v14974_v49  ;;  %v565_v47 = vld [vmem:[#allocation5 + $0xc70] sm:$0xff]  ;;  %v562_v49 = vld [vmem:[#allocation5 + $0xc58] sm:$0xff] }
 0x32b   :  { %7147 = vmatprep.subr.bf16.mxu0 %v14981_v50  ;;  %7491 = vmatprep.subr.bf16.mxu1 %v14983_v51  ;;  %v566_v50 = vld [vmem:[#allocation5 + $0xc78] sm:$0xff]  ;;  %v15028_v51 = vcombine.low %v553_v35, %v557_v39  ;;  %v15037_v58 = vcombine.high %v561_v45, %v565_v47  ;;  %v601_v35 = vld [vmem:[#allocation5 + $0xd90] sm:$0xff] }
 0x32c   :  { %v15039_v54 = vcombine.high %v562_v49, %v566_v50  ;;  %v15038_v60 = vcombine.low %v562_v49, %v566_v50  ;;  %v605_v39 = vld [vmem:[#allocation5 + $0xdb0] sm:$0xff] }
 0x32e   :  { %7148 = vmatpush1.bf16.msra.mxu0 %v14980_v37  ;;  %7492 = vmatpush1.bf16.msra.mxu1 %v14982_v56  ;;  %v573_v37 = vld [vmem:[#allocation5 + $0xcb0] sm:$0xff]  ;;  %v570_v56 = vld [vmem:[#allocation5 + $0xc98] sm:$0xff] }
 0x32f   :  { %7149 = vmatprep.subr.bf16.mxu0 %v14989_v57  ;;  %7493 = vmatprep.subr.bf16.mxu1 %v14991_v59  ;;  %v574_v57 = vld [vmem:[#allocation5 + $0xcb8] sm:$0xff]  ;;  %v15036_v59 = vcombine.low %v561_v45, %v565_v47  ;;  %v15045_v61 = vcombine.high %v569_v55, %v573_v37  ;;  %v15044_v6 = vcombine.low %v569_v55, %v573_v37  ;;  %v18581_v45 = vld [vmem:[#allocation5 + $0xdd0] sm:$0xff] }
 0x330   :  { %v15047_v63 = vcombine.high %v570_v56, %v574_v57  ;;  %v18583_v47 = vld [vmem:[#allocation5 + $0xdf0] sm:$0xff] }
 0x331   :  { %v18590_v37 = vld [vmem:[#allocation5 + $0xe10] sm:$0xff] }
 0x332   :  { %7150 = vmatpush1.bf16.msra.mxu0 %v14988_v1  ;;  %7494 = vmatpush1.bf16.msra.mxu1 %v14990_v2  ;;  %v581_v1 = vld [vmem:[#allocation5 + $0xcf0] sm:$0xff]  ;;  %v578_v2 = vld [vmem:[#allocation5 + $0xcd8] sm:$0xff] }
 0x333   :  { %7151 = vmatprep.subr.bf16.mxu0 %v14997_v4  ;;  %7495 = vmatprep.subr.bf16.mxu1 %v14999_v5  ;;  %v582_v4 = vld [vmem:[#allocation5 + $0xcf8] sm:$0xff]  ;;  %v1193_v5 = vlaneseq  ;;  %v15053_v7 = vcombine.high %v577_v0, %v581_v1  ;;  %v15052_v17 = vcombine.low %v577_v0, %v581_v1  ;;  %v18594_v0 = vld [vmem:[#allocation5 + $0xe30] sm:$0xff] }
 0x334   :  { %v15055_v9 = vcombine.high %v578_v2, %v582_v4  ;;  %v15054_v18 = vcombine.low %v578_v2, %v582_v4  ;;  %v18596_v1 = vld [vmem:[#allocation5 + $0xe18] sm:$0xff] }
 0x335   :  { %v18598_v2 = vld [vmem:[#allocation5 + $0xe38] sm:$0xff] }
 0x336   :  { %7152 = vmatpush1.bf16.msra.mxu0 %v14996_v12  ;;  %7496 = vmatpush1.bf16.msra.mxu1 %v14998_v15  ;;  %v589_v12 = vld [vmem:[#allocation5 + $0xd30] sm:$0xff]  ;;  %v586_v15 = vld [vmem:[#allocation5 + $0xd18] sm:$0xff] }
 0x337   :  { %7153 = vmatprep.subr.bf16.mxu0 %v15005_v13  ;;  %7497 = vmatprep.subr.bf16.mxu1 %v15007_v14  ;;  %v590_v13 = vld [vmem:[#allocation5 + $0xd38] sm:$0xff]  ;;  %v18564_v14 = vshrl.u32 %v1193_v5, 7  ;;  %v15060_v24 = vcombine.low %v585_v11, %v589_v12 }
 0x338   :  { %v15063_v19 = vcombine.high %v586_v15, %v590_v13 }
 0x339   :  { %v18570_v27 = vsub.s32 2, %v18564_v14  ;;  %v18573_v28 = vsub.s32 1, %v18564_v14 }
 0x33a   :  { %7154 = vmatpush1.bf16.msra.mxu0 %v15004_v21  ;;  %7498 = vmatpush1.bf16.msra.mxu1 %v15006_v22  ;;  %v597_v21 = vld [vmem:[#allocation5 + $0xd70] sm:$0xff]  ;;  %v18567_v22 = vsub.s32 0, %v18564_v14 }
 0x33b   :  { %7155 = vmatprep.subr.bf16.mxu0 %v15013_v23  ;;  %7499 = vmatprep.subr.bf16.mxu1 %v15015_v25  ;;  %v594_v23 = vld [vmem:[#allocation5 + $0xd58] sm:$0xff] }
 0x33c   :  { %v598_v25 = vld [vmem:[#allocation5 + $0xd78] sm:$0xff]  ;;  %v1196_v40 = vrot.slane %v1191_v26, %v18567_v22 }
 0x33d   :  { %v15070_v50 = vcombine.low %v594_v23, %v598_v25 }
 0x33e   :  { %7156 = vmatpush1.bf16.msra.mxu0 %v15012_v31  ;;  %7500 = vmatpush1.bf16.msra.mxu1 %v15014_v32  ;;  %v15062_v31 = vcombine.low %v586_v15, %v590_v13  ;;  %v18576_v32 = vsub.s32 3, %v18564_v14 }
 0x33f   :  { %7157 = vmatprep.subr.bf16.mxu0 %v15021_v33  ;;  %7501 = vmatprep.subr.bf16.mxu1 %v15023_v34  ;;  %v15069_v33 = vcombine.high %v593_v20, %v597_v21  ;;  %v15071_v34 = vcombine.high %v594_v23, %v598_v25  ;;  %v15095_v25 = vcombine.high %v18596_v1, %v18598_v2 }
 0x340   :  { %v1208_v49 = vrot.slane %v1191_v26, %v18576_v32 }
 0x342   :  { %7158 = vmatpush1.bf16.msra.mxu0 %v15020_v42  ;;  %7502 = vmatpush1.bf16.msra.mxu1 %v15022_v43  ;;  %v606_v42 = vld [vmem:[#allocation5 + $0xdb8] sm:$0xff]  ;;  %v1204_v43 = vrot.slane %v1191_v26, %v18570_v27 }
 0x343   :  { %7170 = vmatprep.subr.bf16.mxu0 %v15029_v44  ;;  %7514 = vmatprep.subr.bf16.mxu1 %v15031_v30  ;;  %v1200_v44 = vrot.slane %v1191_v26, %v18573_v28  ;;  %v15068_v30 = vcombine.low %v593_v20, %v597_v21  ;;  %v15079_v55 = vcombine.high %v602_v41, %v606_v42 }
 0x344   :  { %v15094_v20 = vcombine.low %v18596_v1, %v18598_v2  ;;  %v638_v1 = vld [vmem:[#allocation5 + $0xeb8] sm:$0xff] }
 0x345   :  { %7160 = vmatmul.mubr.bf16.vlgmr.msra.gmra.mrb[4].mxu0 %v18506_v46  ;;  %7504 = vmatmul.mubr.bf16.vlgmr.msra.gmra.mrb[4].mxu1 %v18506_v46  ;;  %v15046_v46 = vcombine.low %v570_v56, %v574_v57 }
 0x346   :  { %7171 = vmatpush1.bf16.msra.mxu0 %v15028_v51  ;;  %7515 = vmatpush1.bf16.msra.mxu1 %v15030_v52  ;;  %v15077_v51 = vcombine.high %v601_v35, %v605_v39  ;;  %v18586_v52 = vld [vmem:[#allocation5 + $0xdd8] sm:$0xff] }
 0x347   :  { %7172 = vmatprep.subr.bf16.mxu0 %v15037_v58  ;;  %7516 = vmatprep.subr.bf16.mxu1 %v15039_v54  ;;  %v18588_v58 = vld [vmem:[#allocation5 + $0xdf8] sm:$0xff] }
 0x348   :  { %7202 = vmatprep.mubr.bf16.mxu0 %v18508_v53  ;;  %7546 = vmatprep.mubr.bf16.mxu1 %v18508_v53  ;;  %v15061_v53 = vcombine.high %v585_v11, %v589_v12 }
 0x34a   :  { %7173 = vmatpush1.bf16.msra.mxu0 %v15036_v59  ;;  %7517 = vmatpush1.bf16.msra.mxu1 %v15038_v60  ;;  %v15076_v60 = vcombine.low %v601_v35, %v605_v39  ;;  %v625_v39 = vld [vmem:[#allocation5 + $0xe50] sm:$0xff] }
 0x34b   :  { %7174 = vmatprep.subr.bf16.mxu0 %v15045_v61  ;;  %7518 = vmatprep.subr.bf16.mxu1 %v15047_v63  ;;  %v15078_v61 = vcombine.low %v602_v41, %v606_v42  ;;  %v15085_v63 = vcombine.high %v18581_v45, %v18583_v47 }
 0x34e   :  { %7175 = vmatpush1.bf16.msra.mxu0 %v15044_v6  ;;  %7519 = vmatpush1.bf16.msra.mxu1 %v15046_v46 }
 0x34f   :  { %7176 = vmatprep.subr.bf16.mxu0 %v15053_v7  ;;  %7520 = vmatprep.subr.bf16.mxu1 %v15055_v9  ;;  %v15084_v7 = vcombine.low %v18581_v45, %v18583_v47  ;;  %v15086_v9 = vcombine.low %v18586_v52, %v18588_v58 }
 0x352   :  { %7177 = vmatpush1.bf16.msra.mxu0 %v15052_v17  ;;  %7521 = vmatpush1.bf16.msra.mxu1 %v15054_v18  ;;  %v15087_v18 = vcombine.high %v18586_v52, %v18588_v58 }
 0x353   :  { %7178 = vmatprep.subr.bf16.mxu0 %v15061_v53  ;;  %7522 = vmatprep.subr.bf16.mxu1 %v15063_v19  ;;  %v15092_v53 = vcombine.low %v18590_v37, %v18594_v0  ;;  %v15093_v19 = vcombine.high %v18590_v37, %v18594_v0  ;;  %v634_v0 = vld [vmem:[#allocation5 + $0xe98] sm:$0xff] }
 0x356   :  { %7179 = vmatpush1.bf16.msra.mxu0 %v15060_v24  ;;  %7523 = vmatpush1.bf16.msra.mxu1 %v15062_v31 }
 0x357   :  { %7180 = vmatprep.subr.bf16.mxu0 %v15069_v33  ;;  %7524 = vmatprep.subr.bf16.mxu1 %v15071_v34 }
 0x358   :  { %v6688_v54 = vpop.f32.mrb[0].mxu0  ;;  %v7032_v57 = vpop.f32.mrb[0].mxu1 }
 0x359   :  { %v16663_v56 = vadd.f32 %v6688_v54, %v1196_v40  ;;  %v6690_v59 = vpop.f32.mrb[1].mxu0  ;;  %v16667_v4 = vadd.f32 %v7032_v57, %v1204_v43  ;;  %v7034_v6 = vpop.f32.mrb[1].mxu1 }
 0x35a   :  { %v16664_v5 = vadd.f32 %v6690_v59, %v1200_v44  ;;  %v6692_v46 = vpop.f32.mrb[2].mxu0  ;;  %7181 = vmatpush1.bf16.msra.mxu0 %v15068_v30  ;;  %v16668_v12 = vadd.f32 %v7034_v6, %v1208_v49  ;;  %v7036_v13 = vpop.f32.mrb[2].mxu1  ;;  %7525 = vmatpush1.bf16.msra.mxu1 %v15070_v50  ;;  %v630_v50 = vld [vmem:[#allocation5 + $0xe78] sm:$0xff]  ;;  %v15111_v6 = vcombine.high %v634_v0, %v638_v1 }
 0x35b   :  { %v7745_v11 = vmul.f32 0.01, %v16663_v56  ;;  %v16665_v15 = vadd.f32 %v6692_v46, %v1196_v40  ;;  %v6694_v17 = vpop.f32.mrb[3].mxu0  ;;  %7182 = vmatprep.subr.bf16.mxu0 %v15077_v51  ;;  %vm7729_vm0 = vcmp.ge.f32.partialorder %v16663_v56, 0.0  ;;  %7526 = vmatprep.subr.bf16.mxu1 %v15079_v55  ;;  %vm7731_vm1 = vcmp.ge.f32.partialorder %v16667_v4, 0.0  ;;  %v7038_v23 = vpop.f32.mrb[3].mxu1 }
 0x35c   :  { %v7747_v21 = vmul.f32 0.01, %v16667_v4  ;;  %vm7730_vm3 = vcmp.ge.f32.partialorder %v16664_v5, 0.0  ;;  %v7746_v24 = vmul.f32 0.01, %v16664_v5  ;;  %v16669_v31 = vadd.f32 %v7036_v13, %v1204_v43  ;;  %v629_v40 = vld [vmem:[#allocation5 + $0xe70] sm:$0xff] }
 0x35d   :  { %vm7737_vm2 = vcmp.ge.f32.partialorder %v16665_v15, 0.0  ;;  %v7753_v26 = vmul.f32 0.01, %v16665_v15  ;;  %v7761_v33 = vsel %vm7729_vm0, %v16663_v56, %v7745_v11  ;;  %vm7732_vm4 = vcmp.ge.f32.partialorder %v16668_v12, 0.0  ;;  %v626_v43 = vld [vmem:[#allocation5 + $0xe58] sm:$0xff]  ;;  %v641_v46 = vld [vmem:[#allocation5 + $0xed0] sm:$0xff] }
 0x35e   :  { %7183 = vmatpush1.bf16.msra.mxu0 %v15076_v60  ;;  %v16666_v34 = vadd.f32 %v6694_v17, %v1200_v44  ;;  %v16670_v35 = vadd.f32 %v7038_v23, %v1208_v49  ;;  %7527 = vmatpush1.bf16.msra.mxu1 %v15078_v61  ;;  %v7748_v41 = vmul.f32 0.01, %v16668_v12  ;;  %vm7739_vm5 = vcmp.ge.f32.partialorder %v16669_v31, 0.0  ;;  %v633_v60 = vld [vmem:[#allocation5 + $0xe90] sm:$0xff]  ;;  %v646_v11 = vld [vmem:[#allocation5 + $0xef8] sm:$0xff] }
 0x35f   :  { %7184 = vmatprep.subr.bf16.mxu0 %v15085_v63  ;;  %v7769_v42 = vsel %vm7737_vm2, %v16665_v15, %v7753_v26  ;;  %v7755_v30 = vmul.f32 0.01, %v16669_v31  ;;  %7528 = vmatprep.subr.bf16.mxu1 %v15087_v18  ;;  %v7763_v44 = vsel %vm7731_vm1, %v16667_v4, %v7747_v21  ;;  %v15101_v52 = vcombine.high %v625_v39, %v629_v40  ;;  %v637_v61 = vld [vmem:[#allocation5 + $0xeb0] sm:$0xff] }
 0x360   :  { %v18615_v45 = vpack.c.bf16 %v7769_v42, %v7761_v33  ;;  %vm7738_vm6 = vcmp.ge.f32.partialorder %v16666_v34, 0.0  ;;  %v7754_v47 = vmul.f32 0.01, %v16666_v34  ;;  %vm7740_vm7 = vcmp.ge.f32.partialorder %v16670_v35, 0.0  ;;  %v649_v18 = vld [vmem:[#allocation5 + $0xf10] sm:$0xff]  ;;  %v658_v33 = vld [vmem:[#allocation5 + $0xf58] sm:$0xff] }
 0x361   :  { %v7771_v49 = vsel %vm7739_vm5, %v16669_v31, %v7755_v30  ;;  %v7756_v51 = vmul.f32 0.01, %v16670_v35  ;;  %v7762_v58 = vsel %vm7730_vm3, %v16664_v5, %v7746_v24  ;;  %v7764_v37 = vsel %vm7732_vm4, %v16668_v12, %v7748_v41  ;;  %v657_v26 = vld [vmem:[#allocation5 + $0xf50] sm:$0xff] }
 0x362   :  { %7185 = vmatpush1.bf16.msra.mxu0 %v15084_v7  ;;  %v18619_v54 = vpack.c.bf16 %v7771_v49, %v7763_v44  ;;  %v7770_v55 = vsel %vm7738_vm6, %v16666_v34, %v7754_v47  ;;  %7529 = vmatpush1.bf16.msra.mxu1 %v15086_v9  ;;  %v15103_v59 = vcombine.high %v626_v43, %v630_v50  ;;  %v645_v7 = vld [vmem:[#allocation5 + $0xef0] sm:$0xff]  ;;  %v642_v9 = vld [vmem:[#allocation5 + $0xed8] sm:$0xff] }
 0x363   :  { %7186 = vmatprep.subr.bf16.mxu0 %v15093_v19  ;;  %v18622_v56 = vpack.c.bf16 %v7770_v55, %v7762_v58  ;;  %v7772_v57 = vsel %vm7740_vm7, %v16670_v35, %v7756_v51  ;;  %7530 = vmatprep.subr.bf16.mxu1 %v15095_v25  ;;  %v15100_v2 = vcombine.low %v625_v39, %v629_v40  ;;  %v650_v19 = vld [vmem:[#allocation5 + $0xf18] sm:$0xff]  ;;  %v661_v31 = vld [vmem:[#allocation5 + $0xf70] sm:$0xff] }
 0x364   :  { %v18624_v63 = vpack.c.bf16 %v7772_v57, %v7764_v37  ;;  %v15102_v4 = vcombine.low %v626_v43, %v630_v50  ;;  %v15109_v5 = vcombine.high %v633_v60, %v637_v61  ;;  %v15108_v12 = vcombine.low %v633_v60, %v637_v61  ;;  %v662_v34 = vld [vmem:[#allocation5 + $0xf78] sm:$0xff]  ;;  %v665_v42 = vld [vmem:[#allocation5 + $0xf90] sm:$0xff] }
 0x365   :  { %v15110_v15 = vcombine.low %v634_v0, %v638_v1  ;;  %v15117_v13 = vcombine.high %v641_v46, %v645_v7  ;;  %v15119_v17 = vcombine.high %v642_v9, %v646_v11  ;;  %v15116_v21 = vcombine.low %v641_v46, %v645_v7  ;;  %v669_v30 = vld [vmem:[#allocation5 + $0xfb0] sm:$0xff]  ;;  %v666_v47 = vld [vmem:[#allocation5 + $0xf98] sm:$0xff] }
 0x366   :  { %7187 = vmatpush1.bf16.msra.mxu0 %v15092_v53  ;;  %7531 = vmatpush1.bf16.msra.mxu1 %v15094_v20  ;;  %v653_v53 = vld [vmem:[#allocation5 + $0xf30] sm:$0xff]  ;;  %v654_v20 = vld [vmem:[#allocation5 + $0xf38] sm:$0xff]  ;;  %v15118_v23 = vcombine.low %v642_v9, %v646_v11  ;;  %v15133_v40 = vcombine.high %v657_v26, %v661_v31  ;;  %v15135_v41 = vcombine.high %v658_v33, %v662_v34 }
 0x367   :  { %7188 = vmatprep.subr.bf16.mxu0 %v15101_v52  ;;  %7532 = vmatprep.subr.bf16.mxu1 %v15103_v59  ;;  %v15125_v25 = vcombine.high %v649_v18, %v653_v53  ;;  %v15127_v24 = vcombine.high %v650_v19, %v654_v20  ;;  %v15124_v35 = vcombine.low %v649_v18, %v653_v53  ;;  %v670_v43 = vld [vmem:[#allocation5 + $0xfb8] sm:$0xff]  ;;  %v673_v52 = vld [vmem:[#allocation5 + $0xfd0] sm:$0xff] }
 0x368   :  { %v15126_v39 = vcombine.low %v650_v19, %v654_v20  ;;  %v15132_v50 = vcombine.low %v657_v26, %v661_v31  ;;  %v15134_v44 = vcombine.low %v658_v33, %v662_v34  ;;  %v15141_v49 = vcombine.high %v665_v42, %v669_v30  ;;  %v677_v58 = vld [vmem:[#allocation5 + $0xff0] sm:$0xff]  ;;  %v674_v55 = vld [vmem:[#allocation5 + $0xfd8] sm:$0xff] }
 0x369   :  { %v15143_v51 = vcombine.high %v666_v47, %v670_v43  ;;  %v678_v37 = vld [vmem:[#allocation5 + $0xff8] sm:$0xff]  ;;  %v15140_v57 = vcombine.low %v665_v42, %v669_v30  ;;  %v15142_v59 = vcombine.low %v666_v47, %v670_v43  ;;  %v15149_v60 = vcombine.high %v673_v52, %v677_v58  ;;  %v681_v0 = vld [vmem:[#allocation5 + $0x1010] sm:$0xff] }
 0x36a   :  { %7189 = vmatpush1.bf16.msra.mxu0 %v15100_v2  ;;  %7533 = vmatpush1.bf16.msra.mxu1 %v15102_v4  ;;  %v15151_v61 = vcombine.high %v674_v55, %v678_v37  ;;  %v685_v1 = vld [vmem:[#allocation5 + $0x1030] sm:$0xff]  ;;  %v682_v2 = vld [vmem:[#allocation5 + $0x1018] sm:$0xff] }
 0x36b   :  { %7190 = vmatprep.subr.bf16.mxu0 %v15109_v5  ;;  %7534 = vmatprep.subr.bf16.mxu1 %v15111_v6  ;;  %v686_v4 = vld [vmem:[#allocation5 + $0x1038] sm:$0xff]  ;;  %v15148_v5 = vcombine.low %v673_v52, %v677_v58  ;;  %v15150_v6 = vcombine.low %v674_v55, %v678_v37  ;;  %v15157_v46 = vcombine.high %v681_v0, %v685_v1  ;;  %v689_v9 = vld [vmem:[#allocation5 + $0x1050] sm:$0xff] }
 0x36c   :  { %v15159_v7 = vcombine.high %v682_v2, %v686_v4  ;;  %v693_v11 = vld [vmem:[#allocation5 + $0x1070] sm:$0xff]  ;;  %v714_v43 = vld [vmem:[#allocation5 + $0x1118] sm:$0xff] }
 0x36d   :  { %v15165_v18 = vcombine.high %v689_v9, %v693_v11  ;;  %v697_v19 = vld [vmem:[#allocation5 + $0x1090] sm:$0xff]  ;;  %v722_v55 = vld [vmem:[#allocation5 + $0x1158] sm:$0xff] }
 0x36e   :  { %7191 = vmatpush1.bf16.msra.mxu0 %v15108_v12  ;;  %7535 = vmatpush1.bf16.msra.mxu1 %v15110_v15  ;;  %v690_v12 = vld [vmem:[#allocation5 + $0x1058] sm:$0xff]  ;;  %v701_v20 = vld [vmem:[#allocation5 + $0x10b0] sm:$0xff] }
 0x36f   :  { %7192 = vmatprep.subr.bf16.mxu0 %v15117_v13  ;;  %7536 = vmatprep.subr.bf16.mxu1 %v15119_v17  ;;  %v694_v15 = vld [vmem:[#allocation5 + $0x1078] sm:$0xff]  ;;  %v15156_v13 = vcombine.low %v681_v0, %v685_v1  ;;  %v15158_v17 = vcombine.low %v682_v2, %v686_v4  ;;  %v15173_v26 = vcombine.high %v697_v19, %v701_v20  ;;  %v705_v33 = vld [vmem:[#allocation5 + $0x10d0] sm:$0xff] }
 0x370   :  { %v15167_v53 = vcombine.high %v690_v12, %v694_v15  ;;  %v709_v34 = vld [vmem:[#allocation5 + $0x10f0] sm:$0xff]  ;;  %v726_v37 = vld [vmem:[#allocation5 + $0x1178] sm:$0xff] }
 0x371   :  { %v713_v30 = vld [vmem:[#allocation5 + $0x1110] sm:$0xff]  ;;  %v730_v2 = vld [vmem:[#allocation5 + $0x1198] sm:$0xff] }
 0x372   :  { %7193 = vmatpush1.bf16.msra.mxu0 %v15116_v21  ;;  %7537 = vmatpush1.bf16.msra.mxu1 %v15118_v23  ;;  %v698_v21 = vld [vmem:[#allocation5 + $0x1098] sm:$0xff]  ;;  %v717_v47 = vld [vmem:[#allocation5 + $0x1130] sm:$0xff] }
 0x373   :  { %7194 = vmatprep.subr.bf16.mxu0 %v15125_v25  ;;  %7538 = vmatprep.subr.bf16.mxu1 %v15127_v24  ;;  %v702_v23 = vld [vmem:[#allocation5 + $0x10b8] sm:$0xff]  ;;  %v15164_v25 = vcombine.low %v689_v9, %v693_v11  ;;  %v15166_v24 = vcombine.low %v690_v12, %v694_v15  ;;  %v721_v52 = vld [vmem:[#allocation5 + $0x1150] sm:$0xff] }
 0x374   :  { %v15175_v31 = vcombine.high %v698_v21, %v702_v23  ;;  %v725_v58 = vld [vmem:[#allocation5 + $0x1170] sm:$0xff]  ;;  %v734_v4 = vld [vmem:[#allocation5 + $0x11b8] sm:$0xff] }
 0x375   :  { %v729_v0 = vld [vmem:[#allocation5 + $0x1190] sm:$0xff]  ;;  %v738_v12 = vld [vmem:[#allocation5 + $0x11d8] sm:$0xff] }
 0x376   :  { %7195 = vmatpush1.bf16.msra.mxu0 %v15124_v35  ;;  %7539 = vmatpush1.bf16.msra.mxu1 %v15126_v39  ;;  %v706_v35 = vld [vmem:[#allocation5 + $0x10d8] sm:$0xff]  ;;  %v733_v1 = vld [vmem:[#allocation5 + $0x11b0] sm:$0xff] }
 0x377   :  { %7196 = vmatprep.subr.bf16.mxu0 %v15133_v40  ;;  %7540 = vmatprep.subr.bf16.mxu1 %v15135_v41  ;;  %v710_v39 = vld [vmem:[#allocation5 + $0x10f8] sm:$0xff]  ;;  %v15172_v40 = vcombine.low %v697_v19, %v701_v20  ;;  %v15181_v41 = vcombine.high %v705_v33, %v709_v34  ;;  %v737_v9 = vld [vmem:[#allocation5 + $0x11d0] sm:$0xff] }
 0x378   :  { %v15183_v42 = vcombine.high %v706_v35, %v710_v39  ;;  %v741_v11 = vld [vmem:[#allocation5 + $0x11f0] sm:$0xff]  ;;  %v742_v15 = vld [vmem:[#allocation5 + $0x11f8] sm:$0xff] }
 0x379   :  { %v745_v19 = vld [vmem:[#allocation5 + $0x1210] sm:$0xff] }
 0x37a   :  { %7197 = vmatpush1.bf16.msra.mxu0 %v15132_v50  ;;  %7541 = vmatpush1.bf16.msra.mxu1 %v15134_v44  ;;  %v718_v50 = vld [vmem:[#allocation5 + $0x1138] sm:$0xff]  ;;  %v15180_v44 = vcombine.low %v705_v33, %v709_v34  ;;  %v749_v20 = vld [vmem:[#allocation5 + $0x1230] sm:$0xff] }
 0x37b   :  { %7198 = vmatprep.subr.bf16.mxu0 %v15141_v49  ;;  %7542 = vmatprep.subr.bf16.mxu1 %v15143_v51  ;;  %v15182_v49 = vcombine.low %v706_v35, %v710_v39  ;;  %v15189_v51 = vcombine.high %v713_v30, %v717_v47  ;;  %v753_v33 = vld [vmem:[#allocation5 + $0x1250] sm:$0xff]  ;;  %v754_v35 = vld [vmem:[#allocation5 + $0x1258] sm:$0xff] }
 0x37c   :  { %v757_v34 = vld [vmem:[#allocation5 + $0x1270] sm:$0xff]  ;;  %v758_v39 = vld [vmem:[#allocation5 + $0x1278] sm:$0xff] }
 0x37e   :  { %7199 = vmatpush1.bf16.msra.mxu0 %v15140_v57  ;;  %7543 = vmatpush1.bf16.msra.mxu1 %v15142_v59  ;;  %v15188_v57 = vcombine.low %v713_v30, %v717_v47  ;;  %v15190_v59 = vcombine.low %v714_v43, %v718_v50  ;;  %v761_v30 = vld [vmem:[#allocation5 + $0x1290] sm:$0xff] }
 0x37f   :  { %7200 = vmatprep.subr.bf16.mxu0 %v15149_v60  ;;  %7544 = vmatprep.subr.bf16.mxu1 %v15151_v61  ;;  %v15197_v60 = vcombine.high %v721_v52, %v725_v58  ;;  %v15199_v61 = vcombine.high %v722_v55, %v726_v37  ;;  %v765_v47 = vld [vmem:[#allocation5 + $0x12b0] sm:$0xff] }
 0x382   :  { %7201 = vmatpush1.bf16.msra.mxu0 %v15148_v5  ;;  %7545 = vmatpush1.bf16.msra.mxu1 %v15150_v6  ;;  %v15196_v5 = vcombine.low %v721_v52, %v725_v58  ;;  %v15198_v6 = vcombine.low %v722_v55, %v726_v37  ;;  %v769_v52 = vld [vmem:[#allocation5 + $0x12d0] sm:$0xff]  ;;  %v770_v55 = vld [vmem:[#allocation5 + $0x12d8] sm:$0xff] }
 0x383   :  { %7213 = vmatprep.subr.bf16.mxu0 %v15157_v46  ;;  %7557 = vmatprep.subr.bf16.mxu1 %v15159_v7  ;;  %v15205_v46 = vcombine.high %v729_v0, %v733_v1  ;;  %v15207_v7 = vcombine.high %v730_v2, %v734_v4  ;;  %v773_v58 = vld [vmem:[#allocation5 + $0x12f0] sm:$0xff]  ;;  %v774_v37 = vld [vmem:[#allocation5 + $0x12f8] sm:$0xff] }
 0x385   :  { %7203 = vmatmul.mubr.bf16.vlgmr.msra.gmra.mrb[4].mxu0 %v18514_v3  ;;  %7547 = vmatmul.mubr.bf16.vlgmr.msra.gmra.mrb[4].mxu1 %v18514_v3  ;;  %v15174_v3 = vcombine.low %v698_v21, %v702_v23  ;;  %v746_v21 = vld [vmem:[#allocation5 + $0x1218] sm:$0xff] }
 0x386   :  { %7214 = vmatpush1.bf16.msra.mxu0 %v15156_v13  ;;  %7558 = vmatpush1.bf16.msra.mxu1 %v15158_v17  ;;  %v15204_v13 = vcombine.low %v729_v0, %v733_v1  ;;  %v15206_v17 = vcombine.low %v730_v2, %v734_v4  ;;  %v750_v23 = vld [vmem:[#allocation5 + $0x1238] sm:$0xff]  ;;  %v777_v0 = vld [vmem:[#allocation5 + $0x1310] sm:$0xff] }
 0x387   :  { %7215 = vmatprep.subr.bf16.mxu0 %v15165_v18  ;;  %7559 = vmatprep.subr.bf16.mxu1 %v15167_v53  ;;  %v15213_v18 = vcombine.high %v737_v9, %v741_v11  ;;  %v15215_v53 = vcombine.high %v738_v12, %v742_v15  ;;  %v781_v1 = vld [vmem:[#allocation5 + $0x1330] sm:$0xff]  ;;  %v778_v2 = vld [vmem:[#allocation5 + $0x1318] sm:$0xff] }
 0x388   :  { %7245 = vmatprep.mubr.bf16.mxu0 %v18516_v10  ;;  %7589 = vmatprep.mubr.bf16.mxu1 %v18516_v10  ;;  %v15191_v10 = vcombine.high %v714_v43, %v718_v50  ;;  %v762_v43 = vld [vmem:[#allocation5 + $0x1298] sm:$0xff] }
 0x389   :  { %v766_v50 = vld [vmem:[#allocation5 + $0x12b8] sm:$0xff] }
 0x38a   :  { %7216 = vmatpush1.bf16.msra.mxu0 %v15164_v25  ;;  %7560 = vmatpush1.bf16.msra.mxu1 %v15166_v24  ;;  %v15212_v25 = vcombine.low %v737_v9, %v741_v11  ;;  %v15214_v24 = vcombine.low %v738_v12, %v742_v15  ;;  %v782_v4 = vld [vmem:[#allocation5 + $0x1338] sm:$0xff]  ;;  %v785_v9 = vld [vmem:[#allocation5 + $0x1350] sm:$0xff] }
 0x38b   :  { %7217 = vmatprep.subr.bf16.mxu0 %v15173_v26  ;;  %7561 = vmatprep.subr.bf16.mxu1 %v15175_v31  ;;  %v15221_v26 = vcombine.high %v745_v19, %v749_v20  ;;  %v15223_v31 = vcombine.high %v746_v21, %v750_v23  ;;  %v789_v11 = vld [vmem:[#allocation5 + $0x1370] sm:$0xff]  ;;  %v786_v12 = vld [vmem:[#allocation5 + $0x1358] sm:$0xff] }
 0x38c   :  { %v790_v15 = vld [vmem:[#allocation5 + $0x1378] sm:$0xff] }
 0x38e   :  { %7218 = vmatpush1.bf16.msra.mxu0 %v15172_v40  ;;  %7562 = vmatpush1.bf16.msra.mxu1 %v15174_v3  ;;  %v15220_v40 = vcombine.low %v745_v19, %v749_v20  ;;  %v15222_v3 = vcombine.low %v746_v21, %v750_v23  ;;  %v793_v19 = vld [vmem:[#allocation5 + $0x1390] sm:$0xff]  ;;  %v794_v21 = vld [vmem:[#allocation5 + $0x1398] sm:$0xff] }
 0x38f   :  { %7219 = vmatprep.subr.bf16.mxu0 %v15181_v41  ;;  %7563 = vmatprep.subr.bf16.mxu1 %v15183_v42  ;;  %v15229_v41 = vcombine.high %v753_v33, %v757_v34  ;;  %v15231_v42 = vcombine.high %v754_v35, %v758_v39  ;;  %v797_v20 = vld [vmem:[#allocation5 + $0x13b0] sm:$0xff]  ;;  %v798_v23 = vld [vmem:[#allocation5 + $0x13b8] sm:$0xff] }
 0x392   :  { %7220 = vmatpush1.bf16.msra.mxu0 %v15180_v44  ;;  %7564 = vmatpush1.bf16.msra.mxu1 %v15182_v49  ;;  %v15228_v44 = vcombine.low %v753_v33, %v757_v34  ;;  %v15230_v49 = vcombine.low %v754_v35, %v758_v39  ;;  %v801_v33 = vld [vmem:[#allocation5 + $0x13d0] sm:$0xff]  ;;  %v802_v35 = vld [vmem:[#allocation5 + $0x13d8] sm:$0xff] }
 0x393   :  { %7221 = vmatprep.subr.bf16.mxu0 %v15189_v51  ;;  %7565 = vmatprep.subr.bf16.mxu1 %v15191_v10  ;;  %v15237_v51 = vcombine.high %v761_v30, %v765_v47  ;;  %v15239_v10 = vcombine.high %v762_v43, %v766_v50  ;;  %v805_v34 = vld [vmem:[#allocation5 + $0x13f0] sm:$0xff]  ;;  %v806_v39 = vld [vmem:[#allocation5 + $0x13f8] sm:$0xff] }
 0x396   :  { %7222 = vmatpush1.bf16.msra.mxu0 %v15188_v57  ;;  %7566 = vmatpush1.bf16.msra.mxu1 %v15190_v59  ;;  %v15236_v57 = vcombine.low %v761_v30, %v765_v47  ;;  %v15238_v59 = vcombine.low %v762_v43, %v766_v50  ;;  %v809_v30 = vld [vmem:[#allocation5 + $0x1410] sm:$0xff]  ;;  %v810_v43 = vld [vmem:[#allocation5 + $0x1418] sm:$0xff] }
 0x397   :  { %7223 = vmatprep.subr.bf16.mxu0 %v15197_v60  ;;  %7567 = vmatprep.subr.bf16.mxu1 %v15199_v61  ;;  %v15245_v60 = vcombine.high %v769_v52, %v773_v58  ;;  %v15247_v61 = vcombine.high %v770_v55, %v774_v37  ;;  %v813_v47 = vld [vmem:[#allocation5 + $0x1430] sm:$0xff]  ;;  %v814_v50 = vld [vmem:[#allocation5 + $0x1438] sm:$0xff] }
 0x39a   :  { %7224 = vmatpush1.bf16.msra.mxu0 %v15196_v5  ;;  %7568 = vmatpush1.bf16.msra.mxu1 %v15198_v6  ;;  %v15244_v5 = vcombine.low %v769_v52, %v773_v58  ;;  %v15246_v6 = vcombine.low %v770_v55, %v774_v37  ;;  %v817_v52 = vld [vmem:[#allocation5 + $0x1450] sm:$0xff]  ;;  %v818_v55 = vld [vmem:[#allocation5 + $0x1458] sm:$0xff] }
 0x39b   :  { %7225 = vmatprep.subr.bf16.mxu0 %v15205_v46  ;;  %7569 = vmatprep.subr.bf16.mxu1 %v15207_v7  ;;  %v15253_v46 = vcombine.high %v777_v0, %v781_v1  ;;  %v15255_v7 = vcombine.high %v778_v2, %v782_v4  ;;  %v821_v58 = vld [vmem:[#allocation5 + $0x1470] sm:$0xff]  ;;  %v822_v37 = vld [vmem:[#allocation5 + $0x1478] sm:$0xff] }
 0x39e   :  { %7226 = vmatpush1.bf16.msra.mxu0 %v15204_v13  ;;  %7570 = vmatpush1.bf16.msra.mxu1 %v15206_v17  ;;  %v15252_v13 = vcombine.low %v777_v0, %v781_v1  ;;  %v15254_v17 = vcombine.low %v778_v2, %v782_v4  ;;  %v825_v0 = vld [vmem:[#allocation5 + $0x1490] sm:$0xff]  ;;  %v826_v2 = vld [vmem:[#allocation5 + $0x1498] sm:$0xff] }
 0x39f   :  { %7227 = vmatprep.subr.bf16.mxu0 %v15213_v18  ;;  %7571 = vmatprep.subr.bf16.mxu1 %v15215_v53  ;;  %v15261_v18 = vcombine.high %v785_v9, %v789_v11  ;;  %v15263_v53 = vcombine.high %v786_v12, %v790_v15  ;;  %v829_v1 = vld [vmem:[#allocation5 + $0x14b0] sm:$0xff]  ;;  %v830_v4 = vld [vmem:[#allocation5 + $0x14b8] sm:$0xff] }
 0x3a2   :  { %7228 = vmatpush1.bf16.msra.mxu0 %v15212_v25  ;;  %7572 = vmatpush1.bf16.msra.mxu1 %v15214_v24  ;;  %v15260_v25 = vcombine.low %v785_v9, %v789_v11  ;;  %v15262_v24 = vcombine.low %v786_v12, %v790_v15  ;;  %v833_v9 = vld [vmem:[#allocation5 + $0x14d0] sm:$0xff]  ;;  %v834_v12 = vld [vmem:[#allocation5 + $0x14d8] sm:$0xff] }
 0x3a3   :  { %7229 = vmatprep.subr.bf16.mxu0 %v15221_v26  ;;  %7573 = vmatprep.subr.bf16.mxu1 %v15223_v31  ;;  %v15269_v26 = vcombine.high %v793_v19, %v797_v20  ;;  %v15271_v31 = vcombine.high %v794_v21, %v798_v23  ;;  %v837_v11 = vld [vmem:[#allocation5 + $0x14f0] sm:$0xff]  ;;  %v838_v15 = vld [vmem:[#allocation5 + $0x14f8] sm:$0xff] }
 0x3a6   :  { %7230 = vmatpush1.bf16.msra.mxu0 %v15220_v40  ;;  %7574 = vmatpush1.bf16.msra.mxu1 %v15222_v3  ;;  %v15268_v40 = vcombine.low %v793_v19, %v797_v20  ;;  %v15270_v3 = vcombine.low %v794_v21, %v798_v23  ;;  %v845_v19 = vld [vmem:[#allocation5 + $0x1530] sm:$0xff]  ;;  %v842_v20 = vld [vmem:[#allocation5 + $0x1518] sm:$0xff]  ;;  %v15308_v23 = vcombine.low %v833_v9, %v837_v11 }
 0x3a7   :  { %7231 = vmatprep.subr.bf16.mxu0 %v15229_v41  ;;  %7575 = vmatprep.subr.bf16.mxu1 %v15231_v42  ;;  %v15277_v41 = vcombine.high %v801_v33, %v805_v34  ;;  %v15279_v42 = vcombine.high %v802_v35, %v806_v39  ;;  %v846_v21 = vld [vmem:[#allocation5 + $0x1538] sm:$0xff] }
 0x3aa   :  { %7232 = vmatpush1.bf16.msra.mxu0 %v15228_v44  ;;  %7576 = vmatpush1.bf16.msra.mxu1 %v15230_v49  ;;  %v15276_v44 = vcombine.low %v801_v33, %v805_v34  ;;  %v15278_v49 = vcombine.low %v802_v35, %v806_v39  ;;  %v850_v33 = vld [vmem:[#allocation5 + $0x1558] sm:$0xff]  ;;  %v15318_v39 = vcombine.low %v842_v20, %v846_v21 }
 0x3ab   :  { %7233 = vmatprep.subr.bf16.mxu0 %v15237_v51  ;;  %7577 = vmatprep.subr.bf16.mxu1 %v15239_v10  ;;  %v15285_v51 = vcombine.high %v809_v30, %v813_v47  ;;  %v15287_v10 = vcombine.high %v810_v43, %v814_v50  ;;  %v854_v34 = vld [vmem:[#allocation5 + $0x1578] sm:$0xff] }
 0x3ae   :  { %7234 = vmatpush1.bf16.msra.mxu0 %v15236_v57  ;;  %7578 = vmatpush1.bf16.msra.mxu1 %v15238_v59  ;;  %v15284_v57 = vcombine.low %v809_v30, %v813_v47  ;;  %v15286_v59 = vcombine.low %v810_v43, %v814_v50  ;;  %v858_v30 = vld [vmem:[#allocation5 + $0x1598] sm:$0xff]  ;;  %v15326_v50 = vcombine.low %v850_v33, %v854_v34 }
 0x3af   :  { %7235 = vmatprep.subr.bf16.mxu0 %v15245_v60  ;;  %7579 = vmatprep.subr.bf16.mxu1 %v15247_v61  ;;  %v15293_v60 = vcombine.high %v817_v52, %v821_v58  ;;  %v15295_v61 = vcombine.high %v818_v55, %v822_v37  ;;  %v862_v47 = vld [vmem:[#allocation5 + $0x15b8] sm:$0xff] }
 0x3b2   :  { %7236 = vmatpush1.bf16.msra.mxu0 %v15244_v5  ;;  %7580 = vmatpush1.bf16.msra.mxu1 %v15246_v6  ;;  %v15292_v5 = vcombine.low %v817_v52, %v821_v58  ;;  %v15294_v6 = vcombine.low %v818_v55, %v822_v37  ;;  %v866_v52 = vld [vmem:[#allocation5 + $0x15d8] sm:$0xff]  ;;  %v15334_v37 = vcombine.low %v858_v30, %v862_v47 }
 0x3b3   :  { %7237 = vmatprep.subr.bf16.mxu0 %v15253_v46  ;;  %7581 = vmatprep.subr.bf16.mxu1 %v15255_v7  ;;  %v15301_v46 = vcombine.high %v825_v0, %v829_v1  ;;  %v15303_v7 = vcombine.high %v826_v2, %v830_v4  ;;  %v870_v58 = vld [vmem:[#allocation5 + $0x15f8] sm:$0xff] }
 0x3b6   :  { %7238 = vmatpush1.bf16.msra.mxu0 %v15252_v13  ;;  %7582 = vmatpush1.bf16.msra.mxu1 %v15254_v17  ;;  %v15300_v13 = vcombine.low %v825_v0, %v829_v1  ;;  %v15309_v17 = vcombine.high %v833_v9, %v837_v11  ;;  %v874_v0 = vld [vmem:[#allocation5 + $0x1618] sm:$0xff] }
 0x3b7   :  { %7239 = vmatprep.subr.bf16.mxu0 %v15261_v18  ;;  %7583 = vmatprep.subr.bf16.mxu1 %v15263_v53  ;;  %v15311_v18 = vcombine.high %v834_v12, %v838_v15  ;;  %v841_v53 = vld [vmem:[#allocation5 + $0x1510] sm:$0xff]  ;;  %v878_v1 = vld [vmem:[#allocation5 + $0x1638] sm:$0xff] }
 0x3b8   :  { %v15316_v35 = vcombine.low %v841_v53, %v845_v19  ;;  %v882_v9 = vld [vmem:[#allocation5 + $0x1658] sm:$0xff] }
 0x3b9   :  { %v886_v11 = vld [vmem:[#allocation5 + $0x1678] sm:$0xff] }
 0x3ba   :  { %7240 = vmatpush1.bf16.msra.mxu0 %v15260_v25  ;;  %7584 = vmatpush1.bf16.msra.mxu1 %v15262_v24  ;;  %v15310_v25 = vcombine.low %v834_v12, %v838_v15  ;;  %v15317_v24 = vcombine.high %v841_v53, %v845_v19  ;;  %v15350_v15 = vcombine.low %v874_v0, %v878_v1  ;;  %v890_v53 = vld [vmem:[#allocation5 + $0x1698] sm:$0xff] }
 0x3bb   :  { %7241 = vmatprep.subr.bf16.mxu0 %v15269_v26  ;;  %7585 = vmatprep.subr.bf16.mxu1 %v15271_v31  ;;  %v849_v26 = vld [vmem:[#allocation5 + $0x1550] sm:$0xff]  ;;  %v894_v19 = vld [vmem:[#allocation5 + $0x16b8] sm:$0xff] }
 0x3bc   :  { %v853_v31 = vld [vmem:[#allocation5 + $0x1570] sm:$0xff] }
 0x3bd   :  { %v15324_v43 = vcombine.low %v849_v26, %v853_v31 }
 0x3be   :  { %7242 = vmatpush1.bf16.msra.mxu0 %v15268_v40  ;;  %7586 = vmatpush1.bf16.msra.mxu1 %v15270_v3  ;;  %v15325_v40 = vcombine.high %v849_v26, %v853_v31  ;;  %v15327_v3 = vcombine.high %v850_v33, %v854_v34  ;;  %v898_v26 = vld [vmem:[#allocation5 + $0x16d8] sm:$0xff]  ;;  %v15366_v34 = vcombine.low %v890_v53, %v894_v19 }
 0x3bf   :  { %7243 = vmatprep.subr.bf16.mxu0 %v15277_v41  ;;  %7587 = vmatprep.subr.bf16.mxu1 %v15279_v42  ;;  %v857_v41 = vld [vmem:[#allocation5 + $0x1590] sm:$0xff]  ;;  %v902_v31 = vld [vmem:[#allocation5 + $0x16f8] sm:$0xff] }
 0x3c0   :  { %v861_v42 = vld [vmem:[#allocation5 + $0x15b0] sm:$0xff] }
 0x3c1   :  { %v15332_v55 = vcombine.low %v857_v41, %v861_v42 }
 0x3c2   :  { %7244 = vmatpush1.bf16.msra.mxu0 %v15276_v44  ;;  %7588 = vmatpush1.bf16.msra.mxu1 %v15278_v49  ;;  %v15333_v44 = vcombine.high %v857_v41, %v861_v42  ;;  %v15335_v49 = vcombine.high %v858_v30, %v862_v47  ;;  %v906_v41 = vld [vmem:[#allocation5 + $0x1718] sm:$0xff]  ;;  %v15374_v47 = vcombine.low %v898_v26, %v902_v31 }
 0x3c3   :  { %7256 = vmatprep.subr.bf16.mxu0 %v15285_v51  ;;  %7600 = vmatprep.subr.bf16.mxu1 %v15287_v10  ;;  %v865_v51 = vld [vmem:[#allocation5 + $0x15d0] sm:$0xff]  ;;  %v910_v42 = vld [vmem:[#allocation5 + $0x1738] sm:$0xff] }
 0x3c4   :  { %v869_v10 = vld [vmem:[#allocation5 + $0x15f0] sm:$0xff] }
 0x3c5   :  { %7246 = vmatmul.mubr.bf16.vlgmr.msra.gmra.mrb[4].mxu0 %v18522_v29  ;;  %7590 = vmatmul.mubr.bf16.vlgmr.msra.gmra.mrb[4].mxu1 %v18522_v29  ;;  %v15302_v29 = vcombine.low %v826_v2, %v830_v4  ;;  %v15340_v2 = vcombine.low %v865_v51, %v869_v10  ;;  %v15342_v4 = vcombine.low %v866_v52, %v870_v58 }
 0x3c6   :  { %7257 = vmatpush1.bf16.msra.mxu0 %v15284_v57  ;;  %7601 = vmatpush1.bf16.msra.mxu1 %v15286_v59  ;;  %v15341_v57 = vcombine.high %v865_v51, %v869_v10  ;;  %v15343_v59 = vcombine.high %v866_v52, %v870_v58  ;;  %v914_v51 = vld [vmem:[#allocation5 + $0x1758] sm:$0xff]  ;;  %v15382_v58 = vcombine.low %v906_v41, %v910_v42 }
 0x3c7   :  { %7258 = vmatprep.subr.bf16.mxu0 %v15293_v60  ;;  %7602 = vmatprep.subr.bf16.mxu1 %v15295_v61  ;;  %v873_v60 = vld [vmem:[#allocation5 + $0x1610] sm:$0xff]  ;;  %v918_v10 = vld [vmem:[#allocation5 + $0x1778] sm:$0xff] }
 0x3c8   :  { %7288 = vmatprep.mubr.bf16.mxu0 %v18524_v38  ;;  %7632 = vmatprep.mubr.bf16.mxu1 %v18524_v38  ;;  %v15319_v38 = vcombine.high %v842_v20, %v846_v21  ;;  %v877_v61 = vld [vmem:[#allocation5 + $0x1630] sm:$0xff]  ;;  %v15358_v21 = vcombine.low %v882_v9, %v886_v11 }
 0x3c9   :  { %v15348_v12 = vcombine.low %v873_v60, %v877_v61 }
 0x3ca   :  { %7259 = vmatpush1.bf16.msra.mxu0 %v15292_v5  ;;  %7603 = vmatpush1.bf16.msra.mxu1 %v15294_v6  ;;  %v15349_v5 = vcombine.high %v873_v60, %v877_v61  ;;  %v15351_v6 = vcombine.high %v874_v0, %v878_v1  ;;  %v922_v60 = vld [vmem:[#allocation5 + $0x1798] sm:$0xff]  ;;  %v15390_v1 = vcombine.low %v914_v51, %v918_v10 }
 0x3cb   :  { %7260 = vmatprep.subr.bf16.mxu0 %v15301_v46  ;;  %7604 = vmatprep.subr.bf16.mxu1 %v15303_v7  ;;  %v881_v46 = vld [vmem:[#allocation5 + $0x1650] sm:$0xff]  ;;  %v926_v61 = vld [vmem:[#allocation5 + $0x17b8] sm:$0xff] }
 0x3cc   :  { %v885_v7 = vld [vmem:[#allocation5 + $0x1670] sm:$0xff] }
 0x3cd   :  { %v15356_v20 = vcombine.low %v881_v46, %v885_v7 }
 0x3ce   :  { %7261 = vmatpush1.bf16.msra.mxu0 %v15300_v13  ;;  %7605 = vmatpush1.bf16.msra.mxu1 %v15302_v29  ;;  %v15357_v13 = vcombine.high %v881_v46, %v885_v7  ;;  %v15359_v29 = vcombine.high %v882_v9, %v886_v11  ;;  %v930_v46 = vld [vmem:[#allocation5 + $0x17d8] sm:$0xff]  ;;  %v15398_v11 = vcombine.low %v922_v60, %v926_v61 }
 0x3cf   :  { %7262 = vmatprep.subr.bf16.mxu0 %v15309_v17  ;;  %7606 = vmatprep.subr.bf16.mxu1 %v15311_v18  ;;  %v889_v17 = vld [vmem:[#allocation5 + $0x1690] sm:$0xff]  ;;  %v934_v7 = vld [vmem:[#allocation5 + $0x17f8] sm:$0xff] }
 0x3d0   :  { %v893_v18 = vld [vmem:[#allocation5 + $0x16b0] sm:$0xff] }
 0x3d1   :  { %v15364_v33 = vcombine.low %v889_v17, %v893_v18 }
 0x3d2   :  { %7263 = vmatpush1.bf16.msra.mxu0 %v15308_v23  ;;  %7607 = vmatpush1.bf16.msra.mxu1 %v15310_v25  ;;  %v15365_v23 = vcombine.high %v889_v17, %v893_v18  ;;  %v15367_v25 = vcombine.high %v890_v53, %v894_v19  ;;  %v938_v17 = vld [vmem:[#allocation5 + $0x1818] sm:$0xff]  ;;  %v15406_v19 = vcombine.low %v930_v46, %v934_v7 }
 0x3d3   :  { %7264 = vmatprep.subr.bf16.mxu0 %v15317_v24  ;;  %7608 = vmatprep.subr.bf16.mxu1 %v15319_v38  ;;  %v897_v24 = vld [vmem:[#allocation5 + $0x16d0] sm:$0xff]  ;;  %v942_v18 = vld [vmem:[#allocation5 + $0x1838] sm:$0xff] }
 0x3d4   :  { %v901_v38 = vld [vmem:[#allocation5 + $0x16f0] sm:$0xff] }
 0x3d5   :  { %v15372_v30 = vcombine.low %v897_v24, %v901_v38 }
 0x3d6   :  { %7265 = vmatpush1.bf16.msra.mxu0 %v15316_v35  ;;  %7609 = vmatpush1.bf16.msra.mxu1 %v15318_v39  ;;  %v15373_v35 = vcombine.high %v897_v24, %v901_v38  ;;  %v15375_v39 = vcombine.high %v898_v26, %v902_v31  ;;  %v946_v24 = vld [vmem:[#allocation5 + $0x1858] sm:$0xff]  ;;  %v15414_v31 = vcombine.low %v938_v17, %v942_v18 }
 0x3d7   :  { %7266 = vmatprep.subr.bf16.mxu0 %v15325_v40  ;;  %7610 = vmatprep.subr.bf16.mxu1 %v15327_v3  ;;  %v905_v40 = vld [vmem:[#allocation5 + $0x1710] sm:$0xff]  ;;  %v950_v38 = vld [vmem:[#allocation5 + $0x1878] sm:$0xff] }
 0x3d8   :  { %v909_v3 = vld [vmem:[#allocation5 + $0x1730] sm:$0xff] }
 0x3d9   :  { %v15380_v52 = vcombine.low %v905_v40, %v909_v3 }
 0x3da   :  { %7267 = vmatpush1.bf16.msra.mxu0 %v15324_v43  ;;  %7611 = vmatpush1.bf16.msra.mxu1 %v15326_v50  ;;  %v15381_v43 = vcombine.high %v905_v40, %v909_v3  ;;  %v15383_v50 = vcombine.high %v906_v41, %v910_v42  ;;  %v954_v40 = vld [vmem:[#allocation5 + $0x1898] sm:$0xff]  ;;  %v15422_v42 = vcombine.low %v946_v24, %v950_v38 }
 0x3db   :  { %7268 = vmatprep.subr.bf16.mxu0 %v15333_v44  ;;  %7612 = vmatprep.subr.bf16.mxu1 %v15335_v49  ;;  %v913_v44 = vld [vmem:[#allocation5 + $0x1750] sm:$0xff]  ;;  %v958_v3 = vld [vmem:[#allocation5 + $0x18b8] sm:$0xff] }
 0x3dc   :  { %v917_v49 = vld [vmem:[#allocation5 + $0x1770] sm:$0xff] }
 0x3dd   :  { %v15388_v0 = vcombine.low %v913_v44, %v917_v49 }
 0x3de   :  { %7269 = vmatpush1.bf16.msra.mxu0 %v15332_v55  ;;  %7613 = vmatpush1.bf16.msra.mxu1 %v15334_v37  ;;  %v15389_v55 = vcombine.high %v913_v44, %v917_v49  ;;  %v15391_v37 = vcombine.high %v914_v51, %v918_v10  ;;  %v962_v44 = vld [vmem:[#allocation5 + $0x18d8] sm:$0xff] }
 0x3df   :  { %7270 = vmatprep.subr.bf16.mxu0 %v15341_v57  ;;  %7614 = vmatprep.subr.bf16.mxu1 %v15343_v59  ;;  %v921_v57 = vld [vmem:[#allocation5 + $0x1790] sm:$0xff]  ;;  %v966_v49 = vld [vmem:[#allocation5 + $0x18f8] sm:$0xff] }
 0x3e0   :  { %v925_v59 = vld [vmem:[#allocation5 + $0x17b0] sm:$0xff] }
 0x3e1   :  { %v15396_v9 = vcombine.low %v921_v57, %v925_v59 }
 0x3e2   :  { %7271 = vmatpush1.bf16.msra.mxu0 %v15340_v2  ;;  %7615 = vmatpush1.bf16.msra.mxu1 %v15342_v4  ;;  %v15397_v2 = vcombine.high %v921_v57, %v925_v59  ;;  %v15399_v4 = vcombine.high %v922_v60, %v926_v61  ;;  %v974_v57 = vld [vmem:[#allocation5 + $0x1938] sm:$0xff]  ;;  %v15438_v60 = vcombine.low %v962_v44, %v966_v49 }
 0x3e3   :  { %7272 = vmatprep.subr.bf16.mxu0 %v15349_v5  ;;  %7616 = vmatprep.subr.bf16.mxu1 %v15351_v6  ;;  %v929_v5 = vld [vmem:[#allocation5 + $0x17d0] sm:$0xff] }
 0x3e4   :  { %v933_v6 = vld [vmem:[#allocation5 + $0x17f0] sm:$0xff] }
 0x3e5   :  { %v15404_v53 = vcombine.low %v929_v5, %v933_v6 }
 0x3e6   :  { %7273 = vmatpush1.bf16.msra.mxu0 %v15348_v12  ;;  %7617 = vmatpush1.bf16.msra.mxu1 %v15350_v15  ;;  %v15405_v12 = vcombine.high %v929_v5, %v933_v6  ;;  %v15407_v15 = vcombine.high %v930_v46, %v934_v7 }
 0x3e7   :  { %7274 = vmatprep.subr.bf16.mxu0 %v15357_v13  ;;  %7618 = vmatprep.subr.bf16.mxu1 %v15359_v29  ;;  %v937_v13 = vld [vmem:[#allocation5 + $0x1810] sm:$0xff] }
 0x3e8   :  { %v941_v29 = vld [vmem:[#allocation5 + $0x1830] sm:$0xff] }
 0x3e9   :  { %v15412_v26 = vcombine.low %v937_v13, %v941_v29 }
 0x3ea   :  { %7275 = vmatpush1.bf16.msra.mxu0 %v15356_v20  ;;  %7619 = vmatpush1.bf16.msra.mxu1 %v15358_v21  ;;  %v15413_v20 = vcombine.high %v937_v13, %v941_v29  ;;  %v15415_v21 = vcombine.high %v938_v17, %v942_v18 }
 0x3eb   :  { %7276 = vmatprep.subr.bf16.mxu0 %v15365_v23  ;;  %7620 = vmatprep.subr.bf16.mxu1 %v15367_v25  ;;  %v945_v23 = vld [vmem:[#allocation5 + $0x1850] sm:$0xff] }
 0x3ec   :  { %v949_v25 = vld [vmem:[#allocation5 + $0x1870] sm:$0xff] }
 0x3ed   :  { %v15420_v41 = vcombine.low %v945_v23, %v949_v25 }
 0x3ee   :  { %7277 = vmatpush1.bf16.msra.mxu0 %v15364_v33  ;;  %7621 = vmatpush1.bf16.msra.mxu1 %v15366_v34  ;;  %v15421_v33 = vcombine.high %v945_v23, %v949_v25  ;;  %v15423_v34 = vcombine.high %v946_v24, %v950_v38 }
 0x3ef   :  { %7278 = vmatprep.subr.bf16.mxu0 %v15373_v35  ;;  %7622 = vmatprep.subr.bf16.mxu1 %v15375_v39  ;;  %v953_v35 = vld [vmem:[#allocation5 + $0x1890] sm:$0xff] }
 0x3f0   :  { %v957_v39 = vld [vmem:[#allocation5 + $0x18b0] sm:$0xff] }
 0x3f1   :  { %v15428_v51 = vcombine.low %v953_v35, %v957_v39 }
 0x3f2   :  { %7279 = vmatpush1.bf16.msra.mxu0 %v15372_v30  ;;  %7623 = vmatpush1.bf16.msra.mxu1 %v15374_v47  ;;  %v15429_v30 = vcombine.high %v953_v35, %v957_v39  ;;  %v15431_v47 = vcombine.high %v954_v40, %v958_v3 }
 0x3f3   :  { %7280 = vmatprep.subr.bf16.mxu0 %v15381_v43  ;;  %7624 = vmatprep.subr.bf16.mxu1 %v15383_v50  ;;  %v961_v43 = vld [vmem:[#allocation5 + $0x18d0] sm:$0xff] }
 0x3f4   :  { %v965_v50 = vld [vmem:[#allocation5 + $0x18f0] sm:$0xff] }
 0x3f5   :  { %v15437_v10 = vcombine.high %v961_v43, %v965_v50  ;;  %v15436_v59 = vcombine.low %v961_v43, %v965_v50 }
 0x3f6   :  { %7281 = vmatpush1.bf16.msra.mxu0 %v15380_v52  ;;  %7625 = vmatpush1.bf16.msra.mxu1 %v15382_v58  ;;  %v15439_v52 = vcombine.high %v962_v44, %v966_v49  ;;  %v969_v58 = vld [vmem:[#allocation5 + $0x1910] sm:$0xff] }
 0x3f7   :  { %7282 = vmatprep.subr.bf16.mxu0 %v15389_v55  ;;  %7626 = vmatprep.subr.bf16.mxu1 %v15391_v37  ;;  %v973_v55 = vld [vmem:[#allocation5 + $0x1930] sm:$0xff]  ;;  %v970_v37 = vld [vmem:[#allocation5 + $0x1918] sm:$0xff] }
 0x3f8   :  { %v15445_v61 = vcombine.high %v969_v58, %v973_v55  ;;  %v15444_v5 = vcombine.low %v969_v58, %v973_v55  ;;  %v15446_v6 = vcombine.low %v970_v37, %v974_v57 }
 0x3fa   :  { %7283 = vmatpush1.bf16.msra.mxu0 %v15388_v0  ;;  %7627 = vmatpush1.bf16.msra.mxu1 %v15390_v1  ;;  %v977_v0 = vld [vmem:[#allocation5 + $0x1950] sm:$0xff] }
 0x3fb   :  { %7284 = vmatprep.subr.bf16.mxu0 %v15397_v2  ;;  %7628 = vmatprep.subr.bf16.mxu1 %v15399_v4  ;;  %v981_v1 = vld [vmem:[#allocation5 + $0x1970] sm:$0xff]  ;;  %v978_v2 = vld [vmem:[#allocation5 + $0x1958] sm:$0xff] }
 0x3fc   :  { %v982_v4 = vld [vmem:[#allocation5 + $0x1978] sm:$0xff]  ;;  %v15453_v46 = vcombine.high %v977_v0, %v981_v1  ;;  %v15452_v13 = vcombine.low %v977_v0, %v981_v1 }
 0x3fd   :  { %v15455_v7 = vcombine.high %v978_v2, %v982_v4  ;;  %v15454_v29 = vcombine.low %v978_v2, %v982_v4 }
 0x3fe   :  { %7285 = vmatpush1.bf16.msra.mxu0 %v15396_v9  ;;  %7629 = vmatpush1.bf16.msra.mxu1 %v15398_v11  ;;  %v985_v9 = vld [vmem:[#allocation5 + $0x1990] sm:$0xff] }
 0x3ff   :  { %7286 = vmatprep.subr.bf16.mxu0 %v15405_v12  ;;  %7630 = vmatprep.subr.bf16.mxu1 %v15407_v15  ;;  %v989_v11 = vld [vmem:[#allocation5 + $0x19b0] sm:$0xff]  ;;  %v986_v12 = vld [vmem:[#allocation5 + $0x1998] sm:$0xff] }
 0x400   :  { %v990_v15 = vld [vmem:[#allocation5 + $0x19b8] sm:$0xff]  ;;  %v15461_v17 = vcombine.high %v985_v9, %v989_v11  ;;  %v15460_v23 = vcombine.low %v985_v9, %v989_v11 }
 0x401   :  { %v15463_v18 = vcombine.high %v986_v12, %v990_v15  ;;  %v15462_v25 = vcombine.low %v986_v12, %v990_v15 }
 0x402   :  { %7287 = vmatpush1.bf16.msra.mxu0 %v15404_v53  ;;  %7631 = vmatpush1.bf16.msra.mxu1 %v15406_v19  ;;  %v993_v53 = vld [vmem:[#allocation5 + $0x19d0] sm:$0xff] }
 0x403   :  { %7299 = vmatprep.subr.bf16.mxu0 %v15413_v20  ;;  %7643 = vmatprep.subr.bf16.mxu1 %v15415_v21  ;;  %v997_v19 = vld [vmem:[#allocation5 + $0x19f0] sm:$0xff]  ;;  %v994_v20 = vld [vmem:[#allocation5 + $0x19d8] sm:$0xff] }
 0x404   :  { %v998_v21 = vld [vmem:[#allocation5 + $0x19f8] sm:$0xff]  ;;  %v15469_v24 = vcombine.high %v993_v53, %v997_v19  ;;  %v15468_v35 = vcombine.low %v993_v53, %v997_v19 }
 0x405   :  { %7289 = vmatmul.mubr.bf16.vlgmr.msra.gmra.mrb[4].mxu0 %v18530_v62  ;;  %7633 = vmatmul.mubr.bf16.vlgmr.msra.gmra.mrb[4].mxu1 %v18530_v62  ;;  %v15430_v62 = vcombine.low %v954_v40, %v958_v3  ;;  %v15471_v38 = vcombine.high %v994_v20, %v998_v21  ;;  %v15470_v39 = vcombine.low %v994_v20, %v998_v21 }
 0x406   :  { %7300 = vmatpush1.bf16.msra.mxu0 %v15412_v26  ;;  %7644 = vmatpush1.bf16.msra.mxu1 %v15414_v31  ;;  %v1001_v26 = vld [vmem:[#allocation5 + $0x1a10] sm:$0xff] }
 0x407   :  { %7301 = vmatprep.subr.bf16.mxu0 %v15421_v33  ;;  %7645 = vmatprep.subr.bf16.mxu1 %v15423_v34  ;;  %v1005_v31 = vld [vmem:[#allocation5 + $0x1a30] sm:$0xff]  ;;  %v1002_v33 = vld [vmem:[#allocation5 + $0x1a18] sm:$0xff] }
 0x408   :  { %7331 = vmatprep.mubr.bf16.mxu0 %v18532_v8  ;;  %7675 = vmatprep.mubr.bf16.mxu1 %v18532_v8  ;;  %v15447_v8 = vcombine.high %v970_v37, %v974_v57  ;;  %v1006_v34 = vld [vmem:[#allocation5 + $0x1a38] sm:$0xff]  ;;  %v15477_v40 = vcombine.high %v1001_v26, %v1005_v31  ;;  %v15476_v43 = vcombine.low %v1001_v26, %v1005_v31 }
 0x409   :  { %v15479_v3 = vcombine.high %v1002_v33, %v1006_v34  ;;  %v15478_v50 = vcombine.low %v1002_v33, %v1006_v34 }
 0x40a   :  { %7302 = vmatpush1.bf16.msra.mxu0 %v15420_v41  ;;  %7646 = vmatpush1.bf16.msra.mxu1 %v15422_v42  ;;  %v1009_v41 = vld [vmem:[#allocation5 + $0x1a50] sm:$0xff] }
 0x40b   :  { %7303 = vmatprep.subr.bf16.mxu0 %v15429_v30  ;;  %7647 = vmatprep.subr.bf16.mxu1 %v15431_v47  ;;  %v1013_v42 = vld [vmem:[#allocation5 + $0x1a70] sm:$0xff]  ;;  %v1010_v30 = vld [vmem:[#allocation5 + $0x1a58] sm:$0xff] }
 0x40c   :  { %v1014_v47 = vld [vmem:[#allocation5 + $0x1a78] sm:$0xff]  ;;  %v15485_v44 = vcombine.high %v1009_v41, %v1013_v42  ;;  %v15484_v58 = vcombine.low %v1009_v41, %v1013_v42 }
 0x40d   :  { %v15487_v49 = vcombine.high %v1010_v30, %v1014_v47  ;;  %v15486_v55 = vcombine.low %v1010_v30, %v1014_v47 }
 0x40e   :  { %7304 = vmatpush1.bf16.msra.mxu0 %v15428_v51  ;;  %7648 = vmatpush1.bf16.msra.mxu1 %v15430_v62  ;;  %v1017_v51 = vld [vmem:[#allocation5 + $0x1a90] sm:$0xff] }
 0x40f   :  { %7305 = vmatprep.subr.bf16.mxu0 %v15437_v10  ;;  %7649 = vmatprep.subr.bf16.mxu1 %v15439_v52  ;;  %v1021_v62 = vld [vmem:[#allocation5 + $0x1ab0] sm:$0xff]  ;;  %v1018_v10 = vld [vmem:[#allocation5 + $0x1a98] sm:$0xff] }
 0x410   :  { %v1022_v52 = vld [vmem:[#allocation5 + $0x1ab8] sm:$0xff]  ;;  %v15493_v37 = vcombine.high %v1017_v51, %v1021_v62  ;;  %v15492_v0 = vcombine.low %v1017_v51, %v1021_v62 }
 0x411   :  { %v15495_v57 = vcombine.high %v1018_v10, %v1022_v52  ;;  %v15494_v1 = vcombine.low %v1018_v10, %v1022_v52 }
 0x412   :  { %7306 = vmatpush1.bf16.msra.mxu0 %v15436_v59  ;;  %7650 = vmatpush1.bf16.msra.mxu1 %v15438_v60  ;;  %v1025_v59 = vld [vmem:[#allocation5 + $0x1ad0] sm:$0xff] }
 0x413   :  { %7307 = vmatprep.subr.bf16.mxu0 %v15445_v61  ;;  %7651 = vmatprep.subr.bf16.mxu1 %v15447_v8  ;;  %v1029_v60 = vld [vmem:[#allocation5 + $0x1af0] sm:$0xff]  ;;  %v1026_v61 = vld [vmem:[#allocation5 + $0x1ad8] sm:$0xff] }
 0x414   :  { %v1030_v8 = vld [vmem:[#allocation5 + $0x1af8] sm:$0xff]  ;;  %v15501_v2 = vcombine.high %v1025_v59, %v1029_v60  ;;  %v15500_v9 = vcombine.low %v1025_v59, %v1029_v60 }
 0x415   :  { %v15503_v4 = vcombine.high %v1026_v61, %v1030_v8  ;;  %v15502_v11 = vcombine.low %v1026_v61, %v1030_v8 }
 0x416   :  { %7308 = vmatpush1.bf16.msra.mxu0 %v15444_v5  ;;  %7652 = vmatpush1.bf16.msra.mxu1 %v15446_v6  ;;  %v1033_v5 = vld [vmem:[#allocation5 + $0x1b10] sm:$0xff] }
 0x417   :  { %7309 = vmatprep.subr.bf16.mxu0 %v15453_v46  ;;  %7653 = vmatprep.subr.bf16.mxu1 %v15455_v7  ;;  %v1037_v6 = vld [vmem:[#allocation5 + $0x1b30] sm:$0xff]  ;;  %v1034_v46 = vld [vmem:[#allocation5 + $0x1b18] sm:$0xff] }
 0x418   :  { %v1038_v7 = vld [vmem:[#allocation5 + $0x1b38] sm:$0xff]  ;;  %v15509_v12 = vcombine.high %v1033_v5, %v1037_v6  ;;  %v15508_v53 = vcombine.low %v1033_v5, %v1037_v6 }
 0x419   :  { %v15511_v15 = vcombine.high %v1034_v46, %v1038_v7  ;;  %v15510_v19 = vcombine.low %v1034_v46, %v1038_v7 }
 0x41a   :  { %7310 = vmatpush1.bf16.msra.mxu0 %v15452_v13  ;;  %7654 = vmatpush1.bf16.msra.mxu1 %v15454_v29  ;;  %v1041_v13 = vld [vmem:[#allocation5 + $0x1b50] sm:$0xff] }
 0x41b   :  { %7311 = vmatprep.subr.bf16.mxu0 %v15461_v17  ;;  %7655 = vmatprep.subr.bf16.mxu1 %v15463_v18  ;;  %v1045_v29 = vld [vmem:[#allocation5 + $0x1b70] sm:$0xff]  ;;  %v1042_v17 = vld [vmem:[#allocation5 + $0x1b58] sm:$0xff] }
 0x41c   :  { %v1046_v18 = vld [vmem:[#allocation5 + $0x1b78] sm:$0xff]  ;;  %v15517_v20 = vcombine.high %v1041_v13, %v1045_v29  ;;  %v15516_v26 = vcombine.low %v1041_v13, %v1045_v29 }
 0x41d   :  { %v15519_v21 = vcombine.high %v1042_v17, %v1046_v18  ;;  %v15518_v31 = vcombine.low %v1042_v17, %v1046_v18  ;;  %v1097_v18 = vld [vmem:[#allocation5 + $0x1d10] sm:$0xff] }
 0x41e   :  { %7312 = vmatpush1.bf16.msra.mxu0 %v15460_v23  ;;  %7656 = vmatpush1.bf16.msra.mxu1 %v15462_v25  ;;  %v1049_v23 = vld [vmem:[#allocation5 + $0x1b90] sm:$0xff] }
 0x41f   :  { %7313 = vmatprep.subr.bf16.mxu0 %v15469_v24  ;;  %7657 = vmatprep.subr.bf16.mxu1 %v15471_v38  ;;  %v1053_v25 = vld [vmem:[#allocation5 + $0x1bb0] sm:$0xff]  ;;  %v1050_v24 = vld [vmem:[#allocation5 + $0x1b98] sm:$0xff] }
 0x420   :  { %v1054_v38 = vld [vmem:[#allocation5 + $0x1bb8] sm:$0xff]  ;;  %v15525_v33 = vcombine.high %v1049_v23, %v1053_v25  ;;  %v15524_v41 = vcombine.low %v1049_v23, %v1053_v25 }
 0x421   :  { %v15527_v34 = vcombine.high %v1050_v24, %v1054_v38  ;;  %v15526_v42 = vcombine.low %v1050_v24, %v1054_v38  ;;  %v1105_v24 = vld [vmem:[#allocation5 + $0x1d50] sm:$0xff] }
 0x422   :  { %7314 = vmatpush1.bf16.msra.mxu0 %v15468_v35  ;;  %7658 = vmatpush1.bf16.msra.mxu1 %v15470_v39  ;;  %v1057_v35 = vld [vmem:[#allocation5 + $0x1bd0] sm:$0xff] }
 0x423   :  { %7315 = vmatprep.subr.bf16.mxu0 %v15477_v40  ;;  %7659 = vmatprep.subr.bf16.mxu1 %v15479_v3  ;;  %v1061_v39 = vld [vmem:[#allocation5 + $0x1bf0] sm:$0xff]  ;;  %v1058_v40 = vld [vmem:[#allocation5 + $0x1bd8] sm:$0xff] }
 0x424   :  { %v1062_v3 = vld [vmem:[#allocation5 + $0x1bf8] sm:$0xff]  ;;  %v15533_v30 = vcombine.high %v1057_v35, %v1061_v39  ;;  %v15532_v51 = vcombine.low %v1057_v35, %v1061_v39  ;;  %v1109_v38 = vld [vmem:[#allocation5 + $0x1d70] sm:$0xff] }
 0x425   :  { %v15535_v47 = vcombine.high %v1058_v40, %v1062_v3  ;;  %v15534_v62 = vcombine.low %v1058_v40, %v1062_v3  ;;  %v15581_v35 = vcombine.high %v1105_v24, %v1109_v38  ;;  %v1113_v40 = vld [vmem:[#allocation5 + $0x1d90] sm:$0xff] }
 0x426   :  { %7316 = vmatpush1.bf16.msra.mxu0 %v15476_v43  ;;  %7660 = vmatpush1.bf16.msra.mxu1 %v15478_v50  ;;  %v1065_v43 = vld [vmem:[#allocation5 + $0x1c10] sm:$0xff] }
 0x427   :  { %7317 = vmatprep.subr.bf16.mxu0 %v15485_v44  ;;  %7661 = vmatprep.subr.bf16.mxu1 %v15487_v49  ;;  %v1069_v50 = vld [vmem:[#allocation5 + $0x1c30] sm:$0xff]  ;;  %v1066_v44 = vld [vmem:[#allocation5 + $0x1c18] sm:$0xff] }
 0x428   :  { %v1070_v49 = vld [vmem:[#allocation5 + $0x1c38] sm:$0xff]  ;;  %v15541_v10 = vcombine.high %v1065_v43, %v1069_v50  ;;  %v15540_v59 = vcombine.low %v1065_v43, %v1069_v50  ;;  %v1117_v3 = vld [vmem:[#allocation5 + $0x1db0] sm:$0xff] }
 0x429   :  { %v15543_v52 = vcombine.high %v1066_v44, %v1070_v49  ;;  %v15542_v60 = vcombine.low %v1066_v44, %v1070_v49  ;;  %v15589_v43 = vcombine.high %v1113_v40, %v1117_v3  ;;  %v1121_v44 = vld [vmem:[#allocation5 + $0x1dd0] sm:$0xff] }
 0x42a   :  { %7318 = vmatpush1.bf16.msra.mxu0 %v15484_v58  ;;  %7662 = vmatpush1.bf16.msra.mxu1 %v15486_v55  ;;  %v1073_v58 = vld [vmem:[#allocation5 + $0x1c50] sm:$0xff] }
 0x42b   :  { %7319 = vmatprep.subr.bf16.mxu0 %v15493_v37  ;;  %7663 = vmatprep.subr.bf16.mxu1 %v15495_v57  ;;  %v1077_v55 = vld [vmem:[#allocation5 + $0x1c70] sm:$0xff]  ;;  %v1074_v37 = vld [vmem:[#allocation5 + $0x1c58] sm:$0xff] }
 0x42c   :  { %v1078_v57 = vld [vmem:[#allocation5 + $0x1c78] sm:$0xff]  ;;  %v15549_v61 = vcombine.high %v1073_v58, %v1077_v55  ;;  %v15548_v5 = vcombine.low %v1073_v58, %v1077_v55  ;;  %v1125_v49 = vld [vmem:[#allocation5 + $0x1df0] sm:$0xff] }
 0x42d   :  { %v15551_v8 = vcombine.high %v1074_v37, %v1078_v57  ;;  %v15550_v6 = vcombine.low %v1074_v37, %v1078_v57  ;;  %v15597_v58 = vcombine.high %v1121_v44, %v1125_v49  ;;  %v1129_v37 = vld [vmem:[#allocation5 + $0x1e10] sm:$0xff] }
 0x42e   :  { %7320 = vmatpush1.bf16.msra.mxu0 %v15492_v0  ;;  %7664 = vmatpush1.bf16.msra.mxu1 %v15494_v1  ;;  %v1081_v0 = vld [vmem:[#allocation5 + $0x1c90] sm:$0xff] }
 0x42f   :  { %7321 = vmatprep.subr.bf16.mxu0 %v15501_v2  ;;  %7665 = vmatprep.subr.bf16.mxu1 %v15503_v4  ;;  %v1085_v1 = vld [vmem:[#allocation5 + $0x1cb0] sm:$0xff]  ;;  %v1082_v2 = vld [vmem:[#allocation5 + $0x1c98] sm:$0xff] }
 0x430   :  { %v1086_v4 = vld [vmem:[#allocation5 + $0x1cb8] sm:$0xff]  ;;  %v15557_v46 = vcombine.high %v1081_v0, %v1085_v1  ;;  %v15556_v13 = vcombine.low %v1081_v0, %v1085_v1  ;;  %v1133_v57 = vld [vmem:[#allocation5 + $0x1e30] sm:$0xff] }
 0x431   :  { %v15559_v7 = vcombine.high %v1082_v2, %v1086_v4  ;;  %v15605_v0 = vcombine.high %v1129_v37, %v1133_v57 }
 0x432   :  { %7322 = vmatpush1.bf16.msra.mxu0 %v15500_v9  ;;  %7666 = vmatpush1.bf16.msra.mxu1 %v15502_v11  ;;  %v1089_v9 = vld [vmem:[#allocation5 + $0x1cd0] sm:$0xff] }
 0x433   :  { %7323 = vmatprep.subr.bf16.mxu0 %v15509_v12  ;;  %7667 = vmatprep.subr.bf16.mxu1 %v15511_v15  ;;  %v1093_v11 = vld [vmem:[#allocation5 + $0x1cf0] sm:$0xff]  ;;  %v1090_v12 = vld [vmem:[#allocation5 + $0x1cd8] sm:$0xff] }
 0x434   :  { %v1094_v15 = vld [vmem:[#allocation5 + $0x1cf8] sm:$0xff]  ;;  %v15565_v29 = vcombine.high %v1089_v9, %v1093_v11 }
 0x435   :  { %v15567_v17 = vcombine.high %v1090_v12, %v1094_v15  ;;  %v15566_v23 = vcombine.low %v1090_v12, %v1094_v15  ;;  %v1145_v12 = vld [vmem:[#allocation5 + $0x1e90] sm:$0xff] }
 0x436   :  { %7324 = vmatpush1.bf16.msra.mxu0 %v15508_v53  ;;  %7668 = vmatpush1.bf16.msra.mxu1 %v15510_v19  ;;  %v1101_v53 = vld [vmem:[#allocation5 + $0x1d30] sm:$0xff]  ;;  %v1098_v19 = vld [vmem:[#allocation5 + $0x1d18] sm:$0xff] }
 0x437   :  { %7325 = vmatprep.subr.bf16.mxu0 %v15517_v20  ;;  %7669 = vmatprep.subr.bf16.mxu1 %v15519_v21  ;;  %v1102_v20 = vld [vmem:[#allocation5 + $0x1d38] sm:$0xff]  ;;  %v15564_v21 = vcombine.low %v1089_v9, %v1093_v11  ;;  %v15573_v25 = vcombine.high %v1097_v18, %v1101_v53  ;;  %v1149_v15 = vld [vmem:[#allocation5 + $0x1eb0] sm:$0xff] }
 0x43a   :  { %7326 = vmatpush1.bf16.msra.mxu0 %v15516_v26  ;;  %7670 = vmatpush1.bf16.msra.mxu1 %v15518_v31  ;;  %v1106_v26 = vld [vmem:[#allocation5 + $0x1d58] sm:$0xff] }
 0x43b   :  { %7327 = vmatprep.subr.bf16.mxu0 %v15525_v33  ;;  %7671 = vmatprep.subr.bf16.mxu1 %v15527_v34  ;;  %v1110_v31 = vld [vmem:[#allocation5 + $0x1d78] sm:$0xff]  ;;  %v15572_v33 = vcombine.low %v1097_v18, %v1101_v53  ;;  %v15574_v34 = vcombine.low %v1098_v19, %v1102_v20  ;;  %v15621_v18 = vcombine.high %v1145_v12, %v1149_v15 }
 0x43c   :  { %v15583_v39 = vcombine.high %v1106_v26, %v1110_v31 }
 0x43e   :  { %7328 = vmatpush1.bf16.msra.mxu0 %v15524_v41  ;;  %7672 = vmatpush1.bf16.msra.mxu1 %v15526_v42  ;;  %v1114_v41 = vld [vmem:[#allocation5 + $0x1d98] sm:$0xff] }
 0x43f   :  { %7329 = vmatprep.subr.bf16.mxu0 %v15533_v30  ;;  %7673 = vmatprep.subr.bf16.mxu1 %v15535_v47  ;;  %v1118_v42 = vld [vmem:[#allocation5 + $0x1db8] sm:$0xff]  ;;  %v15580_v30 = vcombine.low %v1105_v24, %v1109_v38  ;;  %v15582_v47 = vcombine.low %v1106_v26, %v1110_v31  ;;  %v1161_v26 = vld [vmem:[#allocation5 + $0x1f10] sm:$0xff] }
 0x440   :  { %v15591_v50 = vcombine.high %v1114_v41, %v1118_v42  ;;  %v1165_v31 = vld [vmem:[#allocation5 + $0x1f30] sm:$0xff] }
 0x442   :  { %7330 = vmatpush1.bf16.msra.mxu0 %v15532_v51  ;;  %7674 = vmatpush1.bf16.msra.mxu1 %v15534_v62  ;;  %v1122_v51 = vld [vmem:[#allocation5 + $0x1dd8] sm:$0xff] }
 0x443   :  { %7342 = vmatprep.subr.bf16.mxu0 %v15541_v10  ;;  %7686 = vmatprep.subr.bf16.mxu1 %v15543_v52  ;;  %v1126_v62 = vld [vmem:[#allocation5 + $0x1df8] sm:$0xff]  ;;  %v15588_v10 = vcombine.low %v1113_v40, %v1117_v3  ;;  %v15590_v52 = vcombine.low %v1114_v41, %v1118_v42  ;;  %v15637_v40 = vcombine.high %v1161_v26, %v1165_v31  ;;  %v1169_v41 = vld [vmem:[#allocation5 + $0x1f50] sm:$0xff] }
 0x444   :  { %v15599_v55 = vcombine.high %v1122_v51, %v1126_v62  ;;  %v1173_v42 = vld [vmem:[#allocation5 + $0x1f70] sm:$0xff] }
 0x445   :  { %7332 = vmatmul.mubr.bf16.vlgmr.msra.gmra.mrb[4].mxu0 %v18538_v36  ;;  %7676 = vmatmul.mubr.bf16.vlgmr.msra.gmra.mrb[4].mxu1 %v18538_v36  ;;  %v15558_v36 = vcombine.low %v1082_v2, %v1086_v4  ;;  %v1137_v2 = vld [vmem:[#allocation5 + $0x1e50] sm:$0xff] }
 0x446   :  { %7343 = vmatpush1.bf16.msra.mxu0 %v15540_v59  ;;  %7687 = vmatpush1.bf16.msra.mxu1 %v15542_v60  ;;  %v1130_v59 = vld [vmem:[#allocation5 + $0x1e18] sm:$0xff]  ;;  %v1141_v4 = vld [vmem:[#allocation5 + $0x1e70] sm:$0xff] }
 0x447   :  { %7344 = vmatprep.subr.bf16.mxu0 %v15549_v61  ;;  %7688 = vmatprep.subr.bf16.mxu1 %v15551_v8  ;;  %v1134_v60 = vld [vmem:[#allocation5 + $0x1e38] sm:$0xff]  ;;  %v15596_v61 = vcombine.low %v1121_v44, %v1125_v49  ;;  %v15598_v8 = vcombine.low %v1122_v51, %v1126_v62  ;;  %v15613_v9 = vcombine.high %v1137_v2, %v1141_v4  ;;  %v1177_v51 = vld [vmem:[#allocation5 + $0x1f90] sm:$0xff] }
 0x448   :  { %7374 = vmatprep.mubr.bf16.mxu0 %v18540_v48  ;;  %7718 = vmatprep.mubr.bf16.mxu1 %v18540_v48  ;;  %v15575_v48 = vcombine.high %v1098_v19, %v1102_v20  ;;  %v15607_v1 = vcombine.high %v1130_v59, %v1134_v60  ;;  %v1153_v19 = vld [vmem:[#allocation5 + $0x1ed0] sm:$0xff]  ;;  %v15645_v44 = vcombine.high %v1169_v41, %v1173_v42 }
 0x449   :  { %v1157_v20 = vld [vmem:[#allocation5 + $0x1ef0] sm:$0xff] }
 0x44a   :  { %7345 = vmatpush1.bf16.msra.mxu0 %v15548_v5  ;;  %7689 = vmatpush1.bf16.msra.mxu1 %v15550_v6  ;;  %v1138_v5 = vld [vmem:[#allocation5 + $0x1e58] sm:$0xff]  ;;  %v15629_v24 = vcombine.high %v1153_v19, %v1157_v20  ;;  %v1181_v62 = vld [vmem:[#allocation5 + $0x1fb0] sm:$0xff] }
 0x44b   :  { %7346 = vmatprep.subr.bf16.mxu0 %v15557_v46  ;;  %7690 = vmatprep.subr.bf16.mxu1 %v15559_v7  ;;  %v1142_v6 = vld [vmem:[#allocation5 + $0x1e78] sm:$0xff]  ;;  %v15604_v46 = vcombine.low %v1129_v37, %v1133_v57  ;;  %v15606_v7 = vcombine.low %v1130_v59, %v1134_v60  ;;  %v15653_v37 = vcombine.high %v1177_v51, %v1181_v62  ;;  %v1185_v59 = vld [vmem:[#allocation5 + $0x1fd0] sm:$0xff] }
 0x44c   :  { %v15615_v11 = vcombine.high %v1138_v5, %v1142_v6  ;;  %v1189_v60 = vld [vmem:[#allocation5 + $0x1ff0] sm:$0xff] }
 0x44e   :  { %7347 = vmatpush1.bf16.msra.mxu0 %v15556_v13  ;;  %7691 = vmatpush1.bf16.msra.mxu1 %v15558_v36  ;;  %v1146_v13 = vld [vmem:[#allocation5 + $0x1e98] sm:$0xff] }
 0x44f   :  { %7348 = vmatprep.subr.bf16.mxu0 %v15565_v29  ;;  %7692 = vmatprep.subr.bf16.mxu1 %v15567_v17  ;;  %v1150_v36 = vld [vmem:[#allocation5 + $0x1eb8] sm:$0xff]  ;;  %v15612_v29 = vcombine.low %v1137_v2, %v1141_v4  ;;  %v15614_v17 = vcombine.low %v1138_v5, %v1142_v6  ;;  %v15661_v2 = vcombine.high %v1185_v59, %v1189_v60 }
 0x450   :  { %v15623_v53 = vcombine.high %v1146_v13, %v1150_v36  ;;  %v15660_v5 = vcombine.low %v1185_v59, %v1189_v60  ;;  %v16977_v59 = vld [vmem:[#allocation8 + $0x42c] ss:$48 sps:$4 sm:$0xff]   ;;  %v16972_v60 = vld [vmem:[#allocation8 + $0x420] ss:$48 sps:$4 sm:$0xff]  }
 0x452   :  { %7349 = vmatpush1.bf16.msra.mxu0 %v15564_v21  ;;  %7693 = vmatpush1.bf16.msra.mxu1 %v15566_v23  ;;  %v1154_v21 = vld [vmem:[#allocation5 + $0x1ed8] sm:$0xff] }
 0x453   :  { %7350 = vmatprep.subr.bf16.mxu0 %v15573_v25  ;;  %7694 = vmatprep.subr.bf16.mxu1 %v15575_v48  ;;  %v1158_v23 = vld [vmem:[#allocation5 + $0x1ef8] sm:$0xff]  ;;  %v15620_v25 = vcombine.low %v1145_v12, %v1149_v15  ;;  %v15622_v48 = vcombine.low %v1146_v13, %v1150_v36  ;;  %v16917_v15 = vld [vmem:[#allocation8 + $0x6c] ss:$48 sps:$4 sm:$0xff]   ;;  %v16915_v36 = vld [vmem:[#allocation8 + $0x68] ss:$48 sps:$4 sm:$0xff]  }
 0x454   :  { %v15631_v38 = vcombine.high %v1154_v21, %v1158_v23  ;;  %v16914_v12 = vld [vmem:[#allocation8 + $0x64] ss:$48 sps:$4 sm:$0xff]   ;;  %v16912_v13 = vld [vmem:[#allocation8 + $0x60] ss:$48 sps:$4 sm:$0xff]  }
 0x456   :  { %7351 = vmatpush1.bf16.msra.mxu0 %v15572_v33  ;;  %7695 = vmatpush1.bf16.msra.mxu1 %v15574_v34  ;;  %v1162_v33 = vld [vmem:[#allocation5 + $0x1f18] sm:$0xff] }
 0x457   :  { %7352 = vmatprep.subr.bf16.mxu0 %v15581_v35  ;;  %7696 = vmatprep.subr.bf16.mxu1 %v15583_v39  ;;  %v1166_v34 = vld [vmem:[#allocation5 + $0x1f38] sm:$0xff]  ;;  %v15628_v35 = vcombine.low %v1153_v19, %v1157_v20  ;;  %v15630_v39 = vcombine.low %v1154_v21, %v1158_v23  ;;  %v16927_v21 = vld [vmem:[#allocation8 + $0x128] ss:$48 sps:$4 sm:$0xff]  }
 0x458   :  { %v15639_v3 = vcombine.high %v1162_v33, %v1166_v34  ;;  %v16926_v19 = vld [vmem:[#allocation8 + $0x124] ss:$48 sps:$4 sm:$0xff]   ;;  %v16924_v20 = vld [vmem:[#allocation8 + $0x120] ss:$48 sps:$4 sm:$0xff]  }
 0x459   :  { %v16932_v23 = vld [vmem:[#allocation8 + $0x184] ss:$48 sps:$4 sm:$0xff]  }
 0x45a   :  { %7353 = vmatpush1.bf16.msra.mxu0 %v15580_v30  ;;  %7697 = vmatpush1.bf16.msra.mxu1 %v15582_v47  ;;  %v1170_v30 = vld [vmem:[#allocation5 + $0x1f58] sm:$0xff] }
 0x45b   :  { %7354 = vmatprep.subr.bf16.mxu0 %v15589_v43  ;;  %7698 = vmatprep.subr.bf16.mxu1 %v15591_v50  ;;  %v1174_v47 = vld [vmem:[#allocation5 + $0x1f78] sm:$0xff]  ;;  %v15636_v43 = vcombine.low %v1161_v26, %v1165_v31  ;;  %v15638_v50 = vcombine.low %v1162_v33, %v1166_v34  ;;  %v16941_v26 = vld [vmem:[#allocation8 + $0x1ec] ss:$48 sps:$4 sm:$0xff]   ;;  %v16939_v33 = vld [vmem:[#allocation8 + $0x1e8] ss:$48 sps:$4 sm:$0xff]  }
 0x45c   :  { %v15647_v49 = vcombine.high %v1170_v30, %v1174_v47  ;;  %v16936_v31 = vld [vmem:[#allocation8 + $0x1e0] ss:$48 sps:$4 sm:$0xff]   ;;  %v16944_v34 = vld [vmem:[#allocation8 + $0x244] ss:$48 sps:$4 sm:$0xff]  }
 0x45e   :  { %7355 = vmatpush1.bf16.msra.mxu0 %v15588_v10  ;;  %7699 = vmatpush1.bf16.msra.mxu1 %v15590_v52  ;;  %v1178_v10 = vld [vmem:[#allocation5 + $0x1f98] sm:$0xff] }
 0x45f   :  { %7356 = vmatprep.subr.bf16.mxu0 %v15597_v58  ;;  %7700 = vmatprep.subr.bf16.mxu1 %v15599_v55  ;;  %v1182_v52 = vld [vmem:[#allocation5 + $0x1fb8] sm:$0xff]  ;;  %v15644_v58 = vcombine.low %v1169_v41, %v1173_v42  ;;  %v15646_v55 = vcombine.low %v1170_v30, %v1174_v47  ;;  %v16953_v41 = vld [vmem:[#allocation8 + $0x2ac] ss:$48 sps:$4 sm:$0xff]   ;;  %v16951_v30 = vld [vmem:[#allocation8 + $0x2a8] ss:$48 sps:$4 sm:$0xff]  }
 0x460   :  { %v15655_v57 = vcombine.high %v1178_v10, %v1182_v52  ;;  %v16948_v42 = vld [vmem:[#allocation8 + $0x2a0] ss:$48 sps:$4 sm:$0xff]   ;;  %v16956_v47 = vld [vmem:[#allocation8 + $0x304] ss:$48 sps:$4 sm:$0xff]  }
 0x462   :  { %7357 = vmatpush1.bf16.msra.mxu0 %v15596_v61  ;;  %7701 = vmatpush1.bf16.msra.mxu1 %v15598_v8  ;;  %v1186_v61 = vld [vmem:[#allocation5 + $0x1fd8] sm:$0xff] }
 0x463   :  { %7358 = vmatprep.subr.bf16.mxu0 %v15605_v0  ;;  %7702 = vmatprep.subr.bf16.mxu1 %v15607_v1  ;;  %v1190_v8 = vld [vmem:[#allocation5 + $0x1ff8] sm:$0xff]  ;;  %v15652_v0 = vcombine.low %v1177_v51, %v1181_v62  ;;  %v15654_v1 = vcombine.low %v1178_v10, %v1182_v52  ;;  %v16965_v51 = vld [vmem:[#allocation8 + $0x36c] ss:$48 sps:$4 sm:$0xff]   ;;  %v16963_v10 = vld [vmem:[#allocation8 + $0x368] ss:$48 sps:$4 sm:$0xff]  }
 0x464   :  { %v15663_v4 = vcombine.high %v1186_v61, %v1190_v8  ;;  %v15662_v6 = vcombine.low %v1186_v61, %v1190_v8  ;;  %v16960_v62 = vld [vmem:[#allocation8 + $0x360] ss:$48 sps:$4 sm:$0xff]   ;;  %v16968_v52 = vld [vmem:[#allocation8 + $0x3c4] ss:$48 sps:$4 sm:$0xff]   ;;  %v16975_v61 = vld [vmem:[#allocation8 + $0x428] ss:$48 sps:$4 sm:$0xff]  }
 0x465   :  { %v16980_v8 = vld [vmem:[#allocation8 + $0x484] ss:$48 sps:$4 sm:$0xff]  }
 0x466   :  { %7359 = vmatpush1.bf16.msra.mxu0 %v15604_v46  ;;  %7703 = vmatpush1.bf16.msra.mxu1 %v15606_v7  ;;  %v16908_v46 = vld [vmem:[#allocation8 + $0x4] ss:$48 sps:$4 sm:$0xff]   ;;  %v16911_v7 = vld [vmem:[#allocation8 + $0xc] ss:$48 sps:$4 sm:$0xff]  }
 0x467   :  { %7360 = vmatprep.subr.bf16.mxu0 %v15613_v9  ;;  %7704 = vmatprep.subr.bf16.mxu1 %v15615_v11  ;;  %v16906_v9 = vld [vmem:[#allocation8] ss:$48 sps:$4 sm:$0xff]   ;;  %v16909_v11 = vld [vmem:[#allocation8 + $0x8] ss:$48 sps:$4 sm:$0xff]  }
 0x46a   :  { %7361 = vmatpush1.bf16.msra.mxu0 %v15612_v29  ;;  %7705 = vmatpush1.bf16.msra.mxu1 %v15614_v17  ;;  %v16920_v29 = vld [vmem:[#allocation8 + $0xc4] ss:$48 sps:$4 sm:$0xff]   ;;  %v16923_v17 = vld [vmem:[#allocation8 + $0xcc] ss:$48 sps:$4 sm:$0xff]  }
 0x46b   :  { %7362 = vmatprep.subr.bf16.mxu0 %v15621_v18  ;;  %7706 = vmatprep.subr.bf16.mxu1 %v15623_v53  ;;  %v16918_v18 = vld [vmem:[#allocation8 + $0xc0] ss:$48 sps:$4 sm:$0xff]   ;;  %v16921_v53 = vld [vmem:[#allocation8 + $0xc8] ss:$48 sps:$4 sm:$0xff]  }
 0x46e   :  { %7363 = vmatpush1.bf16.msra.mxu0 %v15620_v25  ;;  %7707 = vmatpush1.bf16.msra.mxu1 %v15622_v48  ;;  %v16935_v25 = vld [vmem:[#allocation8 + $0x18c] ss:$48 sps:$4 sm:$0xff]   ;;  %v16930_v48 = vld [vmem:[#allocation8 + $0x180] ss:$48 sps:$4 sm:$0xff]  }
 0x46f   :  { %7364 = vmatprep.subr.bf16.mxu0 %v15629_v24  ;;  %7708 = vmatprep.subr.bf16.mxu1 %v15631_v38  ;;  %v16933_v24 = vld [vmem:[#allocation8 + $0x188] ss:$48 sps:$4 sm:$0xff]   ;;  %v16938_v38 = vld [vmem:[#allocation8 + $0x1e4] ss:$48 sps:$4 sm:$0xff]  }
 0x472   :  { %7365 = vmatpush1.bf16.msra.mxu0 %v15628_v35  ;;  %7709 = vmatpush1.bf16.msra.mxu1 %v15630_v39  ;;  %v16947_v35 = vld [vmem:[#allocation8 + $0x24c] ss:$48 sps:$4 sm:$0xff]   ;;  %v16942_v39 = vld [vmem:[#allocation8 + $0x240] ss:$48 sps:$4 sm:$0xff]  }
 0x473   :  { %7366 = vmatprep.subr.bf16.mxu0 %v15637_v40  ;;  %7710 = vmatprep.subr.bf16.mxu1 %v15639_v3  ;;  %v16945_v40 = vld [vmem:[#allocation8 + $0x248] ss:$48 sps:$4 sm:$0xff]   ;;  %v16950_v3 = vld [vmem:[#allocation8 + $0x2a4] ss:$48 sps:$4 sm:$0xff]  }
 0x476   :  { %7367 = vmatpush1.bf16.msra.mxu0 %v15636_v43  ;;  %7711 = vmatpush1.bf16.msra.mxu1 %v15638_v50  ;;  %v16959_v43 = vld [vmem:[#allocation8 + $0x30c] ss:$48 sps:$4 sm:$0xff]   ;;  %v16954_v50 = vld [vmem:[#allocation8 + $0x300] ss:$48 sps:$4 sm:$0xff]  }
 0x477   :  { %7368 = vmatprep.subr.bf16.mxu0 %v15645_v44  ;;  %7712 = vmatprep.subr.bf16.mxu1 %v15647_v49  ;;  %v16957_v44 = vld [vmem:[#allocation8 + $0x308] ss:$48 sps:$4 sm:$0xff]   ;;  %v16962_v49 = vld [vmem:[#allocation8 + $0x364] ss:$48 sps:$4 sm:$0xff]  }
 0x47a   :  { %7369 = vmatpush1.bf16.msra.mxu0 %v15644_v58  ;;  %7713 = vmatpush1.bf16.msra.mxu1 %v15646_v55  ;;  %v16971_v58 = vld [vmem:[#allocation8 + $0x3cc] ss:$48 sps:$4 sm:$0xff]   ;;  %v16966_v55 = vld [vmem:[#allocation8 + $0x3c0] ss:$48 sps:$4 sm:$0xff]  }
 0x47b   :  { %7370 = vmatprep.subr.bf16.mxu0 %v15653_v37  ;;  %7714 = vmatprep.subr.bf16.mxu1 %v15655_v57  ;;  %v16969_v37 = vld [vmem:[#allocation8 + $0x3c8] ss:$48 sps:$4 sm:$0xff]   ;;  %v16974_v57 = vld [vmem:[#allocation8 + $0x424] ss:$48 sps:$4 sm:$0xff]  }
 0x47e   :  { %7371 = vmatpush1.bf16.msra.mxu0 %v15652_v0  ;;  %7715 = vmatpush1.bf16.msra.mxu1 %v15654_v1  ;;  %v16983_v0 = vld [vmem:[#allocation8 + $0x48c] ss:$48 sps:$4 sm:$0xff]   ;;  %v16978_v1 = vld [vmem:[#allocation8 + $0x480] ss:$48 sps:$4 sm:$0xff]  }
 0x47f   :  { %7372 = vmatprep.subr.bf16.mxu0 %v15661_v2  ;;  %7716 = vmatprep.subr.bf16.mxu1 %v15663_v4  ;;  %v16981_v2 = vld [vmem:[#allocation8 + $0x488] ss:$48 sps:$4 sm:$0xff]   ;;  %v16986_v4 = vld [vmem:[#allocation8 + $0x4e4] ss:$48 sps:$4 sm:$0xff]  }
 0x482   :  { %7373 = vmatpush1.bf16.msra.mxu0 %v15660_v5  ;;  %7717 = vmatpush1.bf16.msra.mxu1 %v15662_v6  ;;  %v16989_v5 = vld [vmem:[#allocation8 + $0x4ec] ss:$48 sps:$4 sm:$0xff]   ;;  %v16984_v6 = vld [vmem:[#allocation8 + $0x4e0] ss:$48 sps:$4 sm:$0xff]  }
 0x483   :  { %12457 = vmatprep.subr.bf16.mxu0 %v16908_v46  ;;  %12629 = vmatprep.subr.bf16.mxu1 %v16911_v7  ;;  %v16987_v46 = vld [vmem:[#allocation8 + $0x4e8] ss:$48 sps:$4 sm:$0xff]   ;;  %v16992_v7 = vld [vmem:[#allocation8 + $0x544] ss:$48 sps:$4 sm:$0xff]  }
 0x485   :  { %7375 = vmatmul.mubr.bf16.vlgmr.msra.gmra.mrb[4].mxu0 %v18546_v16  ;;  %7719 = vmatmul.mubr.bf16.vlgmr.msra.gmra.mrb[4].mxu1 %v18546_v16  ;;  %v16929_v16 = vld [vmem:[#allocation8 + $0x12c] ss:$48 sps:$4 sm:$0xff]  }
 0x486   :  { %12458 = vmatpush1.bf16.msra.mxu0 %v16906_v9  ;;  %12489 = vmatprep.mubr.bf16.mxu0 %v18622_v56  ;;  %v16995_v9 = vld [vmem:[#allocation8 + $0x54c] ss:$48 sps:$4 sm:$0xff]  }
 0x487   :  { %12630 = vmatpush1.bf16.msra.mxu1 %v16909_v11  ;;  %12661 = vmatprep.mubr.bf16.mxu1 %v18622_v56  ;;  %v16990_v11 = vld [vmem:[#allocation8 + $0x540] ss:$48 sps:$4 sm:$0xff]  }
 0x488   :  { %12459 = vmatprep.subr.bf16.mxu0 %v16914_v12  ;;  %12631 = vmatprep.subr.bf16.mxu1 %v16917_v15  ;;  %v16993_v12 = vld [vmem:[#allocation8 + $0x548] ss:$48 sps:$4 sm:$0xff]   ;;  %v16998_v15 = vld [vmem:[#allocation8 + $0x5a4] ss:$48 sps:$4 sm:$0xff]  }
 0x48a   :  { %12460 = vmatpush1.bf16.msra.mxu0 %v16912_v13  ;;  %v17001_v13 = vld [vmem:[#allocation8 + $0x5ac] ss:$48 sps:$4 sm:$0xff]  }
 0x48b   :  { %12632 = vmatpush1.bf16.msra.mxu1 %v16915_v36  ;;  %12461 = vmatprep.subr.bf16.mxu0 %v16920_v29  ;;  %v16996_v36 = vld [vmem:[#allocation8 + $0x5a0] ss:$48 sps:$4 sm:$0xff]   ;;  %v16999_v29 = vld [vmem:[#allocation8 + $0x5a8] ss:$48 sps:$4 sm:$0xff]  }
 0x48c   :  { %12633 = vmatprep.subr.bf16.mxu1 %v16923_v17  ;;  %v17004_v17 = vld [vmem:[#allocation8 + $0x604] ss:$48 sps:$4 sm:$0xff]  }
 0x48e   :  { %12462 = vmatpush1.bf16.msra.mxu0 %v16918_v18  ;;  %v17007_v18 = vld [vmem:[#allocation8 + $0x60c] ss:$48 sps:$4 sm:$0xff]  }
 0x48f   :  { %12634 = vmatpush1.bf16.msra.mxu1 %v16921_v53  ;;  %12463 = vmatprep.subr.bf16.mxu0 %v16926_v19  ;;  %v17002_v53 = vld [vmem:[#allocation8 + $0x600] ss:$48 sps:$4 sm:$0xff]   ;;  %v17005_v19 = vld [vmem:[#allocation8 + $0x608] ss:$48 sps:$4 sm:$0xff]  }
 0x490   :  { %12635 = vmatprep.subr.bf16.mxu1 %v16929_v16  ;;  %v17010_v16 = vld [vmem:[#allocation8 + $0x664] ss:$48 sps:$4 sm:$0xff]  }
 0x492   :  { %12464 = vmatpush1.bf16.msra.mxu0 %v16924_v20  ;;  %v17013_v20 = vld [vmem:[#allocation8 + $0x66c] ss:$48 sps:$4 sm:$0xff]  }
 0x493   :  { %12636 = vmatpush1.bf16.msra.mxu1 %v16927_v21  ;;  %12465 = vmatprep.subr.bf16.mxu0 %v16932_v23  ;;  %v17008_v21 = vld [vmem:[#allocation8 + $0x660] ss:$48 sps:$4 sm:$0xff]   ;;  %v17011_v23 = vld [vmem:[#allocation8 + $0x668] ss:$48 sps:$4 sm:$0xff]  }
 0x494   :  { %12637 = vmatprep.subr.bf16.mxu1 %v16935_v25  ;;  %v17016_v25 = vld [vmem:[#allocation8 + $0x6c4] ss:$48 sps:$4 sm:$0xff]  }
 0x496   :  { %12466 = vmatpush1.bf16.msra.mxu0 %v16930_v48  ;;  %v17019_v48 = vld [vmem:[#allocation8 + $0x6cc] ss:$48 sps:$4 sm:$0xff]  }
 0x497   :  { %12638 = vmatpush1.bf16.msra.mxu1 %v16933_v24  ;;  %12467 = vmatprep.subr.bf16.mxu0 %v16938_v38  ;;  %v17014_v24 = vld [vmem:[#allocation8 + $0x6c0] ss:$48 sps:$4 sm:$0xff]   ;;  %v17017_v38 = vld [vmem:[#allocation8 + $0x6c8] ss:$48 sps:$4 sm:$0xff]  }
 0x498   :  { %12639 = vmatprep.subr.bf16.mxu1 %v16941_v26  ;;  %v17022_v26 = vld [vmem:[#allocation8 + $0x724] ss:$48 sps:$4 sm:$0xff]  }
 0x49a   :  { %12468 = vmatpush1.bf16.msra.mxu0 %v16936_v31  ;;  %v17025_v31 = vld [vmem:[#allocation8 + $0x72c] ss:$48 sps:$4 sm:$0xff]  }
 0x49b   :  { %12640 = vmatpush1.bf16.msra.mxu1 %v16939_v33  ;;  %12469 = vmatprep.subr.bf16.mxu0 %v16944_v34  ;;  %v17020_v33 = vld [vmem:[#allocation8 + $0x720] ss:$48 sps:$4 sm:$0xff]   ;;  %v17023_v34 = vld [vmem:[#allocation8 + $0x728] ss:$48 sps:$4 sm:$0xff]  }
 0x49c   :  { %12641 = vmatprep.subr.bf16.mxu1 %v16947_v35  ;;  %v17028_v35 = vld [vmem:[#allocation8 + $0x784] ss:$48 sps:$4 sm:$0xff]  }
 0x49e   :  { %12470 = vmatpush1.bf16.msra.mxu0 %v16942_v39  ;;  %v17031_v39 = vld [vmem:[#allocation8 + $0x78c] ss:$48 sps:$4 sm:$0xff]  }
 0x49f   :  { %12642 = vmatpush1.bf16.msra.mxu1 %v16945_v40  ;;  %12471 = vmatprep.subr.bf16.mxu0 %v16950_v3  ;;  %v17026_v40 = vld [vmem:[#allocation8 + $0x780] ss:$48 sps:$4 sm:$0xff]   ;;  %v17029_v3 = vld [vmem:[#allocation8 + $0x788] ss:$48 sps:$4 sm:$0xff]  }
 0x4a0   :  { %12643 = vmatprep.subr.bf16.mxu1 %v16953_v41  ;;  %v17034_v41 = vld [vmem:[#allocation8 + $0x7e4] ss:$48 sps:$4 sm:$0xff]  }
 0x4a2   :  { %12472 = vmatpush1.bf16.msra.mxu0 %v16948_v42  ;;  %v17037_v42 = vld [vmem:[#allocation8 + $0x7ec] ss:$48 sps:$4 sm:$0xff]  }
 0x4a3   :  { %12644 = vmatpush1.bf16.msra.mxu1 %v16951_v30  ;;  %12473 = vmatprep.subr.bf16.mxu0 %v16956_v47  ;;  %v17032_v30 = vld [vmem:[#allocation8 + $0x7e0] ss:$48 sps:$4 sm:$0xff]   ;;  %v17035_v47 = vld [vmem:[#allocation8 + $0x7e8] ss:$48 sps:$4 sm:$0xff]  }
 0x4a4   :  { %12645 = vmatprep.subr.bf16.mxu1 %v16959_v43  ;;  %v17040_v43 = vld [vmem:[#allocation8 + $0x844] ss:$48 sps:$4 sm:$0xff]  }
 0x4a6   :  { %12474 = vmatpush1.bf16.msra.mxu0 %v16954_v50  ;;  %v17043_v50 = vld [vmem:[#allocation8 + $0x84c] ss:$48 sps:$4 sm:$0xff]  }
 0x4a7   :  { %12646 = vmatpush1.bf16.msra.mxu1 %v16957_v44  ;;  %12475 = vmatprep.subr.bf16.mxu0 %v16962_v49  ;;  %v17038_v44 = vld [vmem:[#allocation8 + $0x840] ss:$48 sps:$4 sm:$0xff]   ;;  %v17041_v49 = vld [vmem:[#allocation8 + $0x848] ss:$48 sps:$4 sm:$0xff]  }
 0x4a8   :  { %12647 = vmatprep.subr.bf16.mxu1 %v16965_v51  ;;  %v17046_v51 = vld [vmem:[#allocation8 + $0x8a4] ss:$48 sps:$4 sm:$0xff]  }
 0x4aa   :  { %12476 = vmatpush1.bf16.msra.mxu0 %v16960_v62  ;;  %v17049_v62 = vld [vmem:[#allocation8 + $0x8ac] ss:$48 sps:$4 sm:$0xff]  }
 0x4ab   :  { %12648 = vmatpush1.bf16.msra.mxu1 %v16963_v10  ;;  %12477 = vmatprep.subr.bf16.mxu0 %v16968_v52  ;;  %v17044_v10 = vld [vmem:[#allocation8 + $0x8a0] ss:$48 sps:$4 sm:$0xff]   ;;  %v17047_v52 = vld [vmem:[#allocation8 + $0x8a8] ss:$48 sps:$4 sm:$0xff]  }
 0x4ac   :  { %12649 = vmatprep.subr.bf16.mxu1 %v16971_v58  ;;  %v17052_v58 = vld [vmem:[#allocation8 + $0x904] ss:$48 sps:$4 sm:$0xff]  }
 0x4ae   :  { %12478 = vmatpush1.bf16.msra.mxu0 %v16966_v55  ;;  %v17055_v55 = vld [vmem:[#allocation8 + $0x90c] ss:$48 sps:$4 sm:$0xff]  }
 0x4af   :  { %12650 = vmatpush1.bf16.msra.mxu1 %v16969_v37  ;;  %12479 = vmatprep.subr.bf16.mxu0 %v16974_v57  ;;  %v17050_v37 = vld [vmem:[#allocation8 + $0x900] ss:$48 sps:$4 sm:$0xff]   ;;  %v17053_v57 = vld [vmem:[#allocation8 + $0x908] ss:$48 sps:$4 sm:$0xff]  }
 0x4b0   :  { %12651 = vmatprep.subr.bf16.mxu1 %v16977_v59  ;;  %v17058_v59 = vld [vmem:[#allocation8 + $0x964] ss:$48 sps:$4 sm:$0xff]  }
 0x4b2   :  { %12480 = vmatpush1.bf16.msra.mxu0 %v16972_v60  ;;  %v17061_v60 = vld [vmem:[#allocation8 + $0x96c] ss:$48 sps:$4 sm:$0xff]  }
 0x4b3   :  { %12652 = vmatpush1.bf16.msra.mxu1 %v16975_v61  ;;  %12481 = vmatprep.subr.bf16.mxu0 %v16980_v8  ;;  %v17056_v61 = vld [vmem:[#allocation8 + $0x960] ss:$48 sps:$4 sm:$0xff]   ;;  %v17059_v8 = vld [vmem:[#allocation8 + $0x968] ss:$48 sps:$4 sm:$0xff]  }
 0x4b4   :  { %12653 = vmatprep.subr.bf16.mxu1 %v16983_v0  ;;  %v17064_v0 = vld [vmem:[#allocation8 + $0x9c4] ss:$48 sps:$4 sm:$0xff]  }
 0x4b6   :  { %12482 = vmatpush1.bf16.msra.mxu0 %v16978_v1  ;;  %v17067_v1 = vld [vmem:[#allocation8 + $0x9cc] ss:$48 sps:$4 sm:$0xff]  }
 0x4b7   :  { %12654 = vmatpush1.bf16.msra.mxu1 %v16981_v2  ;;  %12483 = vmatprep.subr.bf16.mxu0 %v16986_v4  ;;  %v17062_v2 = vld [vmem:[#allocation8 + $0x9c0] ss:$48 sps:$4 sm:$0xff]   ;;  %v17065_v4 = vld [vmem:[#allocation8 + $0x9c8] ss:$48 sps:$4 sm:$0xff]  }
 0x4b8   :  { %12655 = vmatprep.subr.bf16.mxu1 %v16989_v5  ;;  %v17070_v5 = vld [vmem:[#allocation8 + $0xa24] ss:$48 sps:$4 sm:$0xff]  }
 0x4ba   :  { %12484 = vmatpush1.bf16.msra.mxu0 %v16984_v6  ;;  %v17073_v6 = vld [vmem:[#allocation8 + $0xa2c] ss:$48 sps:$4 sm:$0xff]  }
 0x4bb   :  { %12656 = vmatpush1.bf16.msra.mxu1 %v16987_v46  ;;  %12485 = vmatprep.subr.bf16.mxu0 %v16992_v7  ;;  %v17068_v46 = vld [vmem:[#allocation8 + $0xa20] ss:$48 sps:$4 sm:$0xff]   ;;  %v17071_v7 = vld [vmem:[#allocation8 + $0xa28] ss:$48 sps:$4 sm:$0xff]  }
 0x4bc   :  { %12657 = vmatprep.subr.bf16.mxu1 %v16995_v9  ;;  %v17076_v9 = vld [vmem:[#allocation8 + $0xa84] ss:$48 sps:$4 sm:$0xff]  }
 0x4be   :  { %12486 = vmatpush1.bf16.msra.mxu0 %v16990_v11  ;;  %v17079_v11 = vld [vmem:[#allocation8 + $0xa8c] ss:$48 sps:$4 sm:$0xff]  }
 0x4bf   :  { %12658 = vmatpush1.bf16.msra.mxu1 %v16993_v12  ;;  %12487 = vmatprep.subr.bf16.mxu0 %v16998_v15  ;;  %v17074_v12 = vld [vmem:[#allocation8 + $0xa80] ss:$48 sps:$4 sm:$0xff]   ;;  %v17077_v15 = vld [vmem:[#allocation8 + $0xa88] ss:$48 sps:$4 sm:$0xff]  }
 0x4c0   :  { %12659 = vmatprep.subr.bf16.mxu1 %v17001_v13  ;;  %v17082_v13 = vld [vmem:[#allocation8 + $0xae4] ss:$48 sps:$4 sm:$0xff]  }
 0x4c2   :  { %12488 = vmatpush1.bf16.msra.mxu0 %v16996_v36  ;;  %v17085_v36 = vld [vmem:[#allocation8 + $0xaec] ss:$48 sps:$4 sm:$0xff]  }
 0x4c3   :  { %12660 = vmatpush1.bf16.msra.mxu1 %v16999_v29  ;;  %12500 = vmatprep.subr.bf16.mxu0 %v17004_v17  ;;  %v17080_v29 = vld [vmem:[#allocation8 + $0xae0] ss:$48 sps:$4 sm:$0xff]   ;;  %v17083_v17 = vld [vmem:[#allocation8 + $0xae8] ss:$48 sps:$4 sm:$0xff]  }
 0x4c4   :  { %12672 = vmatprep.subr.bf16.mxu1 %v17007_v18  ;;  %v17088_v18 = vld [vmem:[#allocation8 + $0xb44] ss:$48 sps:$4 sm:$0xff]  }
 0x4c5   :  { %12490 = vmatmul.mubr.bf16.vlgmr.msra.gmra.mrb[8].mxu0 %v18615_v45 }
 0x4c6   :  { %12662 = vmatmul.mubr.bf16.vlgmr.msra.gmra.mrb[8].mxu1 %v18615_v45  ;;  %12501 = vmatpush1.bf16.msra.mxu0 %v17002_v53  ;;  %v17091_v53 = vld [vmem:[#allocation8 + $0xb4c] ss:$48 sps:$4 sm:$0xff]  }
 0x4c7   :  { %12532 = vmatprep.mubr.bf16.mxu0 %v18624_v63  ;;  %12673 = vmatpush1.bf16.msra.mxu1 %v17005_v19  ;;  %v17086_v19 = vld [vmem:[#allocation8 + $0xb40] ss:$48 sps:$4 sm:$0xff]  }
 0x4c8   :  { %12704 = vmatprep.mubr.bf16.mxu1 %v18624_v63  ;;  %12502 = vmatprep.subr.bf16.mxu0 %v17010_v16  ;;  %v17089_v16 = vld [vmem:[#allocation8 + $0xb48] ss:$48 sps:$4 sm:$0xff]  }
 0x4c9   :  { %12674 = vmatprep.subr.bf16.mxu1 %v17013_v20  ;;  %v17094_v20 = vld [vmem:[#allocation8 + $0xba4] ss:$48 sps:$4 sm:$0xff]  }
 0x4ca   :  { %12503 = vmatpush1.bf16.msra.mxu0 %v17008_v21  ;;  %v17097_v21 = vld [vmem:[#allocation8 + $0xbac] ss:$48 sps:$4 sm:$0xff]  }
 0x4cb   :  { %12675 = vmatpush1.bf16.msra.mxu1 %v17011_v23  ;;  %12504 = vmatprep.subr.bf16.mxu0 %v17016_v25  ;;  %v17092_v23 = vld [vmem:[#allocation8 + $0xba0] ss:$48 sps:$4 sm:$0xff]   ;;  %v17095_v25 = vld [vmem:[#allocation8 + $0xba8] ss:$48 sps:$4 sm:$0xff]  }
 0x4cc   :  { %12676 = vmatprep.subr.bf16.mxu1 %v17019_v48  ;;  %v17100_v48 = vld [vmem:[#allocation8 + $0xc04] ss:$48 sps:$4 sm:$0xff]  }
 0x4ce   :  { %12505 = vmatpush1.bf16.msra.mxu0 %v17014_v24  ;;  %v17103_v24 = vld [vmem:[#allocation8 + $0xc0c] ss:$48 sps:$4 sm:$0xff]  }
 0x4cf   :  { %12677 = vmatpush1.bf16.msra.mxu1 %v17017_v38  ;;  %12506 = vmatprep.subr.bf16.mxu0 %v17022_v26  ;;  %v17098_v38 = vld [vmem:[#allocation8 + $0xc00] ss:$48 sps:$4 sm:$0xff]   ;;  %v17101_v26 = vld [vmem:[#allocation8 + $0xc08] ss:$48 sps:$4 sm:$0xff]  }
 0x4d0   :  { %12678 = vmatprep.subr.bf16.mxu1 %v17025_v31  ;;  %v17106_v31 = vld [vmem:[#allocation8 + $0xc64] ss:$48 sps:$4 sm:$0xff]  }
 0x4d2   :  { %12507 = vmatpush1.bf16.msra.mxu0 %v17020_v33  ;;  %v17109_v33 = vld [vmem:[#allocation8 + $0xc6c] ss:$48 sps:$4 sm:$0xff]  }
 0x4d3   :  { %12679 = vmatpush1.bf16.msra.mxu1 %v17023_v34  ;;  %12508 = vmatprep.subr.bf16.mxu0 %v17028_v35  ;;  %v17104_v34 = vld [vmem:[#allocation8 + $0xc60] ss:$48 sps:$4 sm:$0xff]   ;;  %v17107_v35 = vld [vmem:[#allocation8 + $0xc68] ss:$48 sps:$4 sm:$0xff]  }
 0x4d4   :  { %12680 = vmatprep.subr.bf16.mxu1 %v17031_v39  ;;  %v17112_v39 = vld [vmem:[#allocation8 + $0xcc4] ss:$48 sps:$4 sm:$0xff]  }
 0x4d6   :  { %12509 = vmatpush1.bf16.msra.mxu0 %v17026_v40  ;;  %v17115_v40 = vld [vmem:[#allocation8 + $0xccc] ss:$48 sps:$4 sm:$0xff]  }
 0x4d7   :  { %12681 = vmatpush1.bf16.msra.mxu1 %v17029_v3  ;;  %12510 = vmatprep.subr.bf16.mxu0 %v17034_v41  ;;  %v17110_v3 = vld [vmem:[#allocation8 + $0xcc0] ss:$48 sps:$4 sm:$0xff]   ;;  %v17113_v41 = vld [vmem:[#allocation8 + $0xcc8] ss:$48 sps:$4 sm:$0xff]  }
 0x4d8   :  { %12682 = vmatprep.subr.bf16.mxu1 %v17037_v42  ;;  %v17118_v42 = vld [vmem:[#allocation8 + $0xd24] ss:$48 sps:$4 sm:$0xff]  }
 0x4da   :  { %12511 = vmatpush1.bf16.msra.mxu0 %v17032_v30  ;;  %v17121_v30 = vld [vmem:[#allocation8 + $0xd2c] ss:$48 sps:$4 sm:$0xff]  }
 0x4db   :  { %12683 = vmatpush1.bf16.msra.mxu1 %v17035_v47  ;;  %12512 = vmatprep.subr.bf16.mxu0 %v17040_v43  ;;  %v17116_v47 = vld [vmem:[#allocation8 + $0xd20] ss:$48 sps:$4 sm:$0xff]   ;;  %v17119_v43 = vld [vmem:[#allocation8 + $0xd28] ss:$48 sps:$4 sm:$0xff]  }
 0x4dc   :  { %12684 = vmatprep.subr.bf16.mxu1 %v17043_v50  ;;  %v17124_v50 = vld [vmem:[#allocation8 + $0xd84] ss:$48 sps:$4 sm:$0xff]  }
 0x4de   :  { %12513 = vmatpush1.bf16.msra.mxu0 %v17038_v44  ;;  %v17127_v44 = vld [vmem:[#allocation8 + $0xd8c] ss:$48 sps:$4 sm:$0xff]  }
 0x4df   :  { %12685 = vmatpush1.bf16.msra.mxu1 %v17041_v49  ;;  %12514 = vmatprep.subr.bf16.mxu0 %v17046_v51  ;;  %v17122_v49 = vld [vmem:[#allocation8 + $0xd80] ss:$48 sps:$4 sm:$0xff]   ;;  %v17125_v51 = vld [vmem:[#allocation8 + $0xd88] ss:$48 sps:$4 sm:$0xff]  }
 0x4e0   :  { %12686 = vmatprep.subr.bf16.mxu1 %v17049_v62  ;;  %v17130_v62 = vld [vmem:[#allocation8 + $0xde4] ss:$48 sps:$4 sm:$0xff]  }
 0x4e2   :  { %12515 = vmatpush1.bf16.msra.mxu0 %v17044_v10  ;;  %v17133_v10 = vld [vmem:[#allocation8 + $0xdec] ss:$48 sps:$4 sm:$0xff]  }
 0x4e3   :  { %12687 = vmatpush1.bf16.msra.mxu1 %v17047_v52  ;;  %12516 = vmatprep.subr.bf16.mxu0 %v17052_v58  ;;  %v17128_v52 = vld [vmem:[#allocation8 + $0xde0] ss:$48 sps:$4 sm:$0xff]   ;;  %v17131_v58 = vld [vmem:[#allocation8 + $0xde8] ss:$48 sps:$4 sm:$0xff]  }
 0x4e4   :  { %12688 = vmatprep.subr.bf16.mxu1 %v17055_v55  ;;  %v17136_v55 = vld [vmem:[#allocation8 + $0xe44] ss:$48 sps:$4 sm:$0xff]  }
 0x4e6   :  { %12517 = vmatpush1.bf16.msra.mxu0 %v17050_v37  ;;  %v17139_v37 = vld [vmem:[#allocation8 + $0xe4c] ss:$48 sps:$4 sm:$0xff]  }
 0x4e7   :  { %12689 = vmatpush1.bf16.msra.mxu1 %v17053_v57  ;;  %12518 = vmatprep.subr.bf16.mxu0 %v17058_v59  ;;  %v17134_v57 = vld [vmem:[#allocation8 + $0xe40] ss:$48 sps:$4 sm:$0xff]   ;;  %v17137_v59 = vld [vmem:[#allocation8 + $0xe48] ss:$48 sps:$4 sm:$0xff]  }
 0x4e8   :  { %12690 = vmatprep.subr.bf16.mxu1 %v17061_v60  ;;  %v17142_v60 = vld [vmem:[#allocation8 + $0xea4] ss:$48 sps:$4 sm:$0xff]  }
 0x4ea   :  { %12519 = vmatpush1.bf16.msra.mxu0 %v17056_v61  ;;  %v17145_v61 = vld [vmem:[#allocation8 + $0xeac] ss:$48 sps:$4 sm:$0xff]  }
 0x4eb   :  { %12691 = vmatpush1.bf16.msra.mxu1 %v17059_v8  ;;  %12520 = vmatprep.subr.bf16.mxu0 %v17064_v0  ;;  %v17140_v8 = vld [vmem:[#allocation8 + $0xea0] ss:$48 sps:$4 sm:$0xff]   ;;  %v17143_v0 = vld [vmem:[#allocation8 + $0xea8] ss:$48 sps:$4 sm:$0xff]  }
 0x4ec   :  { %12692 = vmatprep.subr.bf16.mxu1 %v17067_v1  ;;  %v17148_v1 = vld [vmem:[#allocation8 + $0xf04] ss:$48 sps:$4 sm:$0xff]  }
 0x4ee   :  { %12521 = vmatpush1.bf16.msra.mxu0 %v17062_v2  ;;  %v17151_v2 = vld [vmem:[#allocation8 + $0xf0c] ss:$48 sps:$4 sm:$0xff]  }
 0x4ef   :  { %12693 = vmatpush1.bf16.msra.mxu1 %v17065_v4  ;;  %12522 = vmatprep.subr.bf16.mxu0 %v17070_v5  ;;  %v17146_v4 = vld [vmem:[#allocation8 + $0xf00] ss:$48 sps:$4 sm:$0xff]   ;;  %v17149_v5 = vld [vmem:[#allocation8 + $0xf08] ss:$48 sps:$4 sm:$0xff]  }
 0x4f0   :  { %12694 = vmatprep.subr.bf16.mxu1 %v17073_v6  ;;  %v17154_v6 = vld [vmem:[#allocation8 + $0xf64] ss:$48 sps:$4 sm:$0xff]  }
 0x4f2   :  { %12523 = vmatpush1.bf16.msra.mxu0 %v17068_v46  ;;  %v17157_v46 = vld [vmem:[#allocation8 + $0xf6c] ss:$48 sps:$4 sm:$0xff]  }
 0x4f3   :  { %12695 = vmatpush1.bf16.msra.mxu1 %v17071_v7  ;;  %12524 = vmatprep.subr.bf16.mxu0 %v17076_v9  ;;  %v17152_v7 = vld [vmem:[#allocation8 + $0xf60] ss:$48 sps:$4 sm:$0xff]   ;;  %v17155_v9 = vld [vmem:[#allocation8 + $0xf68] ss:$48 sps:$4 sm:$0xff]  }
 0x4f4   :  { %12696 = vmatprep.subr.bf16.mxu1 %v17079_v11  ;;  %v17160_v11 = vld [vmem:[#allocation8 + $0xfc4] ss:$48 sps:$4 sm:$0xff]  }
 0x4f6   :  { %12525 = vmatpush1.bf16.msra.mxu0 %v17074_v12  ;;  %v17163_v12 = vld [vmem:[#allocation8 + $0xfcc] ss:$48 sps:$4 sm:$0xff]  }
 0x4f7   :  { %12697 = vmatpush1.bf16.msra.mxu1 %v17077_v15  ;;  %12526 = vmatprep.subr.bf16.mxu0 %v17082_v13  ;;  %v17158_v15 = vld [vmem:[#allocation8 + $0xfc0] ss:$48 sps:$4 sm:$0xff]   ;;  %v17161_v13 = vld [vmem:[#allocation8 + $0xfc8] ss:$48 sps:$4 sm:$0xff]  }
 0x4f8   :  { %12698 = vmatprep.subr.bf16.mxu1 %v17085_v36  ;;  %v17166_v36 = vld [vmem:[#allocation8 + $0x1024] ss:$48 sps:$4 sm:$0xff]  }
 0x4fa   :  { %12527 = vmatpush1.bf16.msra.mxu0 %v17080_v29  ;;  %v17169_v29 = vld [vmem:[#allocation8 + $0x102c] ss:$48 sps:$4 sm:$0xff]  }
 0x4fb   :  { %12699 = vmatpush1.bf16.msra.mxu1 %v17083_v17  ;;  %12528 = vmatprep.subr.bf16.mxu0 %v17088_v18  ;;  %v17164_v17 = vld [vmem:[#allocation8 + $0x1020] ss:$48 sps:$4 sm:$0xff]   ;;  %v17167_v18 = vld [vmem:[#allocation8 + $0x1028] ss:$48 sps:$4 sm:$0xff]  }
 0x4fc   :  { %12700 = vmatprep.subr.bf16.mxu1 %v17091_v53  ;;  %v17172_v53 = vld [vmem:[#allocation8 + $0x1084] ss:$48 sps:$4 sm:$0xff]  }
 0x4fe   :  { %12529 = vmatpush1.bf16.msra.mxu0 %v17086_v19  ;;  %v17175_v19 = vld [vmem:[#allocation8 + $0x108c] ss:$48 sps:$4 sm:$0xff]  }
 0x4ff   :  { %12701 = vmatpush1.bf16.msra.mxu1 %v17089_v16  ;;  %12530 = vmatprep.subr.bf16.mxu0 %v17094_v20  ;;  %v17170_v16 = vld [vmem:[#allocation8 + $0x1080] ss:$48 sps:$4 sm:$0xff]   ;;  %v17173_v20 = vld [vmem:[#allocation8 + $0x1088] ss:$48 sps:$4 sm:$0xff]  }
 0x500   :  { %12702 = vmatprep.subr.bf16.mxu1 %v17097_v21  ;;  %v17178_v21 = vld [vmem:[#allocation8 + $0x10e4] ss:$48 sps:$4 sm:$0xff]  }
 0x502   :  { %12531 = vmatpush1.bf16.msra.mxu0 %v17092_v23  ;;  %v17181_v23 = vld [vmem:[#allocation8 + $0x10ec] ss:$48 sps:$4 sm:$0xff]  }
 0x503   :  { %12703 = vmatpush1.bf16.msra.mxu1 %v17095_v25  ;;  %12543 = vmatprep.subr.bf16.mxu0 %v17100_v48  ;;  %v17176_v25 = vld [vmem:[#allocation8 + $0x10e0] ss:$48 sps:$4 sm:$0xff]   ;;  %v17179_v48 = vld [vmem:[#allocation8 + $0x10e8] ss:$48 sps:$4 sm:$0xff]  }
 0x504   :  { %12715 = vmatprep.subr.bf16.mxu1 %v17103_v24  ;;  %v17184_v24 = vld [vmem:[#allocation8 + $0x1144] ss:$48 sps:$4 sm:$0xff]  }
 0x505   :  { %12533 = vmatmul.mubr.bf16.vlgmr.msra.gmra.mrb[8].mxu0 %v18619_v54 }
 0x506   :  { %12705 = vmatmul.mubr.bf16.vlgmr.msra.gmra.mrb[8].mxu1 %v18619_v54  ;;  %12544 = vmatpush1.bf16.msra.mxu0 %v17098_v38  ;;  %v17187_v38 = vld [vmem:[#allocation8 + $0x114c] ss:$48 sps:$4 sm:$0xff]  }
 0x507   :  { %12716 = vmatpush1.bf16.msra.mxu1 %v17101_v26  ;;  %12545 = vmatprep.subr.bf16.mxu0 %v17106_v31  ;;  %v17182_v26 = vld [vmem:[#allocation8 + $0x1140] ss:$48 sps:$4 sm:$0xff]   ;;  %v17185_v31 = vld [vmem:[#allocation8 + $0x1148] ss:$48 sps:$4 sm:$0xff]  }
 0x508   :  { %12717 = vmatprep.subr.bf16.mxu1 %v17109_v33  ;;  %v17190_v33 = vld [vmem:[#allocation8 + $0x11a4] ss:$48 sps:$4 sm:$0xff]  }
 0x50a   :  { %12546 = vmatpush1.bf16.msra.mxu0 %v17104_v34  ;;  %v17193_v34 = vld [vmem:[#allocation8 + $0x11ac] ss:$48 sps:$4 sm:$0xff]  }
 0x50b   :  { %12718 = vmatpush1.bf16.msra.mxu1 %v17107_v35  ;;  %12547 = vmatprep.subr.bf16.mxu0 %v17112_v39  ;;  %v17188_v35 = vld [vmem:[#allocation8 + $0x11a0] ss:$48 sps:$4 sm:$0xff]   ;;  %v17191_v39 = vld [vmem:[#allocation8 + $0x11a8] ss:$48 sps:$4 sm:$0xff]  }
 0x50c   :  { %12719 = vmatprep.subr.bf16.mxu1 %v17115_v40  ;;  %v17196_v40 = vld [vmem:[#allocation8 + $0x1204] ss:$48 sps:$4 sm:$0xff]  }
 0x50e   :  { %12548 = vmatpush1.bf16.msra.mxu0 %v17110_v3  ;;  %v17199_v3 = vld [vmem:[#allocation8 + $0x120c] ss:$48 sps:$4 sm:$0xff]  }
 0x50f   :  { %12720 = vmatpush1.bf16.msra.mxu1 %v17113_v41  ;;  %12549 = vmatprep.subr.bf16.mxu0 %v17118_v42  ;;  %v1211_v41 = vsub.s32 4, %v18564_v14  ;;  %v1219_v42 = vsub.s32 6, %v18564_v14 }
 0x510   :  { %12721 = vmatprep.subr.bf16.mxu1 %v17121_v30  ;;  %v1215_v30 = vsub.s32 5, %v18564_v14 }
 0x512   :  { %12550 = vmatpush1.bf16.msra.mxu0 %v17116_v47  ;;  %v1223_v47 = vsub.s32 7, %v18564_v14 }
 0x513   :  { %12722 = vmatpush1.bf16.msra.mxu1 %v17119_v43  ;;  %12551 = vmatprep.subr.bf16.mxu0 %v17124_v50  ;;  %v18154_v43 = vld [vmem:[#allocation7] sm:$0xff] }
 0x514   :  { %12723 = vmatprep.subr.bf16.mxu1 %v17127_v44  ;;  %v1212_v50 = vrot.slane %v18154_v43, %v1211_v41  ;;  %v1220_v44 = vrot.slane %v18154_v43, %v1219_v42 }
 0x516   :  { %12552 = vmatpush1.bf16.msra.mxu0 %v17122_v49  ;;  %v1216_v49 = vrot.slane %v18154_v43, %v1215_v30 }
 0x517   :  { %12724 = vmatpush1.bf16.msra.mxu1 %v17125_v51  ;;  %12553 = vmatprep.subr.bf16.mxu0 %v17130_v62  ;;  %v1224_v51 = vrot.slane %v18154_v43, %v1223_v47  ;;  %v17214_v43 = vld [vmem:[#allocation8 + $0x1324] ss:$48 sps:$4 sm:$0xff]  }
 0x518   :  { %12725 = vmatprep.subr.bf16.mxu1 %v17133_v10 }
 0x51a   :  { %12554 = vmatpush1.bf16.msra.mxu0 %v17128_v52 }
 0x51b   :  { %12726 = vmatpush1.bf16.msra.mxu1 %v17131_v58  ;;  %12555 = vmatprep.subr.bf16.mxu0 %v17136_v55 }
 0x51c   :  { %12727 = vmatprep.subr.bf16.mxu1 %v17139_v37 }
 0x51e   :  { %12556 = vmatpush1.bf16.msra.mxu0 %v17134_v57 }
 0x51f   :  { %12728 = vmatpush1.bf16.msra.mxu1 %v17137_v59  ;;  %12557 = vmatprep.subr.bf16.mxu0 %v17142_v60 }
 0x520   :  { %12729 = vmatprep.subr.bf16.mxu1 %v17145_v61 }
 0x522   :  { %12558 = vmatpush1.bf16.msra.mxu0 %v17140_v8 }
 0x523   :  { %12730 = vmatpush1.bf16.msra.mxu1 %v17143_v0  ;;  %12559 = vmatprep.subr.bf16.mxu0 %v17148_v1 }
 0x524   :  { %12731 = vmatprep.subr.bf16.mxu1 %v17151_v2 }
 0x526   :  { %12560 = vmatpush1.bf16.msra.mxu0 %v17146_v4 }
 0x527   :  { %12732 = vmatpush1.bf16.msra.mxu1 %v17149_v5  ;;  %12561 = vmatprep.subr.bf16.mxu0 %v17154_v6 }
 0x528   :  { %12733 = vmatprep.subr.bf16.mxu1 %v17157_v46 }
 0x52a   :  { %12562 = vmatpush1.bf16.msra.mxu0 %v17152_v7 }
 0x52b   :  { %12734 = vmatpush1.bf16.msra.mxu1 %v17155_v9  ;;  %12563 = vmatprep.subr.bf16.mxu0 %v17160_v11 }
 0x52c   :  { %12735 = vmatprep.subr.bf16.mxu1 %v17163_v12 }
 0x52e   :  { %12564 = vmatpush1.bf16.msra.mxu0 %v17158_v15 }
 0x52f   :  { %12736 = vmatpush1.bf16.msra.mxu1 %v17161_v13  ;;  %12565 = vmatprep.subr.bf16.mxu0 %v17166_v36 }
 0x530   :  { %12737 = vmatprep.subr.bf16.mxu1 %v17169_v29 }
 0x532   :  { %12566 = vmatpush1.bf16.msra.mxu0 %v17164_v17 }
 0x533   :  { %12738 = vmatpush1.bf16.msra.mxu1 %v17167_v18  ;;  %12567 = vmatprep.subr.bf16.mxu0 %v17172_v53 }
 0x534   :  { %12739 = vmatprep.subr.bf16.mxu1 %v17175_v19 }
 0x536   :  { %12568 = vmatpush1.bf16.msra.mxu0 %v17170_v16 }
 0x537   :  { %12740 = vmatpush1.bf16.msra.mxu1 %v17173_v20  ;;  %12569 = vmatprep.subr.bf16.mxu0 %v17178_v21 }
 0x538   :  { %12741 = vmatprep.subr.bf16.mxu1 %v17181_v23 }
 0x53a   :  { %12570 = vmatpush1.bf16.msra.mxu0 %v17176_v25 }
 0x53b   :  { %12742 = vmatpush1.bf16.msra.mxu1 %v17179_v48  ;;  %12571 = vmatprep.subr.bf16.mxu0 %v17184_v24  ;;  %v17194_v48 = vld [vmem:[#allocation8 + $0x1200] ss:$48 sps:$4 sm:$0xff]   ;;  %v17197_v24 = vld [vmem:[#allocation8 + $0x1208] ss:$48 sps:$4 sm:$0xff]  }
 0x53c   :  { %12743 = vmatprep.subr.bf16.mxu1 %v17187_v38 }
 0x53e   :  { %12572 = vmatpush1.bf16.msra.mxu0 %v17182_v26  ;;  %v17202_v26 = vld [vmem:[#allocation8 + $0x1264] ss:$48 sps:$4 sm:$0xff]  }
 0x53f   :  { %12744 = vmatpush1.bf16.msra.mxu1 %v17185_v31  ;;  %12573 = vmatprep.subr.bf16.mxu0 %v17190_v33  ;;  %v17205_v31 = vld [vmem:[#allocation8 + $0x126c] ss:$48 sps:$4 sm:$0xff]   ;;  %v17200_v33 = vld [vmem:[#allocation8 + $0x1260] ss:$48 sps:$4 sm:$0xff]  }
 0x540   :  { %12745 = vmatprep.subr.bf16.mxu1 %v17193_v34  ;;  %v17203_v34 = vld [vmem:[#allocation8 + $0x1268] ss:$48 sps:$4 sm:$0xff]  }
 0x542   :  { %12574 = vmatpush1.bf16.msra.mxu0 %v17188_v35  ;;  %v17208_v35 = vld [vmem:[#allocation8 + $0x12c4] ss:$48 sps:$4 sm:$0xff]  }
 0x543   :  { %12746 = vmatpush1.bf16.msra.mxu1 %v17191_v39  ;;  %12586 = vmatprep.subr.bf16.mxu0 %v17196_v40  ;;  %v17211_v39 = vld [vmem:[#allocation8 + $0x12cc] ss:$48 sps:$4 sm:$0xff]   ;;  %v17206_v40 = vld [vmem:[#allocation8 + $0x12c0] ss:$48 sps:$4 sm:$0xff]  }
 0x544   :  { %12758 = vmatprep.subr.bf16.mxu1 %v17199_v3  ;;  %v17209_v3 = vld [vmem:[#allocation8 + $0x12c8] ss:$48 sps:$4 sm:$0xff]  }
 0x558   :  { %v7376_v62 = vpop.f32.mrb[4].mxu0  ;;  %v7720_v52 = vpop.f32.mrb[4].mxu1 }
 0x559   :  { %v16671_v10 = vadd.f32 %v7376_v62, %v1212_v50  ;;  %v7378_v58 = vpop.f32.mrb[5].mxu0  ;;  %v16675_v55 = vadd.f32 %v7720_v52, %v1220_v44  ;;  %v7722_v57 = vpop.f32.mrb[5].mxu1  ;;  %v17223_v62 = vld [vmem:[#allocation8 + $0x138c] ss:$48 sps:$4 sm:$0xff]   ;;  %v17221_v52 = vld [vmem:[#allocation8 + $0x1388] ss:$48 sps:$4 sm:$0xff]  }
 0x55a   :  { %v16672_v37 = vadd.f32 %v7378_v58, %v1216_v49  ;;  %v7380_v59 = vpop.f32.mrb[6].mxu0  ;;  %v16676_v61 = vadd.f32 %v7722_v57, %v1224_v51  ;;  %v7724_v0 = vpop.f32.mrb[6].mxu1  ;;  %v17226_v58 = vld [vmem:[#allocation8 + $0x13e4] ss:$48 sps:$4 sm:$0xff]   ;;  %v17227_v57 = vld [vmem:[#allocation8 + $0x13e8] ss:$48 sps:$4 sm:$0xff]  }
 0x55b   :  { %v7749_v60 = vmul.f32 0.01, %v16671_v10  ;;  %v16673_v8 = vadd.f32 %v7380_v59, %v1212_v50  ;;  %v7382_v1 = vpop.f32.mrb[7].mxu0  ;;  %vm7733_vm8 = vcmp.ge.f32.partialorder %v16671_v10, 0.0  ;;  %vm7735_vm9 = vcmp.ge.f32.partialorder %v16675_v55, 0.0  ;;  %v7726_v4 = vpop.f32.mrb[7].mxu1 }
 0x55c   :  { %v7751_v2 = vmul.f32 0.01, %v16675_v55  ;;  %vm7734_vm11 = vcmp.ge.f32.partialorder %v16672_v37, 0.0  ;;  %v7750_v5 = vmul.f32 0.01, %v16672_v37  ;;  %v16677_v46 = vadd.f32 %v7724_v0, %v1220_v44 }
 0x55d   :  { %vm7741_vm10 = vcmp.ge.f32.partialorder %v16673_v8, 0.0  ;;  %v7757_v6 = vmul.f32 0.01, %v16673_v8  ;;  %v7765_v7 = vsel %vm7733_vm8, %v16671_v10, %v7749_v60  ;;  %vm7736_vm12 = vcmp.ge.f32.partialorder %v16676_v61, 0.0  ;;  %v17217_v50 = vld [vmem:[#allocation8 + $0x132c] ss:$48 sps:$4 sm:$0xff]  }
 0x55e   :  { %v16674_v9 = vadd.f32 %v7382_v1, %v1216_v49  ;;  %v16678_v11 = vadd.f32 %v7726_v4, %v1224_v51  ;;  %v7752_v12 = vmul.f32 0.01, %v16676_v61  ;;  %vm7743_vm13 = vcmp.ge.f32.partialorder %v16677_v46, 0.0  ;;  %v17212_v44 = vld [vmem:[#allocation8 + $0x1320] ss:$48 sps:$4 sm:$0xff]  }
 0x55f   :  { %v7773_v15 = vsel %vm7741_vm10, %v16673_v8, %v7757_v6  ;;  %v7759_v13 = vmul.f32 0.01, %v16677_v46  ;;  %v7767_v17 = vsel %vm7735_vm9, %v16675_v55, %v7751_v2  ;;  %v7766_v19 = vsel %vm7734_vm11, %v16672_v37, %v7750_v5  ;;  %v17215_v49 = vld [vmem:[#allocation8 + $0x1328] ss:$48 sps:$4 sm:$0xff]   ;;  %v17220_v51 = vld [vmem:[#allocation8 + $0x1384] ss:$48 sps:$4 sm:$0xff]  }
 0x560   :  { %v18664_v36 = vpack.c.bf16 %v7773_v15, %v7765_v7  ;;  %vm7742_vm14 = vcmp.ge.f32.partialorder %v16674_v9, 0.0  ;;  %v7758_v29 = vmul.f32 0.01, %v16674_v9  ;;  %vm7744_vm15 = vcmp.ge.f32.partialorder %v16678_v11, 0.0  ;;  %v17218_v10 = vld [vmem:[#allocation8 + $0x1380] ss:$48 sps:$4 sm:$0xff]  }
 0x561   :  { %v7775_v18 = vsel %vm7743_vm13, %v16677_v46, %v7759_v13  ;;  %v7760_v53 = vmul.f32 0.01, %v16678_v11  ;;  %v7768_v21 = vsel %vm7736_vm12, %v16676_v61, %v7752_v12  ;;  %v17229_v55 = vld [vmem:[#allocation8 + $0x13ec] ss:$48 sps:$4 sm:$0xff]   ;;  %v17224_v37 = vld [vmem:[#allocation8 + $0x13e0] ss:$48 sps:$4 sm:$0xff]  }
 0x562   :  { %v18668_v16 = vpack.c.bf16 %v7775_v18, %v7767_v17  ;;  %v7774_v20 = vsel %vm7742_vm14, %v16674_v9, %v7758_v29  ;;  %v17232_v59 = vld [vmem:[#allocation8 + $0x1444] ss:$48 sps:$4 sm:$0xff]   ;;  %v17235_v60 = vld [vmem:[#allocation8 + $0x144c] ss:$48 sps:$4 sm:$0xff]   ;;  %v17230_v61 = vld [vmem:[#allocation8 + $0x1440] ss:$48 sps:$4 sm:$0xff]  }
 0x563   :  { %v18671_v23 = vpack.c.bf16 %v7774_v20, %v7766_v19  ;;  %v7776_v25 = vsel %vm7744_vm15, %v16678_v11, %v7760_v53  ;;  %v17233_v8 = vld [vmem:[#allocation8 + $0x1448] ss:$48 sps:$4 sm:$0xff]   ;;  %v17238_v0 = vld [vmem:[#allocation8 + $0x14a4] ss:$48 sps:$4 sm:$0xff]   ;;  %v17241_v1 = vld [vmem:[#allocation8 + $0x14ac] ss:$48 sps:$4 sm:$0xff]  }
 0x564   :  { %v18673_v38 = vpack.c.bf16 %v7776_v25, %v7768_v21  ;;  %v17236_v2 = vld [vmem:[#allocation8 + $0x14a0] ss:$48 sps:$4 sm:$0xff]   ;;  %v17239_v4 = vld [vmem:[#allocation8 + $0x14a8] ss:$48 sps:$4 sm:$0xff]   ;;  %v17244_v5 = vld [vmem:[#allocation8 + $0x1504] ss:$48 sps:$4 sm:$0xff]  }
 0x565   :  { %12575 = vmatprep.mubr.bf16.mxu0 %v18671_v23  ;;  %12747 = vmatprep.mubr.bf16.mxu1 %v18671_v23  ;;  %v17247_v6 = vld [vmem:[#allocation8 + $0x150c] ss:$48 sps:$4 sm:$0xff]   ;;  %v17242_v46 = vld [vmem:[#allocation8 + $0x1500] ss:$48 sps:$4 sm:$0xff]   ;;  %v17245_v7 = vld [vmem:[#allocation8 + $0x1508] ss:$48 sps:$4 sm:$0xff]  }
 0x566   :  { %12576 = vmatmul.mubr.bf16.vlgmr.msra.gmra.mrb[8].mxu0 %v18664_v36  ;;  %12748 = vmatmul.mubr.bf16.vlgmr.msra.gmra.mrb[8].mxu1 %v18664_v36  ;;  %v17250_v9 = vld [vmem:[#allocation8 + $0x1564] ss:$48 sps:$4 sm:$0xff]   ;;  %v17253_v11 = vld [vmem:[#allocation8 + $0x156c] ss:$48 sps:$4 sm:$0xff]   ;;  %v17248_v12 = vld [vmem:[#allocation8 + $0x1560] ss:$48 sps:$4 sm:$0xff]  }
 0x567   :  { %12587 = vmatpush1.bf16.msra.mxu0 %v17194_v48  ;;  %12759 = vmatpush1.bf16.msra.mxu1 %v17197_v24  ;;  %v17251_v15 = vld [vmem:[#allocation8 + $0x1568] ss:$48 sps:$4 sm:$0xff]   ;;  %v17256_v13 = vld [vmem:[#allocation8 + $0x15c4] ss:$48 sps:$4 sm:$0xff]   ;;  %v17259_v29 = vld [vmem:[#allocation8 + $0x15cc] ss:$48 sps:$4 sm:$0xff]  }
 0x568   :  { %12618 = vmatprep.mubr.bf16.mxu0 %v18673_v38  ;;  %12790 = vmatprep.mubr.bf16.mxu1 %v18673_v38  ;;  %v17254_v17 = vld [vmem:[#allocation8 + $0x15c0] ss:$48 sps:$4 sm:$0xff]   ;;  %v17257_v18 = vld [vmem:[#allocation8 + $0x15c8] ss:$48 sps:$4 sm:$0xff]   ;;  %v17262_v53 = vld [vmem:[#allocation8 + $0x1624] ss:$48 sps:$4 sm:$0xff]  }
 0x569   :  { %12588 = vmatprep.subr.bf16.mxu0 %v17202_v26  ;;  %12760 = vmatprep.subr.bf16.mxu1 %v17205_v31  ;;  %v17265_v19 = vld [vmem:[#allocation8 + $0x162c] ss:$48 sps:$4 sm:$0xff]   ;;  %v17260_v20 = vld [vmem:[#allocation8 + $0x1620] ss:$48 sps:$4 sm:$0xff]   ;;  %v17263_v21 = vld [vmem:[#allocation8 + $0x1628] ss:$48 sps:$4 sm:$0xff]  }
 0x56a   :  { %v17268_v25 = vld [vmem:[#allocation8 + $0x1684] ss:$48 sps:$4 sm:$0xff]   ;;  %v17271_v48 = vld [vmem:[#allocation8 + $0x168c] ss:$48 sps:$4 sm:$0xff]   ;;  %v17266_v24 = vld [vmem:[#allocation8 + $0x1680] ss:$48 sps:$4 sm:$0xff]  }
 0x56b   :  { %12589 = vmatpush1.bf16.msra.mxu0 %v17200_v33  ;;  %12761 = vmatpush1.bf16.msra.mxu1 %v17203_v34  ;;  %v17269_v26 = vld [vmem:[#allocation8 + $0x1688] ss:$48 sps:$4 sm:$0xff]   ;;  %v17274_v31 = vld [vmem:[#allocation8 + $0x16e4] ss:$48 sps:$4 sm:$0xff]   ;;  %v17277_v33 = vld [vmem:[#allocation8 + $0x16ec] ss:$48 sps:$4 sm:$0xff]  }
 0x56c   :  { %12590 = vmatprep.subr.bf16.mxu0 %v17208_v35  ;;  %12762 = vmatprep.subr.bf16.mxu1 %v17211_v39  ;;  %v17272_v34 = vld [vmem:[#allocation8 + $0x16e0] ss:$48 sps:$4 sm:$0xff]   ;;  %v17275_v35 = vld [vmem:[#allocation8 + $0x16e8] ss:$48 sps:$4 sm:$0xff]   ;;  %v17280_v39 = vld [vmem:[#allocation8 + $0x1744] ss:$48 sps:$4 sm:$0xff]  }
 0x56f   :  { %12591 = vmatpush1.bf16.msra.mxu0 %v17206_v40  ;;  %12763 = vmatpush1.bf16.msra.mxu1 %v17209_v3  ;;  %v17283_v40 = vld [vmem:[#allocation8 + $0x174c] ss:$48 sps:$4 sm:$0xff]   ;;  %v17278_v3 = vld [vmem:[#allocation8 + $0x1740] ss:$48 sps:$4 sm:$0xff]  }
 0x570   :  { %12592 = vmatprep.subr.bf16.mxu0 %v17214_v43  ;;  %12764 = vmatprep.subr.bf16.mxu1 %v17217_v50  ;;  %v17281_v43 = vld [vmem:[#allocation8 + $0x1748] ss:$48 sps:$4 sm:$0xff]   ;;  %v17286_v50 = vld [vmem:[#allocation8 + $0x17a4] ss:$48 sps:$4 sm:$0xff]  }
 0x573   :  { %12593 = vmatpush1.bf16.msra.mxu0 %v17212_v44  ;;  %12765 = vmatpush1.bf16.msra.mxu1 %v17215_v49  ;;  %v17289_v44 = vld [vmem:[#allocation8 + $0x17ac] ss:$48 sps:$4 sm:$0xff]   ;;  %v17284_v49 = vld [vmem:[#allocation8 + $0x17a0] ss:$48 sps:$4 sm:$0xff]  }
 0x574   :  { %12594 = vmatprep.subr.bf16.mxu0 %v17220_v51  ;;  %12766 = vmatprep.subr.bf16.mxu1 %v17223_v62  ;;  %v17287_v51 = vld [vmem:[#allocation8 + $0x17a8] ss:$48 sps:$4 sm:$0xff]   ;;  %v17292_v62 = vld [vmem:[#allocation8 + $0x14] ss:$48 sps:$4 sm:$0xff]  }
 0x577   :  { %12595 = vmatpush1.bf16.msra.mxu0 %v17218_v10  ;;  %12767 = vmatpush1.bf16.msra.mxu1 %v17221_v52  ;;  %v17295_v10 = vld [vmem:[#allocation8 + $0x1c] ss:$48 sps:$4 sm:$0xff]   ;;  %v17290_v52 = vld [vmem:[#allocation8 + $0x10] ss:$48 sps:$4 sm:$0xff]  }
 0x578   :  { %12596 = vmatprep.subr.bf16.mxu0 %v17226_v58  ;;  %12768 = vmatprep.subr.bf16.mxu1 %v17229_v55  ;;  %v17293_v58 = vld [vmem:[#allocation8 + $0x18] ss:$48 sps:$4 sm:$0xff]   ;;  %v17298_v55 = vld [vmem:[#allocation8 + $0x74] ss:$48 sps:$4 sm:$0xff]  }
 0x57b   :  { %12597 = vmatpush1.bf16.msra.mxu0 %v17224_v37  ;;  %12769 = vmatpush1.bf16.msra.mxu1 %v17227_v57  ;;  %v17301_v37 = vld [vmem:[#allocation8 + $0x7c] ss:$48 sps:$4 sm:$0xff]   ;;  %v17296_v57 = vld [vmem:[#allocation8 + $0x70] ss:$48 sps:$4 sm:$0xff]  }
 0x57c   :  { %12598 = vmatprep.subr.bf16.mxu0 %v17232_v59  ;;  %12770 = vmatprep.subr.bf16.mxu1 %v17235_v60  ;;  %v17299_v59 = vld [vmem:[#allocation8 + $0x78] ss:$48 sps:$4 sm:$0xff]   ;;  %v17304_v60 = vld [vmem:[#allocation8 + $0xd4] ss:$48 sps:$4 sm:$0xff]  }
 0x57f   :  { %12599 = vmatpush1.bf16.msra.mxu0 %v17230_v61  ;;  %12771 = vmatpush1.bf16.msra.mxu1 %v17233_v8  ;;  %v17307_v61 = vld [vmem:[#allocation8 + $0xdc] ss:$48 sps:$4 sm:$0xff]   ;;  %v17302_v8 = vld [vmem:[#allocation8 + $0xd0] ss:$48 sps:$4 sm:$0xff]  }
 0x580   :  { %12600 = vmatprep.subr.bf16.mxu0 %v17238_v0  ;;  %12772 = vmatprep.subr.bf16.mxu1 %v17241_v1  ;;  %v17305_v0 = vld [vmem:[#allocation8 + $0xd8] ss:$48 sps:$4 sm:$0xff]   ;;  %v17310_v1 = vld [vmem:[#allocation8 + $0x134] ss:$48 sps:$4 sm:$0xff]  }
 0x583   :  { %12601 = vmatpush1.bf16.msra.mxu0 %v17236_v2  ;;  %12773 = vmatpush1.bf16.msra.mxu1 %v17239_v4  ;;  %v17313_v2 = vld [vmem:[#allocation8 + $0x13c] ss:$48 sps:$4 sm:$0xff]   ;;  %v17308_v4 = vld [vmem:[#allocation8 + $0x130] ss:$48 sps:$4 sm:$0xff]  }
 0x584   :  { %12602 = vmatprep.subr.bf16.mxu0 %v17244_v5  ;;  %12774 = vmatprep.subr.bf16.mxu1 %v17247_v6  ;;  %v17311_v5 = vld [vmem:[#allocation8 + $0x138] ss:$48 sps:$4 sm:$0xff]   ;;  %v17316_v6 = vld [vmem:[#allocation8 + $0x194] ss:$48 sps:$4 sm:$0xff]  }
 0x587   :  { %12603 = vmatpush1.bf16.msra.mxu0 %v17242_v46  ;;  %12775 = vmatpush1.bf16.msra.mxu1 %v17245_v7  ;;  %v17319_v46 = vld [vmem:[#allocation8 + $0x19c] ss:$48 sps:$4 sm:$0xff]   ;;  %v17314_v7 = vld [vmem:[#allocation8 + $0x190] ss:$48 sps:$4 sm:$0xff]  }
 0x588   :  { %12604 = vmatprep.subr.bf16.mxu0 %v17250_v9  ;;  %12776 = vmatprep.subr.bf16.mxu1 %v17253_v11  ;;  %v17317_v9 = vld [vmem:[#allocation8 + $0x198] ss:$48 sps:$4 sm:$0xff]   ;;  %v17322_v11 = vld [vmem:[#allocation8 + $0x1f4] ss:$48 sps:$4 sm:$0xff]  }
 0x58b   :  { %12605 = vmatpush1.bf16.msra.mxu0 %v17248_v12  ;;  %12777 = vmatpush1.bf16.msra.mxu1 %v17251_v15  ;;  %v17325_v12 = vld [vmem:[#allocation8 + $0x1fc] ss:$48 sps:$4 sm:$0xff]   ;;  %v17320_v15 = vld [vmem:[#allocation8 + $0x1f0] ss:$48 sps:$4 sm:$0xff]  }
 0x58c   :  { %12606 = vmatprep.subr.bf16.mxu0 %v17256_v13  ;;  %12778 = vmatprep.subr.bf16.mxu1 %v17259_v29  ;;  %v17323_v13 = vld [vmem:[#allocation8 + $0x1f8] ss:$48 sps:$4 sm:$0xff]   ;;  %v17328_v29 = vld [vmem:[#allocation8 + $0x254] ss:$48 sps:$4 sm:$0xff]  }
 0x58f   :  { %12607 = vmatpush1.bf16.msra.mxu0 %v17254_v17  ;;  %12779 = vmatpush1.bf16.msra.mxu1 %v17257_v18  ;;  %v17331_v17 = vld [vmem:[#allocation8 + $0x25c] ss:$48 sps:$4 sm:$0xff]   ;;  %v17326_v18 = vld [vmem:[#allocation8 + $0x250] ss:$48 sps:$4 sm:$0xff]  }
 0x590   :  { %12608 = vmatprep.subr.bf16.mxu0 %v17262_v53  ;;  %12780 = vmatprep.subr.bf16.mxu1 %v17265_v19  ;;  %v17329_v53 = vld [vmem:[#allocation8 + $0x258] ss:$48 sps:$4 sm:$0xff]   ;;  %v17334_v19 = vld [vmem:[#allocation8 + $0x2b4] ss:$48 sps:$4 sm:$0xff]  }
 0x593   :  { %12609 = vmatpush1.bf16.msra.mxu0 %v17260_v20  ;;  %12781 = vmatpush1.bf16.msra.mxu1 %v17263_v21  ;;  %v17337_v20 = vld [vmem:[#allocation8 + $0x2bc] ss:$48 sps:$4 sm:$0xff]   ;;  %v17332_v21 = vld [vmem:[#allocation8 + $0x2b0] ss:$48 sps:$4 sm:$0xff]  }
 0x594   :  { %12610 = vmatprep.subr.bf16.mxu0 %v17268_v25  ;;  %12782 = vmatprep.subr.bf16.mxu1 %v17271_v48  ;;  %v17335_v25 = vld [vmem:[#allocation8 + $0x2b8] ss:$48 sps:$4 sm:$0xff]   ;;  %v17340_v48 = vld [vmem:[#allocation8 + $0x314] ss:$48 sps:$4 sm:$0xff]  }
 0x597   :  { %12611 = vmatpush1.bf16.msra.mxu0 %v17266_v24  ;;  %12783 = vmatpush1.bf16.msra.mxu1 %v17269_v26  ;;  %v17343_v24 = vld [vmem:[#allocation8 + $0x31c] ss:$48 sps:$4 sm:$0xff]   ;;  %v17338_v26 = vld [vmem:[#allocation8 + $0x310] ss:$48 sps:$4 sm:$0xff]  }
 0x598   :  { %12612 = vmatprep.subr.bf16.mxu0 %v17274_v31  ;;  %12784 = vmatprep.subr.bf16.mxu1 %v17277_v33  ;;  %v17341_v31 = vld [vmem:[#allocation8 + $0x318] ss:$48 sps:$4 sm:$0xff]   ;;  %v17346_v33 = vld [vmem:[#allocation8 + $0x374] ss:$48 sps:$4 sm:$0xff]  }
 0x59b   :  { %12613 = vmatpush1.bf16.msra.mxu0 %v17272_v34  ;;  %12785 = vmatpush1.bf16.msra.mxu1 %v17275_v35  ;;  %v17349_v34 = vld [vmem:[#allocation8 + $0x37c] ss:$48 sps:$4 sm:$0xff]   ;;  %v17344_v35 = vld [vmem:[#allocation8 + $0x370] ss:$48 sps:$4 sm:$0xff]  }
 0x59c   :  { %12614 = vmatprep.subr.bf16.mxu0 %v17280_v39  ;;  %12786 = vmatprep.subr.bf16.mxu1 %v17283_v40  ;;  %v17347_v39 = vld [vmem:[#allocation8 + $0x378] ss:$48 sps:$4 sm:$0xff]   ;;  %v17352_v40 = vld [vmem:[#allocation8 + $0x3d4] ss:$48 sps:$4 sm:$0xff]  }
 0x59f   :  { %12615 = vmatpush1.bf16.msra.mxu0 %v17278_v3  ;;  %12787 = vmatpush1.bf16.msra.mxu1 %v17281_v43  ;;  %v17355_v3 = vld [vmem:[#allocation8 + $0x3dc] ss:$48 sps:$4 sm:$0xff]   ;;  %v17350_v43 = vld [vmem:[#allocation8 + $0x3d0] ss:$48 sps:$4 sm:$0xff]  }
 0x5a0   :  { %12616 = vmatprep.subr.bf16.mxu0 %v17286_v50  ;;  %12788 = vmatprep.subr.bf16.mxu1 %v17289_v44  ;;  %v17353_v50 = vld [vmem:[#allocation8 + $0x3d8] ss:$48 sps:$4 sm:$0xff]   ;;  %v17358_v44 = vld [vmem:[#allocation8 + $0x434] ss:$48 sps:$4 sm:$0xff]  }
 0x5a3   :  { %12617 = vmatpush1.bf16.msra.mxu0 %v17284_v49  ;;  %12789 = vmatpush1.bf16.msra.mxu1 %v17287_v51  ;;  %v17361_v49 = vld [vmem:[#allocation8 + $0x43c] ss:$48 sps:$4 sm:$0xff]   ;;  %v17356_v51 = vld [vmem:[#allocation8 + $0x430] ss:$48 sps:$4 sm:$0xff]  }
 0x5a4   :  { %12801 = vmatprep.subr.bf16.mxu0 %v17292_v62  ;;  %12973 = vmatprep.subr.bf16.mxu1 %v17295_v10  ;;  %v17359_v62 = vld [vmem:[#allocation8 + $0x438] ss:$48 sps:$4 sm:$0xff]   ;;  %v17364_v10 = vld [vmem:[#allocation8 + $0x494] ss:$48 sps:$4 sm:$0xff]  }
 0x5a6   :  { %12619 = vmatmul.mubr.bf16.vlgmr.msra.gmra.mrb[8].mxu0 %v18668_v16  ;;  %12791 = vmatmul.mubr.bf16.vlgmr.msra.gmra.mrb[8].mxu1 %v18668_v16 }
 0x5a7   :  { %12802 = vmatpush1.bf16.msra.mxu0 %v17290_v52  ;;  %12833 = vmatprep.mubr.bf16.mxu0 %v18622_v56  ;;  %v17367_v52 = vld [vmem:[#allocation8 + $0x49c] ss:$48 sps:$4 sm:$0xff]  }
 0x5a8   :  { %12974 = vmatpush1.bf16.msra.mxu1 %v17293_v58  ;;  %13005 = vmatprep.mubr.bf16.mxu1 %v18622_v56  ;;  %v17362_v58 = vld [vmem:[#allocation8 + $0x490] ss:$48 sps:$4 sm:$0xff]  }
 0x5a9   :  { %12803 = vmatprep.subr.bf16.mxu0 %v17298_v55  ;;  %12975 = vmatprep.subr.bf16.mxu1 %v17301_v37  ;;  %v17365_v55 = vld [vmem:[#allocation8 + $0x498] ss:$48 sps:$4 sm:$0xff]   ;;  %v17370_v37 = vld [vmem:[#allocation8 + $0x4f4] ss:$48 sps:$4 sm:$0xff]  }
 0x5ab   :  { %12804 = vmatpush1.bf16.msra.mxu0 %v17296_v57  ;;  %v17373_v57 = vld [vmem:[#allocation8 + $0x4fc] ss:$48 sps:$4 sm:$0xff]  }
 0x5ac   :  { %12976 = vmatpush1.bf16.msra.mxu1 %v17299_v59  ;;  %12805 = vmatprep.subr.bf16.mxu0 %v17304_v60  ;;  %v17368_v59 = vld [vmem:[#allocation8 + $0x4f0] ss:$48 sps:$4 sm:$0xff]   ;;  %v17371_v60 = vld [vmem:[#allocation8 + $0x4f8] ss:$48 sps:$4 sm:$0xff]  }
 0x5ad   :  { %12977 = vmatprep.subr.bf16.mxu1 %v17307_v61  ;;  %v17376_v61 = vld [vmem:[#allocation8 + $0x554] ss:$48 sps:$4 sm:$0xff]  }
 0x5af   :  { %12806 = vmatpush1.bf16.msra.mxu0 %v17302_v8  ;;  %v17379_v8 = vld [vmem:[#allocation8 + $0x55c] ss:$48 sps:$4 sm:$0xff]  }
 0x5b0   :  { %12978 = vmatpush1.bf16.msra.mxu1 %v17305_v0  ;;  %12807 = vmatprep.subr.bf16.mxu0 %v17310_v1  ;;  %v17374_v0 = vld [vmem:[#allocation8 + $0x550] ss:$48 sps:$4 sm:$0xff]   ;;  %v17377_v1 = vld [vmem:[#allocation8 + $0x558] ss:$48 sps:$4 sm:$0xff]  }
 0x5b1   :  { %12979 = vmatprep.subr.bf16.mxu1 %v17313_v2  ;;  %v17382_v2 = vld [vmem:[#allocation8 + $0x5b4] ss:$48 sps:$4 sm:$0xff]  }
 0x5b3   :  { %12808 = vmatpush1.bf16.msra.mxu0 %v17308_v4  ;;  %v17385_v4 = vld [vmem:[#allocation8 + $0x5bc] ss:$48 sps:$4 sm:$0xff]  }
 0x5b4   :  { %12980 = vmatpush1.bf16.msra.mxu1 %v17311_v5  ;;  %12809 = vmatprep.subr.bf16.mxu0 %v17316_v6  ;;  %v17380_v5 = vld [vmem:[#allocation8 + $0x5b0] ss:$48 sps:$4 sm:$0xff]   ;;  %v17383_v6 = vld [vmem:[#allocation8 + $0x5b8] ss:$48 sps:$4 sm:$0xff]  }
 0x5b5   :  { %12981 = vmatprep.subr.bf16.mxu1 %v17319_v46  ;;  %v17388_v46 = vld [vmem:[#allocation8 + $0x614] ss:$48 sps:$4 sm:$0xff]  }
 0x5b7   :  { %12810 = vmatpush1.bf16.msra.mxu0 %v17314_v7  ;;  %v17391_v7 = vld [vmem:[#allocation8 + $0x61c] ss:$48 sps:$4 sm:$0xff]  }
 0x5b8   :  { %12982 = vmatpush1.bf16.msra.mxu1 %v17317_v9  ;;  %12811 = vmatprep.subr.bf16.mxu0 %v17322_v11  ;;  %v17386_v9 = vld [vmem:[#allocation8 + $0x610] ss:$48 sps:$4 sm:$0xff]   ;;  %v17389_v11 = vld [vmem:[#allocation8 + $0x618] ss:$48 sps:$4 sm:$0xff]  }
 0x5b9   :  { %12983 = vmatprep.subr.bf16.mxu1 %v17325_v12  ;;  %v17394_v12 = vld [vmem:[#allocation8 + $0x674] ss:$48 sps:$4 sm:$0xff]  }
 0x5bb   :  { %12812 = vmatpush1.bf16.msra.mxu0 %v17320_v15  ;;  %v17397_v15 = vld [vmem:[#allocation8 + $0x67c] ss:$48 sps:$4 sm:$0xff]  }
 0x5bc   :  { %12984 = vmatpush1.bf16.msra.mxu1 %v17323_v13  ;;  %12813 = vmatprep.subr.bf16.mxu0 %v17328_v29  ;;  %v17392_v13 = vld [vmem:[#allocation8 + $0x670] ss:$48 sps:$4 sm:$0xff]   ;;  %v17395_v29 = vld [vmem:[#allocation8 + $0x678] ss:$48 sps:$4 sm:$0xff]  }
 0x5bd   :  { %12985 = vmatprep.subr.bf16.mxu1 %v17331_v17  ;;  %v17400_v17 = vld [vmem:[#allocation8 + $0x6d4] ss:$48 sps:$4 sm:$0xff]  }
 0x5bf   :  { %12814 = vmatpush1.bf16.msra.mxu0 %v17326_v18  ;;  %v17403_v18 = vld [vmem:[#allocation8 + $0x6dc] ss:$48 sps:$4 sm:$0xff]  }
 0x5c0   :  { %12986 = vmatpush1.bf16.msra.mxu1 %v17329_v53  ;;  %12815 = vmatprep.subr.bf16.mxu0 %v17334_v19  ;;  %v17398_v53 = vld [vmem:[#allocation8 + $0x6d0] ss:$48 sps:$4 sm:$0xff]   ;;  %v17401_v19 = vld [vmem:[#allocation8 + $0x6d8] ss:$48 sps:$4 sm:$0xff]  }
 0x5c1   :  { %12987 = vmatprep.subr.bf16.mxu1 %v17337_v20  ;;  %v17406_v20 = vld [vmem:[#allocation8 + $0x734] ss:$48 sps:$4 sm:$0xff]  }
 0x5c3   :  { %12816 = vmatpush1.bf16.msra.mxu0 %v17332_v21  ;;  %v17409_v21 = vld [vmem:[#allocation8 + $0x73c] ss:$48 sps:$4 sm:$0xff]  }
 0x5c4   :  { %12988 = vmatpush1.bf16.msra.mxu1 %v17335_v25  ;;  %12817 = vmatprep.subr.bf16.mxu0 %v17340_v48  ;;  %v17404_v25 = vld [vmem:[#allocation8 + $0x730] ss:$48 sps:$4 sm:$0xff]   ;;  %v17407_v48 = vld [vmem:[#allocation8 + $0x738] ss:$48 sps:$4 sm:$0xff]  }
 0x5c5   :  { %12989 = vmatprep.subr.bf16.mxu1 %v17343_v24  ;;  %v17412_v24 = vld [vmem:[#allocation8 + $0x794] ss:$48 sps:$4 sm:$0xff]  }
 0x5c7   :  { %12818 = vmatpush1.bf16.msra.mxu0 %v17338_v26  ;;  %v17415_v26 = vld [vmem:[#allocation8 + $0x79c] ss:$48 sps:$4 sm:$0xff]  }
 0x5c8   :  { %12990 = vmatpush1.bf16.msra.mxu1 %v17341_v31  ;;  %12819 = vmatprep.subr.bf16.mxu0 %v17346_v33  ;;  %v17410_v31 = vld [vmem:[#allocation8 + $0x790] ss:$48 sps:$4 sm:$0xff]   ;;  %v17413_v33 = vld [vmem:[#allocation8 + $0x798] ss:$48 sps:$4 sm:$0xff]  }
 0x5c9   :  { %12991 = vmatprep.subr.bf16.mxu1 %v17349_v34  ;;  %v17418_v34 = vld [vmem:[#allocation8 + $0x7f4] ss:$48 sps:$4 sm:$0xff]  }
 0x5cb   :  { %12820 = vmatpush1.bf16.msra.mxu0 %v17344_v35  ;;  %v17421_v35 = vld [vmem:[#allocation8 + $0x7fc] ss:$48 sps:$4 sm:$0xff]  }
 0x5cc   :  { %12992 = vmatpush1.bf16.msra.mxu1 %v17347_v39  ;;  %12821 = vmatprep.subr.bf16.mxu0 %v17352_v40  ;;  %v17416_v39 = vld [vmem:[#allocation8 + $0x7f0] ss:$48 sps:$4 sm:$0xff]   ;;  %v17419_v40 = vld [vmem:[#allocation8 + $0x7f8] ss:$48 sps:$4 sm:$0xff]  }
 0x5cd   :  { %12993 = vmatprep.subr.bf16.mxu1 %v17355_v3  ;;  %v17424_v3 = vld [vmem:[#allocation8 + $0x854] ss:$48 sps:$4 sm:$0xff]  }
 0x5cf   :  { %12822 = vmatpush1.bf16.msra.mxu0 %v17350_v43  ;;  %v17427_v43 = vld [vmem:[#allocation8 + $0x85c] ss:$48 sps:$4 sm:$0xff]  }
 0x5d0   :  { %12994 = vmatpush1.bf16.msra.mxu1 %v17353_v50  ;;  %12823 = vmatprep.subr.bf16.mxu0 %v17358_v44  ;;  %v17422_v50 = vld [vmem:[#allocation8 + $0x850] ss:$48 sps:$4 sm:$0xff]   ;;  %v17425_v44 = vld [vmem:[#allocation8 + $0x858] ss:$48 sps:$4 sm:$0xff]  }
 0x5d1   :  { %12995 = vmatprep.subr.bf16.mxu1 %v17361_v49  ;;  %v17430_v49 = vld [vmem:[#allocation8 + $0x8b4] ss:$48 sps:$4 sm:$0xff]  }
 0x5d3   :  { %12824 = vmatpush1.bf16.msra.mxu0 %v17356_v51  ;;  %v17433_v51 = vld [vmem:[#allocation8 + $0x8bc] ss:$48 sps:$4 sm:$0xff]  }
 0x5d4   :  { %12996 = vmatpush1.bf16.msra.mxu1 %v17359_v62  ;;  %12825 = vmatprep.subr.bf16.mxu0 %v17364_v10  ;;  %v17428_v62 = vld [vmem:[#allocation8 + $0x8b0] ss:$48 sps:$4 sm:$0xff]   ;;  %v17431_v10 = vld [vmem:[#allocation8 + $0x8b8] ss:$48 sps:$4 sm:$0xff]  }
 0x5d5   :  { %12997 = vmatprep.subr.bf16.mxu1 %v17367_v52  ;;  %v17436_v52 = vld [vmem:[#allocation8 + $0x914] ss:$48 sps:$4 sm:$0xff]  }
 0x5d7   :  { %12826 = vmatpush1.bf16.msra.mxu0 %v17362_v58  ;;  %v17439_v58 = vld [vmem:[#allocation8 + $0x91c] ss:$48 sps:$4 sm:$0xff]  }
 0x5d8   :  { %12998 = vmatpush1.bf16.msra.mxu1 %v17365_v55  ;;  %12827 = vmatprep.subr.bf16.mxu0 %v17370_v37  ;;  %v17434_v55 = vld [vmem:[#allocation8 + $0x910] ss:$48 sps:$4 sm:$0xff]   ;;  %v17437_v37 = vld [vmem:[#allocation8 + $0x918] ss:$48 sps:$4 sm:$0xff]  }
 0x5d9   :  { %12999 = vmatprep.subr.bf16.mxu1 %v17373_v57  ;;  %v17442_v57 = vld [vmem:[#allocation8 + $0x974] ss:$48 sps:$4 sm:$0xff]  }
 0x5db   :  { %12828 = vmatpush1.bf16.msra.mxu0 %v17368_v59  ;;  %v17445_v59 = vld [vmem:[#allocation8 + $0x97c] ss:$48 sps:$4 sm:$0xff]  }
 0x5dc   :  { %13000 = vmatpush1.bf16.msra.mxu1 %v17371_v60  ;;  %12829 = vmatprep.subr.bf16.mxu0 %v17376_v61  ;;  %v17440_v60 = vld [vmem:[#allocation8 + $0x970] ss:$48 sps:$4 sm:$0xff]   ;;  %v17443_v61 = vld [vmem:[#allocation8 + $0x978] ss:$48 sps:$4 sm:$0xff]  }
 0x5dd   :  { %13001 = vmatprep.subr.bf16.mxu1 %v17379_v8  ;;  %v17448_v8 = vld [vmem:[#allocation8 + $0x9d4] ss:$48 sps:$4 sm:$0xff]  }
 0x5df   :  { %12830 = vmatpush1.bf16.msra.mxu0 %v17374_v0  ;;  %v17451_v0 = vld [vmem:[#allocation8 + $0x9dc] ss:$48 sps:$4 sm:$0xff]  }
 0x5e0   :  { %13002 = vmatpush1.bf16.msra.mxu1 %v17377_v1  ;;  %12831 = vmatprep.subr.bf16.mxu0 %v17382_v2  ;;  %v17446_v1 = vld [vmem:[#allocation8 + $0x9d0] ss:$48 sps:$4 sm:$0xff]   ;;  %v17449_v2 = vld [vmem:[#allocation8 + $0x9d8] ss:$48 sps:$4 sm:$0xff]  }
 0x5e1   :  { %13003 = vmatprep.subr.bf16.mxu1 %v17385_v4  ;;  %v17454_v4 = vld [vmem:[#allocation8 + $0xa34] ss:$48 sps:$4 sm:$0xff]  }
 0x5e3   :  { %12832 = vmatpush1.bf16.msra.mxu0 %v17380_v5  ;;  %v17457_v5 = vld [vmem:[#allocation8 + $0xa3c] ss:$48 sps:$4 sm:$0xff]  }
 0x5e4   :  { %13004 = vmatpush1.bf16.msra.mxu1 %v17383_v6  ;;  %12844 = vmatprep.subr.bf16.mxu0 %v17388_v46  ;;  %v17452_v6 = vld [vmem:[#allocation8 + $0xa30] ss:$48 sps:$4 sm:$0xff]   ;;  %v17455_v46 = vld [vmem:[#allocation8 + $0xa38] ss:$48 sps:$4 sm:$0xff]  }
 0x5e5   :  { %13016 = vmatprep.subr.bf16.mxu1 %v17391_v7  ;;  %v17460_v7 = vld [vmem:[#allocation8 + $0xa94] ss:$48 sps:$4 sm:$0xff]  }
 0x5e6   :  { %12834 = vmatmul.mubr.bf16.vlgmr.msra.gmra.mrb[12].mxu0 %v18615_v45 }
 0x5e7   :  { %13006 = vmatmul.mubr.bf16.vlgmr.msra.gmra.mrb[12].mxu1 %v18615_v45  ;;  %12845 = vmatpush1.bf16.msra.mxu0 %v17386_v9  ;;  %v17463_v9 = vld [vmem:[#allocation8 + $0xa9c] ss:$48 sps:$4 sm:$0xff]  }
 0x5e8   :  { %12876 = vmatprep.mubr.bf16.mxu0 %v18624_v63  ;;  %13017 = vmatpush1.bf16.msra.mxu1 %v17389_v11  ;;  %v17458_v11 = vld [vmem:[#allocation8 + $0xa90] ss:$48 sps:$4 sm:$0xff]  }
 0x5e9   :  { %13048 = vmatprep.mubr.bf16.mxu1 %v18624_v63  ;;  %12846 = vmatprep.subr.bf16.mxu0 %v17394_v12  ;;  %v17461_v12 = vld [vmem:[#allocation8 + $0xa98] ss:$48 sps:$4 sm:$0xff]  }
 0x5ea   :  { %13018 = vmatprep.subr.bf16.mxu1 %v17397_v15  ;;  %v17466_v15 = vld [vmem:[#allocation8 + $0xaf4] ss:$48 sps:$4 sm:$0xff]  }
 0x5eb   :  { %12847 = vmatpush1.bf16.msra.mxu0 %v17392_v13  ;;  %v17469_v13 = vld [vmem:[#allocation8 + $0xafc] ss:$48 sps:$4 sm:$0xff]  }
 0x5ec   :  { %13019 = vmatpush1.bf16.msra.mxu1 %v17395_v29  ;;  %12848 = vmatprep.subr.bf16.mxu0 %v17400_v17  ;;  %v17464_v29 = vld [vmem:[#allocation8 + $0xaf0] ss:$48 sps:$4 sm:$0xff]   ;;  %v17467_v17 = vld [vmem:[#allocation8 + $0xaf8] ss:$48 sps:$4 sm:$0xff]  }
 0x5ed   :  { %13020 = vmatprep.subr.bf16.mxu1 %v17403_v18  ;;  %v17472_v18 = vld [vmem:[#allocation8 + $0xb54] ss:$48 sps:$4 sm:$0xff]  }
 0x5ef   :  { %12849 = vmatpush1.bf16.msra.mxu0 %v17398_v53  ;;  %v17475_v53 = vld [vmem:[#allocation8 + $0xb5c] ss:$48 sps:$4 sm:$0xff]  }
 0x5f0   :  { %13021 = vmatpush1.bf16.msra.mxu1 %v17401_v19  ;;  %12850 = vmatprep.subr.bf16.mxu0 %v17406_v20  ;;  %v17470_v19 = vld [vmem:[#allocation8 + $0xb50] ss:$48 sps:$4 sm:$0xff]   ;;  %v17473_v20 = vld [vmem:[#allocation8 + $0xb58] ss:$48 sps:$4 sm:$0xff]  }
 0x5f1   :  { %13022 = vmatprep.subr.bf16.mxu1 %v17409_v21  ;;  %v17478_v21 = vld [vmem:[#allocation8 + $0xbb4] ss:$48 sps:$4 sm:$0xff]  }
 0x5f3   :  { %12851 = vmatpush1.bf16.msra.mxu0 %v17404_v25  ;;  %v17481_v25 = vld [vmem:[#allocation8 + $0xbbc] ss:$48 sps:$4 sm:$0xff]  }
 0x5f4   :  { %13023 = vmatpush1.bf16.msra.mxu1 %v17407_v48  ;;  %12852 = vmatprep.subr.bf16.mxu0 %v17412_v24  ;;  %v17476_v48 = vld [vmem:[#allocation8 + $0xbb0] ss:$48 sps:$4 sm:$0xff]   ;;  %v17479_v24 = vld [vmem:[#allocation8 + $0xbb8] ss:$48 sps:$4 sm:$0xff]  }
 0x5f5   :  { %13024 = vmatprep.subr.bf16.mxu1 %v17415_v26  ;;  %v17484_v26 = vld [vmem:[#allocation8 + $0xc14] ss:$48 sps:$4 sm:$0xff]  }
 0x5f7   :  { %12853 = vmatpush1.bf16.msra.mxu0 %v17410_v31  ;;  %v17487_v31 = vld [vmem:[#allocation8 + $0xc1c] ss:$48 sps:$4 sm:$0xff]  }
 0x5f8   :  { %13025 = vmatpush1.bf16.msra.mxu1 %v17413_v33  ;;  %12854 = vmatprep.subr.bf16.mxu0 %v17418_v34  ;;  %v17482_v33 = vld [vmem:[#allocation8 + $0xc10] ss:$48 sps:$4 sm:$0xff]   ;;  %v17485_v34 = vld [vmem:[#allocation8 + $0xc18] ss:$48 sps:$4 sm:$0xff]  }
 0x5f9   :  { %13026 = vmatprep.subr.bf16.mxu1 %v17421_v35  ;;  %v17490_v35 = vld [vmem:[#allocation8 + $0xc74] ss:$48 sps:$4 sm:$0xff]  }
 0x5fb   :  { %12855 = vmatpush1.bf16.msra.mxu0 %v17416_v39  ;;  %v17493_v39 = vld [vmem:[#allocation8 + $0xc7c] ss:$48 sps:$4 sm:$0xff]  }
 0x5fc   :  { %13027 = vmatpush1.bf16.msra.mxu1 %v17419_v40  ;;  %12856 = vmatprep.subr.bf16.mxu0 %v17424_v3  ;;  %v17488_v40 = vld [vmem:[#allocation8 + $0xc70] ss:$48 sps:$4 sm:$0xff]   ;;  %v17491_v3 = vld [vmem:[#allocation8 + $0xc78] ss:$48 sps:$4 sm:$0xff]  }
 0x5fd   :  { %13028 = vmatprep.subr.bf16.mxu1 %v17427_v43  ;;  %v17496_v43 = vld [vmem:[#allocation8 + $0xcd4] ss:$48 sps:$4 sm:$0xff]  }
 0x5ff   :  { %12857 = vmatpush1.bf16.msra.mxu0 %v17422_v50  ;;  %v17499_v50 = vld [vmem:[#allocation8 + $0xcdc] ss:$48 sps:$4 sm:$0xff]  }
 0x600   :  { %13029 = vmatpush1.bf16.msra.mxu1 %v17425_v44  ;;  %12858 = vmatprep.subr.bf16.mxu0 %v17430_v49  ;;  %v17494_v44 = vld [vmem:[#allocation8 + $0xcd0] ss:$48 sps:$4 sm:$0xff]   ;;  %v17497_v49 = vld [vmem:[#allocation8 + $0xcd8] ss:$48 sps:$4 sm:$0xff]  }
 0x601   :  { %13030 = vmatprep.subr.bf16.mxu1 %v17433_v51  ;;  %v17502_v51 = vld [vmem:[#allocation8 + $0xd34] ss:$48 sps:$4 sm:$0xff]  }
 0x603   :  { %12859 = vmatpush1.bf16.msra.mxu0 %v17428_v62  ;;  %v17505_v62 = vld [vmem:[#allocation8 + $0xd3c] ss:$48 sps:$4 sm:$0xff]  }
 0x604   :  { %13031 = vmatpush1.bf16.msra.mxu1 %v17431_v10  ;;  %12860 = vmatprep.subr.bf16.mxu0 %v17436_v52  ;;  %v17500_v10 = vld [vmem:[#allocation8 + $0xd30] ss:$48 sps:$4 sm:$0xff]   ;;  %v17503_v52 = vld [vmem:[#allocation8 + $0xd38] ss:$48 sps:$4 sm:$0xff]  }
 0x605   :  { %13032 = vmatprep.subr.bf16.mxu1 %v17439_v58  ;;  %v17508_v58 = vld [vmem:[#allocation8 + $0xd94] ss:$48 sps:$4 sm:$0xff]  }
 0x607   :  { %12861 = vmatpush1.bf16.msra.mxu0 %v17434_v55  ;;  %v17511_v55 = vld [vmem:[#allocation8 + $0xd9c] ss:$48 sps:$4 sm:$0xff]  }
 0x608   :  { %13033 = vmatpush1.bf16.msra.mxu1 %v17437_v37  ;;  %12862 = vmatprep.subr.bf16.mxu0 %v17442_v57  ;;  %v17506_v37 = vld [vmem:[#allocation8 + $0xd90] ss:$48 sps:$4 sm:$0xff]   ;;  %v17509_v57 = vld [vmem:[#allocation8 + $0xd98] ss:$48 sps:$4 sm:$0xff]  }
 0x609   :  { %13034 = vmatprep.subr.bf16.mxu1 %v17445_v59  ;;  %v17514_v59 = vld [vmem:[#allocation8 + $0xdf4] ss:$48 sps:$4 sm:$0xff]  }
 0x60b   :  { %12863 = vmatpush1.bf16.msra.mxu0 %v17440_v60  ;;  %v17517_v60 = vld [vmem:[#allocation8 + $0xdfc] ss:$48 sps:$4 sm:$0xff]  }
 0x60c   :  { %13035 = vmatpush1.bf16.msra.mxu1 %v17443_v61  ;;  %12864 = vmatprep.subr.bf16.mxu0 %v17448_v8  ;;  %v17512_v61 = vld [vmem:[#allocation8 + $0xdf0] ss:$48 sps:$4 sm:$0xff]   ;;  %v17515_v8 = vld [vmem:[#allocation8 + $0xdf8] ss:$48 sps:$4 sm:$0xff]  }
 0x60d   :  { %13036 = vmatprep.subr.bf16.mxu1 %v17451_v0  ;;  %v17520_v0 = vld [vmem:[#allocation8 + $0xe54] ss:$48 sps:$4 sm:$0xff]  }
 0x60f   :  { %12865 = vmatpush1.bf16.msra.mxu0 %v17446_v1  ;;  %v17523_v1 = vld [vmem:[#allocation8 + $0xe5c] ss:$48 sps:$4 sm:$0xff]  }
 0x610   :  { %13037 = vmatpush1.bf16.msra.mxu1 %v17449_v2  ;;  %12866 = vmatprep.subr.bf16.mxu0 %v17454_v4  ;;  %v17518_v2 = vld [vmem:[#allocation8 + $0xe50] ss:$48 sps:$4 sm:$0xff]   ;;  %v17521_v4 = vld [vmem:[#allocation8 + $0xe58] ss:$48 sps:$4 sm:$0xff]  }
 0x611   :  { %13038 = vmatprep.subr.bf16.mxu1 %v17457_v5  ;;  %v17526_v5 = vld [vmem:[#allocation8 + $0xeb4] ss:$48 sps:$4 sm:$0xff]  }
 0x613   :  { %12867 = vmatpush1.bf16.msra.mxu0 %v17452_v6  ;;  %v17529_v6 = vld [vmem:[#allocation8 + $0xebc] ss:$48 sps:$4 sm:$0xff]  }
 0x614   :  { %13039 = vmatpush1.bf16.msra.mxu1 %v17455_v46  ;;  %12868 = vmatprep.subr.bf16.mxu0 %v17460_v7  ;;  %v17524_v46 = vld [vmem:[#allocation8 + $0xeb0] ss:$48 sps:$4 sm:$0xff]   ;;  %v17527_v7 = vld [vmem:[#allocation8 + $0xeb8] ss:$48 sps:$4 sm:$0xff]  }
 0x615   :  { %13040 = vmatprep.subr.bf16.mxu1 %v17463_v9  ;;  %v17532_v9 = vld [vmem:[#allocation8 + $0xf14] ss:$48 sps:$4 sm:$0xff]  }
 0x617   :  { %12869 = vmatpush1.bf16.msra.mxu0 %v17458_v11  ;;  %v17535_v11 = vld [vmem:[#allocation8 + $0xf1c] ss:$48 sps:$4 sm:$0xff]  }
 0x618   :  { %13041 = vmatpush1.bf16.msra.mxu1 %v17461_v12  ;;  %12870 = vmatprep.subr.bf16.mxu0 %v17466_v15  ;;  %v17530_v12 = vld [vmem:[#allocation8 + $0xf10] ss:$48 sps:$4 sm:$0xff]   ;;  %v17533_v15 = vld [vmem:[#allocation8 + $0xf18] ss:$48 sps:$4 sm:$0xff]  }
 0x619   :  { %13042 = vmatprep.subr.bf16.mxu1 %v17469_v13  ;;  %v17538_v13 = vld [vmem:[#allocation8 + $0xf74] ss:$48 sps:$4 sm:$0xff]  }
 0x61b   :  { %12871 = vmatpush1.bf16.msra.mxu0 %v17464_v29  ;;  %v17541_v29 = vld [vmem:[#allocation8 + $0xf7c] ss:$48 sps:$4 sm:$0xff]  }
 0x61c   :  { %13043 = vmatpush1.bf16.msra.mxu1 %v17467_v17  ;;  %12872 = vmatprep.subr.bf16.mxu0 %v17472_v18  ;;  %v17536_v17 = vld [vmem:[#allocation8 + $0xf70] ss:$48 sps:$4 sm:$0xff]   ;;  %v17539_v18 = vld [vmem:[#allocation8 + $0xf78] ss:$48 sps:$4 sm:$0xff]  }
 0x61d   :  { %13044 = vmatprep.subr.bf16.mxu1 %v17475_v53  ;;  %v17544_v53 = vld [vmem:[#allocation8 + $0xfd4] ss:$48 sps:$4 sm:$0xff]  }
 0x61f   :  { %12873 = vmatpush1.bf16.msra.mxu0 %v17470_v19  ;;  %v17547_v19 = vld [vmem:[#allocation8 + $0xfdc] ss:$48 sps:$4 sm:$0xff]  }
 0x620   :  { %13045 = vmatpush1.bf16.msra.mxu1 %v17473_v20  ;;  %12874 = vmatprep.subr.bf16.mxu0 %v17478_v21  ;;  %v17542_v20 = vld [vmem:[#allocation8 + $0xfd0] ss:$48 sps:$4 sm:$0xff]   ;;  %v17545_v21 = vld [vmem:[#allocation8 + $0xfd8] ss:$48 sps:$4 sm:$0xff]  }
 0x621   :  { %13046 = vmatprep.subr.bf16.mxu1 %v17481_v25  ;;  %v17550_v25 = vld [vmem:[#allocation8 + $0x1034] ss:$48 sps:$4 sm:$0xff]  }
 0x623   :  { %12875 = vmatpush1.bf16.msra.mxu0 %v17476_v48  ;;  %v17553_v48 = vld [vmem:[#allocation8 + $0x103c] ss:$48 sps:$4 sm:$0xff]  }
 0x624   :  { %13047 = vmatpush1.bf16.msra.mxu1 %v17479_v24  ;;  %12887 = vmatprep.subr.bf16.mxu0 %v17484_v26  ;;  %v17548_v24 = vld [vmem:[#allocation8 + $0x1030] ss:$48 sps:$4 sm:$0xff]   ;;  %v17551_v26 = vld [vmem:[#allocation8 + $0x1038] ss:$48 sps:$4 sm:$0xff]  }
 0x625   :  { %13059 = vmatprep.subr.bf16.mxu1 %v17487_v31  ;;  %v17556_v31 = vld [vmem:[#allocation8 + $0x1094] ss:$48 sps:$4 sm:$0xff]  }
 0x626   :  { %12877 = vmatmul.mubr.bf16.vlgmr.msra.gmra.mrb[12].mxu0 %v18619_v54 }
 0x627   :  { %13049 = vmatmul.mubr.bf16.vlgmr.msra.gmra.mrb[12].mxu1 %v18619_v54  ;;  %12888 = vmatpush1.bf16.msra.mxu0 %v17482_v33  ;;  %v17559_v33 = vld [vmem:[#allocation8 + $0x109c] ss:$48 sps:$4 sm:$0xff]  }
 0x628   :  { %12919 = vmatprep.mubr.bf16.mxu0 %v18671_v23  ;;  %13060 = vmatpush1.bf16.msra.mxu1 %v17485_v34  ;;  %v17554_v34 = vld [vmem:[#allocation8 + $0x1090] ss:$48 sps:$4 sm:$0xff]  }
 0x629   :  { %13091 = vmatprep.mubr.bf16.mxu1 %v18671_v23  ;;  %12889 = vmatprep.subr.bf16.mxu0 %v17490_v35  ;;  %v17557_v35 = vld [vmem:[#allocation8 + $0x1098] ss:$48 sps:$4 sm:$0xff]  }
 0x62a   :  { %13061 = vmatprep.subr.bf16.mxu1 %v17493_v39  ;;  %v17562_v39 = vld [vmem:[#allocation8 + $0x10f4] ss:$48 sps:$4 sm:$0xff]  }
 0x62b   :  { %12890 = vmatpush1.bf16.msra.mxu0 %v17488_v40  ;;  %v17565_v40 = vld [vmem:[#allocation8 + $0x10fc] ss:$48 sps:$4 sm:$0xff]  }
 0x62c   :  { %13062 = vmatpush1.bf16.msra.mxu1 %v17491_v3  ;;  %12891 = vmatprep.subr.bf16.mxu0 %v17496_v43  ;;  %v17560_v3 = vld [vmem:[#allocation8 + $0x10f0] ss:$48 sps:$4 sm:$0xff]   ;;  %v17563_v43 = vld [vmem:[#allocation8 + $0x10f8] ss:$48 sps:$4 sm:$0xff]  }
 0x62d   :  { %13063 = vmatprep.subr.bf16.mxu1 %v17499_v50  ;;  %v17568_v50 = vld [vmem:[#allocation8 + $0x1154] ss:$48 sps:$4 sm:$0xff]  }
 0x62f   :  { %12892 = vmatpush1.bf16.msra.mxu0 %v17494_v44  ;;  %v17571_v44 = vld [vmem:[#allocation8 + $0x115c] ss:$48 sps:$4 sm:$0xff]  }
 0x630   :  { %13064 = vmatpush1.bf16.msra.mxu1 %v17497_v49  ;;  %12893 = vmatprep.subr.bf16.mxu0 %v17502_v51  ;;  %v17566_v49 = vld [vmem:[#allocation8 + $0x1150] ss:$48 sps:$4 sm:$0xff]   ;;  %v17569_v51 = vld [vmem:[#allocation8 + $0x1158] ss:$48 sps:$4 sm:$0xff]  }
 0x631   :  { %13065 = vmatprep.subr.bf16.mxu1 %v17505_v62  ;;  %v17574_v62 = vld [vmem:[#allocation8 + $0x11b4] ss:$48 sps:$4 sm:$0xff]  }
 0x633   :  { %12894 = vmatpush1.bf16.msra.mxu0 %v17500_v10  ;;  %v17577_v10 = vld [vmem:[#allocation8 + $0x11bc] ss:$48 sps:$4 sm:$0xff]  }
 0x634   :  { %13066 = vmatpush1.bf16.msra.mxu1 %v17503_v52  ;;  %12895 = vmatprep.subr.bf16.mxu0 %v17508_v58  ;;  %v17572_v52 = vld [vmem:[#allocation8 + $0x11b0] ss:$48 sps:$4 sm:$0xff]   ;;  %v17575_v58 = vld [vmem:[#allocation8 + $0x11b8] ss:$48 sps:$4 sm:$0xff]  }
 0x635   :  { %13067 = vmatprep.subr.bf16.mxu1 %v17511_v55  ;;  %v17580_v55 = vld [vmem:[#allocation8 + $0x1214] ss:$48 sps:$4 sm:$0xff]  }
 0x637   :  { %12896 = vmatpush1.bf16.msra.mxu0 %v17506_v37  ;;  %v17583_v37 = vld [vmem:[#allocation8 + $0x121c] ss:$48 sps:$4 sm:$0xff]  }
 0x638   :  { %13068 = vmatpush1.bf16.msra.mxu1 %v17509_v57  ;;  %12897 = vmatprep.subr.bf16.mxu0 %v17514_v59  ;;  %v17578_v57 = vld [vmem:[#allocation8 + $0x1210] ss:$48 sps:$4 sm:$0xff]   ;;  %v17581_v59 = vld [vmem:[#allocation8 + $0x1218] ss:$48 sps:$4 sm:$0xff]  }
 0x639   :  { %13069 = vmatprep.subr.bf16.mxu1 %v17517_v60  ;;  %v17586_v60 = vld [vmem:[#allocation8 + $0x1274] ss:$48 sps:$4 sm:$0xff]  }
 0x63b   :  { %12898 = vmatpush1.bf16.msra.mxu0 %v17512_v61  ;;  %v17589_v61 = vld [vmem:[#allocation8 + $0x127c] ss:$48 sps:$4 sm:$0xff]  }
 0x63c   :  { %13070 = vmatpush1.bf16.msra.mxu1 %v17515_v8  ;;  %12899 = vmatprep.subr.bf16.mxu0 %v17520_v0  ;;  %v17584_v8 = vld [vmem:[#allocation8 + $0x1270] ss:$48 sps:$4 sm:$0xff]   ;;  %v17587_v0 = vld [vmem:[#allocation8 + $0x1278] ss:$48 sps:$4 sm:$0xff]  }
 0x63d   :  { %13071 = vmatprep.subr.bf16.mxu1 %v17523_v1  ;;  %v17592_v1 = vld [vmem:[#allocation8 + $0x12d4] ss:$48 sps:$4 sm:$0xff]  }
 0x63f   :  { %12900 = vmatpush1.bf16.msra.mxu0 %v17518_v2  ;;  %v17595_v2 = vld [vmem:[#allocation8 + $0x12dc] ss:$48 sps:$4 sm:$0xff]  }
 0x640   :  { %13072 = vmatpush1.bf16.msra.mxu1 %v17521_v4  ;;  %12901 = vmatprep.subr.bf16.mxu0 %v17526_v5  ;;  %v17590_v4 = vld [vmem:[#allocation8 + $0x12d0] ss:$48 sps:$4 sm:$0xff]   ;;  %v17593_v5 = vld [vmem:[#allocation8 + $0x12d8] ss:$48 sps:$4 sm:$0xff]  }
 0x641   :  { %13073 = vmatprep.subr.bf16.mxu1 %v17529_v6  ;;  %v17598_v6 = vld [vmem:[#allocation8 + $0x1334] ss:$48 sps:$4 sm:$0xff]  }
 0x643   :  { %12902 = vmatpush1.bf16.msra.mxu0 %v17524_v46  ;;  %v17601_v46 = vld [vmem:[#allocation8 + $0x133c] ss:$48 sps:$4 sm:$0xff]  }
 0x644   :  { %13074 = vmatpush1.bf16.msra.mxu1 %v17527_v7  ;;  %12903 = vmatprep.subr.bf16.mxu0 %v17532_v9  ;;  %v17596_v7 = vld [vmem:[#allocation8 + $0x1330] ss:$48 sps:$4 sm:$0xff]   ;;  %v17599_v9 = vld [vmem:[#allocation8 + $0x1338] ss:$48 sps:$4 sm:$0xff]  }
 0x645   :  { %13075 = vmatprep.subr.bf16.mxu1 %v17535_v11  ;;  %v17604_v11 = vld [vmem:[#allocation8 + $0x1394] ss:$48 sps:$4 sm:$0xff]  }
 0x647   :  { %12904 = vmatpush1.bf16.msra.mxu0 %v17530_v12  ;;  %v17607_v12 = vld [vmem:[#allocation8 + $0x139c] ss:$48 sps:$4 sm:$0xff]  }
 0x648   :  { %13076 = vmatpush1.bf16.msra.mxu1 %v17533_v15  ;;  %12905 = vmatprep.subr.bf16.mxu0 %v17538_v13  ;;  %v17602_v15 = vld [vmem:[#allocation8 + $0x1390] ss:$48 sps:$4 sm:$0xff]  }
 0x649   :  { %13077 = vmatprep.subr.bf16.mxu1 %v17541_v29  ;;  %v8553_v13 = vld [vmem:[#allocation10] sm:$0xff]  ;;  %v17605_v29 = vld [vmem:[#allocation8 + $0x1398] ss:$48 sps:$4 sm:$0xff]  }
 0x64b   :  { %12906 = vmatpush1.bf16.msra.mxu0 %v17536_v17  ;;  %v17610_v17 = vld [vmem:[#allocation8 + $0x13f4] ss:$48 sps:$4 sm:$0xff]  }
 0x64c   :  { %13078 = vmatpush1.bf16.msra.mxu1 %v17539_v18  ;;  %12907 = vmatprep.subr.bf16.mxu0 %v17544_v53  ;;  %v17613_v18 = vld [vmem:[#allocation8 + $0x13fc] ss:$48 sps:$4 sm:$0xff]   ;;  %v8560_v53 = vrot.slane %v8553_v13, %v18567_v22 }
 0x64d   :  { %13079 = vmatprep.subr.bf16.mxu1 %v17547_v19  ;;  %v8568_v19 = vrot.slane %v8553_v13, %v18570_v27 }
 0x64f   :  { %12908 = vmatpush1.bf16.msra.mxu0 %v17542_v20  ;;  %v8564_v20 = vrot.slane %v8553_v13, %v18573_v28 }
 0x650   :  { %13080 = vmatpush1.bf16.msra.mxu1 %v17545_v21  ;;  %12909 = vmatprep.subr.bf16.mxu0 %v17550_v25  ;;  %v8572_v21 = vrot.slane %v8553_v13, %v18576_v32  ;;  %v17608_v25 = vld [vmem:[#allocation8 + $0x13f0] ss:$48 sps:$4 sm:$0xff]  }
 0x651   :  { %13081 = vmatprep.subr.bf16.mxu1 %v17553_v48  ;;  %v17611_v48 = vld [vmem:[#allocation8 + $0x13f8] ss:$48 sps:$4 sm:$0xff]  }
 0x653   :  { %12910 = vmatpush1.bf16.msra.mxu0 %v17548_v24  ;;  %v17616_v24 = vld [vmem:[#allocation8 + $0x1454] ss:$48 sps:$4 sm:$0xff]  }
 0x654   :  { %13082 = vmatpush1.bf16.msra.mxu1 %v17551_v26  ;;  %12911 = vmatprep.subr.bf16.mxu0 %v17556_v31 }
 0x655   :  { %13083 = vmatprep.subr.bf16.mxu1 %v17559_v33  ;;  %v17619_v33 = vld [vmem:[#allocation8 + $0x145c] ss:$48 sps:$4 sm:$0xff]  }
 0x657   :  { %12912 = vmatpush1.bf16.msra.mxu0 %v17554_v34 }
 0x658   :  { %13084 = vmatpush1.bf16.msra.mxu1 %v17557_v35  ;;  %12913 = vmatprep.subr.bf16.mxu0 %v17562_v39 }
 0x659   :  { %13085 = vmatprep.subr.bf16.mxu1 %v17565_v40 }
 0x65b   :  { %12914 = vmatpush1.bf16.msra.mxu0 %v17560_v3  ;;  %v17614_v3 = vld [vmem:[#allocation8 + $0x1450] ss:$48 sps:$4 sm:$0xff]  }
 0x65c   :  { %13086 = vmatpush1.bf16.msra.mxu1 %v17563_v43  ;;  %12915 = vmatprep.subr.bf16.mxu0 %v17568_v50  ;;  %v17617_v43 = vld [vmem:[#allocation8 + $0x1458] ss:$48 sps:$4 sm:$0xff]  }
 0x65d   :  { %13087 = vmatprep.subr.bf16.mxu1 %v17571_v44 }
 0x65f   :  { %12916 = vmatpush1.bf16.msra.mxu0 %v17566_v49 }
 0x660   :  { %13088 = vmatpush1.bf16.msra.mxu1 %v17569_v51  ;;  %12917 = vmatprep.subr.bf16.mxu0 %v17574_v62  ;;  %v17622_v62 = vld [vmem:[#allocation8 + $0x14b4] ss:$48 sps:$4 sm:$0xff]  }
 0x661   :  { %13089 = vmatprep.subr.bf16.mxu1 %v17577_v10  ;;  %v17625_v10 = vld [vmem:[#allocation8 + $0x14bc] ss:$48 sps:$4 sm:$0xff]  }
 0x663   :  { %12918 = vmatpush1.bf16.msra.mxu0 %v17572_v52 }
 0x664   :  { %13090 = vmatpush1.bf16.msra.mxu1 %v17575_v58  ;;  %12930 = vmatprep.subr.bf16.mxu0 %v17580_v55 }
 0x665   :  { %13102 = vmatprep.subr.bf16.mxu1 %v17583_v37  ;;  %v17620_v37 = vld [vmem:[#allocation8 + $0x14b0] ss:$48 sps:$4 sm:$0xff]  }
 0x666   :  { %12920 = vmatmul.mubr.bf16.vlgmr.msra.gmra.mrb[12].mxu0 %v18664_v36 }
 0x667   :  { %13092 = vmatmul.mubr.bf16.vlgmr.msra.gmra.mrb[12].mxu1 %v18664_v36  ;;  %12931 = vmatpush1.bf16.msra.mxu0 %v17578_v57 }
 0x668   :  { %12962 = vmatprep.mubr.bf16.mxu0 %v18673_v38  ;;  %13103 = vmatpush1.bf16.msra.mxu1 %v17581_v59 }
 0x669   :  { %13134 = vmatprep.mubr.bf16.mxu1 %v18673_v38  ;;  %12932 = vmatprep.subr.bf16.mxu0 %v17586_v60 }
 0x66a   :  { %13104 = vmatprep.subr.bf16.mxu1 %v17589_v61 }
 0x66b   :  { %12933 = vmatpush1.bf16.msra.mxu0 %v17584_v8 }
 0x66c   :  { %13105 = vmatpush1.bf16.msra.mxu1 %v17587_v0  ;;  %12934 = vmatprep.subr.bf16.mxu0 %v17592_v1 }
 0x66d   :  { %13106 = vmatprep.subr.bf16.mxu1 %v17595_v2 }
 0x66f   :  { %12935 = vmatpush1.bf16.msra.mxu0 %v17590_v4 }
 0x670   :  { %13107 = vmatpush1.bf16.msra.mxu1 %v17593_v5  ;;  %12936 = vmatprep.subr.bf16.mxu0 %v17598_v6  ;;  %v17623_v5 = vld [vmem:[#allocation8 + $0x14b8] ss:$48 sps:$4 sm:$0xff]   ;;  %v17628_v6 = vld [vmem:[#allocation8 + $0x1514] ss:$48 sps:$4 sm:$0xff]  }
 0x671   :  { %13108 = vmatprep.subr.bf16.mxu1 %v17601_v46  ;;  %v17631_v46 = vld [vmem:[#allocation8 + $0x151c] ss:$48 sps:$4 sm:$0xff]  }
 0x673   :  { %12937 = vmatpush1.bf16.msra.mxu0 %v17596_v7 }
 0x674   :  { %13109 = vmatpush1.bf16.msra.mxu1 %v17599_v9  ;;  %12938 = vmatprep.subr.bf16.mxu0 %v17604_v11 }
 0x675   :  { %13110 = vmatprep.subr.bf16.mxu1 %v17607_v12 }
 0x677   :  { %12939 = vmatpush1.bf16.msra.mxu0 %v17602_v15 }
 0x678   :  { %13111 = vmatpush1.bf16.msra.mxu1 %v17605_v29  ;;  %12940 = vmatprep.subr.bf16.mxu0 %v17610_v17 }
 0x679   :  { %v12620_v26 = vpop.f32.mrb[8].mxu0  ;;  %v12792_v31 = vpop.f32.mrb[8].mxu1  ;;  %13112 = vmatprep.subr.bf16.mxu1 %v17613_v18 }
 0x67a   :  { %v16679_v34 = vadd.f32 %v12620_v26, %v8560_v53  ;;  %v16683_v35 = vadd.f32 %v12792_v31, %v8568_v19  ;;  %v12622_v39 = vpop.f32.mrb[9].mxu0  ;;  %v12794_v40 = vpop.f32.mrb[9].mxu1  ;;  %v17637_v31 = vld [vmem:[#allocation8 + $0x157c] ss:$48 sps:$4 sm:$0xff]  }
 0x67b   :  { %v16680_v50 = vadd.f32 %v12622_v39, %v8564_v20  ;;  %v16684_v44 = vadd.f32 %v12794_v40, %v8572_v21  ;;  %v12624_v49 = vpop.f32.mrb[10].mxu0  ;;  %v12796_v51 = vpop.f32.mrb[10].mxu1  ;;  %12941 = vmatpush1.bf16.msra.mxu0 %v17608_v25  ;;  %v17629_v25 = vld [vmem:[#allocation8 + $0x1518] ss:$48 sps:$4 sm:$0xff]   ;;  %v17643_v39 = vld [vmem:[#allocation8 + $0x15dc] ss:$48 sps:$4 sm:$0xff]  }
 0x67c   :  { %vm13489_vm0 = vcmp.ge.f32.partialorder %v16679_v34, 0.0  ;;  %v13513_v52 = vmul.f32 0.01, %v16679_v34  ;;  %vm13491_vm1 = vcmp.ge.f32.partialorder %v16683_v35, 0.0  ;;  %v13515_v58 = vmul.f32 0.01, %v16683_v35  ;;  %13113 = vmatpush1.bf16.msra.mxu1 %v17611_v48  ;;  %12942 = vmatprep.subr.bf16.mxu0 %v17616_v24 }
 0x67d   :  { %vm13490_vm2 = vcmp.ge.f32.partialorder %v16680_v50, 0.0  ;;  %v13514_v55 = vmul.f32 0.01, %v16680_v50  ;;  %13114 = vmatprep.subr.bf16.mxu1 %v17619_v33  ;;  %vm13492_vm3 = vcmp.ge.f32.partialorder %v16684_v44, 0.0  ;;  %v13516_v57 = vmul.f32 0.01, %v16684_v44 }
 0x67e   :  { %v16681_v59 = vadd.f32 %v12624_v49, %v8560_v53  ;;  %v16685_v60 = vadd.f32 %v12796_v51, %v8568_v19  ;;  %v12626_v61 = vpop.f32.mrb[11].mxu0  ;;  %v12798_v8 = vpop.f32.mrb[11].mxu1  ;;  %v18702_v0 = vsel %vm13489_vm0, %v16679_v34, %v13513_v52  ;;  %v18704_v1 = vsel %vm13491_vm1, %v16683_v35, %v13515_v58  ;;  %v17626_v19 = vld [vmem:[#allocation8 + $0x1510] ss:$48 sps:$4 sm:$0xff]   ;;  %v17634_v48 = vld [vmem:[#allocation8 + $0x1574] ss:$48 sps:$4 sm:$0xff]  }
 0x67f   :  { %v16682_v2 = vadd.f32 %v12626_v61, %v8564_v20  ;;  %v16686_v4 = vadd.f32 %v12798_v8, %v8572_v21  ;;  %12943 = vmatpush1.bf16.msra.mxu0 %v17614_v3  ;;  %v18711_v29 = vsel %vm13490_vm2, %v16680_v50, %v13514_v55  ;;  %v18714_v17 = vsel %vm13492_vm3, %v16684_v44, %v13516_v57  ;;  %v17632_v33 = vld [vmem:[#allocation8 + $0x1570] ss:$48 sps:$4 sm:$0xff]   ;;  %v17635_v34 = vld [vmem:[#allocation8 + $0x1578] ss:$48 sps:$4 sm:$0xff]   ;;  %v17640_v35 = vld [vmem:[#allocation8 + $0x15d4] ss:$48 sps:$4 sm:$0xff]  }
 0x680   :  { %vm13501_vm4 = vcmp.ge.f32.partialorder %v16681_v59, 0.0  ;;  %v13525_v7 = vmul.f32 0.01, %v16681_v59  ;;  %vm13503_vm5 = vcmp.ge.f32.partialorder %v16685_v60, 0.0  ;;  %v13527_v9 = vmul.f32 0.01, %v16685_v60  ;;  %13115 = vmatpush1.bf16.msra.mxu1 %v17617_v43  ;;  %12944 = vmatprep.subr.bf16.mxu0 %v17622_v62 }
 0x681   :  { %vm13502_vm6 = vcmp.ge.f32.partialorder %v16682_v2, 0.0  ;;  %v13526_v11 = vmul.f32 0.01, %v16682_v2  ;;  %vm13504_vm7 = vcmp.ge.f32.partialorder %v16686_v4, 0.0  ;;  %v13528_v12 = vmul.f32 0.01, %v16686_v4  ;;  %13116 = vmatprep.subr.bf16.mxu1 %v17625_v10 }
 0x682   :  { %v18706_v15 = vsel %vm13501_vm4, %v16681_v59, %v13525_v7  ;;  %v18708_v13 = vsel %vm13503_vm5, %v16685_v60, %v13527_v9  ;;  %v17638_v40 = vld [vmem:[#allocation8 + $0x15d0] ss:$48 sps:$4 sm:$0xff]   ;;  %v17641_v3 = vld [vmem:[#allocation8 + $0x15d8] ss:$48 sps:$4 sm:$0xff]   ;;  %v17646_v43 = vld [vmem:[#allocation8 + $0x1634] ss:$48 sps:$4 sm:$0xff]  }
 0x683   :  { %v13561_v18 = vpack.c.bf16 %v18706_v15, %v18702_v0  ;;  %v13563_v53 = vpack.c.bf16 %v18708_v13, %v18704_v1  ;;  %12945 = vmatpush1.bf16.msra.mxu0 %v17620_v37  ;;  %v18720_v20 = vsel %vm13502_vm6, %v16682_v2, %v13526_v11  ;;  %v18722_v21 = vsel %vm13504_vm7, %v16686_v4, %v13528_v12  ;;  %v17649_v50 = vld [vmem:[#allocation8 + $0x163c] ss:$48 sps:$4 sm:$0xff]   ;;  %v17644_v44 = vld [vmem:[#allocation8 + $0x1630] ss:$48 sps:$4 sm:$0xff]   ;;  %v17647_v49 = vld [vmem:[#allocation8 + $0x1638] ss:$48 sps:$4 sm:$0xff]  }
 0x684   :  { %13117 = vmatpush1.bf16.msra.mxu1 %v17623_v5  ;;  %12946 = vmatprep.subr.bf16.mxu0 %v17628_v6  ;;  %v13562_v24 = vpack.c.bf16 %v18720_v20, %v18711_v29  ;;  %v13564_v26 = vpack.c.bf16 %v18722_v21, %v18714_v17  ;;  %v17652_v51 = vld [vmem:[#allocation8 + $0x1694] ss:$48 sps:$4 sm:$0xff]   ;;  %v17655_v62 = vld [vmem:[#allocation8 + $0x169c] ss:$48 sps:$4 sm:$0xff]   ;;  %v17650_v10 = vld [vmem:[#allocation8 + $0x1690] ss:$48 sps:$4 sm:$0xff]  }
 0x685   :  { %13118 = vmatprep.subr.bf16.mxu1 %v17631_v46  ;;  %v17653_v52 = vld [vmem:[#allocation8 + $0x1698] ss:$48 sps:$4 sm:$0xff]   ;;  %v17658_v58 = vld [vmem:[#allocation8 + $0x16f4] ss:$48 sps:$4 sm:$0xff]   ;;  %v17661_v55 = vld [vmem:[#allocation8 + $0x16fc] ss:$48 sps:$4 sm:$0xff]  }
 0x686   :  { %v17656_v37 = vld [vmem:[#allocation8 + $0x16f0] ss:$48 sps:$4 sm:$0xff]   ;;  %v17659_v57 = vld [vmem:[#allocation8 + $0x16f8] ss:$48 sps:$4 sm:$0xff]   ;;  %v17664_v59 = vld [vmem:[#allocation8 + $0x1754] ss:$48 sps:$4 sm:$0xff]  }
 0x687   :  { %12947 = vmatpush1.bf16.msra.mxu0 %v17626_v19  ;;  %v17667_v60 = vld [vmem:[#allocation8 + $0x175c] ss:$48 sps:$4 sm:$0xff]   ;;  %v17662_v61 = vld [vmem:[#allocation8 + $0x1750] ss:$48 sps:$4 sm:$0xff]   ;;  %v17665_v8 = vld [vmem:[#allocation8 + $0x1758] ss:$48 sps:$4 sm:$0xff]  }
 0x688   :  { %13119 = vmatpush1.bf16.msra.mxu1 %v17629_v25  ;;  %12948 = vmatprep.subr.bf16.mxu0 %v17634_v48  ;;  %v17670_v2 = vld [vmem:[#allocation8 + $0x17b4] ss:$48 sps:$4 sm:$0xff]   ;;  %v17673_v4 = vld [vmem:[#allocation8 + $0x17bc] ss:$48 sps:$4 sm:$0xff]   ;;  %v17668_v5 = vld [vmem:[#allocation8 + $0x17b0] ss:$48 sps:$4 sm:$0xff]  }
 0x689   :  { %13120 = vmatprep.subr.bf16.mxu1 %v17637_v31  ;;  %v17671_v6 = vld [vmem:[#allocation8 + $0x17b8] ss:$48 sps:$4 sm:$0xff]   ;;  %v17676_v46 = vld [vmem:[#allocation8 + $0x24] ss:$48 sps:$4 sm:$0xff]   ;;  %v17679_v7 = vld [vmem:[#allocation8 + $0x2c] ss:$48 sps:$4 sm:$0xff]  }
 0x68a   :  { %v17674_v9 = vld [vmem:[#allocation8 + $0x20] ss:$48 sps:$4 sm:$0xff]   ;;  %v17677_v11 = vld [vmem:[#allocation8 + $0x28] ss:$48 sps:$4 sm:$0xff]   ;;  %v17682_v12 = vld [vmem:[#allocation8 + $0x84] ss:$48 sps:$4 sm:$0xff]  }
 0x68b   :  { %12949 = vmatpush1.bf16.msra.mxu0 %v17632_v33  ;;  %v17685_v19 = vld [vmem:[#allocation8 + $0x8c] ss:$48 sps:$4 sm:$0xff]   ;;  %v17680_v25 = vld [vmem:[#allocation8 + $0x80] ss:$48 sps:$4 sm:$0xff]   ;;  %v17683_v48 = vld [vmem:[#allocation8 + $0x88] ss:$48 sps:$4 sm:$0xff]  }
 0x68c   :  { %13121 = vmatpush1.bf16.msra.mxu1 %v17635_v34  ;;  %12950 = vmatprep.subr.bf16.mxu0 %v17640_v35  ;;  %v17688_v31 = vld [vmem:[#allocation8 + $0xe4] ss:$48 sps:$4 sm:$0xff]   ;;  %v17691_v33 = vld [vmem:[#allocation8 + $0xec] ss:$48 sps:$4 sm:$0xff]   ;;  %v17686_v34 = vld [vmem:[#allocation8 + $0xe0] ss:$48 sps:$4 sm:$0xff]  }
 0x68d   :  { %13122 = vmatprep.subr.bf16.mxu1 %v17643_v39  ;;  %v17689_v35 = vld [vmem:[#allocation8 + $0xe8] ss:$48 sps:$4 sm:$0xff]   ;;  %v17694_v39 = vld [vmem:[#allocation8 + $0x144] ss:$48 sps:$4 sm:$0xff]   ;;  %v18075_v17 = vld [vmem:[#allocation11 + $0xe0] sm:$0xff]  }
 0x68e   :  { %v18072_v29 = vld [vmem:[#allocation11 + $0x18] sm:$0xff]   ;;  %v18076_v21 = vld [vmem:[#allocation11 + $0x20] sm:$0xff]   ;;  %v18099_v0 = vld [vmem:[#allocation11 + $0x1d0] sm:$0xff]  }
 0x68f   :  { %12951 = vmatpush1.bf16.msra.mxu0 %v17638_v40  ;;  %v17697_v40 = vld [vmem:[#allocation8 + $0x14c] ss:$48 sps:$4 sm:$0xff]   ;;  %v18073_v20 = vld [vmem:[#allocation11 + $0x98] sm:$0xff]  }
 0x690   :  { %13123 = vmatpush1.bf16.msra.mxu1 %v17641_v3  ;;  %12952 = vmatprep.subr.bf16.mxu0 %v17646_v43  ;;  %v17692_v3 = vld [vmem:[#allocation8 + $0x140] ss:$48 sps:$4 sm:$0xff]   ;;  %v17695_v43 = vld [vmem:[#allocation8 + $0x148] ss:$48 sps:$4 sm:$0xff]  }
 0x691   :  { %13124 = vmatprep.subr.bf16.mxu1 %v17649_v50  ;;  %v17700_v50 = vld [vmem:[#allocation8 + $0x1a4] ss:$48 sps:$4 sm:$0xff]   ;;  %v18100_v15 = vld [vmem:[#allocation11 + $0x110] sm:$0xff]  }
 0x692   :  { %v18101_v1 = vld [vmem:[#allocation11 + $0x190] sm:$0xff]   ;;  %v18102_v13 = vld [vmem:[#allocation11 + $0x158] sm:$0xff]  }
 0x693   :  { %12953 = vmatpush1.bf16.msra.mxu0 %v17644_v44  ;;  %v17703_v44 = vld [vmem:[#allocation8 + $0x1ac] ss:$48 sps:$4 sm:$0xff]  }
 0x694   :  { %13125 = vmatpush1.bf16.msra.mxu1 %v17647_v49  ;;  %12954 = vmatprep.subr.bf16.mxu0 %v17652_v51  ;;  %v17701_v49 = vld [vmem:[#allocation8 + $0x1a8] ss:$48 sps:$4 sm:$0xff]   ;;  %v17706_v51 = vld [vmem:[#allocation8 + $0x204] ss:$48 sps:$4 sm:$0xff]  }
 0x695   :  { %13126 = vmatprep.subr.bf16.mxu1 %v17655_v62  ;;  %v17709_v62 = vld [vmem:[#allocation8 + $0x20c] ss:$48 sps:$4 sm:$0xff]  }
 0x697   :  { %12955 = vmatpush1.bf16.msra.mxu0 %v17650_v10  ;;  %v17704_v10 = vld [vmem:[#allocation8 + $0x200] ss:$48 sps:$4 sm:$0xff]  }
 0x698   :  { %13127 = vmatpush1.bf16.msra.mxu1 %v17653_v52  ;;  %12956 = vmatprep.subr.bf16.mxu0 %v17658_v58  ;;  %v17707_v52 = vld [vmem:[#allocation8 + $0x208] ss:$48 sps:$4 sm:$0xff]   ;;  %v17712_v58 = vld [vmem:[#allocation8 + $0x264] ss:$48 sps:$4 sm:$0xff]  }
 0x699   :  { %13128 = vmatprep.subr.bf16.mxu1 %v17661_v55  ;;  %v17715_v55 = vld [vmem:[#allocation8 + $0x26c] ss:$48 sps:$4 sm:$0xff]  }
 0x69b   :  { %12957 = vmatpush1.bf16.msra.mxu0 %v17656_v37  ;;  %v17710_v37 = vld [vmem:[#allocation8 + $0x260] ss:$48 sps:$4 sm:$0xff]  }
 0x69c   :  { %13129 = vmatpush1.bf16.msra.mxu1 %v17659_v57  ;;  %12958 = vmatprep.subr.bf16.mxu0 %v17664_v59  ;;  %v17713_v57 = vld [vmem:[#allocation8 + $0x268] ss:$48 sps:$4 sm:$0xff]   ;;  %v17718_v59 = vld [vmem:[#allocation8 + $0x2c4] ss:$48 sps:$4 sm:$0xff]  }
 0x69d   :  { %13130 = vmatprep.subr.bf16.mxu1 %v17667_v60  ;;  %v17721_v60 = vld [vmem:[#allocation8 + $0x2cc] ss:$48 sps:$4 sm:$0xff]  }
 0x69f   :  { %12959 = vmatpush1.bf16.msra.mxu0 %v17662_v61  ;;  %v17716_v61 = vld [vmem:[#allocation8 + $0x2c0] ss:$48 sps:$4 sm:$0xff]  }
 0x6a0   :  { %13131 = vmatpush1.bf16.msra.mxu1 %v17665_v8  ;;  %12960 = vmatprep.subr.bf16.mxu0 %v17670_v2  ;;  %v17719_v8 = vld [vmem:[#allocation8 + $0x2c8] ss:$48 sps:$4 sm:$0xff]   ;;  %v17724_v2 = vld [vmem:[#allocation8 + $0x324] ss:$48 sps:$4 sm:$0xff]  }
 0x6a1   :  { %13132 = vmatprep.subr.bf16.mxu1 %v17673_v4  ;;  %v17727_v4 = vld [vmem:[#allocation8 + $0x32c] ss:$48 sps:$4 sm:$0xff]  }
 0x6a3   :  { %12961 = vmatpush1.bf16.msra.mxu0 %v17668_v5  ;;  %v17722_v5 = vld [vmem:[#allocation8 + $0x320] ss:$48 sps:$4 sm:$0xff]  }
 0x6a4   :  { %13133 = vmatpush1.bf16.msra.mxu1 %v17671_v6  ;;  %13145 = vmatprep.subr.bf16.mxu0 %v17676_v46  ;;  %v17725_v6 = vld [vmem:[#allocation8 + $0x328] ss:$48 sps:$4 sm:$0xff]   ;;  %v17730_v46 = vld [vmem:[#allocation8 + $0x384] ss:$48 sps:$4 sm:$0xff]  }
 0x6a5   :  { %13317 = vmatprep.subr.bf16.mxu1 %v17679_v7  ;;  %v17733_v7 = vld [vmem:[#allocation8 + $0x38c] ss:$48 sps:$4 sm:$0xff]  }
 0x6a6   :  { %12963 = vmatmul.mubr.bf16.vlgmr.msra.gmra.mrb[12].mxu0 %v18668_v16 }
 0x6a7   :  { %13135 = vmatmul.mubr.bf16.vlgmr.msra.gmra.mrb[12].mxu1 %v18668_v16  ;;  %13146 = vmatpush1.bf16.msra.mxu0 %v17674_v9  ;;  %v17728_v9 = vld [vmem:[#allocation8 + $0x380] ss:$48 sps:$4 sm:$0xff]  }
 0x6a8   :  { %13177 = vmatprep.mubr.bf16.mxu0 %v18622_v56  ;;  %13318 = vmatpush1.bf16.msra.mxu1 %v17677_v11  ;;  %v17731_v11 = vld [vmem:[#allocation8 + $0x388] ss:$48 sps:$4 sm:$0xff]  }
 0x6a9   :  { %13349 = vmatprep.mubr.bf16.mxu1 %v18622_v56  ;;  %13147 = vmatprep.subr.bf16.mxu0 %v17682_v12  ;;  %v17698_v56 = vld [vmem:[#allocation8 + $0x1a0] ss:$48 sps:$4 sm:$0xff]   ;;  %v17736_v12 = vld [vmem:[#allocation8 + $0x3e4] ss:$48 sps:$4 sm:$0xff]  }
 0x6aa   :  { %13319 = vmatprep.subr.bf16.mxu1 %v17685_v19  ;;  %v17739_v19 = vld [vmem:[#allocation8 + $0x3ec] ss:$48 sps:$4 sm:$0xff]  }
 0x6ab   :  { %13148 = vmatpush1.bf16.msra.mxu0 %v17680_v25  ;;  %v17734_v25 = vld [vmem:[#allocation8 + $0x3e0] ss:$48 sps:$4 sm:$0xff]  }
 0x6ac   :  { %13320 = vmatpush1.bf16.msra.mxu1 %v17683_v48  ;;  %13149 = vmatprep.subr.bf16.mxu0 %v17688_v31  ;;  %v17737_v48 = vld [vmem:[#allocation8 + $0x3e8] ss:$48 sps:$4 sm:$0xff]   ;;  %v17742_v31 = vld [vmem:[#allocation8 + $0x444] ss:$48 sps:$4 sm:$0xff]  }
 0x6ad   :  { %13321 = vmatprep.subr.bf16.mxu1 %v17691_v33  ;;  %v17745_v33 = vld [vmem:[#allocation8 + $0x44c] ss:$48 sps:$4 sm:$0xff]  }
 0x6af   :  { %13150 = vmatpush1.bf16.msra.mxu0 %v17686_v34  ;;  %v17740_v34 = vld [vmem:[#allocation8 + $0x440] ss:$48 sps:$4 sm:$0xff]  }
 0x6b0   :  { %13322 = vmatpush1.bf16.msra.mxu1 %v17689_v35  ;;  %13151 = vmatprep.subr.bf16.mxu0 %v17694_v39  ;;  %v17743_v35 = vld [vmem:[#allocation8 + $0x448] ss:$48 sps:$4 sm:$0xff]   ;;  %v17748_v39 = vld [vmem:[#allocation8 + $0x4a4] ss:$48 sps:$4 sm:$0xff]  }
 0x6b1   :  { %13323 = vmatprep.subr.bf16.mxu1 %v17697_v40  ;;  %v17751_v40 = vld [vmem:[#allocation8 + $0x4ac] ss:$48 sps:$4 sm:$0xff]  }
 0x6b3   :  { %13152 = vmatpush1.bf16.msra.mxu0 %v17692_v3  ;;  %v17746_v3 = vld [vmem:[#allocation8 + $0x4a0] ss:$48 sps:$4 sm:$0xff]  }
 0x6b4   :  { %13324 = vmatpush1.bf16.msra.mxu1 %v17695_v43  ;;  %13153 = vmatprep.subr.bf16.mxu0 %v17700_v50  ;;  %v17749_v43 = vld [vmem:[#allocation8 + $0x4a8] ss:$48 sps:$4 sm:$0xff]   ;;  %v17754_v50 = vld [vmem:[#allocation8 + $0x504] ss:$48 sps:$4 sm:$0xff]  }
 0x6b5   :  { %13325 = vmatprep.subr.bf16.mxu1 %v17703_v44  ;;  %v17757_v44 = vld [vmem:[#allocation8 + $0x50c] ss:$48 sps:$4 sm:$0xff]  }
 0x6b7   :  { %13154 = vmatpush1.bf16.msra.mxu0 %v17698_v56  ;;  %v17752_v56 = vld [vmem:[#allocation8 + $0x500] ss:$48 sps:$4 sm:$0xff]  }
 0x6b8   :  { %13326 = vmatpush1.bf16.msra.mxu1 %v17701_v49  ;;  %13155 = vmatprep.subr.bf16.mxu0 %v17706_v51  ;;  %v17755_v49 = vld [vmem:[#allocation8 + $0x508] ss:$48 sps:$4 sm:$0xff]   ;;  %v17760_v51 = vld [vmem:[#allocation8 + $0x564] ss:$48 sps:$4 sm:$0xff]  }
 0x6b9   :  { %13327 = vmatprep.subr.bf16.mxu1 %v17709_v62  ;;  %v17763_v62 = vld [vmem:[#allocation8 + $0x56c] ss:$48 sps:$4 sm:$0xff]  }
 0x6bb   :  { %13156 = vmatpush1.bf16.msra.mxu0 %v17704_v10  ;;  %v17758_v10 = vld [vmem:[#allocation8 + $0x560] ss:$48 sps:$4 sm:$0xff]  }
 0x6bc   :  { %13328 = vmatpush1.bf16.msra.mxu1 %v17707_v52  ;;  %13157 = vmatprep.subr.bf16.mxu0 %v17712_v58  ;;  %v17761_v52 = vld [vmem:[#allocation8 + $0x568] ss:$48 sps:$4 sm:$0xff]   ;;  %v17766_v58 = vld [vmem:[#allocation8 + $0x5c4] ss:$48 sps:$4 sm:$0xff]  }
 0x6bd   :  { %13329 = vmatprep.subr.bf16.mxu1 %v17715_v55  ;;  %v17769_v55 = vld [vmem:[#allocation8 + $0x5cc] ss:$48 sps:$4 sm:$0xff]  }
 0x6bf   :  { %13158 = vmatpush1.bf16.msra.mxu0 %v17710_v37  ;;  %v17764_v37 = vld [vmem:[#allocation8 + $0x5c0] ss:$48 sps:$4 sm:$0xff]  }
 0x6c0   :  { %13330 = vmatpush1.bf16.msra.mxu1 %v17713_v57  ;;  %13159 = vmatprep.subr.bf16.mxu0 %v17718_v59  ;;  %v17767_v57 = vld [vmem:[#allocation8 + $0x5c8] ss:$48 sps:$4 sm:$0xff]   ;;  %v17772_v59 = vld [vmem:[#allocation8 + $0x624] ss:$48 sps:$4 sm:$0xff]  }
 0x6c1   :  { %13331 = vmatprep.subr.bf16.mxu1 %v17721_v60  ;;  %v17775_v60 = vld [vmem:[#allocation8 + $0x62c] ss:$48 sps:$4 sm:$0xff]  }
 0x6c3   :  { %13160 = vmatpush1.bf16.msra.mxu0 %v17716_v61  ;;  %v17770_v61 = vld [vmem:[#allocation8 + $0x620] ss:$48 sps:$4 sm:$0xff]  }
 0x6c4   :  { %13332 = vmatpush1.bf16.msra.mxu1 %v17719_v8  ;;  %13161 = vmatprep.subr.bf16.mxu0 %v17724_v2  ;;  %v17773_v8 = vld [vmem:[#allocation8 + $0x628] ss:$48 sps:$4 sm:$0xff]   ;;  %v17778_v2 = vld [vmem:[#allocation8 + $0x684] ss:$48 sps:$4 sm:$0xff]  }
 0x6c5   :  { %13333 = vmatprep.subr.bf16.mxu1 %v17727_v4  ;;  %v17781_v4 = vld [vmem:[#allocation8 + $0x68c] ss:$48 sps:$4 sm:$0xff]  }
 0x6c7   :  { %13162 = vmatpush1.bf16.msra.mxu0 %v17722_v5  ;;  %v17776_v5 = vld [vmem:[#allocation8 + $0x680] ss:$48 sps:$4 sm:$0xff]  }
 0x6c8   :  { %13334 = vmatpush1.bf16.msra.mxu1 %v17725_v6  ;;  %13163 = vmatprep.subr.bf16.mxu0 %v17730_v46  ;;  %v17779_v6 = vld [vmem:[#allocation8 + $0x688] ss:$48 sps:$4 sm:$0xff]   ;;  %v17784_v46 = vld [vmem:[#allocation8 + $0x6e4] ss:$48 sps:$4 sm:$0xff]  }
 0x6c9   :  { %13335 = vmatprep.subr.bf16.mxu1 %v17733_v7  ;;  %v17787_v7 = vld [vmem:[#allocation8 + $0x6ec] ss:$48 sps:$4 sm:$0xff]  }
 0x6cb   :  { %13164 = vmatpush1.bf16.msra.mxu0 %v17728_v9  ;;  %v17782_v9 = vld [vmem:[#allocation8 + $0x6e0] ss:$48 sps:$4 sm:$0xff]  }
 0x6cc   :  { %13336 = vmatpush1.bf16.msra.mxu1 %v17731_v11  ;;  %13165 = vmatprep.subr.bf16.mxu0 %v17736_v12  ;;  %v17785_v11 = vld [vmem:[#allocation8 + $0x6e8] ss:$48 sps:$4 sm:$0xff]   ;;  %v17790_v12 = vld [vmem:[#allocation8 + $0x744] ss:$48 sps:$4 sm:$0xff]  }
 0x6cd   :  { %13337 = vmatprep.subr.bf16.mxu1 %v17739_v19  ;;  %v17788_v19 = vld [vmem:[#allocation8 + $0x740] ss:$48 sps:$4 sm:$0xff]  }
 0x6cf   :  { %13166 = vmatpush1.bf16.msra.mxu0 %v17734_v25  ;;  %v17791_v25 = vld [vmem:[#allocation8 + $0x748] ss:$48 sps:$4 sm:$0xff]  }
 0x6d0   :  { %13338 = vmatpush1.bf16.msra.mxu1 %v17737_v48  ;;  %13167 = vmatprep.subr.bf16.mxu0 %v17742_v31  ;;  %v17796_v48 = vld [vmem:[#allocation8 + $0x7a4] ss:$48 sps:$4 sm:$0xff]   ;;  %v17799_v31 = vld [vmem:[#allocation8 + $0x7ac] ss:$48 sps:$4 sm:$0xff]  }
 0x6d1   :  { %13339 = vmatprep.subr.bf16.mxu1 %v17745_v33  ;;  %v17797_v33 = vld [vmem:[#allocation8 + $0x7a8] ss:$48 sps:$4 sm:$0xff]  }
 0x6d3   :  { %13168 = vmatpush1.bf16.msra.mxu0 %v17740_v34  ;;  %v17802_v34 = vld [vmem:[#allocation8 + $0x804] ss:$48 sps:$4 sm:$0xff]  }
 0x6d4   :  { %13340 = vmatpush1.bf16.msra.mxu1 %v17743_v35  ;;  %13169 = vmatprep.subr.bf16.mxu0 %v17748_v39  ;;  %v17805_v35 = vld [vmem:[#allocation8 + $0x80c] ss:$48 sps:$4 sm:$0xff]   ;;  %v17800_v39 = vld [vmem:[#allocation8 + $0x800] ss:$48 sps:$4 sm:$0xff]  }
 0x6d5   :  { %13341 = vmatprep.subr.bf16.mxu1 %v17751_v40  ;;  %v17803_v40 = vld [vmem:[#allocation8 + $0x808] ss:$48 sps:$4 sm:$0xff]  }
 0x6d7   :  { %13170 = vmatpush1.bf16.msra.mxu0 %v17746_v3  ;;  %v17808_v3 = vld [vmem:[#allocation8 + $0x864] ss:$48 sps:$4 sm:$0xff]  }
 0x6d8   :  { %13342 = vmatpush1.bf16.msra.mxu1 %v17749_v43  ;;  %13171 = vmatprep.subr.bf16.mxu0 %v17754_v50  ;;  %v17811_v43 = vld [vmem:[#allocation8 + $0x86c] ss:$48 sps:$4 sm:$0xff]   ;;  %v17806_v50 = vld [vmem:[#allocation8 + $0x860] ss:$48 sps:$4 sm:$0xff]  }
 0x6d9   :  { %13343 = vmatprep.subr.bf16.mxu1 %v17757_v44  ;;  %v17809_v44 = vld [vmem:[#allocation8 + $0x868] ss:$48 sps:$4 sm:$0xff]  }
 0x6db   :  { %13172 = vmatpush1.bf16.msra.mxu0 %v17752_v56  ;;  %v17814_v56 = vld [vmem:[#allocation8 + $0x8c4] ss:$48 sps:$4 sm:$0xff]  }
 0x6dc   :  { %13344 = vmatpush1.bf16.msra.mxu1 %v17755_v49  ;;  %13173 = vmatprep.subr.bf16.mxu0 %v17760_v51  ;;  %v17817_v49 = vld [vmem:[#allocation8 + $0x8cc] ss:$48 sps:$4 sm:$0xff]   ;;  %v17812_v51 = vld [vmem:[#allocation8 + $0x8c0] ss:$48 sps:$4 sm:$0xff]  }
 0x6dd   :  { %13345 = vmatprep.subr.bf16.mxu1 %v17763_v62  ;;  %v17815_v62 = vld [vmem:[#allocation8 + $0x8c8] ss:$48 sps:$4 sm:$0xff]  }
 0x6df   :  { %13174 = vmatpush1.bf16.msra.mxu0 %v17758_v10  ;;  %v17820_v10 = vld [vmem:[#allocation8 + $0x924] ss:$48 sps:$4 sm:$0xff]  }
 0x6e0   :  { %13346 = vmatpush1.bf16.msra.mxu1 %v17761_v52  ;;  %13175 = vmatprep.subr.bf16.mxu0 %v17766_v58  ;;  %v17823_v52 = vld [vmem:[#allocation8 + $0x92c] ss:$48 sps:$4 sm:$0xff]   ;;  %v17818_v58 = vld [vmem:[#allocation8 + $0x920] ss:$48 sps:$4 sm:$0xff]  }
 0x6e1   :  { %13347 = vmatprep.subr.bf16.mxu1 %v17769_v55  ;;  %v17821_v55 = vld [vmem:[#allocation8 + $0x928] ss:$48 sps:$4 sm:$0xff]  }
 0x6e3   :  { %13176 = vmatpush1.bf16.msra.mxu0 %v17764_v37  ;;  %v17826_v37 = vld [vmem:[#allocation8 + $0x984] ss:$48 sps:$4 sm:$0xff]  }
 0x6e4   :  { %13348 = vmatpush1.bf16.msra.mxu1 %v17767_v57  ;;  %13188 = vmatprep.subr.bf16.mxu0 %v17772_v59  ;;  %v17829_v57 = vld [vmem:[#allocation8 + $0x98c] ss:$48 sps:$4 sm:$0xff]   ;;  %v17824_v59 = vld [vmem:[#allocation8 + $0x980] ss:$48 sps:$4 sm:$0xff]  }
 0x6e5   :  { %13360 = vmatprep.subr.bf16.mxu1 %v17775_v60  ;;  %v17827_v60 = vld [vmem:[#allocation8 + $0x988] ss:$48 sps:$4 sm:$0xff]  }
 0x6e6   :  { %13178 = vmatmul.mubr.bf16.vlgmr.msra.gmra.mrb[16].mxu0 %v18615_v45 }
 0x6e7   :  { %13350 = vmatmul.mubr.bf16.vlgmr.msra.gmra.mrb[16].mxu1 %v18615_v45  ;;  %13189 = vmatpush1.bf16.msra.mxu0 %v17770_v61  ;;  %v17793_v45 = vld [vmem:[#allocation8 + $0x74c] ss:$48 sps:$4 sm:$0xff]   ;;  %v17832_v61 = vld [vmem:[#allocation8 + $0x9e4] ss:$48 sps:$4 sm:$0xff]  }
 0x6e8   :  { %13220 = vmatprep.mubr.bf16.mxu0 %v18624_v63  ;;  %13361 = vmatpush1.bf16.msra.mxu1 %v17773_v8  ;;  %v17835_v8 = vld [vmem:[#allocation8 + $0x9ec] ss:$48 sps:$4 sm:$0xff]  }
 0x6e9   :  { %13392 = vmatprep.mubr.bf16.mxu1 %v18624_v63  ;;  %13190 = vmatprep.subr.bf16.mxu0 %v17778_v2  ;;  %v17794_v63 = vld [vmem:[#allocation8 + $0x7a0] ss:$48 sps:$4 sm:$0xff]  }
 0x6ea   :  { %13362 = vmatprep.subr.bf16.mxu1 %v17781_v4  ;;  %v17830_v2 = vld [vmem:[#allocation8 + $0x9e0] ss:$48 sps:$4 sm:$0xff]   ;;  %v17833_v4 = vld [vmem:[#allocation8 + $0x9e8] ss:$48 sps:$4 sm:$0xff]  }
 0x6eb   :  { %13191 = vmatpush1.bf16.msra.mxu0 %v17776_v5  ;;  %v17838_v5 = vld [vmem:[#allocation8 + $0xa44] ss:$48 sps:$4 sm:$0xff]  }
 0x6ec   :  { %13363 = vmatpush1.bf16.msra.mxu1 %v17779_v6  ;;  %13192 = vmatprep.subr.bf16.mxu0 %v17784_v46  ;;  %v17841_v6 = vld [vmem:[#allocation8 + $0xa4c] ss:$48 sps:$4 sm:$0xff]   ;;  %v17836_v46 = vld [vmem:[#allocation8 + $0xa40] ss:$48 sps:$4 sm:$0xff]  }
 0x6ed   :  { %13364 = vmatprep.subr.bf16.mxu1 %v17787_v7  ;;  %v17839_v7 = vld [vmem:[#allocation8 + $0xa48] ss:$48 sps:$4 sm:$0xff]  }
 0x6ef   :  { %13193 = vmatpush1.bf16.msra.mxu0 %v17782_v9  ;;  %v17844_v9 = vld [vmem:[#allocation8 + $0xaa4] ss:$48 sps:$4 sm:$0xff]  }
 0x6f0   :  { %13365 = vmatpush1.bf16.msra.mxu1 %v17785_v11  ;;  %13194 = vmatprep.subr.bf16.mxu0 %v17790_v12  ;;  %v17847_v11 = vld [vmem:[#allocation8 + $0xaac] ss:$48 sps:$4 sm:$0xff]   ;;  %v17842_v12 = vld [vmem:[#allocation8 + $0xaa0] ss:$48 sps:$4 sm:$0xff]  }
 0x6f1   :  { %13366 = vmatprep.subr.bf16.mxu1 %v17793_v45  ;;  %v17845_v45 = vld [vmem:[#allocation8 + $0xaa8] ss:$48 sps:$4 sm:$0xff]  }
 0x6f3   :  { %13195 = vmatpush1.bf16.msra.mxu0 %v17788_v19  ;;  %v17850_v19 = vld [vmem:[#allocation8 + $0xb04] ss:$48 sps:$4 sm:$0xff]  }
 0x6f4   :  { %13367 = vmatpush1.bf16.msra.mxu1 %v17791_v25  ;;  %13196 = vmatprep.subr.bf16.mxu0 %v17796_v48  ;;  %v17853_v25 = vld [vmem:[#allocation8 + $0xb0c] ss:$48 sps:$4 sm:$0xff]   ;;  %v17848_v48 = vld [vmem:[#allocation8 + $0xb00] ss:$48 sps:$4 sm:$0xff]  }
 0x6f5   :  { %13368 = vmatprep.subr.bf16.mxu1 %v17799_v31  ;;  %v17851_v31 = vld [vmem:[#allocation8 + $0xb08] ss:$48 sps:$4 sm:$0xff]  }
 0x6f7   :  { %13197 = vmatpush1.bf16.msra.mxu0 %v17794_v63  ;;  %v17856_v63 = vld [vmem:[#allocation8 + $0xb64] ss:$48 sps:$4 sm:$0xff]  }
 0x6f8   :  { %13369 = vmatpush1.bf16.msra.mxu1 %v17797_v33  ;;  %13198 = vmatprep.subr.bf16.mxu0 %v17802_v34  ;;  %v17859_v33 = vld [vmem:[#allocation8 + $0xb6c] ss:$48 sps:$4 sm:$0xff]   ;;  %v17854_v34 = vld [vmem:[#allocation8 + $0xb60] ss:$48 sps:$4 sm:$0xff]  }
 0x6f9   :  { %13370 = vmatprep.subr.bf16.mxu1 %v17805_v35  ;;  %v17857_v35 = vld [vmem:[#allocation8 + $0xb68] ss:$48 sps:$4 sm:$0xff]  }
 0x6fb   :  { %13199 = vmatpush1.bf16.msra.mxu0 %v17800_v39  ;;  %v17862_v39 = vld [vmem:[#allocation8 + $0xbc4] ss:$48 sps:$4 sm:$0xff]  }
 0x6fc   :  { %13371 = vmatpush1.bf16.msra.mxu1 %v17803_v40  ;;  %13200 = vmatprep.subr.bf16.mxu0 %v17808_v3  ;;  %v17865_v40 = vld [vmem:[#allocation8 + $0xbcc] ss:$48 sps:$4 sm:$0xff]   ;;  %v17860_v3 = vld [vmem:[#allocation8 + $0xbc0] ss:$48 sps:$4 sm:$0xff]  }
 0x6fd   :  { %13372 = vmatprep.subr.bf16.mxu1 %v17811_v43  ;;  %v17863_v43 = vld [vmem:[#allocation8 + $0xbc8] ss:$48 sps:$4 sm:$0xff]  }
 0x6ff   :  { %13201 = vmatpush1.bf16.msra.mxu0 %v17806_v50  ;;  %v17868_v50 = vld [vmem:[#allocation8 + $0xc24] ss:$48 sps:$4 sm:$0xff]  }
 0x700   :  { %13373 = vmatpush1.bf16.msra.mxu1 %v17809_v44  ;;  %13202 = vmatprep.subr.bf16.mxu0 %v17814_v56  ;;  %v17871_v44 = vld [vmem:[#allocation8 + $0xc2c] ss:$48 sps:$4 sm:$0xff]   ;;  %v17866_v56 = vld [vmem:[#allocation8 + $0xc20] ss:$48 sps:$4 sm:$0xff]  }
 0x701   :  { %13374 = vmatprep.subr.bf16.mxu1 %v17817_v49  ;;  %v17869_v49 = vld [vmem:[#allocation8 + $0xc28] ss:$48 sps:$4 sm:$0xff]  }
 0x703   :  { %13203 = vmatpush1.bf16.msra.mxu0 %v17812_v51  ;;  %v17874_v51 = vld [vmem:[#allocation8 + $0xc84] ss:$48 sps:$4 sm:$0xff]  }
 0x704   :  { %13375 = vmatpush1.bf16.msra.mxu1 %v17815_v62  ;;  %13204 = vmatprep.subr.bf16.mxu0 %v17820_v10  ;;  %v17877_v62 = vld [vmem:[#allocation8 + $0xc8c] ss:$48 sps:$4 sm:$0xff]   ;;  %v17872_v10 = vld [vmem:[#allocation8 + $0xc80] ss:$48 sps:$4 sm:$0xff]  }
 0x705   :  { %13376 = vmatprep.subr.bf16.mxu1 %v17823_v52  ;;  %v17875_v52 = vld [vmem:[#allocation8 + $0xc88] ss:$48 sps:$4 sm:$0xff]  }
 0x707   :  { %13205 = vmatpush1.bf16.msra.mxu0 %v17818_v58  ;;  %v17880_v58 = vld [vmem:[#allocation8 + $0xce4] ss:$48 sps:$4 sm:$0xff]  }
 0x708   :  { %13377 = vmatpush1.bf16.msra.mxu1 %v17821_v55  ;;  %13206 = vmatprep.subr.bf16.mxu0 %v17826_v37  ;;  %v17883_v55 = vld [vmem:[#allocation8 + $0xcec] ss:$48 sps:$4 sm:$0xff]   ;;  %v17878_v37 = vld [vmem:[#allocation8 + $0xce0] ss:$48 sps:$4 sm:$0xff]  }
 0x709   :  { %13378 = vmatprep.subr.bf16.mxu1 %v17829_v57  ;;  %v17881_v57 = vld [vmem:[#allocation8 + $0xce8] ss:$48 sps:$4 sm:$0xff]  }
 0x70b   :  { %13207 = vmatpush1.bf16.msra.mxu0 %v17824_v59  ;;  %v17886_v59 = vld [vmem:[#allocation8 + $0xd44] ss:$48 sps:$4 sm:$0xff]  }
 0x70c   :  { %13379 = vmatpush1.bf16.msra.mxu1 %v17827_v60  ;;  %13208 = vmatprep.subr.bf16.mxu0 %v17832_v61  ;;  %v17884_v60 = vld [vmem:[#allocation8 + $0xd40] ss:$48 sps:$4 sm:$0xff]   ;;  %v17887_v61 = vld [vmem:[#allocation8 + $0xd48] ss:$48 sps:$4 sm:$0xff]  }
 0x70d   :  { %13380 = vmatprep.subr.bf16.mxu1 %v17835_v8  ;;  %v17892_v8 = vld [vmem:[#allocation8 + $0xda4] ss:$48 sps:$4 sm:$0xff]  }
 0x70f   :  { %13209 = vmatpush1.bf16.msra.mxu0 %v17830_v2  ;;  %v17895_v2 = vld [vmem:[#allocation8 + $0xdac] ss:$48 sps:$4 sm:$0xff]  }
 0x710   :  { %13381 = vmatpush1.bf16.msra.mxu1 %v17833_v4  ;;  %13210 = vmatprep.subr.bf16.mxu0 %v17838_v5  ;;  %v17893_v4 = vld [vmem:[#allocation8 + $0xda8] ss:$48 sps:$4 sm:$0xff]   ;;  %v17898_v5 = vld [vmem:[#allocation8 + $0xe04] ss:$48 sps:$4 sm:$0xff]  }
 0x711   :  { %13382 = vmatprep.subr.bf16.mxu1 %v17841_v6  ;;  %v17901_v6 = vld [vmem:[#allocation8 + $0xe0c] ss:$48 sps:$4 sm:$0xff]  }
 0x713   :  { %13211 = vmatpush1.bf16.msra.mxu0 %v17836_v46  ;;  %v17896_v46 = vld [vmem:[#allocation8 + $0xe00] ss:$48 sps:$4 sm:$0xff]  }
 0x714   :  { %13383 = vmatpush1.bf16.msra.mxu1 %v17839_v7  ;;  %13212 = vmatprep.subr.bf16.mxu0 %v17844_v9  ;;  %v17899_v7 = vld [vmem:[#allocation8 + $0xe08] ss:$48 sps:$4 sm:$0xff]   ;;  %v17904_v9 = vld [vmem:[#allocation8 + $0xe64] ss:$48 sps:$4 sm:$0xff]  }
 0x715   :  { %13384 = vmatprep.subr.bf16.mxu1 %v17847_v11  ;;  %v17907_v11 = vld [vmem:[#allocation8 + $0xe6c] ss:$48 sps:$4 sm:$0xff]  }
 0x717   :  { %13213 = vmatpush1.bf16.msra.mxu0 %v17842_v12  ;;  %v17902_v12 = vld [vmem:[#allocation8 + $0xe60] ss:$48 sps:$4 sm:$0xff]  }
 0x718   :  { %13385 = vmatpush1.bf16.msra.mxu1 %v17845_v45  ;;  %13214 = vmatprep.subr.bf16.mxu0 %v17850_v19  ;;  %v17905_v45 = vld [vmem:[#allocation8 + $0xe68] ss:$48 sps:$4 sm:$0xff]   ;;  %v17910_v19 = vld [vmem:[#allocation8 + $0xec4] ss:$48 sps:$4 sm:$0xff]  }
 0x719   :  { %13386 = vmatprep.subr.bf16.mxu1 %v17853_v25  ;;  %v17913_v25 = vld [vmem:[#allocation8 + $0xecc] ss:$48 sps:$4 sm:$0xff]  }
 0x71b   :  { %13215 = vmatpush1.bf16.msra.mxu0 %v17848_v48  ;;  %v17908_v48 = vld [vmem:[#allocation8 + $0xec0] ss:$48 sps:$4 sm:$0xff]  }
 0x71c   :  { %13387 = vmatpush1.bf16.msra.mxu1 %v17851_v31  ;;  %13216 = vmatprep.subr.bf16.mxu0 %v17856_v63  ;;  %v17911_v31 = vld [vmem:[#allocation8 + $0xec8] ss:$48 sps:$4 sm:$0xff]   ;;  %v17916_v63 = vld [vmem:[#allocation8 + $0xf24] ss:$48 sps:$4 sm:$0xff]  }
 0x71d   :  { %13388 = vmatprep.subr.bf16.mxu1 %v17859_v33  ;;  %v17919_v33 = vld [vmem:[#allocation8 + $0xf2c] ss:$48 sps:$4 sm:$0xff]  }
 0x71f   :  { %13217 = vmatpush1.bf16.msra.mxu0 %v17854_v34  ;;  %v17914_v34 = vld [vmem:[#allocation8 + $0xf20] ss:$48 sps:$4 sm:$0xff]  }
 0x720   :  { %13389 = vmatpush1.bf16.msra.mxu1 %v17857_v35  ;;  %13218 = vmatprep.subr.bf16.mxu0 %v17862_v39  ;;  %v17917_v35 = vld [vmem:[#allocation8 + $0xf28] ss:$48 sps:$4 sm:$0xff]   ;;  %v17922_v39 = vld [vmem:[#allocation8 + $0xf84] ss:$48 sps:$4 sm:$0xff]  }
 0x721   :  { %13390 = vmatprep.subr.bf16.mxu1 %v17865_v40  ;;  %v17925_v40 = vld [vmem:[#allocation8 + $0xf8c] ss:$48 sps:$4 sm:$0xff]  }
 0x723   :  { %13219 = vmatpush1.bf16.msra.mxu0 %v17860_v3  ;;  %v17920_v3 = vld [vmem:[#allocation8 + $0xf80] ss:$48 sps:$4 sm:$0xff]  }
 0x724   :  { %13391 = vmatpush1.bf16.msra.mxu1 %v17863_v43  ;;  %13231 = vmatprep.subr.bf16.mxu0 %v17868_v50  ;;  %v17923_v43 = vld [vmem:[#allocation8 + $0xf88] ss:$48 sps:$4 sm:$0xff]   ;;  %v17928_v50 = vld [vmem:[#allocation8 + $0xfe4] ss:$48 sps:$4 sm:$0xff]  }
 0x725   :  { %13403 = vmatprep.subr.bf16.mxu1 %v17871_v44  ;;  %v17931_v44 = vld [vmem:[#allocation8 + $0xfec] ss:$48 sps:$4 sm:$0xff]  }
 0x726   :  { %13221 = vmatmul.mubr.bf16.vlgmr.msra.gmra.mrb[16].mxu0 %v18619_v54 }
 0x727   :  { %13393 = vmatmul.mubr.bf16.vlgmr.msra.gmra.mrb[16].mxu1 %v18619_v54  ;;  %13232 = vmatpush1.bf16.msra.mxu0 %v17866_v56  ;;  %v17889_v54 = vld [vmem:[#allocation8 + $0xd4c] ss:$48 sps:$4 sm:$0xff]   ;;  %v17926_v56 = vld [vmem:[#allocation8 + $0xfe0] ss:$48 sps:$4 sm:$0xff]  }
 0x728   :  { %13263 = vmatprep.mubr.bf16.mxu0 %v18671_v23  ;;  %13404 = vmatpush1.bf16.msra.mxu1 %v17869_v49  ;;  %v17929_v49 = vld [vmem:[#allocation8 + $0xfe8] ss:$48 sps:$4 sm:$0xff]  }
 0x729   :  { %13435 = vmatprep.mubr.bf16.mxu1 %v18671_v23  ;;  %13233 = vmatprep.subr.bf16.mxu0 %v17874_v51  ;;  %v17890_v23 = vld [vmem:[#allocation8 + $0xda0] ss:$48 sps:$4 sm:$0xff]   ;;  %v17934_v51 = vld [vmem:[#allocation8 + $0x1044] ss:$48 sps:$4 sm:$0xff]  }
 0x72a   :  { %13405 = vmatprep.subr.bf16.mxu1 %v17877_v62  ;;  %v17937_v62 = vld [vmem:[#allocation8 + $0x104c] ss:$48 sps:$4 sm:$0xff]  }
 0x72b   :  { %13234 = vmatpush1.bf16.msra.mxu0 %v17872_v10  ;;  %v17932_v10 = vld [vmem:[#allocation8 + $0x1040] ss:$48 sps:$4 sm:$0xff]  }
 0x72c   :  { %13406 = vmatpush1.bf16.msra.mxu1 %v17875_v52  ;;  %13235 = vmatprep.subr.bf16.mxu0 %v17880_v58  ;;  %v17935_v52 = vld [vmem:[#allocation8 + $0x1048] ss:$48 sps:$4 sm:$0xff]   ;;  %v17940_v58 = vld [vmem:[#allocation8 + $0x10a4] ss:$48 sps:$4 sm:$0xff]  }
 0x72d   :  { %13407 = vmatprep.subr.bf16.mxu1 %v17883_v55  ;;  %v17943_v55 = vld [vmem:[#allocation8 + $0x10ac] ss:$48 sps:$4 sm:$0xff]  }
 0x72f   :  { %13236 = vmatpush1.bf16.msra.mxu0 %v17878_v37  ;;  %v17938_v37 = vld [vmem:[#allocation8 + $0x10a0] ss:$48 sps:$4 sm:$0xff]  }
 0x730   :  { %13408 = vmatpush1.bf16.msra.mxu1 %v17881_v57  ;;  %13237 = vmatprep.subr.bf16.mxu0 %v17886_v59  ;;  %v17941_v57 = vld [vmem:[#allocation8 + $0x10a8] ss:$48 sps:$4 sm:$0xff]   ;;  %v17946_v59 = vld [vmem:[#allocation8 + $0x1104] ss:$48 sps:$4 sm:$0xff]  }
 0x731   :  { %13409 = vmatprep.subr.bf16.mxu1 %v17889_v54  ;;  %v17949_v54 = vld [vmem:[#allocation8 + $0x110c] ss:$48 sps:$4 sm:$0xff]  }
 0x733   :  { %13238 = vmatpush1.bf16.msra.mxu0 %v17884_v60  ;;  %v17944_v60 = vld [vmem:[#allocation8 + $0x1100] ss:$48 sps:$4 sm:$0xff]  }
 0x734   :  { %13410 = vmatpush1.bf16.msra.mxu1 %v17887_v61  ;;  %13239 = vmatprep.subr.bf16.mxu0 %v17892_v8  ;;  %v17947_v61 = vld [vmem:[#allocation8 + $0x1108] ss:$48 sps:$4 sm:$0xff]   ;;  %v17952_v8 = vld [vmem:[#allocation8 + $0x1164] ss:$48 sps:$4 sm:$0xff]  }
 0x735   :  { %13411 = vmatprep.subr.bf16.mxu1 %v17895_v2  ;;  %v17955_v2 = vld [vmem:[#allocation8 + $0x116c] ss:$48 sps:$4 sm:$0xff]  }
 0x737   :  { %13240 = vmatpush1.bf16.msra.mxu0 %v17890_v23  ;;  %v17950_v23 = vld [vmem:[#allocation8 + $0x1160] ss:$48 sps:$4 sm:$0xff]  }
 0x738   :  { %13412 = vmatpush1.bf16.msra.mxu1 %v17893_v4  ;;  %13241 = vmatprep.subr.bf16.mxu0 %v17898_v5  ;;  %v17953_v4 = vld [vmem:[#allocation8 + $0x1168] ss:$48 sps:$4 sm:$0xff]   ;;  %v17958_v5 = vld [vmem:[#allocation8 + $0x11c4] ss:$48 sps:$4 sm:$0xff]  }
 0x739   :  { %13413 = vmatprep.subr.bf16.mxu1 %v17901_v6  ;;  %v17961_v6 = vld [vmem:[#allocation8 + $0x11cc] ss:$48 sps:$4 sm:$0xff]  }
 0x73b   :  { %13242 = vmatpush1.bf16.msra.mxu0 %v17896_v46  ;;  %v17956_v46 = vld [vmem:[#allocation8 + $0x11c0] ss:$48 sps:$4 sm:$0xff]  }
 0x73c   :  { %13414 = vmatpush1.bf16.msra.mxu1 %v17899_v7  ;;  %13243 = vmatprep.subr.bf16.mxu0 %v17904_v9  ;;  %v17959_v7 = vld [vmem:[#allocation8 + $0x11c8] ss:$48 sps:$4 sm:$0xff]   ;;  %v17964_v9 = vld [vmem:[#allocation8 + $0x1224] ss:$48 sps:$4 sm:$0xff]  }
 0x73d   :  { %13415 = vmatprep.subr.bf16.mxu1 %v17907_v11  ;;  %v17967_v11 = vld [vmem:[#allocation8 + $0x122c] ss:$48 sps:$4 sm:$0xff]  }
 0x73f   :  { %13244 = vmatpush1.bf16.msra.mxu0 %v17902_v12  ;;  %v17962_v12 = vld [vmem:[#allocation8 + $0x1220] ss:$48 sps:$4 sm:$0xff]  }
 0x740   :  { %13416 = vmatpush1.bf16.msra.mxu1 %v17905_v45  ;;  %13245 = vmatprep.subr.bf16.mxu0 %v17910_v19  ;;  %v17965_v45 = vld [vmem:[#allocation8 + $0x1228] ss:$48 sps:$4 sm:$0xff]   ;;  %v17970_v19 = vld [vmem:[#allocation8 + $0x1284] ss:$48 sps:$4 sm:$0xff]  }
 0x741   :  { %13417 = vmatprep.subr.bf16.mxu1 %v17913_v25  ;;  %v17973_v25 = vld [vmem:[#allocation8 + $0x128c] ss:$48 sps:$4 sm:$0xff]  }
 0x743   :  { %13246 = vmatpush1.bf16.msra.mxu0 %v17908_v48  ;;  %v17968_v48 = vld [vmem:[#allocation8 + $0x1280] ss:$48 sps:$4 sm:$0xff]  }
 0x744   :  { %13418 = vmatpush1.bf16.msra.mxu1 %v17911_v31  ;;  %13247 = vmatprep.subr.bf16.mxu0 %v17916_v63  ;;  %v17971_v31 = vld [vmem:[#allocation8 + $0x1288] ss:$48 sps:$4 sm:$0xff]   ;;  %v17976_v63 = vld [vmem:[#allocation8 + $0x12e4] ss:$48 sps:$4 sm:$0xff]  }
 0x745   :  { %13419 = vmatprep.subr.bf16.mxu1 %v17919_v33  ;;  %v17979_v33 = vld [vmem:[#allocation8 + $0x12ec] ss:$48 sps:$4 sm:$0xff]  }
 0x747   :  { %13248 = vmatpush1.bf16.msra.mxu0 %v17914_v34  ;;  %v17974_v34 = vld [vmem:[#allocation8 + $0x12e0] ss:$48 sps:$4 sm:$0xff]  }
 0x748   :  { %13420 = vmatpush1.bf16.msra.mxu1 %v17917_v35  ;;  %13249 = vmatprep.subr.bf16.mxu0 %v17922_v39  ;;  %v17977_v35 = vld [vmem:[#allocation8 + $0x12e8] ss:$48 sps:$4 sm:$0xff]   ;;  %v17982_v39 = vld [vmem:[#allocation8 + $0x1344] ss:$48 sps:$4 sm:$0xff]  }
 0x749   :  { %13421 = vmatprep.subr.bf16.mxu1 %v17925_v40  ;;  %v17980_v40 = vld [vmem:[#allocation8 + $0x1340] ss:$48 sps:$4 sm:$0xff]  }
 0x74b   :  { %13250 = vmatpush1.bf16.msra.mxu0 %v17920_v3  ;;  %v17983_v3 = vld [vmem:[#allocation8 + $0x1348] ss:$48 sps:$4 sm:$0xff]  }
 0x74c   :  { %13422 = vmatpush1.bf16.msra.mxu1 %v17923_v43  ;;  %13251 = vmatprep.subr.bf16.mxu0 %v17928_v50  ;;  %v17988_v43 = vld [vmem:[#allocation8 + $0x13a4] ss:$48 sps:$4 sm:$0xff]   ;;  %v17991_v50 = vld [vmem:[#allocation8 + $0x13ac] ss:$48 sps:$4 sm:$0xff]  }
 0x74d   :  { %13423 = vmatprep.subr.bf16.mxu1 %v17931_v44  ;;  %v17989_v44 = vld [vmem:[#allocation8 + $0x13a8] ss:$48 sps:$4 sm:$0xff]  }
 0x74f   :  { %13252 = vmatpush1.bf16.msra.mxu0 %v17926_v56  ;;  %v17994_v56 = vld [vmem:[#allocation8 + $0x1404] ss:$48 sps:$4 sm:$0xff]  }
 0x750   :  { %13424 = vmatpush1.bf16.msra.mxu1 %v17929_v49  ;;  %13253 = vmatprep.subr.bf16.mxu0 %v17934_v51  ;;  %v17997_v49 = vld [vmem:[#allocation8 + $0x140c] ss:$48 sps:$4 sm:$0xff]   ;;  %v18155_v51 = vld [vmem:[#allocation10] sm:$0xff] }
 0x751   :  { %13425 = vmatprep.subr.bf16.mxu1 %v17937_v62  ;;  %v8576_v62 = vrot.slane %v18155_v51, %v1211_v41 }
 0x753   :  { %13254 = vmatpush1.bf16.msra.mxu0 %v17932_v10  ;;  %v8584_v10 = vrot.slane %v18155_v51, %v1219_v42 }
 0x754   :  { %13426 = vmatpush1.bf16.msra.mxu1 %v17935_v52  ;;  %13255 = vmatprep.subr.bf16.mxu0 %v17940_v58  ;;  %v8580_v52 = vrot.slane %v18155_v51, %v1215_v30  ;;  %v17992_v58 = vld [vmem:[#allocation8 + $0x1400] ss:$48 sps:$4 sm:$0xff]  }
 0x755   :  { %13427 = vmatprep.subr.bf16.mxu1 %v17943_v55  ;;  %v8588_v55 = vrot.slane %v18155_v51, %v1223_v47  ;;  %v17998_v30 = vld [vmem:[#allocation8 + $0x1460] ss:$48 sps:$4 sm:$0xff]  }
 0x757   :  { %13256 = vmatpush1.bf16.msra.mxu0 %v17938_v37  ;;  %v17995_v37 = vld [vmem:[#allocation8 + $0x1408] ss:$48 sps:$4 sm:$0xff]  }
 0x758   :  { %13428 = vmatpush1.bf16.msra.mxu1 %v17941_v57  ;;  %13257 = vmatprep.subr.bf16.mxu0 %v17946_v59  ;;  %v18000_v57 = vld [vmem:[#allocation8 + $0x1464] ss:$48 sps:$4 sm:$0xff]  }
 0x759   :  { %13429 = vmatprep.subr.bf16.mxu1 %v17949_v54  ;;  %v18003_v54 = vld [vmem:[#allocation8 + $0x146c] ss:$48 sps:$4 sm:$0xff]  }
 0x75b   :  { %13258 = vmatpush1.bf16.msra.mxu0 %v17944_v60 }
 0x75c   :  { %13430 = vmatpush1.bf16.msra.mxu1 %v17947_v61  ;;  %13259 = vmatprep.subr.bf16.mxu0 %v17952_v8 }
 0x75d   :  { %13431 = vmatprep.subr.bf16.mxu1 %v17955_v2 }
 0x75f   :  { %13260 = vmatpush1.bf16.msra.mxu0 %v17950_v23 }
 0x760   :  { %13432 = vmatpush1.bf16.msra.mxu1 %v17953_v4  ;;  %13261 = vmatprep.subr.bf16.mxu0 %v17958_v5  ;;  %v18001_v4 = vld [vmem:[#allocation8 + $0x1468] ss:$48 sps:$4 sm:$0xff]  }
 0x761   :  { %13433 = vmatprep.subr.bf16.mxu1 %v17961_v6 }
 0x763   :  { %13262 = vmatpush1.bf16.msra.mxu0 %v17956_v46 }
 0x764   :  { %13434 = vmatpush1.bf16.msra.mxu1 %v17959_v7  ;;  %13274 = vmatprep.subr.bf16.mxu0 %v17964_v9  ;;  %v18006_v7 = vld [vmem:[#allocation8 + $0x14c4] ss:$48 sps:$4 sm:$0xff]   ;;  %v18009_v9 = vld [vmem:[#allocation8 + $0x14cc] ss:$48 sps:$4 sm:$0xff]  }
 0x765   :  { %13446 = vmatprep.subr.bf16.mxu1 %v17967_v11 }
 0x766   :  { %13264 = vmatmul.mubr.bf16.vlgmr.msra.gmra.mrb[16].mxu0 %v18664_v36 }
 0x767   :  { %13436 = vmatmul.mubr.bf16.vlgmr.msra.gmra.mrb[16].mxu1 %v18664_v36  ;;  %13275 = vmatpush1.bf16.msra.mxu0 %v17962_v12  ;;  %v17985_v36 = vld [vmem:[#allocation8 + $0x134c] ss:$48 sps:$4 sm:$0xff]  }
 0x768   :  { %13306 = vmatprep.mubr.bf16.mxu0 %v18673_v38  ;;  %13447 = vmatpush1.bf16.msra.mxu1 %v17965_v45 }
 0x769   :  { %13478 = vmatprep.mubr.bf16.mxu1 %v18673_v38  ;;  %13276 = vmatprep.subr.bf16.mxu0 %v17970_v19  ;;  %v17986_v38 = vld [vmem:[#allocation8 + $0x13a0] ss:$48 sps:$4 sm:$0xff]  }
 0x76a   :  { %13448 = vmatprep.subr.bf16.mxu1 %v17973_v25 }
 0x76b   :  { %13277 = vmatpush1.bf16.msra.mxu0 %v17968_v48 }
 0x76c   :  { %13449 = vmatpush1.bf16.msra.mxu1 %v17971_v31  ;;  %13278 = vmatprep.subr.bf16.mxu0 %v17976_v63  ;;  %v18004_v63 = vld [vmem:[#allocation8 + $0x14c0] ss:$48 sps:$4 sm:$0xff]  }
 0x76d   :  { %13450 = vmatprep.subr.bf16.mxu1 %v17979_v33 }
 0x76f   :  { %13279 = vmatpush1.bf16.msra.mxu0 %v17974_v34 }
 0x770   :  { %13451 = vmatpush1.bf16.msra.mxu1 %v17977_v35  ;;  %13280 = vmatprep.subr.bf16.mxu0 %v17982_v39  ;;  %v18007_v35 = vld [vmem:[#allocation8 + $0x14c8] ss:$48 sps:$4 sm:$0xff]   ;;  %v18012_v39 = vld [vmem:[#allocation8 + $0x1524] ss:$48 sps:$4 sm:$0xff]  }
 0x771   :  { %13452 = vmatprep.subr.bf16.mxu1 %v17985_v36 }
 0x773   :  { %13281 = vmatpush1.bf16.msra.mxu0 %v17980_v40 }
 0x774   :  { %13453 = vmatpush1.bf16.msra.mxu1 %v17983_v3  ;;  %13282 = vmatprep.subr.bf16.mxu0 %v17988_v43  ;;  %v18015_v3 = vld [vmem:[#allocation8 + $0x152c] ss:$48 sps:$4 sm:$0xff]  }
 0x775   :  { %13454 = vmatprep.subr.bf16.mxu1 %v17991_v50 }
 0x777   :  { %13283 = vmatpush1.bf16.msra.mxu0 %v17986_v38 }
 0x778   :  { %13455 = vmatpush1.bf16.msra.mxu1 %v17989_v44  ;;  %13284 = vmatprep.subr.bf16.mxu0 %v17994_v56 }
 0x779   :  { %v12964_v59 = vpop.f32.mrb[12].mxu0  ;;  %13456 = vmatprep.subr.bf16.mxu1 %v17997_v49  ;;  %v18010_v49 = vld [vmem:[#allocation8 + $0x1520] ss:$48 sps:$4 sm:$0xff]  }
 0x77a   :  { %v16687_v60 = vadd.f32 %v12964_v59, %v8576_v62  ;;  %v13136_v41 = vpop.f32.mrb[12].mxu1  ;;  %v12966_v61 = vpop.f32.mrb[13].mxu0 }
 0x77b   :  { %v16691_v8 = vadd.f32 %v13136_v41, %v8584_v10  ;;  %v16688_v2 = vadd.f32 %v12966_v61, %v8580_v52  ;;  %v13138_v42 = vpop.f32.mrb[13].mxu1  ;;  %v12968_v23 = vpop.f32.mrb[14].mxu0  ;;  %13285 = vmatpush1.bf16.msra.mxu0 %v17992_v58  ;;  %v18018_v58 = vld [vmem:[#allocation8 + $0x1584] ss:$48 sps:$4 sm:$0xff]   ;;  %v18019_v41 = vld [vmem:[#allocation8 + $0x1588] ss:$48 sps:$4 sm:$0xff]  }
 0x77c   :  { %v13517_v5 = vmul.f32 0.01, %v16687_v60  ;;  %v16692_v6 = vadd.f32 %v13138_v42, %v8588_v55  ;;  %v16689_v14 = vadd.f32 %v12968_v23, %v8576_v62  ;;  %v13140_v47 = vpop.f32.mrb[14].mxu1  ;;  %13457 = vmatpush1.bf16.msra.mxu1 %v17995_v37  ;;  %v12970_v46 = vpop.f32.mrb[15].mxu0  ;;  %13286 = vmatprep.subr.bf16.mxu0 %v18000_v57  ;;  %vm13493_vm8 = vcmp.ge.f32.partialorder %v16687_v60, 0.0 }
 0x77d   :  { %vm13495_vm9 = vcmp.ge.f32.partialorder %v16691_v8, 0.0  ;;  %13458 = vmatprep.subr.bf16.mxu1 %v18003_v54  ;;  %v13519_v11 = vmul.f32 0.01, %v16691_v8  ;;  %v13518_v12 = vmul.f32 0.01, %v16688_v2  ;;  %v13142_v45 = vpop.f32.mrb[15].mxu1  ;;  %v16693_v48 = vadd.f32 %v13140_v47, %v8584_v10 }
 0x77e   :  { %vm13505_vm10 = vcmp.ge.f32.partialorder %v16689_v14, 0.0  ;;  %v13520_v19 = vmul.f32 0.01, %v16692_v6  ;;  %v13529_v25 = vmul.f32 0.01, %v16689_v14  ;;  %v16690_v31 = vadd.f32 %v12970_v46, %v8580_v52 }
 0x77f   :  { %13287 = vmatpush1.bf16.msra.mxu0 %v17998_v30  ;;  %v18752_v33 = vsel %vm13493_vm8, %v16687_v60, %v13517_v5  ;;  %vm13494_vm11 = vcmp.ge.f32.partialorder %v16688_v2, 0.0  ;;  %vm13496_vm12 = vcmp.ge.f32.partialorder %v16692_v6, 0.0  ;;  %v16694_v34 = vadd.f32 %v13142_v45, %v8588_v55  ;;  %v18013_v52 = vld [vmem:[#allocation8 + $0x1528] ss:$48 sps:$4 sm:$0xff]   ;;  %v18021_v57 = vld [vmem:[#allocation8 + $0x158c] ss:$48 sps:$4 sm:$0xff]  }
 0x780   :  { %13459 = vmatpush1.bf16.msra.mxu1 %v18001_v4  ;;  %13288 = vmatprep.subr.bf16.mxu0 %v18006_v7  ;;  %v18755_v36 = vsel %vm13505_vm10, %v16689_v14, %v13529_v25  ;;  %vm13507_vm13 = vcmp.ge.f32.partialorder %v16693_v48, 0.0  ;;  %v13531_v40 = vmul.f32 0.01, %v16693_v48  ;;  %vm13506_vm14 = vcmp.ge.f32.partialorder %v16690_v31, 0.0  ;;  %v18016_v60 = vld [vmem:[#allocation8 + $0x1580] ss:$48 sps:$4 sm:$0xff]  }
 0x781   :  { %13460 = vmatprep.subr.bf16.mxu1 %v18009_v9  ;;  %v13565_v43 = vpack.c.bf16 %v18755_v36, %v18752_v33  ;;  %v13530_v50 = vmul.f32 0.01, %v16690_v31  ;;  %vm13508_vm15 = vcmp.ge.f32.partialorder %v16694_v34, 0.0  ;;  %v13532_v38 = vmul.f32 0.01, %v16694_v34  ;;  %v18135_v33 = vld [vmem:[#allocation11 + $0x2d8] sm:$0xff]  }
 0x782   :  { %v18760_v44 = vsel %vm13495_vm9, %v16691_v8, %v13519_v11  ;;  %v18762_v56 = vsel %vm13507_vm13, %v16693_v48, %v13531_v40  ;;  %v18765_v51 = vsel %vm13494_vm11, %v16688_v2, %v13518_v12  ;;  %v18768_v62 = vsel %vm13496_vm12, %v16692_v6, %v13520_v19  ;;  %v18024_v61 = vld [vmem:[#allocation8 + $0x15e4] ss:$48 sps:$4 sm:$0xff]   ;;  %v18027_v8 = vld [vmem:[#allocation8 + $0x15ec] ss:$48 sps:$4 sm:$0xff]   ;;  %v18022_v2 = vld [vmem:[#allocation8 + $0x15e0] ss:$48 sps:$4 sm:$0xff]  }
 0x783   :  { %13289 = vmatpush1.bf16.msra.mxu0 %v18004_v63  ;;  %v13567_v10 = vpack.c.bf16 %v18762_v56, %v18760_v44  ;;  %v18773_v55 = vsel %vm13506_vm14, %v16690_v31, %v13530_v50  ;;  %v18775_v37 = vsel %vm13508_vm15, %v16694_v34, %v13532_v38  ;;  %v18025_v42 = vld [vmem:[#allocation8 + $0x15e8] ss:$48 sps:$4 sm:$0xff]   ;;  %v18030_v23 = vld [vmem:[#allocation8 + $0x1644] ss:$48 sps:$4 sm:$0xff]   ;;  %v18033_v30 = vld [vmem:[#allocation8 + $0x164c] ss:$48 sps:$4 sm:$0xff]  }
 0x784   :  { %13461 = vmatpush1.bf16.msra.mxu1 %v18007_v35  ;;  %13290 = vmatprep.subr.bf16.mxu0 %v18012_v39  ;;  %v13566_v59 = vpack.c.bf16 %v18773_v55, %v18765_v51  ;;  %v13568_v54 = vpack.c.bf16 %v18775_v37, %v18768_v62  ;;  %v18028_v4 = vld [vmem:[#allocation8 + $0x1640] ss:$48 sps:$4 sm:$0xff]   ;;  %v18031_v5 = vld [vmem:[#allocation8 + $0x1648] ss:$48 sps:$4 sm:$0xff]   ;;  %v18036_v6 = vld [vmem:[#allocation8 + $0x16a4] ss:$48 sps:$4 sm:$0xff]  }
 0x785   :  { %13462 = vmatprep.subr.bf16.mxu1 %v18015_v3  ;;  %v18039_v14 = vld [vmem:[#allocation8 + $0x16ac] ss:$48 sps:$4 sm:$0xff]   ;;  %v18034_v47 = vld [vmem:[#allocation8 + $0x16a0] ss:$48 sps:$4 sm:$0xff]   ;;  %v18037_v46 = vld [vmem:[#allocation8 + $0x16a8] ss:$48 sps:$4 sm:$0xff]  }
 0x786   :  { %v18042_v7 = vld [vmem:[#allocation8 + $0x1704] ss:$48 sps:$4 sm:$0xff]   ;;  %v18045_v9 = vld [vmem:[#allocation8 + $0x170c] ss:$48 sps:$4 sm:$0xff]   ;;  %v18040_v11 = vld [vmem:[#allocation8 + $0x1700] ss:$48 sps:$4 sm:$0xff]  }
 0x787   :  { %13291 = vmatpush1.bf16.msra.mxu0 %v18010_v49  ;;  %v18043_v12 = vld [vmem:[#allocation8 + $0x1708] ss:$48 sps:$4 sm:$0xff]   ;;  %v18048_v45 = vld [vmem:[#allocation8 + $0x1764] ss:$48 sps:$4 sm:$0xff]   ;;  %v18051_v19 = vld [vmem:[#allocation8 + $0x176c] ss:$48 sps:$4 sm:$0xff]  }
 0x788   :  { %13463 = vmatpush1.bf16.msra.mxu1 %v18013_v52  ;;  %13292 = vmatprep.subr.bf16.mxu0 %v18018_v58  ;;  %v18046_v25 = vld [vmem:[#allocation8 + $0x1760] ss:$48 sps:$4 sm:$0xff]   ;;  %v18049_v48 = vld [vmem:[#allocation8 + $0x1768] ss:$48 sps:$4 sm:$0xff]   ;;  %v18054_v31 = vld [vmem:[#allocation8 + $0x17c4] ss:$48 sps:$4 sm:$0xff]  }
 0x789   :  { %13464 = vmatprep.subr.bf16.mxu1 %v18021_v57  ;;  %v18057_v63 = vld [vmem:[#allocation8 + $0x17cc] ss:$48 sps:$4 sm:$0xff]   ;;  %v18052_v34 = vld [vmem:[#allocation8 + $0x17c0] ss:$48 sps:$4 sm:$0xff]   ;;  %v18055_v35 = vld [vmem:[#allocation8 + $0x17c8] ss:$48 sps:$4 sm:$0xff]  }
 0x78a   :  { %v18058_v39 = vld [vmem:[#allocation11 + $0x40] sm:$0xff]   ;;  %v18062_v38 = vld [vmem:[#allocation11 + $0x48] sm:$0xff]   ;;  %v18066_v57 = vld [vmem:[#allocation11 + $0x50] sm:$0xff]  }
 0x78b   :  { %13293 = vmatpush1.bf16.msra.mxu0 %v18016_v60  ;;  %v18059_v40 = vld [vmem:[#allocation11 + $0xc0] sm:$0xff]   ;;  %v18063_v49 = vld [vmem:[#allocation11 + $0xc8] sm:$0xff]   ;;  %v18067_v60 = vld [vmem:[#allocation11 + $0xd0] sm:$0xff]  }
 0x78c   :  { %13465 = vmatpush1.bf16.msra.mxu1 %v18019_v41  ;;  %13294 = vmatprep.subr.bf16.mxu0 %v18024_v61  ;;  %v18060_v3 = vld [vmem:[#allocation11] sm:$0xff]   ;;  %v18064_v52 = vld [vmem:[#allocation11 + $0x8] sm:$0xff]   ;;  %v18068_v41 = vld [vmem:[#allocation11 + $0x10] sm:$0xff]  }
 0x78d   :  { %13466 = vmatprep.subr.bf16.mxu1 %v18027_v8  ;;  %v18061_v50 = vld [vmem:[#allocation11 + $0x80] sm:$0xff]   ;;  %v18065_v58 = vld [vmem:[#allocation11 + $0x88] sm:$0xff]   ;;  %v18070_v61 = vld [vmem:[#allocation11 + $0x58] sm:$0xff]  }
 0x78e   :  { %v18071_v8 = vld [vmem:[#allocation11 + $0xd8] sm:$0xff]   ;;  %v18106_v55 = vld [vmem:[#allocation11 + $0x160] sm:$0xff]  }
 0x78f   :  { %13295 = vmatpush1.bf16.msra.mxu0 %v18022_v2  ;;  %v18078_v2 = vld [vmem:[#allocation11 + $0x68] sm:$0xff]   ;;  %v18105_v51 = vld [vmem:[#allocation11 + $0x198] sm:$0xff]   ;;  %v18107_v62 = vld [vmem:[#allocation11 + $0x1e0] sm:$0xff]  }
 0x790   :  { %13467 = vmatpush1.bf16.msra.mxu1 %v18025_v42  ;;  %13296 = vmatprep.subr.bf16.mxu0 %v18030_v23  ;;  %v18079_v42 = vld [vmem:[#allocation11 + $0xe8] sm:$0xff]   ;;  %v18108_v37 = vld [vmem:[#allocation11 + $0x120] sm:$0xff]   ;;  %v18136_v36 = vld [vmem:[#allocation11 + $0x218] sm:$0xff]  }
 0x791   :  { %13468 = vmatprep.subr.bf16.mxu1 %v18033_v30  ;;  %v18080_v23 = vld [vmem:[#allocation11 + $0x28] sm:$0xff]   ;;  %v18138_v44 = vld [vmem:[#allocation11 + $0x260] sm:$0xff]  }
 0x792   :  { %v18081_v30 = vld [vmem:[#allocation11 + $0xa8] sm:$0xff]   ;;  %v18139_v56 = vld [vmem:[#allocation11 + $0x2e0] sm:$0xff]  }
 0x793   :  { %13297 = vmatpush1.bf16.msra.mxu0 %v18028_v4  ;;  %v18082_v4 = vld [vmem:[#allocation11 + $0x70] sm:$0xff]  }
 0x794   :  { %13469 = vmatpush1.bf16.msra.mxu1 %v18031_v5  ;;  %13298 = vmatprep.subr.bf16.mxu0 %v18036_v6  ;;  %v18083_v5 = vld [vmem:[#allocation11 + $0xf0] sm:$0xff]  }
 0x795   :  { %13470 = vmatprep.subr.bf16.mxu1 %v18039_v14  ;;  %v18084_v6 = vld [vmem:[#allocation11 + $0x30] sm:$0xff]  }
 0x796   :  { %v18085_v14 = vld [vmem:[#allocation11 + $0xb0] sm:$0xff]  }
 0x797   :  { %13299 = vmatpush1.bf16.msra.mxu0 %v18034_v47  ;;  %v18086_v47 = vld [vmem:[#allocation11 + $0x78] sm:$0xff]  }
 0x798   :  { %13471 = vmatpush1.bf16.msra.mxu1 %v18037_v46  ;;  %13300 = vmatprep.subr.bf16.mxu0 %v18042_v7  ;;  %v18087_v46 = vld [vmem:[#allocation11 + $0xf8] sm:$0xff]  }
 0x799   :  { %13472 = vmatprep.subr.bf16.mxu1 %v18045_v9  ;;  %v18088_v7 = vld [vmem:[#allocation11 + $0x38] sm:$0xff]  }
 0x79a   :  { %v18089_v9 = vld [vmem:[#allocation11 + $0xb8] sm:$0xff]  }
 0x79b   :  { %13301 = vmatpush1.bf16.msra.mxu0 %v18040_v11  ;;  %v18090_v11 = vld [vmem:[#allocation11 + $0x140] sm:$0xff]  }
 0x79c   :  { %13473 = vmatpush1.bf16.msra.mxu1 %v18043_v12  ;;  %13302 = vmatprep.subr.bf16.mxu0 %v18048_v45  ;;  %v18091_v12 = vld [vmem:[#allocation11 + $0x1c0] sm:$0xff]  }
 0x79d   :  { %13474 = vmatprep.subr.bf16.mxu1 %v18051_v19  ;;  %v18092_v45 = vld [vmem:[#allocation11 + $0x100] sm:$0xff]  }
 0x79e   :  { %v18093_v19 = vld [vmem:[#allocation11 + $0x180] sm:$0xff]  }
 0x79f   :  { %13303 = vmatpush1.bf16.msra.mxu0 %v18046_v25  ;;  %v18094_v25 = vld [vmem:[#allocation11 + $0x148] sm:$0xff]  }
 0x7a0   :  { %13475 = vmatpush1.bf16.msra.mxu1 %v18049_v48  ;;  %13304 = vmatprep.subr.bf16.mxu0 %v18054_v31  ;;  %v18095_v48 = vld [vmem:[#allocation11 + $0x1c8] sm:$0xff]  }
 0x7a1   :  { %13476 = vmatprep.subr.bf16.mxu1 %v18057_v63  ;;  %v18096_v31 = vld [vmem:[#allocation11 + $0x108] sm:$0xff]  }
 0x7a2   :  { %v18097_v63 = vld [vmem:[#allocation11 + $0x188] sm:$0xff]  }
 0x7a3   :  { %13305 = vmatpush1.bf16.msra.mxu0 %v18052_v34  ;;  %v18098_v34 = vld [vmem:[#allocation11 + $0x150] sm:$0xff]  }
 0x7a4   :  { %13477 = vmatpush1.bf16.msra.mxu1 %v18055_v35  ;;  %16531 = vmatprep.subr.bf16.mxu0 %v18058_v39  ;;  %v18111_v35 = vld [vmem:[#allocation11 + $0x1e8] sm:$0xff]  }
 0x7a5   :  { %16553 = vmatprep.subr.bf16.mxu1 %v18059_v40  ;;  %v18112_v39 = vld [vmem:[#allocation11 + $0x128] sm:$0xff]  }
 0x7a6   :  { %13307 = vmatmul.mubr.bf16.vlgmr.msra.gmra.mrb[16].mxu0 %v18668_v16  ;;  %v18113_v40 = vld [vmem:[#allocation11 + $0x1a8] sm:$0xff]  }
 0x7a7   :  { %13479 = vmatmul.mubr.bf16.vlgmr.msra.gmra.mrb[16].mxu1 %v18668_v16  ;;  %16532 = vmatpush3.bf16.msra.mxu0 %v18060_v3  ;;  %v18069_v16 = vld [vmem:[#allocation11 + $0x90] sm:$0xff]  }
 0x7a8   :  { %13868 = vmatprep.mubr.bf16.mxu0 %v13562_v24  ;;  %16554 = vmatpush3.bf16.msra.mxu1 %v18061_v50  ;;  %v18074_v24 = vld [vmem:[#allocation11 + $0x60] sm:$0xff]   ;;  %v18114_v3 = vld [vmem:[#allocation11 + $0x170] sm:$0xff]  }
 0x7a9   :  { %13909 = vmatprep.mubr.bf16.mxu1 %v13564_v26  ;;  %16533 = vmatprep.subr.bf16.mxu0 %v18062_v38  ;;  %v18077_v26 = vld [vmem:[#allocation11 + $0xa0] sm:$0xff]   ;;  %v18115_v50 = vld [vmem:[#allocation11 + $0x1f0] sm:$0xff]  }
 0x7aa   :  { %16555 = vmatprep.subr.bf16.mxu1 %v18063_v49  ;;  %v18116_v38 = vld [vmem:[#allocation11 + $0x130] sm:$0xff]  }
 0x7ab   :  { %16534 = vmatpush3.bf16.msra.mxu0 %v18064_v52  ;;  %v18117_v49 = vld [vmem:[#allocation11 + $0x1b0] sm:$0xff]   ;;  %v18118_v52 = vld [vmem:[#allocation11 + $0x178] sm:$0xff]  }
 0x7ac   :  { %16556 = vmatpush3.bf16.msra.mxu1 %v18065_v58  ;;  %16535 = vmatprep.subr.bf16.mxu0 %v18066_v57  ;;  %v18119_v58 = vld [vmem:[#allocation11 + $0x1f8] sm:$0xff]  }
 0x7ad   :  { %16557 = vmatprep.subr.bf16.mxu1 %v18067_v60  ;;  %v18120_v57 = vld [vmem:[#allocation11 + $0x138] sm:$0xff]  }
 0x7ae   :  { %v18121_v60 = vld [vmem:[#allocation11 + $0x1b8] sm:$0xff]  }
 0x7af   :  { %16536 = vmatpush3.bf16.msra.mxu0 %v18068_v41  ;;  %v18122_v41 = vld [vmem:[#allocation11 + $0x240] sm:$0xff]  }
 0x7b0   :  { %16558 = vmatpush3.bf16.msra.mxu1 %v18069_v16  ;;  %16537 = vmatprep.subr.bf16.mxu0 %v18070_v61  ;;  %v18123_v16 = vld [vmem:[#allocation11 + $0x2c0] sm:$0xff]  }
 0x7b1   :  { %16559 = vmatprep.subr.bf16.mxu1 %v18071_v8  ;;  %v18124_v61 = vld [vmem:[#allocation11 + $0x200] sm:$0xff]  }
 0x7b2   :  { %v18125_v8 = vld [vmem:[#allocation11 + $0x280] sm:$0xff]  }
 0x7b3   :  { %16538 = vmatpush3.bf16.msra.mxu0 %v18072_v29  ;;  %v18126_v29 = vld [vmem:[#allocation11 + $0x248] sm:$0xff]  }
 0x7b4   :  { %16560 = vmatpush3.bf16.msra.mxu1 %v18073_v20  ;;  %16539 = vmatprep.subr.bf16.mxu0 %v18074_v24  ;;  %v18127_v20 = vld [vmem:[#allocation11 + $0x2c8] sm:$0xff]  }
 0x7b5   :  { %16561 = vmatprep.subr.bf16.mxu1 %v18075_v17  ;;  %v18128_v24 = vld [vmem:[#allocation11 + $0x208] sm:$0xff]  }
 0x7b6   :  { %v18129_v17 = vld [vmem:[#allocation11 + $0x288] sm:$0xff]  }
 0x7b7   :  { %16540 = vmatpush3.bf16.msra.mxu0 %v18076_v21  ;;  %v18130_v21 = vld [vmem:[#allocation11 + $0x250] sm:$0xff]  }
 0x7b8   :  { %16562 = vmatpush3.bf16.msra.mxu1 %v18077_v26  ;;  %16541 = vmatprep.subr.bf16.mxu0 %v18078_v2  ;;  %v18131_v26 = vld [vmem:[#allocation11 + $0x2d0] sm:$0xff]  }
 0x7b9   :  { %16563 = vmatprep.subr.bf16.mxu1 %v18079_v42  ;;  %v18132_v2 = vld [vmem:[#allocation11 + $0x210] sm:$0xff]  }
 0x7ba   :  { %v18133_v42 = vld [vmem:[#allocation11 + $0x290] sm:$0xff]  }
 0x7bb   :  { %16542 = vmatpush3.bf16.msra.mxu0 %v18080_v23  ;;  %v18134_v23 = vld [vmem:[#allocation11 + $0x258] sm:$0xff]  }
 0x7bc   :  { %16564 = vmatpush3.bf16.msra.mxu1 %v18081_v30  ;;  %16543 = vmatprep.subr.bf16.mxu0 %v18082_v4  ;;  %v18141_v30 = vld [vmem:[#allocation11 + $0x2a0] sm:$0xff]   ;;  %v18142_v4 = vld [vmem:[#allocation11 + $0x268] sm:$0xff]  }
 0x7bd   :  { %16565 = vmatprep.subr.bf16.mxu1 %v18083_v5  ;;  %v18143_v5 = vld [vmem:[#allocation11 + $0x2e8] sm:$0xff]  }
 0x7bf   :  { %16544 = vmatpush3.bf16.msra.mxu0 %v18084_v6  ;;  %v18144_v6 = vld [vmem:[#allocation11 + $0x228] sm:$0xff]  }
 0x7c0   :  { %16566 = vmatpush3.bf16.msra.mxu1 %v18085_v14  ;;  %16545 = vmatprep.subr.bf16.mxu0 %v18086_v47  ;;  %v18145_v14 = vld [vmem:[#allocation11 + $0x2a8] sm:$0xff]   ;;  %v18146_v47 = vld [vmem:[#allocation11 + $0x270] sm:$0xff]  }
 0x7c1   :  { %16567 = vmatprep.subr.bf16.mxu1 %v18087_v46  ;;  %v18147_v46 = vld [vmem:[#allocation11 + $0x2f0] sm:$0xff]  }
 0x7c3   :  { %16546 = vmatpush3.bf16.msra.mxu0 %v18088_v7  ;;  %v18148_v7 = vld [vmem:[#allocation11 + $0x230] sm:$0xff]  }
 0x7c4   :  { %16568 = vmatpush3.bf16.msra.mxu1 %v18089_v9  ;;  %16575 = vmatprep.subr.bf16.mxu0 %v18090_v11  ;;  %v18149_v9 = vld [vmem:[#allocation11 + $0x2b0] sm:$0xff]   ;;  %v18150_v11 = vld [vmem:[#allocation11 + $0x278] sm:$0xff]  }
 0x7c5   :  { %16597 = vmatprep.subr.bf16.mxu1 %v18091_v12  ;;  %v18151_v12 = vld [vmem:[#allocation11 + $0x2f8] sm:$0xff]  }
 0x7c6   :  { %13869 = vmatmul.mubr.bf16.vlgmr.msra.gmra.mrb[20].mxu0 %v13561_v18  ;;  %v18103_v18 = vld [vmem:[#allocation11 + $0x1d8] sm:$0xff]  }
 0x7c7   :  { %13910 = vmatmul.mubr.bf16.vlgmr.msra.gmra.mrb[20].mxu1 %v13563_v53  ;;  %16576 = vmatpush3.bf16.msra.mxu0 %v18092_v45  ;;  %v18104_v53 = vld [vmem:[#allocation11 + $0x118] sm:$0xff]  }
 0x7c8   :  { %14217 = vmatprep.mubr.bf16.mxu0 %v13566_v59  ;;  %16598 = vmatpush3.bf16.msra.mxu1 %v18093_v19  ;;  %v18109_v59 = vld [vmem:[#allocation11 + $0x1a0] sm:$0xff]   ;;  %v18152_v45 = vld [vmem:[#allocation11 + $0x238] sm:$0xff]  }
 0x7c9   :  { %14258 = vmatprep.mubr.bf16.mxu1 %v13568_v54  ;;  %16577 = vmatprep.subr.bf16.mxu0 %v18094_v25  ;;  %v18110_v54 = vld [vmem:[#allocation11 + $0x168] sm:$0xff]   ;;  %v18153_v19 = vld [vmem:[#allocation11 + $0x2b8] sm:$0xff]  }
 0x7ca   :  { %16599 = vmatprep.subr.bf16.mxu1 %v18095_v48  ;;  %v8554_v25 = vld [vmem:[#allocation10 + $0x8] sm:$0xf] }
 0x7cb   :  { %16578 = vmatpush3.bf16.msra.mxu0 %v18096_v31  ;;  %v8592_v48 = vrot.slane %v8554_v25, %v18567_v22  ;;  %v8600_v31 = vrot.slane %v8554_v25, %v18570_v27 }
 0x7cc   :  { %16600 = vmatpush3.bf16.msra.mxu1 %v18097_v63  ;;  %16579 = vmatprep.subr.bf16.mxu0 %v18098_v34  ;;  %v8596_v63 = vrot.slane %v8554_v25, %v18573_v28  ;;  %v8604_v34 = vrot.slane %v8554_v25, %v18576_v32 }
 0x7cd   :  { %16601 = vmatprep.subr.bf16.mxu1 %v18099_v0 }
 0x7cf   :  { %16580 = vmatpush3.bf16.msra.mxu0 %v18100_v15 }
 0x7d0   :  { %16602 = vmatpush3.bf16.msra.mxu1 %v18101_v1  ;;  %16581 = vmatprep.subr.bf16.mxu0 %v18102_v13 }
 0x7d1   :  { %16603 = vmatprep.subr.bf16.mxu1 %v18103_v18 }
 0x7d3   :  { %16582 = vmatpush3.bf16.msra.mxu0 %v18104_v53 }
 0x7d4   :  { %16604 = vmatpush3.bf16.msra.mxu1 %v18105_v51  ;;  %16583 = vmatprep.subr.bf16.mxu0 %v18106_v55 }
 0x7d5   :  { %16605 = vmatprep.subr.bf16.mxu1 %v18107_v62 }
 0x7d7   :  { %16584 = vmatpush3.bf16.msra.mxu0 %v18108_v37 }
 0x7d8   :  { %16606 = vmatpush3.bf16.msra.mxu1 %v18109_v59  ;;  %16585 = vmatprep.subr.bf16.mxu0 %v18110_v54 }
 0x7d9   :  { %16607 = vmatprep.subr.bf16.mxu1 %v18111_v35 }
 0x7db   :  { %16586 = vmatpush3.bf16.msra.mxu0 %v18112_v39 }
 0x7dc   :  { %16608 = vmatpush3.bf16.msra.mxu1 %v18113_v40  ;;  %16587 = vmatprep.subr.bf16.mxu0 %v18114_v3 }
 0x7dd   :  { %16609 = vmatprep.subr.bf16.mxu1 %v18115_v50 }
 0x7df   :  { %16588 = vmatpush3.bf16.msra.mxu0 %v18116_v38 }
 0x7e0   :  { %16610 = vmatpush3.bf16.msra.mxu1 %v18117_v49  ;;  %16589 = vmatprep.subr.bf16.mxu0 %v18118_v52 }
 0x7e1   :  { %16611 = vmatprep.subr.bf16.mxu1 %v18119_v58 }
 0x7e3   :  { %16590 = vmatpush3.bf16.msra.mxu0 %v18120_v57 }
 0x7e4   :  { %16612 = vmatpush3.bf16.msra.mxu1 %v18121_v60  ;;  %16619 = vmatprep.subr.bf16.mxu0 %v18122_v41 }
 0x7e5   :  { %16641 = vmatprep.subr.bf16.mxu1 %v18123_v16 }
 0x7e6   :  { %14218 = vmatmul.mubr.bf16.vlgmr.msra.gmra.mrb[24].mxu0 %v13565_v43  ;;  %v18137_v43 = vld [vmem:[#allocation11 + $0x298] sm:$0xff]  }
 0x7e7   :  { %14259 = vmatmul.mubr.bf16.vlgmr.msra.gmra.mrb[24].mxu1 %v13567_v10  ;;  %16620 = vmatpush3.bf16.msra.mxu0 %v18124_v61  ;;  %v18140_v10 = vld [vmem:[#allocation11 + $0x220] sm:$0xff]  }
 0x7e8   :  { %16642 = vmatpush3.bf16.msra.mxu1 %v18125_v8  ;;  %16621 = vmatprep.subr.bf16.mxu0 %v18126_v29 }
 0x7e9   :  { %16643 = vmatprep.subr.bf16.mxu1 %v18127_v20 }
 0x7eb   :  { %16622 = vmatpush3.bf16.msra.mxu0 %v18128_v24 }
 0x7ec   :  { %16644 = vmatpush3.bf16.msra.mxu1 %v18129_v17  ;;  %16623 = vmatprep.subr.bf16.mxu0 %v18130_v21 }
 0x7ed   :  { %16645 = vmatprep.subr.bf16.mxu1 %v18131_v26 }
 0x7ef   :  { %16624 = vmatpush3.bf16.msra.mxu0 %v18132_v2 }
 0x7f0   :  { %16646 = vmatpush3.bf16.msra.mxu1 %v18133_v42  ;;  %16625 = vmatprep.subr.bf16.mxu0 %v18134_v23  ;;  %v16432_v42 = vld [vmem:[#allocation13] ss:$0 sm:$0xff] }
 0x7f1   :  { %16647 = vmatprep.subr.bf16.mxu1 %v18135_v33 }
 0x7f3   :  { %16626 = vmatpush3.bf16.msra.mxu0 %v18136_v36 }
 0x7f4   :  { %16648 = vmatpush3.bf16.msra.mxu1 %v18137_v43  ;;  %16627 = vmatprep.subr.bf16.mxu0 %v18138_v44 }
 0x7f5   :  { %16649 = vmatprep.subr.bf16.mxu1 %v18139_v56 }
 0x7f7   :  { %16628 = vmatpush3.bf16.msra.mxu0 %v18140_v10 }
 0x7f8   :  { %16650 = vmatpush3.bf16.msra.mxu1 %v18141_v30  ;;  %16629 = vmatprep.subr.bf16.mxu0 %v18142_v4 }
 0x7f9   :  { %16651 = vmatprep.subr.bf16.mxu1 %v18143_v5 }
 0x7fb   :  { %16630 = vmatpush3.bf16.msra.mxu0 %v18144_v6 }
 0x7fc   :  { %16652 = vmatpush3.bf16.msra.mxu1 %v18145_v14  ;;  %16631 = vmatprep.subr.bf16.mxu0 %v18146_v47 }
 0x7fd   :  { %16653 = vmatprep.subr.bf16.mxu1 %v18147_v46 }
 0x7ff   :  { %16632 = vmatpush3.bf16.msra.mxu0 %v18148_v7 }
 0x800   :  { %16654 = vmatpush3.bf16.msra.mxu1 %v18149_v9  ;;  %16633 = vmatprep.subr.bf16.mxu0 %v18150_v11  ;;  %v16465_v11 = vld [vmem:[#allocation13 + $0x1] ss:$0 sm:$0xff] }
 0x801   :  { %16655 = vmatprep.subr.bf16.mxu1 %v18151_v12 }
 0x803   :  { %16634 = vmatpush3.bf16.msra.mxu0 %v18152_v45 }
 0x804   :  { %16656 = vmatpush3.bf16.msra.mxu1 %v18153_v19 }
 0x879   :  { %v13308_v0 = vpop.f32.mrb[16].mxu0 }
 0x87a   :  { %v16695_v15 = vadd.f32 %v13308_v0, %v8592_v48  ;;  %v13480_v1 = vpop.f32.mrb[16].mxu1  ;;  %v13310_v13 = vpop.f32.mrb[17].mxu0 }
 0x87b   :  { %v16699_v18 = vadd.f32 %v13480_v1, %v8600_v31  ;;  %v16696_v53 = vadd.f32 %v13310_v13, %v8596_v63  ;;  %v13482_v51 = vpop.f32.mrb[17].mxu1  ;;  %v13312_v55 = vpop.f32.mrb[18].mxu0 }
 0x87c   :  { %v13521_v62 = vmul.f32 0.01, %v16695_v15  ;;  %v16700_v37 = vadd.f32 %v13482_v51, %v8604_v34  ;;  %v16697_v59 = vadd.f32 %v13312_v55, %v8592_v48  ;;  %v13484_v54 = vpop.f32.mrb[18].mxu1  ;;  %v13314_v35 = vpop.f32.mrb[19].mxu0  ;;  %vm13497_vm0 = vcmp.ge.f32.partialorder %v16695_v15, 0.0 }
 0x87d   :  { %vm13499_vm1 = vcmp.ge.f32.partialorder %v16699_v18, 0.0  ;;  %v13523_v22 = vmul.f32 0.01, %v16699_v18  ;;  %vm13498_vm2 = vcmp.ge.f32.partialorder %v16696_v53, 0.0  ;;  %v13486_v27 = vpop.f32.mrb[19].mxu1  ;;  %v16701_v39 = vadd.f32 %v13484_v54, %v8600_v31 }
 0x87e   :  { %vm13509_vm3 = vcmp.ge.f32.partialorder %v16697_v59, 0.0  ;;  %v13522_v28 = vmul.f32 0.01, %v16696_v53  ;;  %v13533_v32 = vmul.f32 0.01, %v16697_v59  ;;  %v16698_v40 = vadd.f32 %v13314_v35, %v8596_v63 }
 0x87f   :  { %v13545_v3 = vsel %vm13497_vm0, %v16695_v15, %v13521_v62  ;;  %vm13500_vm4 = vcmp.ge.f32.partialorder %v16700_v37, 0.0  ;;  %v13524_v50 = vmul.f32 0.01, %v16700_v37  ;;  %v16702_v38 = vadd.f32 %v13486_v27, %v8604_v34  ;;  %v16498_v62 = vld [vmem:[#allocation13 + $0x2] ss:$0 sm:$0xff] }
 0x880   :  { %v13557_v49 = vsel %vm13509_vm3, %v16697_v59, %v13533_v32  ;;  %vm13511_vm5 = vcmp.ge.f32.partialorder %v16701_v39, 0.0  ;;  %v13535_v52 = vmul.f32 0.01, %v16701_v39  ;;  %vm13510_vm6 = vcmp.ge.f32.partialorder %v16698_v40, 0.0 }
 0x881   :  { %v13569_v58 = vpack.c.bf16 %v13557_v49, %v13545_v3  ;;  %v13534_v57 = vmul.f32 0.01, %v16698_v40  ;;  %vm13512_vm7 = vcmp.ge.f32.partialorder %v16702_v38, 0.0  ;;  %v13536_v60 = vmul.f32 0.01, %v16702_v38 }
 0x882   :  { %v13547_v41 = vsel %vm13499_vm1, %v16699_v18, %v13523_v22  ;;  %v13559_v16 = vsel %vm13511_vm5, %v16701_v39, %v13535_v52  ;;  %v13546_v61 = vsel %vm13498_vm2, %v16696_v53, %v13522_v28  ;;  %v13548_v20 = vsel %vm13500_vm4, %v16700_v37, %v13524_v50 }
 0x883   :  { %v13571_v8 = vpack.c.bf16 %v13559_v16, %v13547_v41  ;;  %v13558_v29 = vsel %vm13510_vm6, %v16698_v40, %v13534_v57  ;;  %v13560_v24 = vsel %vm13512_vm7, %v16702_v38, %v13536_v60 }
 0x884   :  { %v13570_v17 = vpack.c.bf16 %v13558_v29, %v13546_v61  ;;  %v13572_v21 = vpack.c.bf16 %v13560_v24, %v13548_v20 }
 0x886   :  { %14567 = vmatprep.mubr.bf16.mxu0 %v13570_v17  ;;  %14608 = vmatprep.mubr.bf16.mxu1 %v13572_v21 }
 0x887   :  { %14568 = vmatmul.mubr.bf16.vlgmr.msra.gmra.mrb[28].mxu0 %v13569_v58  ;;  %14609 = vmatmul.mubr.bf16.vlgmr.msra.gmra.mrb[28].mxu1 %v13571_v8 }
 0x899   :  { %v16547_v26 = vpop.f32.mrb[20].mxu0 }
 0x89a   :  { %v16569_v2 = vpop.f32.mrb[20].mxu1  ;;  %v16548_v23 = vpop.f32.mrb[21].mxu0 }
 0x89b   :  { %v16549_v33 = vadd.f32 %v16548_v23, %v16547_v26  ;;  %v16570_v36 = vpop.f32.mrb[21].mxu1  ;;  %v16550_v43 = vpop.f32.mrb[22].mxu0 }
 0x89c   :  { %v16571_v44 = vadd.f32 %v16570_v36, %v16569_v2  ;;  %v16572_v56 = vpop.f32.mrb[22].mxu1  ;;  %v16551_v10 = vpop.f32.mrb[23].mxu0 }
 0x89d   :  { %v13871_v30 = vadd.f32 %v16549_v33, %v16432_v42  ;;  %v16552_v4 = vadd.f32 %v16551_v10, %v16550_v43  ;;  %v16573_v5 = vpop.f32.mrb[23].mxu1 }
 0x89e   :  { %v16574_v6 = vadd.f32 %v16573_v5, %v16572_v56 }
 0x89f   :  { %v13912_v14 = vadd.f32 %v16571_v44, %v13871_v30  ;;  %v13874_v47 = vadd.f32 %v16552_v4, %v16432_v42 }
 0x8a1   :  { %13918 = vst [vmem:[#allocation14] sm:$0xff] %v13912_v14  ;;  %v13915_v46 = vadd.f32 %v16574_v6, %v13874_v47 }
 0x8a3   :  { %13919 = vst [vmem:[#allocation14 + $0x8] sm:$0xff] %v13915_v46 }
 0x8b9   :  { %v16591_v7 = vpop.f32.mrb[24].mxu0 }
 0x8ba   :  { %v16613_v9 = vpop.f32.mrb[24].mxu1  ;;  %v16592_v12 = vpop.f32.mrb[25].mxu0 }
 0x8bb   :  { %v16593_v45 = vadd.f32 %v16592_v12, %v16591_v7  ;;  %v16614_v19 = vpop.f32.mrb[25].mxu1  ;;  %v16594_v25 = vpop.f32.mrb[26].mxu0 }
 0x8bc   :  { %v16615_v48 = vadd.f32 %v16614_v19, %v16613_v9  ;;  %v16616_v31 = vpop.f32.mrb[26].mxu1  ;;  %v16595_v63 = vpop.f32.mrb[27].mxu0 }
 0x8bd   :  { %v14220_v34 = vadd.f32 %v16593_v45, %v16465_v11  ;;  %v16596_v0 = vadd.f32 %v16595_v63, %v16594_v25  ;;  %v16617_v15 = vpop.f32.mrb[27].mxu1 }
 0x8be   :  { %v16618_v1 = vadd.f32 %v16617_v15, %v16616_v31 }
 0x8bf   :  { %v14261_v13 = vadd.f32 %v16615_v48, %v14220_v34  ;;  %v14223_v18 = vadd.f32 %v16596_v0, %v16465_v11 }
 0x8c1   :  { %14268 = vst [vmem:[#allocation14 + $0x10] sm:$0xff] %v14261_v13  ;;  %v14264_v53 = vadd.f32 %v16618_v1, %v14223_v18 }
 0x8c3   :  { %14269 = vst [vmem:[#allocation14 + $0x18] sm:$0xff] %v14264_v53 }
 0x95a   :  { %v16635_v51 = vpop.f32.mrb[28].mxu0  ;;  %v16657_v55 = vpop.f32.mrb[28].mxu1 }
 0x95b   :  { %v16636_v37 = vpop.f32.mrb[29].mxu0  ;;  %v16658_v59 = vpop.f32.mrb[29].mxu1 }
 0x95c   :  { %v16637_v54 = vadd.f32 %v16636_v37, %v16635_v51  ;;  %v16659_v35 = vadd.f32 %v16658_v59, %v16657_v55  ;;  %v16638_v22 = vpop.f32.mrb[30].mxu0  ;;  %v16660_v27 = vpop.f32.mrb[30].mxu1 }
 0x95d   :  { %v16639_v28 = vpop.f32.mrb[31].mxu0  ;;  %v16661_v32 = vpop.f32.mrb[31].mxu1 }
 0x95e   :  { %v14570_v39 = vadd.f32 %v16637_v54, %v16498_v62  ;;  %v16640_v40 = vadd.f32 %v16639_v28, %v16638_v22  ;;  %v16662_v3 = vadd.f32 %v16661_v32, %v16660_v27 }
 0x960   :  { %v14611_v50 = vadd.f32 %v16659_v35, %v14570_v39  ;;  %v14573_v38 = vadd.f32 %v16640_v40, %v16498_v62 }
 0x962   :  { %14618 = vst [vmem:[#allocation14 + $0x20] sm:$0xff] %v14611_v50  ;;  %v14614_v49 = vadd.f32 %v16662_v3, %v14573_v38 }
 0x964   :  { %14619 = vst [vmem:[#allocation14 + $0x28] sm:$0xff] %v14614_v49 }
 0x965   :  { %18321 = shalt.err (!%p18318_p4)
}
 0x966   :  { %s18322_s20 = scalar_lea.hbm %s18835_s7, 768 }
 0x967   :  { %p18323_p5 = scmp.ne.s32.totalorder %s18835_s7, %s18322_s20  ;;  %p18326_p6 = scmp.lt.u32.totalorder %s18322_s20, %s18835_s7 }
 0x969   :  { %p18328_p7 = pnand %p18326_p6, %p18323_p5 }
 0x96b   :  { %18331 = shalt.err (!%p18328_p7)
}
 0x96c   :  { %s18360_s1 = smov 8  }
 0x96d   :  { %14631 = dma.vmem_to_hbm [thread:$0]  %s14626_s0, 768, %s18835_s7, [#allocation4], %s18353_s27, %s18353_s27, %s18360_s1  }
 0x96e   :  { %18340 = dma.done.wait [#allocation4], 768  }
 0x96f   :  { %18341 = vsyncadd [#allocation4], 4294966528 }
 0x970   :  { %14635 = vsyncpa [#allocation3], 1 }
 0x971   :  { %14636 = vsyncpa [#allocation6], 1 }
 0x972   :  { %14637 = vsyncpa [#allocation9], 1 }
 0x973   :  { %14638 = vsyncpa [#allocation12], 1 }
 0x974   :  { %14639 = vsyncpa [#allocation4], 1 }

</bundles_post_ra>
